<compile_context>
chip_gen: v6e
topology: v6e:2x2x1
jax: 0.10.0
libtpu: 0.0.40
codegen_flags: <defaults>
</compile_context>

<pallas_src>
import jax
import jax.numpy as jnp
from jax.experimental import pallas as pl
from jax.experimental.pallas import tpu as pltpu

H = 512  # LSTM hidden size (hard-coded at 512 in the PyTorch module)


def _round_up(x, m):
    return ((x + m - 1) // m) * m


def teller_decoder_kernel(
    img_ref,      # [Bp, L, E]   f32  image features (constant across the time grid)
    ws_ref,       # [Bp, L, H]   wd   hoisted W_s = img @ att_W + b  (constant)
    h0c0_ref,     # [Bp, 2H]     f32  initial LSTM state [h0 | c0]   (constant)
    fused_w_ref,  # [H, 5H+Ep]   wd   [att_U_w | w_hh | f_beta_w (lane-padded)]
    fused_b_ref,  # [1, 5H+Ep]   f32  [att_U_b |   0  | f_beta_b (lane-padded)]
    wihc_ref,     # [E, 4H]      wd   LSTM input weight for the gated context
    av_w_ref,     # [1, H]       f32  attention "v" weight
    av_b_ref,     # [1, 1]       f32  attention "v" bias
    pad_ref,      # [L, Lp]      f32  eye(L, Lp): lane-dense alpha store selector
    eg_ref,       # [1, Bp, 4H]  f32  per-step  emb[:, t] @ w_ih_e + b_ih + b_hh
    h_out_ref,    # [1, Bp, H]   f32  per-step hidden state (preds projected outside)
    alpha_ref,    # [1, Bp, Lp]  f32  per-step attention weights (lane-padded)
    h_sc, c_sc,   # [Bp, H]      f32  recurrent state carried across the time grid
):
    t = pl.program_id(0)
    cd = fused_w_ref.dtype                   # MXU compute dtype (f32 or bf16)
    _, _, E = img_ref.shape

    # ----- load the precomputed init-LSTM state, only at t == 0 -----
    @pl.when(t == 0)
    def _init():
        hc0 = h0c0_ref[...]
        h_sc[...] = hc0[:, :H]
        c_sc[...] = hc0[:, H:]

    h = h_sc[...]                            # [Bp, H]  f32
    c = c_sc[...]                            # [Bp, H]  f32

    # ----- single fused h-projection: U(h) | w_hh@h | f_beta(h) -----
    hmat = (jnp.dot(h.astype(cd), fused_w_ref[...],
                    preferred_element_type=jnp.float32)
            + fused_b_ref[...])              # [Bp, 5H+Ep]  f32
    U_h = hmat[:, :H]                        # [Bp, H]
    hh_gates = hmat[:, H:5 * H]              # [Bp, 4H]  (bias already in eg)
    gate_pre = hmat[:, 5 * H:5 * H + E]      # [Bp, E]

    # ----- Attention(img_features, h): W_s was hoisted to the wrapper -----
    att = jnp.tanh(ws_ref[...].astype(jnp.float32) + U_h[:, None, :])   # [Bp, L, H]
    e = jnp.sum(att * av_w_ref[...][None, :, :], axis=-1) + av_b_ref[...]  # [Bp, L]
    e = e - jnp.max(e, axis=1, keepdims=True)
    p = jnp.exp(e)
    alpha = p / jnp.sum(p, axis=1, keepdims=True)                          # [Bp, L]
    context = jnp.sum(img_ref[...] * alpha[:, :, None], axis=1)            # [Bp, E]

    # ----- gate / gated context -----
    gate = jax.nn.sigmoid(gate_pre)                                        # [Bp, E]
    gated_ctx = gate * context

    # ----- LSTMCell: emb-part of gates precomputed outside the kernel -----
    gates = (eg_ref[0] + hh_gates
             + jnp.dot(gated_ctx.astype(cd), wihc_ref[...],
                       preferred_element_type=jnp.float32))                # [Bp, 4H]
    i_g = jax.nn.sigmoid(gates[:, 0:H])
    f_g = jax.nn.sigmoid(gates[:, H:2 * H])
    g_g = jnp.tanh(gates[:, 2 * H:3 * H])
    o_g = jax.nn.sigmoid(gates[:, 3 * H:4 * H])
    c_new = f_g * c + i_g * g_g
    h_new = o_g * jnp.tanh(c_new)
    h_sc[...] = h_new
    c_sc[...] = c_new

    # ----- lane-dense outputs -----
    h_out_ref[0] = h_new                                                   # 512 lanes
    # alpha (L=16 lanes) is scattered into a 128-lane slab via a tiny eye(L,Lp) matmul
    # so the per-step store is a full, unmasked vector store.
    alpha_ref[0] = jnp.dot(alpha, pad_ref[...], preferred_element_type=jnp.float32)


def teller_decoder_forward(img_features, captions, params, *,
                           weight_dtype=jnp.float32, enc_state=None):
    """Training / teacher-forcing forward. Returns (preds [B,T,V], alphas [B,T,L])."""
    f32 = jnp.float32
    B, L, E = img_features.shape
    T = captions.shape[1] - 1                 # max_timespan
    V = params["deep_w"].shape[1]

    Bp = _round_up(max(B, 8), 8)              # pad batch to >= 8 sublanes
    Lp = _round_up(max(L, 128), 128)          # lane-dense alpha output slab
    Ep = _round_up(E, 128)                    # lane-pad the f_beta chunk of fused weight

    # ----- batch padding (extra rows are dead weight; sliced off at the end) -----
    img_p = jnp.pad(img_features.astype(f32), ((0, Bp - B), (0, 0), (0, 0)))
    cap_p = jnp.pad(captions[:, :T], ((0, Bp - B), (0, 0)))

    # ----- hoisted, time-invariant precomputation (batched, MXU-efficient in XLA) -----
    # attention key projection (was recomputed every timestep inside the loop)
    ws = img_p @ params["att_W_w"] + params["att_W_b"][0]                 # [Bp, L, H]

    # get_init_lstm_state
    avg = img_p.mean(axis=1)
    h0 = jnp.tanh(avg @ params["init_h_w"] + params["init_h_b"][0])
    c0 = jnp.tanh(avg @ params["init_c_w"] + params["init_c_b"][0])
    if enc_state is not None:
        h0 = h0 + jnp.pad(enc_state[0], ((0, Bp - B), (0, 0)))
        c0 = c0 + jnp.pad(enc_state[1], ((0, Bp - B), (0, 0)))
    h0c0 = jnp.concatenate([h0, c0], axis=1).astype(f32)                  # [Bp, 2H]

    # embedding contribution to the LSTM gates (+ both LSTM biases), one big matmul
    emb_seq = params["emb"][cap_p]                                        # [Bp, T, H]
    emb_gates = (emb_seq.reshape(Bp * T, H) @ params["w_ih_e"]
                 + (params["b_ih"][0] + params["b_hh"][0])).reshape(Bp, T, 4 * H)
    emb_gates_tm = jnp.transpose(emb_gates, (1, 0, 2)).astype(f32)        # [T, Bp, 4H]

    # fused per-step h-projection weight: [att_U_w | w_hh | f_beta_w (lane-padded)]
    fbeta_w = jnp.pad(params["f_beta_w"], ((0, 0), (0, Ep - E)))
    fused_w = jnp.concatenate([params["att_U_w"], params["w_hh"], fbeta_w], axis=1)
    fbeta_b = jnp.pad(params["f_beta_b"][0], (0, Ep - E))
    fused_b = jnp.concatenate(
        [params["att_U_b"][0], jnp.zeros((4 * H,), f32), fbeta_b])[None, :]

    pad_mat = jnp.eye(L, Lp, dtype=f32)       # [L, Lp] selector for lane-dense alpha

    wd = weight_dtype
    ins = (
        img_p,                                # f32
        ws.astype(wd),
        h0c0,                                 # f32
        fused_w.astype(wd),
        fused_b.astype(f32),
        params["w_ih_c"].astype(wd),
        params["att_v_w"].astype(f32),
        params["att_v_b"].astype(f32),
        pad_mat,
        emb_gates_tm,                         # f32, streamed per step
    )
    Wf = fused_w.shape[1]

    in_specs = [
        pl.BlockSpec((Bp, L, E), lambda t: (0, 0, 0)),       # img        (constant)
        pl.BlockSpec((Bp, L, H), lambda t: (0, 0, 0)),       # W_s        (constant)
        pl.BlockSpec((Bp, 2 * H), lambda t: (0, 0)),         # h0|c0      (constant)
        pl.BlockSpec((H, Wf), lambda t: (0, 0)),             # fused W    (constant)
        pl.BlockSpec((1, Wf), lambda t: (0, 0)),             # fused b    (constant)
        pl.BlockSpec((E, 4 * H), lambda t: (0, 0)),          # w_ih_c     (constant)
        pl.BlockSpec((1, H), lambda t: (0, 0)),              # att_v_w    (constant)
        pl.BlockSpec((1, 1), lambda t: (0, 0)),              # att_v_b    (constant)
        pl.BlockSpec((L, Lp), lambda t: (0, 0)),             # eye(L,Lp)  (constant)
        pl.BlockSpec((1, Bp, 4 * H), lambda t: (t, 0, 0)),   # emb gates  (per step)
    ]
    out_specs = [
        pl.BlockSpec((1, Bp, H), lambda t: (t, 0, 0)),       # h_t  (lane-dense, 512)
        pl.BlockSpec((1, Bp, Lp), lambda t: (t, 0, 0)),      # alpha_t (padded to 128)
    ]
    out_shape = (
        jax.ShapeDtypeStruct((T, Bp, H), f32),
        jax.ShapeDtypeStruct((T, Bp, Lp), f32),
    )

    # Re-derive the VMEM budget from the actual footprint (double-buffered) + headroom
    # instead of a fixed 48 MiB (v7x has only 64 MiB of VMEM per TensorCore).
    const_bytes = sum(int(a.size) * a.dtype.itemsize for a in ins[:-1])
    step_bytes = (Bp * 4 * H * 4) + (Bp * H * 4) + (Bp * Lp * 4)
    scratch_bytes = 2 * Bp * H * 4
    est = 2 * (const_bytes + step_bytes) + scratch_bytes + (8 << 20)
    vmem_limit = int(min(60 << 20, max(32 << 20, est)))

    h_tm, alpha_tm = pl.pallas_call(
        teller_decoder_kernel,
        out_shape=out_shape,
        grid_spec=pltpu.PrefetchScalarGridSpec(
            num_scalar_prefetch=0,
            grid=(T,),
            in_specs=in_specs,
            out_specs=out_specs,
            scratch_shapes=[
                pltpu.VMEM((Bp, H), f32),   # h carry
                pltpu.VMEM((Bp, H), f32),   # c carry
            ],
        ),
        compiler_params=pltpu.CompilerParams(
            dimension_semantics=("arbitrary",),   # time axis carries h/c
            vmem_limit_bytes=vmem_limit,
        ),
    )(*ins)

    # Output projection done ONCE over all timesteps (full MXU occupancy) instead of a
    # [B,H]@[H,V] matmul per step inside the serial loop; also keeps the (possibly huge)
    # deep_w out of kernel VMEM entirely.
    # TODO(synk): nn.Dropout() is treated as identity (eval-mode dropout) for determinism.
    preds_tm = (h_tm.reshape(T * Bp, H) @ params["deep_w"]
                + params["deep_b"][0]).reshape(T, Bp, V)

    preds = jnp.transpose(preds_tm, (1, 0, 2))[:B]              # [B, T, V]
    alphas = jnp.transpose(alpha_tm, (1, 0, 2))[:B, :, :L]      # [B, T, L]
    return preds, alphas


def reference_forward(img, captions, params):
    """Pure-JAX reference replicating the PyTorch forward (dropout = identity)."""
    B, L, E = img.shape
    T = captions.shape[1] - 1
    avg = img.mean(axis=1)
    h = jnp.tanh(avg @ params["init_h_w"] + params["init_h_b"][0])
    c = jnp.tanh(avg @ params["init_c_w"] + params["init_c_b"][0])
    emb_seq = params["emb"][captions[:, :T]]
    preds, alphas = [], []
    for t in range(T):
        U_h = h @ params["att_U_w"] + params["att_U_b"][0]
        W_s = img @ params["att_W_w"] + params["att_W_b"][0]
        att = jnp.tanh(W_s + U_h[:, None, :])
        e = jnp.sum(att * params["att_v_w"][0], axis=-1) + params["att_v_b"][0, 0]
        alpha = jax.nn.softmax(e, axis=1)
        context = jnp.sum(img * alpha[:, :, None], axis=1)
        gate = jax.nn.sigmoid(h @ params["f_beta_w"] + params["f_beta_b"][0])
        gc = gate * context
        x_e = emb_seq[:, t]
        gates = (x_e @ params["w_ih_e"] + gc @ params["w_ih_c"] + params["b_ih"][0]
                 + h @ params["w_hh"] + params["b_hh"][0])
        i_g = jax.nn.sigmoid(gates[:, :H])
        f_g = jax.nn.sigmoid(gates[:, H:2 * H])
        g_g = jnp.tanh(gates[:, 2 * H:3 * H])
        o_g = jax.nn.sigmoid(gates[:, 3 * H:])
        c = f_g * c + i_g * g_g
        h = o_g * jnp.tanh(c)
        out = h @ params["deep_w"] + params["deep_b"][0]
        preds.append(out)
        alphas.append(alpha)
    return jnp.stack(preds, axis=1), jnp.stack(alphas, axis=1)


def make_params(key, E, V):
    names_shapes = {
        "init_h_w": (E, H), "init_h_b": (1, H),
        "init_c_w": (E, H), "init_c_b": (1, H),
        "att_U_w": (H, H), "att_U_b": (1, H),
        "att_W_w": (E, H), "att_W_b": (1, H),
        "att_v_w": (1, H), "att_v_b": (1, 1),
        "f_beta_w": (H, E), "f_beta_b": (1, E),
        "deep_w": (H, V), "deep_b": (1, V),
        "w_ih_e": (H, 4 * H), "w_ih_c": (E, 4 * H), "b_ih": (1, 4 * H),
        "w_hh": (H, 4 * H), "b_hh": (1, 4 * H),
        "emb": (V, H),
    }
    params = {}
    keys = jax.random.split(key, len(names_shapes))
    for k, (name, shape) in zip(keys, names_shapes.items()):
        params[name] = (0.05 * jax.random.normal(k, shape)).astype(jnp.float32)
    return params


if __name__ == "__main__":
    # Small config: batch=2, L=16 image-feature locations, encoder_dim=64
    # (cfg.teller_fuse == 'elemwise_add'), vocab_size=32, caption length 9 -> T=8.
    B, L, E, V, SEQ = 2, 16, 64, 32, 9

    root = jax.random.PRNGKey(0)
    k_img, k_cap, k_par = jax.random.split(root, 3)
    img_features = jax.random.normal(k_img, (B, L, E), dtype=jnp.float32)
    captions = jax.random.randint(k_cap, (B, SEQ), 0, V, dtype=jnp.int32)
    params = make_params(k_par, E, V)

    # --- f32 run: strict check against the pure-JAX reference ---
    preds, alphas = teller_decoder_forward(img_features, captions, params)
    preds = jax.block_until_ready(preds)
    alphas = jax.block_until_ready(alphas)

    preds_ref, alphas_ref = reference_forward(img_features, captions, params)
    assert preds.shape == (B, SEQ - 1, V) and alphas.shape == (B, SEQ - 1, L)
    assert jnp.allclose(preds, preds_ref, rtol=1e-2, atol=1e-2)
    assert jnp.allclose(alphas, alphas_ref, rtol=1e-2, atol=1e-2)

    # --- bf16-weight run (v5e/v6e MXU path): loose sanity bounds vs. f32 reference ---
    preds_bf, alphas_bf = teller_decoder_forward(
        img_features, captions, params, weight_dtype=jnp.bfloat16)
    preds_bf = jax.block_until_ready(preds_bf)
    alphas_bf = jax.block_until_ready(alphas_bf)
    assert bool(jnp.all(jnp.isfinite(preds_bf))) and bool(jnp.all(jnp.isfinite(alphas_bf)))
    assert float(jnp.max(jnp.abs(preds_bf - preds_ref))) < 0.25
    assert float(jnp.max(jnp.abs(alphas_bf - alphas_ref))) < 0.1

    print("KERNEL_OK")
</pallas_src>

<mosaic_0001>
module attributes {stable_mosaic.version = 11 : i64} {
  func.func @teller_decoder_kernel(%arg0: i32, %arg1: memref<8x16x64xf32, #tpu.memory_space<vmem>>, %arg2: memref<8x16x512xf32, #tpu.memory_space<vmem>>, %arg3: memref<8x1024xf32, #tpu.memory_space<vmem>>, %arg4: memref<512x2688xf32, #tpu.memory_space<vmem>>, %arg5: memref<1x2688xf32, #tpu.memory_space<vmem>>, %arg6: memref<64x2048xf32, #tpu.memory_space<vmem>>, %arg7: memref<1x512xf32, #tpu.memory_space<vmem>>, %arg8: memref<1x1xf32, #tpu.memory_space<vmem>>, %arg9: memref<16x128xf32, #tpu.memory_space<vmem>>, %arg10: memref<1x8x2048xf32, #tpu.memory_space<vmem>>, %arg11: memref<1x8x512xf32, #tpu.memory_space<vmem>>, %arg12: memref<1x8x128xf32, #tpu.memory_space<vmem>>, %arg13: memref<8x512xf32, #tpu.memory_space<vmem>>, %arg14: memref<8x512xf32, #tpu.memory_space<vmem>>) attributes {dimension_semantics = [#tpu.dimension_semantics<arbitrary>], iteration_bounds = array<i64: 8>, scalar_prefetch = 0 : i64, scratch_operands = 2 : i64, tpu.core_type = #tpu.core_type<tc>, window_params = [{pipeline_mode = #tpu.pipeline_mode<synchronous>, transform_indices = @transform_0, window_bounds = array<i64: 8, 16, 64>}, {pipeline_mode = #tpu.pipeline_mode<synchronous>, transform_indices = @transform_1, window_bounds = array<i64: 8, 16, 512>}, {pipeline_mode = #tpu.pipeline_mode<synchronous>, transform_indices = @transform_2, window_bounds = array<i64: 8, 1024>}, {pipeline_mode = #tpu.pipeline_mode<synchronous>, transform_indices = @transform_3, window_bounds = array<i64: 512, 2688>}, {pipeline_mode = #tpu.pipeline_mode<synchronous>, transform_indices = @transform_4, window_bounds = array<i64: 1, 2688>}, {pipeline_mode = #tpu.pipeline_mode<synchronous>, transform_indices = @transform_5, window_bounds = array<i64: 64, 2048>}, {pipeline_mode = #tpu.pipeline_mode<synchronous>, transform_indices = @transform_6, window_bounds = array<i64: 1, 512>}, {pipeline_mode = #tpu.pipeline_mode<synchronous>, transform_indices = @transform_7, window_bounds = array<i64: 1, 1>}, {pipeline_mode = #tpu.pipeline_mode<synchronous>, transform_indices = @transform_8, window_bounds = array<i64: 16, 128>}, {transform_indices = @transform_9, window_bounds = array<i64: 1, 8, 2048>}, {transform_indices = @transform_10, window_bounds = array<i64: 1, 8, 512>}, {transform_indices = @transform_11, window_bounds = array<i64: 1, 8, 128>}]} {
    %c0_i32 = arith.constant 0 : i32
    %0 = arith.cmpi eq, %arg0, %c0_i32 : i32
    %1 = arith.extui %0 : i1 to i32
    %c0_i32_0 = arith.constant 0 : i32
    %2 = arith.cmpi ne, %1, %c0_i32_0 : i32
    scf.if %2 {
      %c0_45 = arith.constant 0 : index
      %c0_46 = arith.constant 0 : index
      %87 = vector.load %arg3[%c0_45, %c0_46] : memref<8x1024xf32, #tpu.memory_space<vmem>>, vector<8x1024xf32>
      %88 = vector.extract_strided_slice %87 {offsets = [0, 0], sizes = [8, 512], strides = [1, 1]} : vector<8x1024xf32> to vector<8x512xf32>
      %c0_47 = arith.constant 0 : index
      %c0_48 = arith.constant 0 : index
      %89 = vector.load %arg13[%c0_47, %c0_48] : memref<8x512xf32, #tpu.memory_space<vmem>>, vector<8x512xf32>
      tpu.vector_store %arg13[%c0_47, %c0_48], %88 {strides = array<i32>} : memref<8x512xf32, #tpu.memory_space<vmem>>, vector<8x512xf32>,
      %90 = vector.extract_strided_slice %87 {offsets = [0, 512], sizes = [8, 512], strides = [1, 1]} : vector<8x1024xf32> to vector<8x512xf32>
      %c0_49 = arith.constant 0 : index
      %c0_50 = arith.constant 0 : index
      %91 = vector.load %arg14[%c0_49, %c0_50] : memref<8x512xf32, #tpu.memory_space<vmem>>, vector<8x512xf32>
      tpu.vector_store %arg14[%c0_49, %c0_50], %90 {strides = array<i32>} : memref<8x512xf32, #tpu.memory_space<vmem>>, vector<8x512xf32>,
    } else {
    }
    %c0 = arith.constant 0 : index
    %c0_1 = arith.constant 0 : index
    %3 = vector.load %arg13[%c0, %c0_1] : memref<8x512xf32, #tpu.memory_space<vmem>>, vector<8x512xf32>
    %c0_2 = arith.constant 0 : index
    %c0_3 = arith.constant 0 : index
    %4 = vector.load %arg14[%c0_2, %c0_3] : memref<8x512xf32, #tpu.memory_space<vmem>>, vector<8x512xf32>
    %c0_4 = arith.constant 0 : index
    %c0_5 = arith.constant 0 : index
    %5 = vector.load %arg4[%c0_4, %c0_5] : memref<512x2688xf32, #tpu.memory_space<vmem>>, vector<512x2688xf32>
    %cst = arith.constant dense<0.000000e+00> : vector<8x2688xf32>
    %6 = tpu.matmul %3, %5, %cst {dimension_numbers = #tpu.dot_dimension_numbers<[1], [0], [0], [1], [0, 0, 1, 1], [], []>} : vector<8x512xf32>, vector<512x2688xf32>, vector<8x2688xf32> -> vector<8x2688xf32>
    %c0_6 = arith.constant 0 : index
    %c0_7 = arith.constant 0 : index
    %7 = vector.load %arg5[%c0_6, %c0_7] : memref<1x2688xf32, #tpu.memory_space<vmem>>, vector<1x2688xf32>
    %8 = vector.broadcast %7 : vector<1x2688xf32> to vector<8x2688xf32>
    %9 = arith.addf %6, %8 : vector<8x2688xf32>
    %10 = vector.extract_strided_slice %9 {offsets = [0, 0], sizes = [8, 512], strides = [1, 1]} : vector<8x2688xf32> to vector<8x512xf32>
    %11 = vector.extract_strided_slice %9 {offsets = [0, 512], sizes = [8, 2048], strides = [1, 1]} : vector<8x2688xf32> to vector<8x2048xf32>
    %12 = vector.extract_strided_slice %9 {offsets = [0, 2560], sizes = [8, 64], strides = [1, 1]} : vector<8x2688xf32> to vector<8x64xf32>
    %c0_8 = arith.constant 0 : index
    %c0_9 = arith.constant 0 : index
    %c0_10 = arith.constant 0 : index
    %13 = vector.load %arg2[%c0_8, %c0_9, %c0_10] : memref<8x16x512xf32, #tpu.memory_space<vmem>>, vector<8x16x512xf32>
    %14 = vector.shape_cast %10 : vector<8x512xf32> to vector<8x1x512xf32>
    %15 = vector.broadcast %14 : vector<8x1x512xf32> to vector<8x16x512xf32>
    %16 = arith.addf %13, %15 : vector<8x16x512xf32>
    %17 = math.tanh %16 : vector<8x16x512xf32>
    %c0_11 = arith.constant 0 : index
    %c0_12 = arith.constant 0 : index
    %18 = vector.load %arg7[%c0_11, %c0_12] : memref<1x512xf32, #tpu.memory_space<vmem>>, vector<1x512xf32>
    %19 = vector.shape_cast %18 : vector<1x512xf32> to vector<1x1x512xf32>
    %20 = vector.broadcast %19 : vector<1x1x512xf32> to vector<8x16x512xf32>
    %21 = arith.mulf %17, %20 : vector<8x16x512xf32>
    %cst_13 = arith.constant dense<0.000000e+00> : vector<8x16xf32>
    %22 = vector.multi_reduction <add>, %21, %cst_13 [2] : vector<8x16x512xf32> to vector<8x16xf32>
    %c0_14 = arith.constant 0 : index
    %c0_15 = arith.constant 0 : index
    %23 = vector.load %arg8[%c0_14, %c0_15] : memref<1x1xf32, #tpu.memory_space<vmem>>, vector<1x1xf32>
    %24 = vector.broadcast %23 : vector<1x1xf32> to vector<8x16xf32>
    %25 = arith.addf %22, %24 : vector<8x16xf32>
    %cst_16 = arith.constant dense<0xFF800000> : vector<8xf32>
    %26 = vector.multi_reduction <maximumf>, %25, %cst_16 [1] : vector<8x16xf32> to vector<8xf32>
    %27 = vector.shape_cast %26 : vector<8xf32> to vector<8x1xf32>
    %28 = vector.broadcast %27 : vector<8x1xf32> to vector<8x16xf32>
    %29 = arith.subf %25, %28 : vector<8x16xf32>
    %30 = math.exp %29 : vector<8x16xf32>
    %cst_17 = arith.constant dense<0.000000e+00> : vector<8xf32>
    %31 = vector.multi_reduction <add>, %30, %cst_17 [1] : vector<8x16xf32> to vector<8xf32>
    %32 = vector.shape_cast %31 : vector<8xf32> to vector<8x1xf32>
    %33 = vector.broadcast %32 : vector<8x1xf32> to vector<8x16xf32>
    %34 = arith.divf %30, %33 : vector<8x16xf32>
    %c0_18 = arith.constant 0 : index
    %c0_19 = arith.constant 0 : index
    %c0_20 = arith.constant 0 : index
    %35 = vector.load %arg1[%c0_18, %c0_19, %c0_20] : memref<8x16x64xf32, #tpu.memory_space<vmem>>, vector<8x16x64xf32>
    %36 = vector.shape_cast %34 : vector<8x16xf32> to vector<8x16x1xf32>
    %37 = vector.broadcast %36 : vector<8x16x1xf32> to vector<8x16x64xf32>
    %38 = arith.mulf %35, %37 : vector<8x16x64xf32>
    %cst_21 = arith.constant dense<0.000000e+00> : vector<8x64xf32>
    %39 = vector.multi_reduction <add>, %38, %cst_21 [1] : vector<8x16x64xf32> to vector<8x64xf32>
    %40 = arith.negf %12 : vector<8x64xf32>
    %41 = math.exp %40 : vector<8x64xf32>
    %cst_22 = arith.constant 1.000000e+00 : f32
    %42 = vector.broadcast %cst_22 : f32 to vector<8x64xf32>
    %43 = arith.addf %42, %41 : vector<8x64xf32>
    %44 = arith.divf %42, %43 : vector<8x64xf32>
    %45 = arith.mulf %44, %39 : vector<8x64xf32>
    %c0_23 = arith.constant 0 : index
    %c0_24 = arith.constant 0 : index
    %c0_25 = arith.constant 0 : index
    %46 = vector.load %arg10[%c0_23, %c0_24, %c0_25] : memref<1x8x2048xf32, #tpu.memory_space<vmem>>, vector<1x8x2048xf32>
    %47 = vector.shape_cast %46 : vector<1x8x2048xf32> to vector<8x2048xf32>
    %48 = arith.addf %47, %11 : vector<8x2048xf32>
    %c0_26 = arith.constant 0 : index
    %c0_27 = arith.constant 0 : index
    %49 = vector.load %arg6[%c0_26, %c0_27] : memref<64x2048xf32, #tpu.memory_space<vmem>>, vector<64x2048xf32>
    %cst_28 = arith.constant dense<0.000000e+00> : vector<8x2048xf32>
    %50 = tpu.matmul %45, %49, %cst_28 {dimension_numbers = #tpu.dot_dimension_numbers<[1], [0], [0], [1], [0, 0, 1, 1], [], []>} : vector<8x64xf32>, vector<64x2048xf32>, vector<8x2048xf32> -> vector<8x2048xf32>
    %51 = arith.addf %48, %50 : vector<8x2048xf32>
    %52 = vector.extract_strided_slice %51 {offsets = [0, 0], sizes = [8, 512], strides = [1, 1]} : vector<8x2048xf32> to vector<8x512xf32>
    %53 = arith.negf %52 : vector<8x512xf32>
    %54 = math.exp %53 : vector<8x512xf32>
    %cst_29 = arith.constant 1.000000e+00 : f32
    %55 = vector.broadcast %cst_29 : f32 to vector<8x512xf32>
    %56 = arith.addf %55, %54 : vector<8x512xf32>
    %57 = arith.divf %55, %56 : vector<8x512xf32>
    %58 = vector.extract_strided_slice %51 {offsets = [0, 512], sizes = [8, 512], strides = [1, 1]} : vector<8x2048xf32> to vector<8x512xf32>
    %59 = arith.negf %58 : vector<8x512xf32>
    %60 = math.exp %59 : vector<8x512xf32>
    %cst_30 = arith.constant 1.000000e+00 : f32
    %61 = vector.broadcast %cst_30 : f32 to vector<8x512xf32>
    %62 = arith.addf %61, %60 : vector<8x512xf32>
    %63 = arith.divf %61, %62 : vector<8x512xf32>
    %64 = vector.extract_strided_slice %51 {offsets = [0, 1024], sizes = [8, 512], strides = [1, 1]} : vector<8x2048xf32> to vector<8x512xf32>
    %65 = math.tanh %64 : vector<8x512xf32>
    %66 = vector.extract_strided_slice %51 {offsets = [0, 1536], sizes = [8, 512], strides = [1, 1]} : vector<8x2048xf32> to vector<8x512xf32>
    %67 = arith.negf %66 : vector<8x512xf32>
    %68 = math.exp %67 : vector<8x512xf32>
    %cst_31 = arith.constant 1.000000e+00 : f32
    %69 = vector.broadcast %cst_31 : f32 to vector<8x512xf32>
    %70 = arith.addf %69, %68 : vector<8x512xf32>
    %71 = arith.divf %69, %70 : vector<8x512xf32>
    %72 = arith.mulf %63, %4 : vector<8x512xf32>
    %73 = arith.mulf %57, %65 : vector<8x512xf32>
    %74 = arith.addf %72, %73 : vector<8x512xf32>
    %75 = math.tanh %74 : vector<8x512xf32>
    %76 = arith.mulf %71, %75 : vector<8x512xf32>
    %c0_32 = arith.constant 0 : index
    %c0_33 = arith.constant 0 : index
    %77 = vector.load %arg13[%c0_32, %c0_33] : memref<8x512xf32, #tpu.memory_space<vmem>>, vector<8x512xf32>
    tpu.vector_store %arg13[%c0_32, %c0_33], %76 {strides = array<i32>} : memref<8x512xf32, #tpu.memory_space<vmem>>, vector<8x512xf32>,
    %c0_34 = arith.constant 0 : index
    %c0_35 = arith.constant 0 : index
    %78 = vector.load %arg14[%c0_34, %c0_35] : memref<8x512xf32, #tpu.memory_space<vmem>>, vector<8x512xf32>
    tpu.vector_store %arg14[%c0_34, %c0_35], %74 {strides = array<i32>} : memref<8x512xf32, #tpu.memory_space<vmem>>, vector<8x512xf32>,
    %c0_36 = arith.constant 0 : index
    %c0_37 = arith.constant 0 : index
    %c0_38 = arith.constant 0 : index
    %79 = vector.load %arg11[%c0_36, %c0_37, %c0_38] : memref<1x8x512xf32, #tpu.memory_space<vmem>>, vector<1x8x512xf32>
    %80 = vector.shape_cast %79 : vector<1x8x512xf32> to vector<8x512xf32>
    %81 = vector.shape_cast %76 : vector<8x512xf32> to vector<1x8x512xf32>
    tpu.vector_store %arg11[%c0_36, %c0_37, %c0_38], %81 {strides = array<i32>} : memref<1x8x512xf32, #tpu.memory_space<vmem>>, vector<1x8x512xf32>,
    %c0_39 = arith.constant 0 : index
    %c0_40 = arith.constant 0 : index
    %82 = vector.load %arg9[%c0_39, %c0_40] : memref<16x128xf32, #tpu.memory_space<vmem>>, vector<16x128xf32>
    %cst_41 = arith.constant dense<0.000000e+00> : vector<8x128xf32>
    %83 = tpu.matmul %34, %82, %cst_41 {dimension_numbers = #tpu.dot_dimension_numbers<[1], [0], [0], [1], [0, 0, 1, 1], [], []>} : vector<8x16xf32>, vector<16x128xf32>, vector<8x128xf32> -> vector<8x128xf32>
    %c0_42 = arith.constant 0 : index
    %c0_43 = arith.constant 0 : index
    %c0_44 = arith.constant 0 : index
    %84 = vector.load %arg12[%c0_42, %c0_43, %c0_44] : memref<1x8x128xf32, #tpu.memory_space<vmem>>, vector<1x8x128xf32>
    %85 = vector.shape_cast %84 : vector<1x8x128xf32> to vector<8x128xf32>
    %86 = vector.shape_cast %83 : vector<8x128xf32> to vector<1x8x128xf32>
    tpu.vector_store %arg12[%c0_42, %c0_43, %c0_44], %86 {strides = array<i32>} : memref<1x8x128xf32, #tpu.memory_space<vmem>>, vector<1x8x128xf32>,
    return
  }
  func.func @transform_0(%arg0: i32) -> (i32, i32, i32) {
    %c0_i32 = arith.constant 0 : i32
    %c0_i32_0 = arith.constant 0 : i32
    %c0_i32_1 = arith.constant 0 : i32
    %c0_i32_2 = arith.constant 0 : i32
    return %c0_i32, %c0_i32_0, %c0_i32_1 : i32, i32, i32
  }
  func.func @transform_1(%arg0: i32) -> (i32, i32, i32) {
    %c0_i32 = arith.constant 0 : i32
    %c0_i32_0 = arith.constant 0 : i32
    %c0_i32_1 = arith.constant 0 : i32
    %c0_i32_2 = arith.constant 0 : i32
    return %c0_i32, %c0_i32_0, %c0_i32_1 : i32, i32, i32
  }
  func.func @transform_2(%arg0: i32) -> (i32, i32) {
    %c0_i32 = arith.constant 0 : i32
    %c0_i32_0 = arith.constant 0 : i32
    %c0_i32_1 = arith.constant 0 : i32
    return %c0_i32, %c0_i32_0 : i32, i32
  }
  func.func @transform_3(%arg0: i32) -> (i32, i32) {
    %c0_i32 = arith.constant 0 : i32
    %c0_i32_0 = arith.constant 0 : i32
    %c0_i32_1 = arith.constant 0 : i32
    return %c0_i32, %c0_i32_0 : i32, i32
  }
  func.func @transform_4(%arg0: i32) -> (i32, i32) {
    %c0_i32 = arith.constant 0 : i32
    %c0_i32_0 = arith.constant 0 : i32
    %c0_i32_1 = arith.constant 0 : i32
    return %c0_i32, %c0_i32_0 : i32, i32
  }
  func.func @transform_5(%arg0: i32) -> (i32, i32) {
    %c0_i32 = arith.constant 0 : i32
    %c0_i32_0 = arith.constant 0 : i32
    %c0_i32_1 = arith.constant 0 : i32
    return %c0_i32, %c0_i32_0 : i32, i32
  }
  func.func @transform_6(%arg0: i32) -> (i32, i32) {
    %c0_i32 = arith.constant 0 : i32
    %c0_i32_0 = arith.constant 0 : i32
    %c0_i32_1 = arith.constant 0 : i32
    return %c0_i32, %c0_i32_0 : i32, i32
  }
  func.func @transform_7(%arg0: i32) -> (i32, i32) {
    %c0_i32 = arith.constant 0 : i32
    %c0_i32_0 = arith.constant 0 : i32
    %c0_i32_1 = arith.constant 0 : i32
    return %c0_i32, %c0_i32_0 : i32, i32
  }
  func.func @transform_8(%arg0: i32) -> (i32, i32) {
    %c0_i32 = arith.constant 0 : i32
    %c0_i32_0 = arith.constant 0 : i32
    %c0_i32_1 = arith.constant 0 : i32
    return %c0_i32, %c0_i32_0 : i32, i32
  }
  func.func @transform_9(%arg0: i32) -> (i32, i32, i32) {
    %c0_i32 = arith.constant 0 : i32
    %c0_i32_0 = arith.constant 0 : i32
    %c0_i32_1 = arith.constant 0 : i32
    return %arg0, %c0_i32, %c0_i32_0 : i32, i32, i32
  }
  func.func @transform_10(%arg0: i32) -> (i32, i32, i32) {
    %c0_i32 = arith.constant 0 : i32
    %c0_i32_0 = arith.constant 0 : i32
    %c0_i32_1 = arith.constant 0 : i32
    return %arg0, %c0_i32, %c0_i32_0 : i32, i32, i32
  }
  func.func @transform_11(%arg0: i32) -> (i32, i32, i32) {
    %c0_i32 = arith.constant 0 : i32
    %c0_i32_0 = arith.constant 0 : i32
    %c0_i32_1 = arith.constant 0 : i32
    return %arg0, %c0_i32, %c0_i32_0 : i32, i32, i32
  }
}

</mosaic_0001>

<bundles_post_ra>
// kernel: tpu_custom_call.1
= control target key start
LH: loop header
LB: loop body
LE: loop exit
PB: predicated region body
PF: predicated region fallthrough
CT: control target
= control target key end

     0   :  { %s8298_s0 = inlined_call_operand.hbm [shape: f32[8,16,64], index: 0, kind: input, shape index: {}]   ;;  %s8299_s1 = inlined_call_operand.hbm [shape: f32[8,16,512], index: 1, kind: input, shape index: {}]   ;;  %s8300_s2 = inlined_call_operand.hbm [shape: f32[8,1024], index: 2, kind: input, shape index: {}]   ;;  %s8301_s3 = inlined_call_operand.hbm [shape: f32[512,2688], index: 3, kind: input, shape index: {}]   ;;  %s8302_s4 = inlined_call_operand.hbm [shape: f32[1,2688], index: 4, kind: input, shape index: {}]   ;;  %s8303_s5 = inlined_call_operand.hbm [shape: f32[64,2048], index: 5, kind: input, shape index: {}]   ;;  %s8304_s6 = inlined_call_operand.hbm [shape: f32[1,512], index: 6, kind: input, shape index: {}]   ;;  %s8305_s7 = inlined_call_operand.<no memory space> [shape: f32[1,1], index: 7, kind: input, shape index: {}]   ;;  %s8306_s8 = inlined_call_operand.hbm [shape: f32[16,128], index: 8, kind: input, shape index: {}]   ;;  %s8307_s9 = inlined_call_operand.hbm [shape: f32[8,8,2048], index: 9, kind: input, shape index: {}]   ;;  %s8308_s10 = inlined_call_operand.hbm [shape: f32[8,8,512], index: 10, kind: output, shape index: {0}]   ;;  %s8309_s11 = inlined_call_operand.hbm [shape: f32[8,8,128], index: 11, kind: output, shape index: {1}]  }
   0x1   :  { %8315 = sst [smem:[#allocation36_spill]] %s8298_s0  ;;  %v17_v0 = vstv %s8305_s7 }
   0x2   :  { %8316 = sst [smem:[#allocation37_spill]] %s8299_s1  ;;  %18 = vst [vmem:[#allocation4] sm:$0x1] %v17_v0 }
   0x3   :  { %8317 = sst [smem:[#allocation38_spill]] %s8300_s2 }
   0x4   :  { %8318 = sst [smem:[#allocation39_spill]] %s8301_s3 }
   0x5   :  { %8319 = sst [smem:[#allocation40_spill]] %s8302_s4 }
   0x6   :  { %19 = vsyncpa [#allocation6], 0 }
   0x7   :  { %20 = vsyncpa [#allocation9], 0 }
   0x8   :  { %21 = vsyncpa [#allocation12], 0 }
   0x9   :  { %22 = vsyncpa [#allocation15], 0 }
   0xa   :  { %23 = vsyncpa [#allocation18], 0 }
   0xb   :  { %24 = vsyncpa [#allocation7], 0 }
   0xc   :  { %26 = vsyncpa [#allocation7 + $0x1], 0 }
   0xd   :  { %27 = vsyncpa [#allocation22], 0 }
   0xe   :  { %29 = vsyncpa [#allocation22 + $0x1], 0  ;;  %s7008_s19 = smov 0   ;;  %s7010_s20 = smov 0  }
   0xf   :  { %s7012_s21 = smov 0   ;;  %s7014_s22 = smov 0  }
  0x10 LB: > { %s6923_s7 = smov [#allocation5]   ;;  %s7029_s24 = sadd.s32 4294967295, %s6921_s22   ;;  %s6921_s22 = sphi %s7014_s22, %s8362_s22   ;;  %s6917_s21 = sphi %s7012_s21, %s8361_s21   ;;  %s6913_s20 = sphi %s7010_s20, %s8360_s20   ;;  %s6909_s19 = sphi %s7008_s19, %s8359_s19  }
  0x11   : > { %s319_s23 = sshll.u32 %s6923_s7, 4  ;;  %p6024_p0 = scmp.ge.s32.totalorder %s6921_s22, 1  ;;  %s320_s23 = int_to_ptr.vmem [resolvable:$true] %s319_s23 }
  0x12   : > { %p8311_p1 = scmp.eq.s32.totalorder %s7029_s24, 0  ;;  %p307_p2 = scmp.lt.s32.totalorder %s6921_s22, 9 }
  0x13   : > { %s6924_s26 = smov [#allocation8]   ;;  %s6925_s29 = smov [#allocation11]  }
  0x14   : > { %p7035_p4 = pnand %p6024_p0, %p307_p2  ;;  %s332_s27 = sshll.u32 %s6924_s26, 4  ;;  %s7047_s27 = int_to_ptr.vmem [resolvable:$true] %s332_s27 }
  0x15   : > { %s7049_s30 = sshll.u32 %s6925_s29, 4  ;;  %s6582_s13 = scalar_lea.vmem %s320_s23, 2048  ;;  %s357_s30 = int_to_ptr.vmem [resolvable:$true] %s7049_s30 }
  0x16   : > { %s8320_s25 = scalar_select %p7035_p4, 1, 0 }
  0x17   : > { %p6200_p5 = pneg %p7035_p4  ;;  %p6583_p8 = scmp.ne.s32.totalorder %s320_s23, %s6582_s13 }
  0x18   : > { %p6590_p11 = scmp.lt.s32.totalorder %s320_s23, %s320_s23  ;;  %p6591_p12 = scmp.lt.s32.totalorder %s6582_s13, %s6582_s13 }
  0x19   : > { %p7043_p6 = pnand %p6200_p5, %p8311_p1 }
  0x1a   : > { %p6592_p13 = por %p6591_p12, %p6590_p11 }
  0x1b   : > { %p7053_p7 = pneg %p7043_p6 }
  0x1d   : > { %p6585_p9 = pnand %p6583_p8, %p7053_p7 }
  0x1f   : > { %p6586_p10 = pneg %p6585_p9 }
  0x21   : > { %p6593_p0 = pnand %p6592_p13, %p6586_p10 }
  0x23   : > { %6596 = shalt.err (!%p6593_p0)
}
  0x24   : > { %s6926_s14 = smov 128   ;;  %s8310_s15 = smov 8  }
  0x25   : > { %s8323_s0 = sld [smem:[#allocation36_spill]]  ;;  %s6608_s18 = scalar_lea.vmem %s7047_s27, 8192 }
  0x26   : > { %p6609_p2 = scmp.ne.s32.totalorder %s7047_s27, %s6608_s18  ;;  %p6616_p9 = scmp.lt.s32.totalorder %s7047_s27, %s7047_s27 }
  0x27   : > { %p6617_p10 = scmp.lt.s32.totalorder %s6608_s18, %s6608_s18 }
  0x28   : > { %p6611_p5 = pnand %p6609_p2, %p7053_p7 }
  0x29   : > { %p6618_p11 = por %p6617_p10, %p6616_p9 }
  0x2a   : > { %p6612_p8 = pneg %p6611_p5 }
  0x2b   : > { %6203 = dma.hbm_to_vmem [thread:$0]  (!%p7043_p6), %s8323_s0, 2048, %s320_s23, [#allocation6], %s6926_s14, %s6926_s14, %s8310_s15  }
  0x2c   : > { %p6619_p12 = pnand %p6618_p11, %p6612_p8 }
  0x2e   : > { %6622 = shalt.err (!%p6619_p12)
}
  0x2f   : > { %s6928_s7 = smov 512   ;;  %s6929_s26 = smov 32  }
  0x30   : > { %s8324_s1 = sld [smem:[#allocation37_spill]]  ;;  %s6634_s13 = scalar_lea.vmem %s357_s30, 172032 }
  0x31   : > { %p6635_p13 = scmp.ne.s32.totalorder %s357_s30, %s6634_s13  ;;  %p6642_p5 = scmp.lt.s32.totalorder %s357_s30, %s357_s30 }
  0x32   : > { %p6643_p8 = scmp.lt.s32.totalorder %s6634_s13, %s6634_s13 }
  0x33   : > { %p6637_p0 = pnand %p6635_p13, %p7053_p7 }
  0x34   : > { %p6644_p9 = por %p6643_p8, %p6642_p5 }
  0x35   : > { %p6638_p2 = pneg %p6637_p0 }
  0x36   : > { %6206 = dma.hbm_to_vmem [thread:$0]  (!%p7043_p6), %s8324_s1, 8192, %s7047_s27, [#allocation9], %s6928_s7, %s6928_s7, %s6929_s26  }
  0x37   : > { %p6645_p10 = pnand %p6644_p9, %p6638_p2 }
  0x39   : > { %6648 = shalt.err (!%p6645_p10)
}
  0x3a   : > { %s6930_s16 = smov 2688   ;;  %s6931_s17 = smov 168  }
  0x3b   : > { %s8325_s3 = sld [smem:[#allocation39_spill]]  ;;  %s6932_s27 = smov [#allocation14]  }
  0x3c   : > { %s380_s7 = sshll.u32 %s6932_s27, 4  ;;  %s381_s7 = int_to_ptr.vmem [resolvable:$true] %s380_s7 }
  0x3d   : > { %s6660_s26 = scalar_lea.vmem %s381_s7, 16384  ;;  %p6668_p0 = scmp.lt.s32.totalorder %s381_s7, %s381_s7 }
  0x3e   : > { %p6661_p11 = scmp.ne.s32.totalorder %s381_s7, %s6660_s26  ;;  %p6669_p2 = scmp.lt.s32.totalorder %s6660_s26, %s6660_s26 }
  0x40   : > { %p6663_p12 = pnand %p6661_p11, %p7053_p7  ;;  %p6670_p5 = por %p6669_p2, %p6668_p0 }
  0x41   : > { %6212 = dma.hbm_to_vmem [thread:$0]  (!%p7043_p6), %s8325_s3, 172032, %s357_s30, [#allocation12], %s6930_s16, %s6930_s16, %s6931_s17  }
  0x42   : > { %p6664_p13 = pneg %p6663_p12 }
  0x44   : > { %p6671_p8 = pnand %p6670_p5, %p6664_p13 }
  0x46   : > { %6674 = shalt.err (!%p6671_p8)
}
  0x47   : > { %s6933_s29 = smov 2048   ;;  %s6934_s30 = smov [#allocation10]  }
  0x48   : > { %6218 = dma.hbm_to_vmem [thread:$0]  (!%p7043_p6), %s8303_s5, 16384, %s381_s7, [#allocation15], %s6933_s29, %s6933_s29, %s6926_s14  }
  0x49   : > { %s346_s13 = sshll.u32 %s6934_s30, 4  ;;  %s6935_s16 = smov [#allocation13]   ;;  %s347_s13 = int_to_ptr.vmem [resolvable:$true] %s346_s13 }
  0x4a   : > { %s370_s17 = sshll.u32 %s6935_s16, 4  ;;  %s6686_s18 = scalar_lea.vmem %s347_s13, 1024  ;;  %s371_s17 = int_to_ptr.vmem [resolvable:$true] %s370_s17 }
  0x4b   : > { %p6687_p9 = scmp.ne.s32.totalorder %s347_s13, %s6686_s18  ;;  %p6694_p12 = scmp.lt.s32.totalorder %s347_s13, %s347_s13 }
  0x4c   : > { %p6695_p13 = scmp.lt.s32.totalorder %s6686_s18, %s6686_s18 }
  0x4d   : > { %p6689_p10 = pnand %p6687_p9, %p7053_p7 }
  0x4e   : > { %p6696_p0 = por %p6695_p13, %p6694_p12 }
  0x4f   : > { %p6690_p11 = pneg %p6689_p10 }
  0x51   : > { %p6697_p2 = pnand %p6696_p0, %p6690_p11 }
  0x53   : > { %6700 = shalt.err (!%p6697_p2)
}
  0x54   : > { %s8326_s2 = sld [smem:[#allocation38_spill]]  ;;  %s6712_s7 = scalar_lea.vmem %s371_s17, 336 }
  0x55   : > { %p6713_p5 = scmp.ne.s32.totalorder %s371_s17, %s6712_s7  ;;  %s6719_s29 = scalar_lea.vmem %s371_s17, 352 }
  0x56   : > { %p6720_p9 = scmp.lt.s32.totalorder %s371_s17, %s371_s17  ;;  %p6721_p10 = scmp.lt.s32.totalorder %s6719_s29, %s6712_s7 }
  0x57   : > { %p6715_p8 = pnand %p6713_p5, %p7053_p7 }
  0x58   : > { %p6722_p1 = por %p6721_p10, %p6720_p9 }
  0x59   : > { %p6716_p3 = pneg %p6715_p8 }
  0x5a   : > { %6209 = dma.hbm_to_vmem [thread:$0]  (!%p7043_p6), %s8326_s2, 1024, %s347_s13, [#allocation9]  }
  0x5b   : > { %p6723_p12 = pnand %p6722_p1, %p6716_p3 }
  0x5d   : > { %6726 = shalt.err (!%p6723_p12)
}
  0x5e   : > { %s8327_s4 = sld [smem:[#allocation40_spill]]  ;;  %s6936_s30 = smov [#allocation16]  }
  0x5f   : > { %s394_s13 = sshll.u32 %s6936_s30, 4  ;;  %s6937_s16 = smov [#allocation17]   ;;  %s395_s13 = int_to_ptr.vmem [resolvable:$true] %s394_s13 }
  0x60   : > { %s407_s18 = sshll.u32 %s6937_s16, 4  ;;  %s6738_s27 = scalar_lea.vmem %s395_s13, 64  ;;  %s408_s18 = int_to_ptr.vmem [resolvable:$true] %s407_s18 }
  0x61   : > { %p6739_p11 = scmp.ne.s32.totalorder %s395_s13, %s6738_s27  ;;  %p6746_p2 = scmp.lt.s32.totalorder %s395_s13, %s395_s13 }
  0x62   : > { %p6747_p1 = scmp.lt.s32.totalorder %s6738_s27, %s6738_s27 }
  0x63   : > { %p6741_p13 = pnand %p6739_p11, %p7053_p7 }
  0x64   : > { %6215 = dma.hbm_to_vmem [thread:$0]  (!%p7043_p6), %s8327_s4, 336, %s371_s17, [#allocation12]  }
  0x65   : > { %p6742_p0 = pneg %p6741_p13  ;;  %p6748_p3 = por %p6747_p1, %p6746_p2 }
  0x67   : > { %p6749_p5 = pnand %p6748_p3, %p6742_p0 }
  0x69   : > { %6752 = shalt.err (!%p6749_p5)
}
  0x6a   : > { %6221 = dma.hbm_to_vmem [thread:$0]  (!%p7043_p6), %s8304_s6, 64, %s395_s13, [#allocation15]  }
  0x6b   : > { %s6764_s17 = scalar_lea.vmem %s408_s18, 256  ;;  %p6772_p12 = scmp.lt.s32.totalorder %s408_s18, %s408_s18 }
  0x6c   : > { %p6765_p8 = scmp.ne.s32.totalorder %s408_s18, %s6764_s17  ;;  %p6773_p11 = scmp.lt.s32.totalorder %s6764_s17, %s6764_s17 }
  0x6e   : > { %p6767_p9 = pnand %p6765_p8, %p7053_p7  ;;  %p6774_p13 = por %p6773_p11, %p6772_p12 }
  0x70   : > { %p6768_p10 = pneg %p6767_p9 }
  0x72   : > { %p6775_p4 = pnand %p6774_p13, %p6768_p10 }
  0x74   : > { %6778 = shalt.err (!%p6775_p4)
}
  0x75   : > { %s8328_s29 = smov 8   ;;  %s6023_s28 = sadd.s32 4294967294, %s6921_s22  }
  0x76   : > { %6224 = dma.hbm_to_vmem [thread:$0]  (!%p7043_p6), %s8306_s8, 256, %s408_s18, [#allocation18], %s6926_s14, %s6926_s14, %s8328_s29  }
  0x77   : > { %s7128_s12 = sadd.s32 1, %s6921_s22   ;;  %s231_s30 = sadd.s32 1, %s6917_s21 }
  0x78   : > { %s228_s13 = ssub.s32 %s6921_s22, %s7128_s12  ;;  %p238_p4 = scmp.ne.s32.totalorder %s6917_s21, %s6913_s20 }
  0x79   : > { %p229_p7 = scmp.eq.s32.totalorder %s228_s13, 0  ;;  %p239_p0 = scmp.eq.s32.totalorder %s6921_s22, 0 }
  0x7a   : > { %p244_p2 = scmp.ne.s32.totalorder %s6913_s20, %s6909_s19  ;;  %p268_p1 = scmp.eq.s32.totalorder %s7029_s24, 7 }
  0x7b   : > { %s7140_s16 = scalar_select %p229_p7, %s6917_s21, %s231_s30  }
  0x7c   : > { %p240_p3 = por %p239_p0, %p238_p4  ;;  %p8329_p5 = scmp.eq.s32.totalorder %s7029_s24, 0 }
  0x7d   : > { %p7148_p6 = por %p268_p1, %p238_p4  ;;  %p274_p9 = scmp.eq.s32.totalorder %s6023_s28, 7 }
  0x7e   : > { %p7144_p8 = por %p8329_p5, %p244_p2  ;;  %p6244_p10 = scmp.lt.s32.totalorder %s6921_s22, 8 }
  0x7f   : > { %s8331_s18 = scalar_select %p7148_p6, 1, 0 }
  0x80   : > { %s8330_s14 = scalar_select %p7144_p8, 1, 0 }
  0x81   : > { %s421_s27 = sand.u32 1, %s6921_s22   ;;  %p7154_p12 = por %p274_p9, %p244_p2 }
  0x82   : > { %s423_s7 = sand.u32 1, %s6917_s21   ;;  %s6080_s17 = sshll.u32 %s6921_s22, 11 }
  0x83   : > { %s8332_s26 = scalar_select %p7154_p12, 1, 0 }
  0x84   : > { %s6034_s29 = sshll.u32 %s423_s7, 7  ;;  %s7163_s30 = scalar_lea.hbm %s8307_s9, %s6080_s17 }
  0x85   : > { %p7165_p11 = pnand %p6244_p10, %p240_p3  ;;  %s425_s28 = scalar_lea.vmem [#allocation19], %s6034_s29 }
  0x86   : > { %s433_s0 = sshll.u32 %s425_s28, 4  ;;  %s422_s1 = scalar_lea.sflag [#allocation6], %s421_s27  ;;  %s434_s0 = int_to_ptr.vmem [resolvable:$true] %s433_s0 }
  0x87   : > { %s6779_s2 = scalar_lea.hbm %s7163_s30, 2048  ;;  %p6781_p4 = pneg %p7165_p11 }
  0x88   : > { %p6780_p13 = scmp.ne.s32.totalorder %s7163_s30, %s6779_s2  ;;  %s6784_s23 = scalar_lea.hbm %s8307_s9, 16384 }
  0x89   : > { %p6785_p2 = scmp.lt.s32.totalorder %s7163_s30, %s8307_s9  ;;  %p6786_p1 = scmp.lt.s32.totalorder %s6784_s23, %s6779_s2 }
  0x8a   : > { %p6782_p7 = pnand %p6781_p4, %p6780_p13 }
  0x8b   : > { %p6787_p3 = por %p6786_p1, %p6785_p2 }
  0x8c   : > { %p6783_p0 = pneg %p6782_p7 }
  0x8e   : > { %p6788_p5 = pnand %p6787_p3, %p6783_p0 }
  0x90   : > { %6791 = shalt.err (!%p6788_p5)
}
  0x91   : > { %s6792_s29 = scalar_lea.vmem %s434_s0, 2048  ;;  %s6938_s27 = smov [#allocation19]  }
  0x92   : > { %p6793_p9 = scmp.ne.s32.totalorder %s434_s0, %s6792_s29  ;;  %s6797_s28 = sshll.u32 %s6938_s27, 4  ;;  %s6798_s28 = int_to_ptr.vmem [resolvable:$false] %s6797_s28 }
  0x93   : > { %s6799_s4 = scalar_lea.vmem %s6798_s28, 4096  ;;  %p6800_p13 = scmp.lt.s32.totalorder %s434_s0, %s6798_s28 }
  0x94   : > { %p6795_p10 = pnand %p6793_p9, %p6781_p4  ;;  %p6801_p7 = scmp.lt.s32.totalorder %s6799_s4, %s6792_s29 }
  0x96   : > { %p6796_p12 = pneg %p6795_p10  ;;  %p6802_p6 = por %p6801_p7, %p6800_p13 }
  0x98   : > { %p6803_p8 = pnand %p6802_p6, %p6796_p12 }
  0x9a   : > { %6806 = shalt.err (!%p6803_p8)
}
  0x9b   : > { %6228 = dma.hbm_to_vmem [thread:$0]  (!%p7165_p11), %s7163_s30, 2048, %s434_s0, %s422_s1  }
  0x9c   : > { %p8334_p0 = scmp.ne.s32.totalorder %s8320_s25, 0 }
  0x9e   : > { %442 = sbr.rel (%p8334_p0) target bundleno = 1777 (0x6f1), region = 60 }
  0xa3   : > { %p8335_p2 = scmp.eq.s32.totalorder %s7029_s24, 0 }
  0xa5   : > { %6876 = dma.done.wait (%p8335_p2), [#allocation6], 2048   ;;  %p8336_p4 = pmov %p8335_p2 }
  0xa6   : > { %p8337_p1 = pmov %p8335_p2 }
  0xa7   : > { %6878 = vsyncadd (%p8336_p4), [#allocation6], 4294965248 }
  0xa8   : > { %6880 = dma.done.wait (%p8337_p1), [#allocation9], 9216   ;;  %p8338_p3 = pmov %p8337_p1 }
  0xa9   : > { %p8339_p8 = pmov %p8337_p1 }
  0xaa   : > { %6882 = vsyncadd (%p8338_p3), [#allocation9], 4294958080 }
  0xab   : > { %6884 = dma.done.wait (%p8339_p8), [#allocation12], 172368   ;;  %p8340_p6 = pmov %p8337_p1 }
  0xac   : > { %p8341_p12 = pmov %p8337_p1 }
  0xad   : > { %6886 = vsyncadd (%p8340_p6), [#allocation12], 4294794928 }
  0xae   : > { %6888 = dma.done.wait (%p8341_p12), [#allocation15], 16448   ;;  %p8342_p11 = pmov %p8337_p1 }
  0xaf   : > { %p8343_p5 = pmov %p8337_p1 }
  0xb0   : > { %6890 = vsyncadd (%p8342_p11), [#allocation15], 4294950848 }
  0xb1   : > { %6892 = dma.done.wait (%p8343_p5), [#allocation18], 256   ;;  %p8344_p9 = pmov %p8337_p1 }
  0xb2   : > { %s476_s0 = sand.u32 1, %s7029_s24   ;;  %s7207_s1 = sand.u32 1, %s6913_s20  }
  0xb3   : > { %6894 = vsyncadd (%p8344_p9), [#allocation18], 4294967040  ;;  %s6046_s2 = sshll.u32 %s7207_s1, 7  ;;  %s477_s3 = scalar_lea.sflag [#allocation6], %s476_s0 }
  0xb4   : > { %s7210_s4 = scalar_lea.vmem [#allocation19], %s6046_s2  ;;  %p8345_p10 = scmp.ne.s32.totalorder %s8330_s14, 0 }
  0xb6   : > { %6896 = dma.done.wait (%p8345_p10), %s477_s3, 2048  }
  0xb7   : > { %6898 = vsyncadd (%p8345_p10), %s477_s3, 4294965248  ;;  %s6047_s25 = sshll.u32 %s7207_s1, 5  ;;  %s6048_s30 = sshll.u32 %s7207_s1, 3 }
  0xb8   : > { %s7218_s13 = scalar_lea.vmem [#allocation20], %s6047_s25  ;;  %s7220_s7 = scalar_lea.vmem [#allocation21], %s6048_s30 }
  0xb9   : > { %p8346_p13 = scmp.ne.s32.totalorder %s7029_s24, 0 }
  0xbb   : > { %527 = sbr.rel (%p8346_p13) target bundleno = 197 (0xc5), region = 100 }
  0xc0   : > { %v528_v1 = vld [vmem:[#allocation10] sm:$0xff]  ;;  %v529_v2 = vld [vmem:[#allocation10 + $0x8] sm:$0xff]  ;;  %v530_v3 = vld [vmem:[#allocation10 + $0x10] sm:$0xff] }
  0xc1   : > { %536 = vst [vmem:[#allocation2 + $0x10] sm:$0xff] %v528_v1  ;;  %537 = vst [vmem:[#allocation2] sm:$0xff] %v529_v2  ;;  %v531_v4 = vld [vmem:[#allocation10 + $0x18] sm:$0xff]  ;;  %v532_v5 = vld [vmem:[#allocation10 + $0x20] sm:$0xff] }
  0xc2   : > { %538 = vst [vmem:[#allocation2 + $0x18] sm:$0xff] %v530_v3  ;;  %v533_v6 = vld [vmem:[#allocation10 + $0x28] sm:$0xff]  ;;  %539 = vst [vmem:[#allocation2 + $0x8] sm:$0xff] %v531_v4  ;;  %v534_v7 = vld [vmem:[#allocation10 + $0x30] sm:$0xff] }
  0xc3   : > { %540 = vst [vmem:[#allocation3] sm:$0xff] %v532_v5  ;;  %541 = vst [vmem:[#allocation3 + $0x18] sm:$0xff] %v533_v6  ;;  %v535_v8 = vld [vmem:[#allocation10 + $0x38] sm:$0xff] }
  0xc4   : > { %542 = vst [vmem:[#allocation3 + $0x8] sm:$0xff] %v534_v7  ;;  %543 = vst [vmem:[#allocation3 + $0x10] sm:$0xff] %v535_v8 }
  0xc5 PF: > { %v868_v9 = vld [vmem:[#allocation11 + $0x9e0] sm:$0xff]  ;;  %v867_v11 = vld [vmem:[#allocation11 + $0x9d8] sm:$0xff]  ;;  %v846_v15 = vld [vmem:[#allocation11 + $0x930] sm:$0xff]  ;;  %vm4210_vm0 = vcmask 130112   ;;  %vm4275_vm1 = vcmask 1041409   ;;  %vm4277_vm2 = vcmask 1042434  }
  0xc6   : > { %v1540_v10 = vld [vmem:[#allocation11 + $0x1ee0] sm:$0xff]  ;;  %2007 = vmatprep.subr.mxu0 %v868_v9  ;;  %v1539_v12 = vld [vmem:[#allocation11 + $0x1ed8] sm:$0xff]  ;;  %v1518_v16 = vld [vmem:[#allocation11 + $0x1e30] sm:$0xff]  ;;  %vm4279_vm3 = vcmask 1043459   ;;  %vm4281_vm4 = vcmask 1044484   ;;  %vm4283_vm5 = vcmask 1045509  }
  0xc7   : > { %2078 = vmatprep.subr.mxu1 %v1540_v10  ;;  %v847_v13 = vld [vmem:[#allocation11 + $0x938] sm:$0xff]  ;;  %2008 = vmatpush1.msra.mxu0 %v867_v11  ;;  %v826_v17 = vld [vmem:[#allocation11 + $0x890] sm:$0xff]  ;;  %v825_v19 = vld [vmem:[#allocation11 + $0x888] sm:$0xff]  ;;  %vm4285_vm6 = vcmask 1046534   ;;  %vm4287_vm7 = vcmask 1047559   ;;  %vm4290_vm8 = vcmask 130048  }
  0xc8   : > { %v1519_v14 = vld [vmem:[#allocation11 + $0x1e38] sm:$0xff]  ;;  %2079 = vmatpush1.msra.mxu1 %v1539_v12  ;;  %2009 = vmatprep.subr.mxu0 %v847_v13  ;;  %v1498_v18 = vld [vmem:[#allocation11 + $0x1d90] sm:$0xff]  ;;  %v1497_v20 = vld [vmem:[#allocation11 + $0x1d88] sm:$0xff]  ;;  %vm4707_vm9 = vcmask 523264   ;;  %vm6942_vm10 = vmmov 0   ;;  %s6077_s14 = sshll.u32 %s7029_s24, 7 }
  0xc9   : > { %2080 = vmatprep.subr.mxu1 %v1519_v14  ;;  %2010 = vmatpush1.msra.mxu0 %v846_v15  ;;  %v805_v21 = vld [vmem:[#allocation11 + $0x7e8] sm:$0xff]  ;;  %v804_v23 = vld [vmem:[#allocation11 + $0x7e0] sm:$0xff]  ;;  %v783_v27 = vld [vmem:[#allocation11 + $0x738] sm:$0xff]  ;;  %s5845_s17 = sshll.u32 %s7220_s7, 4  ;;  %s8221_s29 = scalar_lea.hbm %s8309_s11, %s6077_s14  ;;  %s8223_s17 = int_to_ptr.vmem [resolvable:$true] %s5845_s17 }
  0xca   : > { %2081 = vmatpush1.msra.mxu1 %v1518_v16  ;;  %v1477_v22 = vld [vmem:[#allocation11 + $0x1ce8] sm:$0xff]  ;;  %2011 = vmatprep.subr.mxu0 %v826_v17  ;;  %v1476_v24 = vld [vmem:[#allocation11 + $0x1ce0] sm:$0xff]  ;;  %v1455_v28 = vld [vmem:[#allocation11 + $0x1c38] sm:$0xff]  ;;  %s5818_s27 = scalar_lea.sflag [#allocation22], %s7207_s1  ;;  %s6807_s28 = scalar_lea.vmem %s8223_s17, 128 }
  0xcb   : > { %2082 = vmatprep.subr.mxu1 %v1498_v18  ;;  %2012 = vmatpush1.msra.mxu0 %v825_v19  ;;  %v784_v25 = vld [vmem:[#allocation11 + $0x740] sm:$0xff]  ;;  %v763_v29 = vld [vmem:[#allocation11 + $0x698] sm:$0xff]  ;;  %v762_v31 = vld [vmem:[#allocation11 + $0x690] sm:$0xff]  ;;  %p6808_p7 = scmp.ne.s32.totalorder %s8223_s17, %s6807_s28  ;;  %p8357_p0 = scmp.ne.s32.totalorder %s8331_s18, 0 }
  0xcc   : > { %2083 = vmatpush1.msra.mxu1 %v1497_v20  ;;  %v1456_v26 = vld [vmem:[#allocation11 + $0x1c40] sm:$0xff]  ;;  %2013 = vmatprep.subr.mxu0 %v805_v21  ;;  %v1435_v30 = vld [vmem:[#allocation11 + $0x1b98] sm:$0xff]  ;;  %v1434_v32 = vld [vmem:[#allocation11 + $0x1b90] sm:$0xff]  ;;  %s6943_s0 = smov [#allocation21]  }
  0xcd   : > { %2084 = vmatprep.subr.mxu1 %v1477_v22  ;;  %2014 = vmatpush1.msra.mxu0 %v804_v23  ;;  %v742_v33 = vld [vmem:[#allocation11 + $0x5f0] sm:$0xff]  ;;  %v741_v35 = vld [vmem:[#allocation11 + $0x5e8] sm:$0xff]  ;;  %v720_v39 = vld [vmem:[#allocation11 + $0x540] sm:$0xff]  ;;  %p6809_p2 = pnand %p6808_p7, %p8357_p0  ;;  %s6811_s2 = sshll.u32 %s6943_s0, 4  ;;  %s6812_s2 = int_to_ptr.vmem [resolvable:$false] %s6811_s2 }
  0xce   : > { %2085 = vmatpush1.msra.mxu1 %v1476_v24  ;;  %2015 = vmatprep.subr.mxu0 %v784_v25  ;;  %v1414_v34 = vld [vmem:[#allocation11 + $0x1af0] sm:$0xff]  ;;  %v1413_v36 = vld [vmem:[#allocation11 + $0x1ae8] sm:$0xff]  ;;  %v1392_v40 = vld [vmem:[#allocation11 + $0x1a40] sm:$0xff]  ;;  %s6813_s3 = scalar_lea.vmem %s6812_s2, 256  ;;  %p6814_p1 = scmp.lt.s32.totalorder %s8223_s17, %s6812_s2 }
  0xcf   : > { %2086 = vmatprep.subr.mxu1 %v1456_v26  ;;  %2016 = vmatpush1.msra.mxu0 %v783_v27  ;;  %v721_v37 = vld [vmem:[#allocation11 + $0x548] sm:$0xff]  ;;  %v700_v41 = vld [vmem:[#allocation11 + $0x4a0] sm:$0xff]  ;;  %v699_v43 = vld [vmem:[#allocation11 + $0x498] sm:$0xff]  ;;  %p6810_p4 = pneg %p6809_p2  ;;  %p6815_p3 = scmp.lt.s32.totalorder %s6813_s3, %s6807_s28 }
  0xd0   : > { %2087 = vmatpush1.msra.mxu1 %v1455_v28  ;;  %2017 = vmatprep.subr.mxu0 %v763_v29  ;;  %v1393_v38 = vld [vmem:[#allocation11 + $0x1a48] sm:$0xff]  ;;  %v1372_v42 = vld [vmem:[#allocation11 + $0x19a0] sm:$0xff]  ;;  %v1371_v44 = vld [vmem:[#allocation11 + $0x1998] sm:$0xff] }
  0xd1   : > { %2088 = vmatprep.subr.mxu1 %v1435_v30  ;;  %2018 = vmatpush1.msra.mxu0 %v762_v31  ;;  %v679_v45 = vld [vmem:[#allocation11 + $0x3f8] sm:$0xff]  ;;  %v678_v47 = vld [vmem:[#allocation11 + $0x3f0] sm:$0xff]  ;;  %v657_v51 = vld [vmem:[#allocation11 + $0x348] sm:$0xff]  ;;  %p6816_p8 = por %p6815_p3, %p6814_p1 }
  0xd2   : > { %2089 = vmatpush1.msra.mxu1 %v1434_v32  ;;  %2019 = vmatprep.subr.mxu0 %v742_v33  ;;  %v1351_v46 = vld [vmem:[#allocation11 + $0x18f8] sm:$0xff]  ;;  %v1350_v48 = vld [vmem:[#allocation11 + $0x18f0] sm:$0xff]  ;;  %v1329_v52 = vld [vmem:[#allocation11 + $0x1848] sm:$0xff] }
  0xd3   : > { %2090 = vmatprep.subr.mxu1 %v1414_v34  ;;  %2020 = vmatpush1.msra.mxu0 %v741_v35  ;;  %v658_v49 = vld [vmem:[#allocation11 + $0x350] sm:$0xff]  ;;  %v637_v53 = vld [vmem:[#allocation11 + $0x2a8] sm:$0xff]  ;;  %v636_v55 = vld [vmem:[#allocation11 + $0x2a0] sm:$0xff]  ;;  %p6817_p6 = pnand %p6816_p8, %p6810_p4 }
  0xd4   : > { %2091 = vmatpush1.msra.mxu1 %v1413_v36  ;;  %2021 = vmatprep.subr.mxu0 %v721_v37  ;;  %v1330_v50 = vld [vmem:[#allocation11 + $0x1850] sm:$0xff]  ;;  %v1309_v54 = vld [vmem:[#allocation11 + $0x17a8] sm:$0xff]  ;;  %v1308_v56 = vld [vmem:[#allocation11 + $0x17a0] sm:$0xff] }
  0xd5   : > { %2092 = vmatprep.subr.mxu1 %v1393_v38  ;;  %2022 = vmatpush1.msra.mxu0 %v720_v39  ;;  %v616_v57 = vld [vmem:[#allocation11 + $0x200] sm:$0xff]  ;;  %v615_v59 = vld [vmem:[#allocation11 + $0x1f8] sm:$0xff]  ;;  %v594_v63 = vld [vmem:[#allocation11 + $0x150] sm:$0xff] }
  0xd6   : > { %2093 = vmatpush1.msra.mxu1 %v1392_v40  ;;  %2023 = vmatprep.subr.mxu0 %v700_v41  ;;  %v1288_v58 = vld [vmem:[#allocation11 + $0x1700] sm:$0xff]  ;;  %v1287_v60 = vld [vmem:[#allocation11 + $0x16f8] sm:$0xff]  ;;  %v1266_v0 = vld [vmem:[#allocation11 + $0x1650] sm:$0xff] }
  0xd7   : > { %2094 = vmatprep.subr.mxu1 %v1372_v42  ;;  %2024 = vmatpush1.msra.mxu0 %v699_v43  ;;  %v595_v61 = vld [vmem:[#allocation11 + $0x158] sm:$0xff]  ;;  %v574_v1 = vld [vmem:[#allocation11 + $0xb0] sm:$0xff]  ;;  %v573_v3 = vld [vmem:[#allocation11 + $0xa8] sm:$0xff] }
  0xd8   : > { %2095 = vmatpush1.msra.mxu1 %v1371_v44  ;;  %2025 = vmatprep.subr.mxu0 %v679_v45  ;;  %v1267_v62 = vld [vmem:[#allocation11 + $0x1658] sm:$0xff]  ;;  %v1246_v2 = vld [vmem:[#allocation11 + $0x15b0] sm:$0xff]  ;;  %v1245_v4 = vld [vmem:[#allocation11 + $0x15a8] sm:$0xff] }
  0xd9   : > { %2096 = vmatprep.subr.mxu1 %v1351_v46  ;;  %2026 = vmatpush1.msra.mxu0 %v678_v47  ;;  %v553_v5 = vld [vmem:[#allocation11 + $0x8] sm:$0xff]  ;;  %v552_v7 = vld [vmem:[#allocation11] sm:$0xff]  ;;  %v1203_v11 = vld [vmem:[#allocation11 + $0x1458] sm:$0xff] }
  0xda   : > { %2097 = vmatpush1.msra.mxu1 %v1350_v48  ;;  %2027 = vmatprep.subr.mxu0 %v658_v49  ;;  %v1225_v6 = vld [vmem:[#allocation11 + $0x1508] sm:$0xff]  ;;  %v1224_v8 = vld [vmem:[#allocation11 + $0x1500] sm:$0xff]  ;;  %v1875_v12 = vld [vmem:[#allocation11 + $0x2958] sm:$0xff] }
  0xdb   : > { %2098 = vmatprep.subr.mxu1 %v1330_v50  ;;  %2028 = vmatpush1.msra.mxu0 %v657_v51  ;;  %v1204_v9 = vld [vmem:[#allocation11 + $0x1460] sm:$0xff]  ;;  %v1183_v13 = vld [vmem:[#allocation11 + $0x13b8] sm:$0xff]  ;;  %v1182_v15 = vld [vmem:[#allocation11 + $0x13b0] sm:$0xff] }
  0xdc   : > { %2099 = vmatpush1.msra.mxu1 %v1329_v52  ;;  %2029 = vmatprep.subr.mxu0 %v637_v53  ;;  %v1876_v10 = vld [vmem:[#allocation11 + $0x2960] sm:$0xff]  ;;  %v1855_v14 = vld [vmem:[#allocation11 + $0x28b8] sm:$0xff]  ;;  %v1854_v16 = vld [vmem:[#allocation11 + $0x28b0] sm:$0xff] }
  0xdd   : > { %2100 = vmatprep.subr.mxu1 %v1309_v54  ;;  %2030 = vmatpush1.msra.mxu0 %v636_v55  ;;  %v1162_v17 = vld [vmem:[#allocation11 + $0x1310] sm:$0xff]  ;;  %v1161_v19 = vld [vmem:[#allocation11 + $0x1308] sm:$0xff]  ;;  %v1140_v23 = vld [vmem:[#allocation11 + $0x1260] sm:$0xff] }
  0xde   : > { %2101 = vmatpush1.msra.mxu1 %v1308_v56  ;;  %2031 = vmatprep.subr.mxu0 %v616_v57  ;;  %v1834_v18 = vld [vmem:[#allocation11 + $0x2810] sm:$0xff]  ;;  %v1833_v20 = vld [vmem:[#allocation11 + $0x2808] sm:$0xff]  ;;  %v1812_v24 = vld [vmem:[#allocation11 + $0x2760] sm:$0xff] }
  0xdf   : > { %2102 = vmatprep.subr.mxu1 %v1288_v58  ;;  %2032 = vmatpush1.msra.mxu0 %v615_v59  ;;  %v1141_v21 = vld [vmem:[#allocation11 + $0x1268] sm:$0xff]  ;;  %v1120_v25 = vld [vmem:[#allocation11 + $0x11c0] sm:$0xff]  ;;  %v1119_v27 = vld [vmem:[#allocation11 + $0x11b8] sm:$0xff] }
  0xe0   : > { %2103 = vmatpush1.msra.mxu1 %v1287_v60  ;;  %2033 = vmatprep.subr.mxu0 %v595_v61  ;;  %v1813_v22 = vld [vmem:[#allocation11 + $0x2768] sm:$0xff]  ;;  %v1792_v26 = vld [vmem:[#allocation11 + $0x26c0] sm:$0xff]  ;;  %v1791_v28 = vld [vmem:[#allocation11 + $0x26b8] sm:$0xff] }
  0xe1   : > { %2104 = vmatprep.subr.mxu1 %v1267_v62  ;;  %2034 = vmatpush1.msra.mxu0 %v594_v63  ;;  %v1099_v29 = vld [vmem:[#allocation11 + $0x1118] sm:$0xff]  ;;  %v1098_v31 = vld [vmem:[#allocation11 + $0x1110] sm:$0xff]  ;;  %v1077_v35 = vld [vmem:[#allocation11 + $0x1068] sm:$0xff] }
  0xe2   : > { %2105 = vmatpush1.msra.mxu1 %v1266_v0  ;;  %2035 = vmatprep.subr.mxu0 %v574_v1  ;;  %v1771_v30 = vld [vmem:[#allocation11 + $0x2618] sm:$0xff]  ;;  %v1770_v32 = vld [vmem:[#allocation11 + $0x2610] sm:$0xff]  ;;  %v1749_v36 = vld [vmem:[#allocation11 + $0x2568] sm:$0xff] }
  0xe3   : > { %2106 = vmatprep.subr.mxu1 %v1246_v2  ;;  %2036 = vmatpush1.msra.mxu0 %v573_v3  ;;  %v1078_v33 = vld [vmem:[#allocation11 + $0x1070] sm:$0xff]  ;;  %v1057_v37 = vld [vmem:[#allocation11 + $0xfc8] sm:$0xff]  ;;  %v1056_v39 = vld [vmem:[#allocation11 + $0xfc0] sm:$0xff] }
  0xe4   : > { %2107 = vmatpush1.msra.mxu1 %v1245_v4  ;;  %2037 = vmatprep.subr.mxu0 %v553_v5  ;;  %v1750_v34 = vld [vmem:[#allocation11 + $0x2570] sm:$0xff]  ;;  %v1729_v38 = vld [vmem:[#allocation11 + $0x24c8] sm:$0xff]  ;;  %v1728_v40 = vld [vmem:[#allocation11 + $0x24c0] sm:$0xff] }
  0xe5   : > { %2108 = vmatprep.subr.mxu1 %v1225_v6  ;;  %2038 = vmatpush1.msra.mxu0 %v552_v7  ;;  %v1036_v41 = vld [vmem:[#allocation11 + $0xf20] sm:$0xff]  ;;  %v1035_v43 = vld [vmem:[#allocation11 + $0xf18] sm:$0xff]  ;;  %v1014_v47 = vld [vmem:[#allocation11 + $0xe70] sm:$0xff] }
  0xe6   : > { %2109 = vmatpush1.msra.mxu1 %v1224_v8  ;;  %2039 = vmatprep.subr.mxu0 %v1204_v9  ;;  %v1708_v42 = vld [vmem:[#allocation11 + $0x2420] sm:$0xff]  ;;  %v1707_v44 = vld [vmem:[#allocation11 + $0x2418] sm:$0xff]  ;;  %v1686_v48 = vld [vmem:[#allocation11 + $0x2370] sm:$0xff] }
  0xe7   : > { %2110 = vmatprep.subr.mxu1 %v1876_v10  ;;  %2040 = vmatpush2.msra.mxu0 %v1203_v11  ;;  %v1015_v45 = vld [vmem:[#allocation11 + $0xe78] sm:$0xff]  ;;  %v994_v49 = vld [vmem:[#allocation11 + $0xdd0] sm:$0xff]  ;;  %v993_v51 = vld [vmem:[#allocation11 + $0xdc8] sm:$0xff] }
  0xe8   : > { %2111 = vmatpush2.msra.mxu1 %v1875_v12  ;;  %2041 = vmatprep.subr.mxu0 %v1183_v13  ;;  %v1687_v46 = vld [vmem:[#allocation11 + $0x2378] sm:$0xff]  ;;  %v1666_v50 = vld [vmem:[#allocation11 + $0x22d0] sm:$0xff]  ;;  %v1665_v52 = vld [vmem:[#allocation11 + $0x22c8] sm:$0xff] }
  0xe9   : > { %2112 = vmatprep.subr.mxu1 %v1855_v14  ;;  %2042 = vmatpush2.msra.mxu0 %v1182_v15  ;;  %v973_v53 = vld [vmem:[#allocation11 + $0xd28] sm:$0xff]  ;;  %v972_v55 = vld [vmem:[#allocation11 + $0xd20] sm:$0xff]  ;;  %v951_v59 = vld [vmem:[#allocation11 + $0xc78] sm:$0xff] }
  0xea   : > { %2113 = vmatpush2.msra.mxu1 %v1854_v16  ;;  %2043 = vmatprep.subr.mxu0 %v1162_v17  ;;  %v1645_v54 = vld [vmem:[#allocation11 + $0x2228] sm:$0xff]  ;;  %v1644_v56 = vld [vmem:[#allocation11 + $0x2220] sm:$0xff]  ;;  %v1623_v60 = vld [vmem:[#allocation11 + $0x2178] sm:$0xff] }
  0xeb   : > { %2114 = vmatprep.subr.mxu1 %v1834_v18  ;;  %2044 = vmatpush2.msra.mxu0 %v1161_v19  ;;  %v952_v57 = vld [vmem:[#allocation11 + $0xc80] sm:$0xff]  ;;  %v931_v61 = vld [vmem:[#allocation11 + $0xbd8] sm:$0xff]  ;;  %v930_v63 = vld [vmem:[#allocation11 + $0xbd0] sm:$0xff] }
  0xec   : > { %2115 = vmatpush2.msra.mxu1 %v1833_v20  ;;  %2045 = vmatprep.subr.mxu0 %v1141_v21  ;;  %v1624_v58 = vld [vmem:[#allocation11 + $0x2180] sm:$0xff]  ;;  %v1603_v62 = vld [vmem:[#allocation11 + $0x20d8] sm:$0xff]  ;;  %v1602_v0 = vld [vmem:[#allocation11 + $0x20d0] sm:$0xff] }
  0xed   : > { %2116 = vmatprep.subr.mxu1 %v1813_v22  ;;  %2046 = vmatpush2.msra.mxu0 %v1140_v23  ;;  %v910_v1 = vld [vmem:[#allocation11 + $0xb30] sm:$0xff]  ;;  %v909_v3 = vld [vmem:[#allocation11 + $0xb28] sm:$0xff]  ;;  %v888_v7 = vld [vmem:[#allocation11 + $0xa80] sm:$0xff] }
  0xee   : > { %2117 = vmatpush2.msra.mxu1 %v1812_v24  ;;  %2047 = vmatprep.subr.mxu0 %v1120_v25  ;;  %v1582_v2 = vld [vmem:[#allocation11 + $0x2030] sm:$0xff]  ;;  %v1581_v4 = vld [vmem:[#allocation11 + $0x2028] sm:$0xff]  ;;  %v7224_v8 = vld [vmem:[#allocation2] sm:$0xff] }
  0xef   : > { %2118 = vmatprep.subr.mxu1 %v1792_v26  ;;  %2048 = vmatpush2.msra.mxu0 %v1119_v27  ;;  %v889_v5 = vld [vmem:[#allocation11 + $0xa88] sm:$0xff]  ;;  %v1560_v9 = vld [vmem:[#allocation11 + $0x1f80] sm:$0xff]  ;;  %v870_v12 = vld [vmem:[#allocation11 + $0x9f0] sm:$0xff] }
  0xf0   : > { %2119 = vmatpush2.msra.mxu1 %v1791_v28  ;;  %2049 = vmatprep.subr.mxu0 %v1099_v29  ;;  %v1561_v6 = vld [vmem:[#allocation11 + $0x1f88] sm:$0xff]  ;;  %v1542_v13 = vld [vmem:[#allocation11 + $0x1ef0] sm:$0xff]  ;;  %v848_v19 = vld [vmem:[#allocation11 + $0x940] sm:$0xff] }
  0xf1   : > { %2120 = vmatprep.subr.mxu1 %v1771_v30  ;;  %2050 = vmatpush2.msra.mxu0 %v1098_v31  ;;  %v7226_v10 = vld [vmem:[#allocation2 + $0x10] sm:$0xff]  ;;  %v7228_v11 = vld [vmem:[#allocation2 + $0x8] sm:$0xff]  ;;  %v7231_v14 = vld [vmem:[#allocation2 + $0x18] sm:$0xff] }
  0xf2   : > { %2121 = vmatpush2.msra.mxu1 %v1770_v32  ;;  %2051 = vmatprep.subr.mxu0 %v1078_v33  ;;  %v869_v15 = vld [vmem:[#allocation11 + $0x9e8] sm:$0xff]  ;;  %v1520_v20 = vld [vmem:[#allocation11 + $0x1e40] sm:$0xff]  ;;  %v827_v23 = vld [vmem:[#allocation11 + $0x898] sm:$0xff] }
  0xf3   : > { %2122 = vmatprep.subr.mxu1 %v1750_v34  ;;  %2052 = vmatpush2.msra.mxu0 %v1077_v35  ;;  %v1541_v16 = vld [vmem:[#allocation11 + $0x1ee8] sm:$0xff]  ;;  %v828_v21 = vld [vmem:[#allocation11 + $0x8a0] sm:$0xff]  ;;  %v1499_v24 = vld [vmem:[#allocation11 + $0x1d98] sm:$0xff] }
  0xf4   : > { %2123 = vmatpush2.msra.mxu1 %v1749_v36  ;;  %2053 = vmatprep.subr.mxu0 %v1057_v37  ;;  %v849_v17 = vld [vmem:[#allocation11 + $0x948] sm:$0xff]  ;;  %v1500_v22 = vld [vmem:[#allocation11 + $0x1da0] sm:$0xff]  ;;  %v807_v25 = vld [vmem:[#allocation11 + $0x7f8] sm:$0xff] }
  0xf5   : > { %2124 = vmatprep.subr.mxu1 %v1729_v38  ;;  %2054 = vmatpush2.msra.mxu0 %v1056_v39  ;;  %v1521_v18 = vld [vmem:[#allocation11 + $0x1e48] sm:$0xff]  ;;  %v1479_v26 = vld [vmem:[#allocation11 + $0x1cf8] sm:$0xff]  ;;  %v806_v27 = vld [vmem:[#allocation11 + $0x7f0] sm:$0xff] }
  0xf6   : > { %2125 = vmatpush2.msra.mxu1 %v1728_v40  ;;  %2055 = vmatprep.subr.mxu0 %v1036_v41  ;;  %v1478_v28 = vld [vmem:[#allocation11 + $0x1cf0] sm:$0xff]  ;;  %v785_v31 = vld [vmem:[#allocation11 + $0x748] sm:$0xff]  ;;  %v764_v35 = vld [vmem:[#allocation11 + $0x6a0] sm:$0xff] }
  0xf7   : > { %2126 = vmatprep.subr.mxu1 %v1708_v42  ;;  %2056 = vmatpush2.msra.mxu0 %v1035_v43  ;;  %v786_v29 = vld [vmem:[#allocation11 + $0x750] sm:$0xff]  ;;  %v1457_v32 = vld [vmem:[#allocation11 + $0x1c48] sm:$0xff]  ;;  %v1436_v36 = vld [vmem:[#allocation11 + $0x1ba0] sm:$0xff] }
  0xf8   : > { %2127 = vmatpush2.msra.mxu1 %v1707_v44  ;;  %2057 = vmatprep.subr.mxu0 %v1015_v45  ;;  %v1458_v30 = vld [vmem:[#allocation11 + $0x1c50] sm:$0xff]  ;;  %v765_v33 = vld [vmem:[#allocation11 + $0x6a8] sm:$0xff]  ;;  %v744_v37 = vld [vmem:[#allocation11 + $0x600] sm:$0xff] }
  0xf9   : > { %2128 = vmatprep.subr.mxu1 %v1687_v46  ;;  %2058 = vmatpush2.msra.mxu0 %v1014_v47  ;;  %v1437_v34 = vld [vmem:[#allocation11 + $0x1ba8] sm:$0xff]  ;;  %v1416_v38 = vld [vmem:[#allocation11 + $0x1b00] sm:$0xff]  ;;  %v743_v39 = vld [vmem:[#allocation11 + $0x5f8] sm:$0xff] }
  0xfa   : > { %2129 = vmatpush2.msra.mxu1 %v1686_v48  ;;  %2059 = vmatprep.subr.mxu0 %v994_v49  ;;  %v1415_v40 = vld [vmem:[#allocation11 + $0x1af8] sm:$0xff]  ;;  %v722_v43 = vld [vmem:[#allocation11 + $0x550] sm:$0xff]  ;;  %v701_v47 = vld [vmem:[#allocation11 + $0x4a8] sm:$0xff] }
  0xfb   : > { %2130 = vmatprep.subr.mxu1 %v1666_v50  ;;  %2060 = vmatpush2.msra.mxu0 %v993_v51  ;;  %v723_v41 = vld [vmem:[#allocation11 + $0x558] sm:$0xff]  ;;  %v1394_v44 = vld [vmem:[#allocation11 + $0x1a50] sm:$0xff]  ;;  %v1373_v48 = vld [vmem:[#allocation11 + $0x19a8] sm:$0xff] }
  0xfc   : > { %2131 = vmatpush2.msra.mxu1 %v1665_v52  ;;  %2061 = vmatprep.subr.mxu0 %v973_v53  ;;  %v1395_v42 = vld [vmem:[#allocation11 + $0x1a58] sm:$0xff]  ;;  %v702_v45 = vld [vmem:[#allocation11 + $0x4b0] sm:$0xff]  ;;  %v681_v49 = vld [vmem:[#allocation11 + $0x408] sm:$0xff] }
  0xfd   : > { %2132 = vmatprep.subr.mxu1 %v1645_v54  ;;  %2062 = vmatpush2.msra.mxu0 %v972_v55  ;;  %v1374_v46 = vld [vmem:[#allocation11 + $0x19b0] sm:$0xff]  ;;  %v1353_v50 = vld [vmem:[#allocation11 + $0x1908] sm:$0xff]  ;;  %v680_v51 = vld [vmem:[#allocation11 + $0x400] sm:$0xff] }
  0xfe   : > { %2133 = vmatpush2.msra.mxu1 %v1644_v56  ;;  %2063 = vmatprep.subr.mxu0 %v952_v57  ;;  %v1352_v52 = vld [vmem:[#allocation11 + $0x1900] sm:$0xff]  ;;  %v659_v55 = vld [vmem:[#allocation11 + $0x358] sm:$0xff] }
  0xff   : > { %2134 = vmatprep.subr.mxu1 %v1624_v58  ;;  %2064 = vmatpush2.msra.mxu0 %v951_v59  ;;  %v660_v53 = vld [vmem:[#allocation11 + $0x360] sm:$0xff]  ;;  %v1331_v56 = vld [vmem:[#allocation11 + $0x1858] sm:$0xff]  ;;  %v638_v59 = vld [vmem:[#allocation11 + $0x2b0] sm:$0xff] }
 0x100   : > { %2135 = vmatpush2.msra.mxu1 %v1623_v60  ;;  %2065 = vmatprep.subr.mxu0 %v931_v61  ;;  %v1332_v54 = vld [vmem:[#allocation11 + $0x1860] sm:$0xff]  ;;  %v639_v57 = vld [vmem:[#allocation11 + $0x2b8] sm:$0xff]  ;;  %v1310_v60 = vld [vmem:[#allocation11 + $0x17b0] sm:$0xff] }
 0x101   : > { %2136 = vmatprep.subr.mxu1 %v1603_v62  ;;  %2066 = vmatpush2.msra.mxu0 %v930_v63  ;;  %v1311_v58 = vld [vmem:[#allocation11 + $0x17b8] sm:$0xff]  ;;  %v618_v61 = vld [vmem:[#allocation11 + $0x210] sm:$0xff]  ;;  %v617_v63 = vld [vmem:[#allocation11 + $0x208] sm:$0xff] }
 0x102   : > { %2137 = vmatpush2.msra.mxu1 %v1602_v0  ;;  %2067 = vmatprep.subr.mxu0 %v910_v1  ;;  %v1290_v62 = vld [vmem:[#allocation11 + $0x1710] sm:$0xff]  ;;  %v1289_v0 = vld [vmem:[#allocation11 + $0x1708] sm:$0xff] }
 0x103   : > { %2138 = vmatprep.subr.mxu1 %v1582_v2  ;;  %2068 = vmatpush2.msra.mxu0 %v909_v3  ;;  %v597_v1 = vld [vmem:[#allocation11 + $0x168] sm:$0xff]  ;;  %v596_v3 = vld [vmem:[#allocation11 + $0x160] sm:$0xff] }
 0x104   : > { %2139 = vmatpush2.msra.mxu1 %v1581_v4  ;;  %2069 = vmatprep.subr.mxu0 %v889_v5  ;;  %v1269_v2 = vld [vmem:[#allocation11 + $0x1668] sm:$0xff]  ;;  %v1268_v4 = vld [vmem:[#allocation11 + $0x1660] sm:$0xff] }
 0x105   : > { %2140 = vmatprep.subr.mxu1 %v1561_v6  ;;  %2070 = vmatpush2.msra.mxu0 %v888_v7  ;;  %v576_v5 = vld [vmem:[#allocation11 + $0xc0] sm:$0xff]  ;;  %v575_v7 = vld [vmem:[#allocation11 + $0xb8] sm:$0xff] }
 0x106   : > { %2071 = vmatprep.mubr.f32.mxu0 %v7224_v8  ;;  %2141 = vmatpush2.msra.mxu1 %v1560_v9  ;;  %v1248_v6 = vld [vmem:[#allocation11 + $0x15c0] sm:$0xff]  ;;  %v1247_v9 = vld [vmem:[#allocation11 + $0x15b8] sm:$0xff] }
 0x107   : > { %2072 = vmatmul.mubr.f32.vlgmr.msra.gmra.mxu0 %v7226_v10  ;;  %2142 = vmatprep.mubr.f32.mxu1 %v7228_v11 }
 0x108   : > { %2149 = vmatprep.subr.mxu0 %v870_v12  ;;  %2220 = vmatprep.subr.mxu1 %v1542_v13  ;;  %v555_v12 = vld [vmem:[#allocation11 + $0x18] sm:$0xff] }
 0x109   : > { %2143 = vmatmul.mubr.f32.vlgmr.msra.gmra.mxu1 %v7231_v14  ;;  %2150 = vmatpush1.msra.mxu0 %v869_v15  ;;  %v1227_v13 = vld [vmem:[#allocation11 + $0x1518] sm:$0xff]  ;;  %v554_v15 = vld [vmem:[#allocation11 + $0x10] sm:$0xff] }
 0x10a   : > { %2221 = vmatpush1.msra.mxu1 %v1541_v16  ;;  %2151 = vmatprep.subr.mxu0 %v849_v17  ;;  %v1226_v16 = vld [vmem:[#allocation11 + $0x1510] sm:$0xff] }
 0x10b   : > { %2222 = vmatprep.subr.mxu1 %v1521_v18  ;;  %2152 = vmatpush1.msra.mxu0 %v848_v19  ;;  %v1206_v17 = vld [vmem:[#allocation11 + $0x1470] sm:$0xff]  ;;  %v1205_v19 = vld [vmem:[#allocation11 + $0x1468] sm:$0xff] }
 0x10c   : > { %2223 = vmatpush1.msra.mxu1 %v1520_v20  ;;  %2153 = vmatprep.subr.mxu0 %v828_v21  ;;  %v1878_v18 = vld [vmem:[#allocation11 + $0x2970] sm:$0xff]  ;;  %v1877_v20 = vld [vmem:[#allocation11 + $0x2968] sm:$0xff] }
 0x10d   : > { %2224 = vmatprep.subr.mxu1 %v1500_v22  ;;  %2154 = vmatpush1.msra.mxu0 %v827_v23  ;;  %v1185_v21 = vld [vmem:[#allocation11 + $0x13c8] sm:$0xff]  ;;  %v1184_v23 = vld [vmem:[#allocation11 + $0x13c0] sm:$0xff] }
 0x10e   : > { %2225 = vmatpush1.msra.mxu1 %v1499_v24  ;;  %2155 = vmatprep.subr.mxu0 %v807_v25  ;;  %v1857_v22 = vld [vmem:[#allocation11 + $0x28c8] sm:$0xff]  ;;  %v1856_v24 = vld [vmem:[#allocation11 + $0x28c0] sm:$0xff] }
 0x10f   : > { %2226 = vmatprep.subr.mxu1 %v1479_v26  ;;  %2156 = vmatpush1.msra.mxu0 %v806_v27  ;;  %v1164_v25 = vld [vmem:[#allocation11 + $0x1320] sm:$0xff]  ;;  %v1163_v27 = vld [vmem:[#allocation11 + $0x1318] sm:$0xff] }
 0x110   : > { %2227 = vmatpush1.msra.mxu1 %v1478_v28  ;;  %2157 = vmatprep.subr.mxu0 %v786_v29  ;;  %v1836_v26 = vld [vmem:[#allocation11 + $0x2820] sm:$0xff]  ;;  %v1835_v28 = vld [vmem:[#allocation11 + $0x2818] sm:$0xff] }
 0x111   : > { %2228 = vmatprep.subr.mxu1 %v1458_v30  ;;  %2158 = vmatpush1.msra.mxu0 %v785_v31  ;;  %v1143_v29 = vld [vmem:[#allocation11 + $0x1278] sm:$0xff]  ;;  %v1142_v31 = vld [vmem:[#allocation11 + $0x1270] sm:$0xff] }
 0x112   : > { %2229 = vmatpush1.msra.mxu1 %v1457_v32  ;;  %2159 = vmatprep.subr.mxu0 %v765_v33  ;;  %v1815_v30 = vld [vmem:[#allocation11 + $0x2778] sm:$0xff]  ;;  %v1814_v32 = vld [vmem:[#allocation11 + $0x2770] sm:$0xff] }
 0x113   : > { %2230 = vmatprep.subr.mxu1 %v1437_v34  ;;  %2160 = vmatpush1.msra.mxu0 %v764_v35  ;;  %v1122_v33 = vld [vmem:[#allocation11 + $0x11d0] sm:$0xff]  ;;  %v1121_v35 = vld [vmem:[#allocation11 + $0x11c8] sm:$0xff] }
 0x114   : > { %2231 = vmatpush1.msra.mxu1 %v1436_v36  ;;  %2161 = vmatprep.subr.mxu0 %v744_v37  ;;  %v1794_v34 = vld [vmem:[#allocation11 + $0x26d0] sm:$0xff]  ;;  %v1793_v36 = vld [vmem:[#allocation11 + $0x26c8] sm:$0xff] }
 0x115   : > { %2232 = vmatprep.subr.mxu1 %v1416_v38  ;;  %2162 = vmatpush1.msra.mxu0 %v743_v39  ;;  %v1101_v37 = vld [vmem:[#allocation11 + $0x1128] sm:$0xff]  ;;  %v1100_v39 = vld [vmem:[#allocation11 + $0x1120] sm:$0xff] }
 0x116   : > { %2233 = vmatpush1.msra.mxu1 %v1415_v40  ;;  %2163 = vmatprep.subr.mxu0 %v723_v41  ;;  %v1773_v38 = vld [vmem:[#allocation11 + $0x2628] sm:$0xff]  ;;  %v1772_v40 = vld [vmem:[#allocation11 + $0x2620] sm:$0xff] }
 0x117   : > { %2234 = vmatprep.subr.mxu1 %v1395_v42  ;;  %2164 = vmatpush1.msra.mxu0 %v722_v43  ;;  %v1080_v41 = vld [vmem:[#allocation11 + $0x1080] sm:$0xff]  ;;  %v1079_v43 = vld [vmem:[#allocation11 + $0x1078] sm:$0xff] }
 0x118   : > { %2235 = vmatpush1.msra.mxu1 %v1394_v44  ;;  %2165 = vmatprep.subr.mxu0 %v702_v45  ;;  %v1752_v42 = vld [vmem:[#allocation11 + $0x2580] sm:$0xff]  ;;  %v1751_v44 = vld [vmem:[#allocation11 + $0x2578] sm:$0xff] }
 0x119   : > { %2236 = vmatprep.subr.mxu1 %v1374_v46  ;;  %2166 = vmatpush1.msra.mxu0 %v701_v47  ;;  %v1059_v45 = vld [vmem:[#allocation11 + $0xfd8] sm:$0xff]  ;;  %v1058_v47 = vld [vmem:[#allocation11 + $0xfd0] sm:$0xff] }
 0x11a   : > { %2237 = vmatpush1.msra.mxu1 %v1373_v48  ;;  %2167 = vmatprep.subr.mxu0 %v681_v49  ;;  %v1731_v46 = vld [vmem:[#allocation11 + $0x24d8] sm:$0xff]  ;;  %v1730_v48 = vld [vmem:[#allocation11 + $0x24d0] sm:$0xff] }
 0x11b   : > { %2238 = vmatprep.subr.mxu1 %v1353_v50  ;;  %2168 = vmatpush1.msra.mxu0 %v680_v51  ;;  %v1038_v49 = vld [vmem:[#allocation11 + $0xf30] sm:$0xff]  ;;  %v1037_v51 = vld [vmem:[#allocation11 + $0xf28] sm:$0xff] }
 0x11c   : > { %2239 = vmatpush1.msra.mxu1 %v1352_v52  ;;  %2169 = vmatprep.subr.mxu0 %v660_v53  ;;  %v1710_v50 = vld [vmem:[#allocation11 + $0x2430] sm:$0xff]  ;;  %v1709_v52 = vld [vmem:[#allocation11 + $0x2428] sm:$0xff] }
 0x11d   : > { %2240 = vmatprep.subr.mxu1 %v1332_v54  ;;  %2170 = vmatpush1.msra.mxu0 %v659_v55  ;;  %v1017_v53 = vld [vmem:[#allocation11 + $0xe88] sm:$0xff]  ;;  %v1016_v55 = vld [vmem:[#allocation11 + $0xe80] sm:$0xff] }
 0x11e   : > { %2241 = vmatpush1.msra.mxu1 %v1331_v56  ;;  %2171 = vmatprep.subr.mxu0 %v639_v57  ;;  %v1689_v54 = vld [vmem:[#allocation11 + $0x2388] sm:$0xff]  ;;  %v1688_v56 = vld [vmem:[#allocation11 + $0x2380] sm:$0xff] }
 0x11f   : > { %2242 = vmatprep.subr.mxu1 %v1311_v58  ;;  %2172 = vmatpush1.msra.mxu0 %v638_v59  ;;  %v996_v57 = vld [vmem:[#allocation11 + $0xde0] sm:$0xff]  ;;  %v995_v59 = vld [vmem:[#allocation11 + $0xdd8] sm:$0xff] }
 0x120   : > { %2243 = vmatpush1.msra.mxu1 %v1310_v60  ;;  %2173 = vmatprep.subr.mxu0 %v618_v61  ;;  %v1668_v58 = vld [vmem:[#allocation11 + $0x22e0] sm:$0xff]  ;;  %v1667_v60 = vld [vmem:[#allocation11 + $0x22d8] sm:$0xff] }
 0x121   : > { %2244 = vmatprep.subr.mxu1 %v1290_v62  ;;  %2174 = vmatpush1.msra.mxu0 %v617_v63  ;;  %v975_v61 = vld [vmem:[#allocation11 + $0xd38] sm:$0xff]  ;;  %v974_v63 = vld [vmem:[#allocation11 + $0xd30] sm:$0xff] }
 0x122   : > { %2245 = vmatpush1.msra.mxu1 %v1289_v0  ;;  %2175 = vmatprep.subr.mxu0 %v597_v1  ;;  %v1647_v62 = vld [vmem:[#allocation11 + $0x2238] sm:$0xff]  ;;  %v1646_v0 = vld [vmem:[#allocation11 + $0x2230] sm:$0xff] }
 0x123   : > { %2246 = vmatprep.subr.mxu1 %v1269_v2  ;;  %2176 = vmatpush1.msra.mxu0 %v596_v3  ;;  %v954_v1 = vld [vmem:[#allocation11 + $0xc90] sm:$0xff]  ;;  %v953_v3 = vld [vmem:[#allocation11 + $0xc88] sm:$0xff] }
 0x124   : > { %2247 = vmatpush1.msra.mxu1 %v1268_v4  ;;  %2177 = vmatprep.subr.mxu0 %v576_v5  ;;  %v1626_v2 = vld [vmem:[#allocation11 + $0x2190] sm:$0xff]  ;;  %v1625_v4 = vld [vmem:[#allocation11 + $0x2188] sm:$0xff] }
 0x125   : > { %2248 = vmatprep.subr.mxu1 %v1248_v6  ;;  %2178 = vmatpush1.msra.mxu0 %v575_v7  ;;  %v933_v5 = vld [vmem:[#allocation11 + $0xbe8] sm:$0xff]  ;;  %v932_v7 = vld [vmem:[#allocation11 + $0xbe0] sm:$0xff] }
 0x126   : > { %2249 = vmatpush1.msra.mxu1 %v1247_v9  ;;  %2179 = vmatprep.subr.mxu0 %v555_v12  ;;  %v1605_v6 = vld [vmem:[#allocation11 + $0x20e8] sm:$0xff]  ;;  %v1604_v9 = vld [vmem:[#allocation11 + $0x20e0] sm:$0xff] }
 0x127   : > { %2250 = vmatprep.subr.mxu1 %v1227_v13  ;;  %2180 = vmatpush1.msra.mxu0 %v554_v15  ;;  %v912_v12 = vld [vmem:[#allocation11 + $0xb40] sm:$0xff]  ;;  %v911_v15 = vld [vmem:[#allocation11 + $0xb38] sm:$0xff] }
 0x128   : > { %2251 = vmatpush1.msra.mxu1 %v1226_v16  ;;  %2181 = vmatprep.subr.mxu0 %v1206_v17  ;;  %v1584_v13 = vld [vmem:[#allocation11 + $0x2040] sm:$0xff]  ;;  %v1583_v16 = vld [vmem:[#allocation11 + $0x2038] sm:$0xff] }
 0x129   : > { %2252 = vmatprep.subr.mxu1 %v1878_v18  ;;  %2182 = vmatpush2.msra.mxu0 %v1205_v19  ;;  %v891_v17 = vld [vmem:[#allocation11 + $0xa98] sm:$0xff]  ;;  %v890_v19 = vld [vmem:[#allocation11 + $0xa90] sm:$0xff] }
 0x12a   : > { %2253 = vmatpush2.msra.mxu1 %v1877_v20  ;;  %2183 = vmatprep.subr.mxu0 %v1185_v21  ;;  %v1563_v18 = vld [vmem:[#allocation11 + $0x1f98] sm:$0xff]  ;;  %v1562_v20 = vld [vmem:[#allocation11 + $0x1f90] sm:$0xff]  ;;  %v6939_v21 = vmov 0  }
 0x12b   : > { %2254 = vmatprep.subr.mxu1 %v1857_v22  ;;  %2184 = vmatpush2.msra.mxu0 %v1184_v23  ;;  %v1902_v22 = vlaneseq }
 0x12c   : > { %2255 = vmatpush2.msra.mxu1 %v1856_v24  ;;  %2185 = vmatprep.subr.mxu0 %v1164_v25 }
 0x12d   : > { %2256 = vmatprep.subr.mxu1 %v1836_v26  ;;  %2186 = vmatpush2.msra.mxu0 %v1163_v27  ;;  %v7243_v23 = vshrl.u32 %v1902_v22, 7 }
 0x12e   : > { %2257 = vmatpush2.msra.mxu1 %v1835_v28  ;;  %2187 = vmatprep.subr.mxu0 %v1143_v29 }
 0x12f   : > { %2258 = vmatprep.subr.mxu1 %v1815_v30  ;;  %2188 = vmatpush2.msra.mxu0 %v1142_v31  ;;  %v7246_v24 = vsub.s32 0, %v7243_v23  ;;  %v7249_v25 = vsub.s32 1, %v7243_v23  ;;  %v7257_v29 = vsub.s32 3, %v7243_v23  ;;  %v6940_v30 = vmov 1966171168  }
 0x130   : > { %2259 = vmatpush2.msra.mxu1 %v1814_v32  ;;  %2189 = vmatprep.subr.mxu0 %v1122_v33  ;;  %v3640_v31 = vunpack.c.l.s4 %v6940_v30 }
 0x131   : > { %2260 = vmatprep.subr.mxu1 %v1794_v34  ;;  %2190 = vmatpush2.msra.mxu0 %v1121_v35 }
 0x132   : > { %2261 = vmatpush2.msra.mxu1 %v1793_v36  ;;  %2191 = vmatprep.subr.mxu0 %v1101_v37  ;;  %v872_v36 = vld [vmem:[#allocation11 + $0xa00] sm:$0xff]  ;;  %v871_v37 = vld [vmem:[#allocation11 + $0x9f8] sm:$0xff] }
 0x133   : > { %2262 = vmatprep.subr.mxu1 %v1773_v38  ;;  %2192 = vmatpush2.msra.mxu0 %v1100_v39  ;;  %v851_v38 = vld [vmem:[#allocation11 + $0x958] sm:$0xff] }
 0x134   : > { %2263 = vmatpush2.msra.mxu1 %v1772_v40  ;;  %2193 = vmatprep.subr.mxu0 %v1080_v41  ;;  %v1544_v40 = vld [vmem:[#allocation11 + $0x1f00] sm:$0xff]  ;;  %v850_v41 = vld [vmem:[#allocation11 + $0x950] sm:$0xff] }
 0x135   : > { %2264 = vmatprep.subr.mxu1 %v1752_v42  ;;  %2194 = vmatpush2.msra.mxu0 %v1079_v43  ;;  %v1543_v42 = vld [vmem:[#allocation11 + $0x1ef8] sm:$0xff]  ;;  %v3641_v43 = vunpack.c.0.s8 %v3640_v31  ;;  %v704_v31 = vld [vmem:[#allocation11 + $0x4c0] sm:$0xff] }
 0x136   : > { %2265 = vmatpush2.msra.mxu1 %v1751_v44  ;;  %2195 = vmatprep.subr.mxu0 %v1059_v45 }
 0x137   : > { %2266 = vmatprep.subr.mxu1 %v1731_v46  ;;  %2196 = vmatpush2.msra.mxu0 %v1058_v47  ;;  %v830_v46 = vld [vmem:[#allocation11 + $0x8b0] sm:$0xff]  ;;  %v1523_v47 = vld [vmem:[#allocation11 + $0x1e58] sm:$0xff] }
 0x138   : > { %2267 = vmatpush2.msra.mxu1 %v1730_v48  ;;  %2197 = vmatprep.subr.mxu0 %v1038_v49 }
 0x139   : > { %2268 = vmatprep.subr.mxu1 %v1710_v50  ;;  %2198 = vmatpush2.msra.mxu0 %v1037_v51  ;;  %v829_v51 = vld [vmem:[#allocation11 + $0x8a8] sm:$0xff] }
 0x13a   : > { %2269 = vmatpush2.msra.mxu1 %v1709_v52  ;;  %2199 = vmatprep.subr.mxu0 %v1017_v53  ;;  %v1522_v52 = vld [vmem:[#allocation11 + $0x1e50] sm:$0xff] }
 0x13b   : > { %2270 = vmatprep.subr.mxu1 %v1689_v54  ;;  %2200 = vmatpush2.msra.mxu0 %v1016_v55  ;;  %v1502_v53 = vld [vmem:[#allocation11 + $0x1db0] sm:$0xff]  ;;  %v809_v55 = vld [vmem:[#allocation11 + $0x808] sm:$0xff] }
 0x13c   : > { %2271 = vmatpush2.msra.mxu1 %v1688_v56  ;;  %2201 = vmatprep.subr.mxu0 %v996_v57  ;;  %v1501_v56 = vld [vmem:[#allocation11 + $0x1da8] sm:$0xff] }
 0x13d   : > { %2272 = vmatprep.subr.mxu1 %v1668_v58  ;;  %2202 = vmatpush2.msra.mxu0 %v995_v59  ;;  %v808_v58 = vld [vmem:[#allocation11 + $0x800] sm:$0xff]  ;;  %v1481_v59 = vld [vmem:[#allocation11 + $0x1d08] sm:$0xff] }
 0x13e   : > { %2273 = vmatpush2.msra.mxu1 %v1667_v60  ;;  %2203 = vmatprep.subr.mxu0 %v975_v61  ;;  %v7266_v60 = vsub.s32 %v3641_v43, %v7243_v23 }
 0x13f   : > { %2274 = vmatprep.subr.mxu1 %v1647_v62  ;;  %2204 = vmatpush2.msra.mxu0 %v974_v63  ;;  %v788_v62 = vld [vmem:[#allocation11 + $0x760] sm:$0xff] }
 0x140   : > { %2275 = vmatpush2.msra.mxu1 %v1646_v0  ;;  %2205 = vmatprep.subr.mxu0 %v954_v1  ;;  %v1480_v63 = vld [vmem:[#allocation11 + $0x1d00] sm:$0xff] }
 0x141   : > { %2276 = vmatprep.subr.mxu1 %v1626_v2  ;;  %2206 = vmatpush2.msra.mxu0 %v953_v3  ;;  %v787_v3 = vld [vmem:[#allocation11 + $0x758] sm:$0xff] }
 0x142   : > { %2277 = vmatpush2.msra.mxu1 %v1625_v4  ;;  %2207 = vmatprep.subr.mxu0 %v933_v5  ;;  %v1460_v4 = vld [vmem:[#allocation11 + $0x1c60] sm:$0xff]  ;;  %v767_v5 = vld [vmem:[#allocation11 + $0x6b8] sm:$0xff] }
 0x143   : > { %2278 = vmatprep.subr.mxu1 %v1605_v6  ;;  %2208 = vmatpush2.msra.mxu0 %v932_v7  ;;  %v1459_v6 = vld [vmem:[#allocation11 + $0x1c58] sm:$0xff] }
 0x144   : > { %2279 = vmatpush2.msra.mxu1 %v1604_v9  ;;  %2209 = vmatprep.subr.mxu0 %v912_v12  ;;  %v766_v9 = vld [vmem:[#allocation11 + $0x6b0] sm:$0xff]  ;;  %v1439_v12 = vld [vmem:[#allocation11 + $0x1bb8] sm:$0xff] }
 0x145   : > { %2280 = vmatprep.subr.mxu1 %v1584_v13  ;;  %2210 = vmatpush2.msra.mxu0 %v911_v15  ;;  %v746_v13 = vld [vmem:[#allocation11 + $0x610] sm:$0xff] }
 0x146   : > { %2281 = vmatpush2.msra.mxu1 %v1583_v16  ;;  %2211 = vmatprep.subr.mxu0 %v891_v17  ;;  %v745_v17 = vld [vmem:[#allocation11 + $0x608] sm:$0xff] }
 0x147   : > { %2282 = vmatprep.subr.mxu1 %v1563_v18  ;;  %2212 = vmatpush2.msra.mxu0 %v890_v19  ;;  %v1438_v18 = vld [vmem:[#allocation11 + $0x1bb0] sm:$0xff]  ;;  %v725_v19 = vld [vmem:[#allocation11 + $0x568] sm:$0xff] }
 0x148   : > { %2213 = vmatprep.mubr.f32.mxu0 %v7224_v8  ;;  %2283 = vmatpush2.msra.mxu1 %v1562_v20 }
 0x149   : > { %2284 = vmatprep.mubr.f32.mxu1 %v7228_v11  ;;  %2214 = vmatmul.mubr.f32.vlgmr.msra.gmra.mxu0 %v7226_v10  ;;  %v1896_v10 = vld [vmem:[#allocation13] sm:$0xff] }
 0x14a   : > { %2285 = vmatmul.mubr.f32.vlgmr.msra.gmra.mxu1 %v7231_v14  ;;  %2355 = vmatprep.mubr.f32.mxu0 %v7224_v8  ;;  %v1905_v14 = vrot.slane %v1896_v10, %v7246_v24  ;;  %v1909_v8 = vrot.slane %v1896_v10, %v7249_v25  ;;  %v1917_v39 = vrot.slane %v1896_v10, %v7257_v29 }
 0x14b   : > { %2426 = vmatprep.mubr.f32.mxu1 %v7228_v11  ;;  %6305 = vset.pattern.permute.xlu0 %v6939_v21  ;;  %v7254_v11 = vsub.s32 2, %v7243_v23 }
 0x14c   : > { %6306 = vset.pattern.permute.xlu1 %v6939_v21  ;;  %2291 = vmatprep.subr.mxu0 %v872_v36  ;;  %v703_v36 = vld [vmem:[#allocation11 + $0x4b8] sm:$0xff] }
 0x14d   : > { %v1913_v34 = vrot.slane %v1896_v10, %v7254_v11  ;;  %2292 = vmatpush1.msra.mxu0 %v871_v37  ;;  %2362 = vmatprep.subr.mxu1 %v1544_v40  ;;  %v3578_v40 = vld [vmem:[#allocation8 + $0x58] sm:$0xff] }
 0x14e   : > { %2293 = vmatprep.subr.mxu0 %v851_v38  ;;  %2363 = vmatpush1.msra.mxu1 %v1543_v42 }
 0x14f   : > { %2294 = vmatpush1.msra.mxu0 %v850_v41  ;;  %2364 = vmatprep.subr.mxu1 %v1523_v47  ;;  %v1396_v41 = vld [vmem:[#allocation11 + $0x1a60] sm:$0xff] }
 0x150   : > { %2295 = vmatprep.subr.mxu0 %v830_v46  ;;  %2365 = vmatpush1.msra.mxu1 %v1522_v52  ;;  %v683_v46 = vld [vmem:[#allocation11 + $0x418] sm:$0xff]  ;;  %v682_v52 = vld [vmem:[#allocation11 + $0x410] sm:$0xff] }
 0x151   : > { %2296 = vmatpush1.msra.mxu0 %v829_v51  ;;  %2366 = vmatprep.subr.mxu1 %v1502_v53  ;;  %v1376_v51 = vld [vmem:[#allocation11 + $0x19c0] sm:$0xff] }
 0x152   : > { %2297 = vmatprep.subr.mxu0 %v809_v55  ;;  %2367 = vmatpush1.msra.mxu1 %v1501_v56  ;;  %v3991_v56 = vld [vmem:[#allocation16] sm:$0xf] }
 0x153   : > { %2298 = vmatpush1.msra.mxu0 %v808_v58  ;;  %2368 = vmatprep.subr.mxu1 %v1481_v59  ;;  %v1375_v59 = vld [vmem:[#allocation11 + $0x19b8] sm:$0xff] }
 0x154   : > { %2299 = vmatprep.subr.mxu0 %v788_v62  ;;  %2369 = vmatpush1.msra.mxu1 %v1480_v63 }
 0x155   : > { %2300 = vmatpush1.msra.mxu0 %v787_v3  ;;  %2370 = vmatprep.subr.mxu1 %v1460_v4  ;;  %v661_v3 = vld [vmem:[#allocation11 + $0x368] sm:$0xff] }
 0x156   : > { %2301 = vmatprep.subr.mxu0 %v767_v5  ;;  %2371 = vmatpush1.msra.mxu1 %v1459_v6  ;;  %v3580_v5 = vld [vmem:[#allocation8 + $0x68] sm:$0xff]  ;;  %v1354_v6 = vld [vmem:[#allocation11 + $0x1910] sm:$0xff] }
 0x157   : > { %2302 = vmatpush1.msra.mxu0 %v766_v9  ;;  %2372 = vmatprep.subr.mxu1 %v1439_v12 }
 0x158   : > { %2303 = vmatprep.subr.mxu0 %v746_v13  ;;  %2373 = vmatpush1.msra.mxu1 %v1438_v18  ;;  %v3581_v13 = vld [vmem:[#allocation8 + $0x70] sm:$0xff] }
 0x159   : > { %2304 = vmatpush1.msra.mxu0 %v745_v17 }
 0x15a   : > { %2305 = vmatprep.subr.mxu0 %v725_v19  ;;  %v3582_v19 = vld [vmem:[#allocation8 + $0x78] sm:$0xff] }
 0x1c7   : > { %v2073_v26 = vpop.f32.mrf.mxu0 }
 0x1c8   : > { %v2074_v32 = vadd.f32 %v2073_v26, %v1905_v14  ;;  %v1418_v26 = vld [vmem:[#allocation11 + $0x1b10] sm:$0xff]  ;;  %v724_v14 = vld [vmem:[#allocation11 + $0x560] sm:$0xff] }
 0x1c9   : > { %v2144_v27 = vpop.f32.mrf.mxu1  ;;  %v2075_v28 = vpop.f32.mrf.mxu0  ;;  %2374 = vmatprep.subr.mxu1 %v1418_v26  ;;  %2306 = vmatpush1.msra.mxu0 %v724_v14  ;;  %v3571_v14 = vld [vmem:[#allocation8 + $0x20] sm:$0xff] }
 0x1ca   : > { %v2076_v33 = vadd.f32 %v2075_v28, %v1909_v8  ;;  %v7261_v48 = vadd.f32 %v2144_v27, %v2074_v32  ;;  %v1417_v8 = vld [vmem:[#allocation11 + $0x1b08] sm:$0xff]  ;;  %2307 = vmatprep.subr.mxu0 %v704_v31  ;;  %v7337_v31 = vrot.slane %v3991_v56, %v7249_v25 }
 0x1cb   : > { %v2146_v35 = vpop.f32.mrf.mxu1  ;;  %v1397_v32 = vld [vmem:[#allocation11 + $0x1a68] sm:$0xff]  ;;  %2375 = vmatpush1.msra.mxu1 %v1417_v8  ;;  %2308 = vmatpush1.msra.mxu0 %v703_v36  ;;  %v599_v36 = vld [vmem:[#allocation11 + $0x178] sm:$0xff] }
 0x1cc   : > { %v7263_v49 = vadd.f32 %v2146_v35, %v2076_v33  ;;  %v3576_v35 = vld [vmem:[#allocation8 + $0x48] sm:$0xff]  ;;  %2376 = vmatprep.subr.mxu1 %v1397_v32  ;;  %2309 = vmatprep.subr.mxu0 %v683_v46  ;;  %v7340_v32 = vrot.slane %v3991_v56, %v7254_v11 }
 0x1cd   : > { %2377 = vmatpush1.msra.mxu1 %v1396_v41  ;;  %2310 = vmatpush1.msra.mxu0 %v682_v52  ;;  %v1313_v8 = vld [vmem:[#allocation11 + $0x17c8] sm:$0xff]  ;;  %v578_v52 = vld [vmem:[#allocation11 + $0xd0] sm:$0xff] }
 0x1ce   : > { %v3635_v0 = vcombine.low %v7261_v48, %v7263_v49  ;;  %v3636_v27 = vcombine.high %v7261_v48, %v7263_v49  ;;  %2378 = vmatprep.subr.mxu1 %v1376_v51  ;;  %v3603_v51 = vld [vmem:[#allocation8 + $0x120] sm:$0xff] }
 0x1cf   : > { %2379 = vmatpush1.msra.mxu1 %v1375_v59 }
 0x1d0   : > { %v3645_v15 = vrot.slane %v3635_v0, %v7266_v60  ;;  %v7292_v42 = vrot.slane %v3636_v27, %v7266_v60  ;;  %v619_v27 = vld [vmem:[#allocation11 + $0x218] sm:$0xff] }
 0x209   : > { %v2215_v44 = vpop.f32.mrf.mxu0 }
 0x20a   : > { %v2286_v45 = vpop.f32.mrf.mxu1  ;;  %v2216_v50 = vadd.f32 %v2215_v44, %v1913_v34  ;;  %v3575_v34 = vld [vmem:[#allocation8 + $0x40] sm:$0xff] }
 0x20b   : > { %v2217_v54 = vpop.f32.mrf.mxu0  ;;  %v3567_v44 = vld [vmem:[#allocation8] sm:$0xff] }
 0x20c   : > { %v2218_v57 = vadd.f32 %v2217_v54, %v1917_v39  ;;  %v2288_v61 = vpop.f32.mrf.mxu1  ;;  %v2287_v1 = vadd.f32 %v2286_v45, %v2216_v50  ;;  %v3577_v39 = vld [vmem:[#allocation8 + $0x50] sm:$0xff]  ;;  %v3568_v45 = vld [vmem:[#allocation8 + $0x8] sm:$0xff] }
 0x20d   : > { %v3569_v50 = vld [vmem:[#allocation8 + $0x10] sm:$0xff] }
 0x20e   : > { %v2289_v2 = vadd.f32 %v2288_v61, %v2218_v57  ;;  %v3570_v57 = vld [vmem:[#allocation8 + $0x18] sm:$0xff]  ;;  %v662_v61 = vld [vmem:[#allocation11 + $0x370] sm:$0xff] }
 0x20f   : > { %2311 = vmatprep.subr.mxu0 %v662_v61 }
 0x210   : > { %v3637_v7 = vcombine.low %v2287_v1, %v2289_v2  ;;  %v3638_v20 = vcombine.high %v2287_v1, %v2289_v2  ;;  %v3579_v1 = vld [vmem:[#allocation8 + $0x60] sm:$0xff]  ;;  %v1355_v2 = vld [vmem:[#allocation11 + $0x1918] sm:$0xff]  ;;  %2312 = vmatpush1.msra.mxu0 %v661_v3 }
 0x211   : > { %2380 = vmatprep.subr.mxu1 %v1355_v2  ;;  %v557_v2 = vld [vmem:[#allocation11 + $0x28] sm:$0xff] }
 0x212   : > { %v3659_v16 = vrot.slane %v3637_v7, %v7266_v60  ;;  %v7281_v33 = vrot.slane %v3638_v20, %v7266_v60  ;;  %v641_v7 = vld [vmem:[#allocation11 + $0x2c8] sm:$0xff]  ;;  %2381 = vmatpush1.msra.mxu1 %v1354_v6  ;;  %v3601_v6 = vld [vmem:[#allocation8 + $0x110] sm:$0xff] }
 0x213   : > { %v1333_v20 = vld [vmem:[#allocation11 + $0x1868] sm:$0xff]  ;;  %2313 = vmatprep.subr.mxu0 %v641_v7  ;;  %v3602_v7 = vld [vmem:[#allocation8 + $0x118] sm:$0xff] }
 0x214   : > { %v3667_v21 = vcombine.low %v3645_v15, %v3659_v16  ;;  %v3668_v10 = vcombine.high %v3645_v15, %v3659_v16  ;;  %v3669_v53 = vcombine.low %v7292_v42, %v7281_v33  ;;  %v3670_v9 = vcombine.high %v7292_v42, %v7281_v33  ;;  %v1334_v15 = vld [vmem:[#allocation11 + $0x1870] sm:$0xff]  ;;  %v640_v16 = vld [vmem:[#allocation11 + $0x2c0] sm:$0xff] }
 0x215   : > { %2382 = vmatprep.subr.mxu1 %v1334_v15  ;;  %2314 = vmatpush1.msra.mxu0 %v640_v16  ;;  %v3573_v42 = vld [vmem:[#allocation8 + $0x30] sm:$0xff]  ;;  %v3611_v15 = vld [vmem:[#allocation8 + $0x160] sm:$0xff]  ;;  %v3612_v16 = vld [vmem:[#allocation8 + $0x168] sm:$0xff] }
 0x216   : > { %v7275_v28 = vrot.slane %v3667_v21, %v7266_v60  ;;  %v7278_v30 = vrot.slane %v3668_v10, %v7266_v60  ;;  %v7329_v17 = vrot.slane %v3669_v53, %v7266_v60  ;;  %v620_v21 = vld [vmem:[#allocation11 + $0x220] sm:$0xff]  ;;  %v7333_v10 = vrot.slane %v3991_v56, %v7246_v24  ;;  %2383 = vmatpush1.msra.mxu1 %v1333_v20 }
 0x217   : > { %2315 = vmatprep.subr.mxu0 %v620_v21  ;;  %2384 = vmatprep.subr.mxu1 %v1313_v8  ;;  %v1229_v8 = vld [vmem:[#allocation11 + $0x1528] sm:$0xff] }
 0x218   : > { %v7285_v37 = vrot.slane %v7278_v30, %v7246_v24  ;;  %v7289_v38 = vrot.slane %v7278_v30, %v7249_v25  ;;  %v7296_v43 = vrot.slane %v7275_v28, %v7246_v24  ;;  %v7300_v47 = vrot.slane %v7275_v28, %v7249_v25  ;;  %2316 = vmatpush1.msra.mxu0 %v619_v27 }
 0x219   : > { %v7304_v48 = vrot.slane %v7278_v30, %v7254_v11  ;;  %v7308_v49 = vrot.slane %v7278_v30, %v7257_v29  ;;  %v7316_v58 = vrot.slane %v7275_v28, %v7254_v11  ;;  %v7322_v0 = vrot.slane %v7275_v28, %v7257_v29  ;;  %2317 = vmatprep.subr.mxu0 %v599_v36  ;;  %v1228_v36 = vld [vmem:[#allocation11 + $0x1520] sm:$0xff] }
 0x21a   : > { %v3871_v54 = vadd.f32 %v7285_v37, %v3575_v34  ;;  %v3872_v55 = vadd.f32 %v7289_v38, %v3576_v35  ;;  %v3863_v4 = vadd.f32 %v7296_v43, %v3567_v44  ;;  %v3864_v12 = vadd.f32 %v7300_v47, %v3568_v45  ;;  %v3572_v34 = vld [vmem:[#allocation8 + $0x28] sm:$0xff]  ;;  %v1312_v35 = vld [vmem:[#allocation11 + $0x17c0] sm:$0xff]  ;;  %v598_v45 = vld [vmem:[#allocation11 + $0x170] sm:$0xff] }
 0x21b   : > { %v3873_v62 = vadd.f32 %v7304_v48, %v3577_v39  ;;  %v3874_v63 = vadd.f32 %v7308_v49, %v3578_v40  ;;  %v3865_v18 = vadd.f32 %v7316_v58, %v3569_v50  ;;  %v3866_v26 = vadd.f32 %v7322_v0, %v3570_v57  ;;  %v1292_v44 = vld [vmem:[#allocation11 + $0x1720] sm:$0xff]  ;;  %v3574_v50 = vld [vmem:[#allocation8 + $0x38] sm:$0xff]  ;;  %2385 = vmatpush1.msra.mxu1 %v1312_v35  ;;  %v577_v57 = vld [vmem:[#allocation11 + $0xc8] sm:$0xff] }
 0x21c   : > { %6307 = vtanh.f32 %v3871_v54  ;;  %v3875_v33 = vadd.f32 %v7285_v37, %v3579_v1  ;;  %v7344_v39 = vrot.slane %v3670_v9, %v7266_v60  ;;  %v7347_v40 = vrot.slane %v3991_v56, %v7257_v29  ;;  %v3605_v56 = vld [vmem:[#allocation8 + $0x130] sm:$0xff]  ;;  %v3600_v1 = vld [vmem:[#allocation8 + $0x108] sm:$0xff]  ;;  %2386 = vmatprep.subr.mxu1 %v1292_v44  ;;  %2318 = vmatpush1.msra.mxu0 %v598_v45  ;;  %v556_v9 = vld [vmem:[#allocation11 + $0x20] sm:$0xff] }
 0x21d   : > { %6309 = vtanh.f32 %v3872_v55  ;;  %v3876_v41 = vadd.f32 %v7289_v38, %v3580_v5  ;;  %v7352_v37 = vcombine.high %v7275_v28, %v7275_v28  ;;  %v7356_v46 = vcombine.high %v7329_v17, %v7329_v17  ;;  %v1291_v38 = vld [vmem:[#allocation11 + $0x1718] sm:$0xff]  ;;  %v3604_v55 = vld [vmem:[#allocation8 + $0x128] sm:$0xff]  ;;  %2319 = vmatprep.subr.mxu0 %v578_v52  ;;  %v3607_v35 = vld [vmem:[#allocation8 + $0x140] sm:$0xff] }
 0x21e   : > { %6311 = vtanh.f32 %v3873_v62  ;;  %v3877_v60 = vadd.f32 %v7304_v48, %v3581_v13  ;;  %v7361_v53 = vcombine.high %v7278_v30, %v7278_v30  ;;  %v3770_v28 = vrot.slane %v7329_v17, %v7246_v24  ;;  %v1271_v48 = vld [vmem:[#allocation11 + $0x1678] sm:$0xff]  ;;  %2387 = vmatpush1.msra.mxu1 %v1291_v38  ;;  %2320 = vmatpush1.msra.mxu0 %v577_v57 }
 0x21f   : > { %6313 = vtanh.f32 %v3874_v63  ;;  %v3878_v54 = vadd.f32 %v7308_v49, %v3582_v19  ;;  %v3774_v59 = vrot.slane %v7329_v17, %v7249_v25  ;;  %v3778_v61 = vrot.slane %v7329_v17, %v7254_v11  ;;  %v3606_v62 = vld [vmem:[#allocation8 + $0x138] sm:$0xff]  ;;  %v3599_v63 = vld [vmem:[#allocation8 + $0x100] sm:$0xff]  ;;  %v1270_v49 = vld [vmem:[#allocation11 + $0x1670] sm:$0xff]  ;;  %2388 = vmatprep.subr.mxu1 %v1271_v48  ;;  %2321 = vmatprep.subr.mxu0 %v557_v2 }
 0x220   : > { %6315 = vtanh.f32 %v3863_v4  ;;  %v3867_v30 = vadd.f32 %v7296_v43, %v3571_v14  ;;  %v7373_v3 = vcombine.high %v7344_v39, %v7344_v39  ;;  %v3868_v4 = vadd.f32 %v7300_v47, %v3572_v34  ;;  %v1250_v43 = vld [vmem:[#allocation11 + $0x15d0] sm:$0xff]  ;;  %v3614_v14 = vld [vmem:[#allocation8 + $0x178] sm:$0xff]  ;;  %2389 = vmatpush1.msra.mxu1 %v1270_v49  ;;  %2322 = vmatpush1.msra.mxu0 %v556_v9 }
 0x221   : > { %6317 = vtanh.f32 %v3864_v12  ;;  %v3782_v5 = vrot.slane %v7329_v17, %v7257_v29  ;;  %v7380_v12 = vrot.slane %v7344_v39, %v7246_v24  ;;  %v7384_v13 = vrot.slane %v7344_v39, %v7249_v25  ;;  %v1249_v17 = vld [vmem:[#allocation11 + $0x15c8] sm:$0xff]  ;;  %2390 = vmatprep.subr.mxu1 %v1250_v43 }
 0x222   : > { %6319 = vtanh.f32 %v3865_v18  ;;  %v3869_v47 = vadd.f32 %v7316_v58, %v3573_v42  ;;  %v1208_v18 = vld [vmem:[#allocation11 + $0x1480] sm:$0xff]  ;;  %v7389_v19 = vrot.slane %v7344_v39, %v7254_v11  ;;  %v3870_v20 = vadd.f32 %v7322_v0, %v3574_v50  ;;  %v1207_v58 = vld [vmem:[#allocation11 + $0x1478] sm:$0xff]  ;;  %2391 = vmatpush1.msra.mxu1 %v1249_v17 }
 0x223   : > { %6321 = vtanh.f32 %v3866_v26  ;;  %v3899_v21 = vadd.f32 %v3770_v28, %v3603_v51  ;;  %v3613_v26 = vld [vmem:[#allocation8 + $0x170] sm:$0xff]  ;;  %v3900_v27 = vadd.f32 %v3774_v59, %v3604_v55  ;;  %v3798_v34 = vrot.slane %v7344_v39, %v7257_v29  ;;  %2323 = vmatprep.subr.mxu0 %v1208_v18  ;;  %v1880_v50 = vld [vmem:[#allocation11 + $0x2980] sm:$0xff]  ;;  %2392 = vmatprep.subr.mxu1 %v1229_v8 }
 0x224   : > { %6323 = vtanh.f32 %v3875_v33  ;;  %v3901_v33 = vadd.f32 %v3778_v61, %v3605_v56  ;;  %v3902_v0 = vadd.f32 %v3782_v5, %v3606_v62  ;;  %v7394_v44 = vadd.f32 %v3770_v28, %v3599_v63  ;;  %v1186_v51 = vld [vmem:[#allocation11 + $0x13d0] sm:$0xff]  ;;  %2324 = vmatpush2.msra.mxu0 %v1207_v58  ;;  %v1879_v28 = vld [vmem:[#allocation11 + $0x2978] sm:$0xff]  ;;  %2393 = vmatpush1.msra.mxu1 %v1228_v36  ;;  %v1165_v63 = vld [vmem:[#allocation11 + $0x1328] sm:$0xff] }
 0x225   : > { %6325 = vtanh.f32 %v3876_v41  ;;  %v1187_v41 = vld [vmem:[#allocation11 + $0x13d8] sm:$0xff]  ;;  %v7396_v45 = vadd.f32 %v3774_v59, %v3600_v1  ;;  %v7399_v52 = vadd.f32 %v3778_v61, %v3601_v6  ;;  %v3609_v55 = vld [vmem:[#allocation8 + $0x150] sm:$0xff]  ;;  %v7405_v59 = vadd.f32 %v7380_v12, %v3611_v15  ;;  %2394 = vmatprep.subr.mxu1 %v1880_v50  ;;  %v1145_v6 = vld [vmem:[#allocation11 + $0x1288] sm:$0xff] }
 0x226   : > { %6327 = vtanh.f32 %v3877_v60  ;;  %v3608_v60 = vld [vmem:[#allocation8 + $0x148] sm:$0xff]  ;;  %v1166_v56 = vld [vmem:[#allocation11 + $0x1330] sm:$0xff]  ;;  %v3610_v62 = vld [vmem:[#allocation8 + $0x158] sm:$0xff]  ;;  %2325 = vmatprep.subr.mxu0 %v1187_v41  ;;  %v7411_v49 = vadd.f32 %v7389_v19, %v3613_v26  ;;  %v7413_v2 = vadd.f32 %v3798_v34, %v3614_v14  ;;  %2395 = vmatpush2.msra.mxu1 %v1879_v28  ;;  %v7424_v18 = vadd.f32 %v7389_v19, %v3609_v55 }
 0x227   : > { %6329 = vtanh.f32 %v3878_v54  ;;  %v7401_v54 = vadd.f32 %v3782_v5, %v3602_v7  ;;  %v1859_v61 = vld [vmem:[#allocation11 + $0x28d8] sm:$0xff]  ;;  %2326 = vmatpush2.msra.mxu0 %v1186_v51  ;;  %v1858_v5 = vld [vmem:[#allocation11 + $0x28d0] sm:$0xff]  ;;  %v1124_v26 = vld [vmem:[#allocation11 + $0x11e0] sm:$0xff]  ;;  %v3738_v36 = vrot.slane %v7352_v37, %v7246_v24  ;;  %v7435_v41 = vrot.slane %v7352_v37, %v7249_v25 }
 0x228   : > { %6331 = vtanh.f32 %v3867_v30  ;;  %v7408_v30 = vadd.f32 %v7384_v13, %v3612_v16  ;;  %2327 = vmatprep.subr.mxu0 %v1166_v56  ;;  %v1838_v15 = vld [vmem:[#allocation11 + $0x2830] sm:$0xff]  ;;  %v1144_v16 = vld [vmem:[#allocation11 + $0x1280] sm:$0xff]  ;;  %2396 = vmatprep.subr.mxu1 %v1859_v61  ;;  %v1795_v61 = vld [vmem:[#allocation11 + $0x26d8] sm:$0xff] }
 0x229   : > { %v6308_v42 = vpop.eup %6307  ;;  %6333 = vtanh.f32 %v3868_v4  ;;  %v7416_v4 = vadd.f32 %v7380_v12, %v3607_v35  ;;  %2328 = vmatpush2.msra.mxu0 %v1165_v63  ;;  %2397 = vmatpush2.msra.mxu1 %v1858_v5  ;;  %v3587_v19 = vld [vmem:[#allocation8 + $0xa0] sm:$0xff] }
 0x22a   : > { %v6310_v38 = vpop.eup %6309  ;;  %v4021_v39 = vmul.f32 %v6308_v42, %v7333_v10  ;;  %6335 = vtanh.f32 %v3869_v47  ;;  %v7420_v47 = vadd.f32 %v7384_v13, %v3608_v60  ;;  %2329 = vmatprep.subr.mxu0 %v1145_v6  ;;  %v7439_v42 = vrot.slane %v7352_v37, %v7254_v11  ;;  %2398 = vmatprep.subr.mxu1 %v1838_v15  ;;  %v1796_v55 = vld [vmem:[#allocation11 + $0x26e0] sm:$0xff]  ;;  %v3590_v6 = vld [vmem:[#allocation8 + $0xb8] sm:$0xff] }
 0x22b   : > { %v6312_v48 = vpop.eup %6311  ;;  %v4022_v57 = vmul.f32 %v6310_v38, %v7337_v31  ;;  %6337 = vtanh.f32 %v3870_v20  ;;  %v7426_v20 = vadd.f32 %v3798_v34, %v3610_v62  ;;  %v3588_v34 = vld [vmem:[#allocation8 + $0xa8] sm:$0xff]  ;;  %2330 = vmatpush2.msra.mxu0 %v1144_v16  ;;  %v3583_v38 = vld [vmem:[#allocation8 + $0x80] sm:$0xff]  ;;  %v7451_v62 = vrot.slane %v7361_v53, %v7246_v24 }
 0x22c   : > { %v6314_v1 = vpop.eup %6313  ;;  %6339 = vtanh.f32 %v3899_v21  ;;  %v4023_v43 = vmul.f32 %v6312_v48, %v7340_v32  ;;  %v1837_v21 = vld [vmem:[#allocation11 + $0x2828] sm:$0xff]  ;;  %2331 = vmatprep.subr.mxu0 %v1124_v26  ;;  %v3589_v48 = vld [vmem:[#allocation8 + $0xb0] sm:$0xff]  ;;  %v7460_v15 = vadd.f32 %v7435_v41, %v3588_v34 }
 0x22d   : > { %v6316_v7 = vpop.eup %6315  ;;  %v4087_v9 = vadd.f32 %v4022_v57, %v4021_v39  ;;  %6341 = vtanh.f32 %v3900_v27  ;;  %v4024_v13 = vmul.f32 %v6314_v1, %v7347_v40  ;;  %v1817_v27 = vld [vmem:[#allocation11 + $0x2788] sm:$0xff]  ;;  %2399 = vmatpush2.msra.mxu1 %v1837_v21  ;;  %v1103_v39 = vld [vmem:[#allocation11 + $0x1138] sm:$0xff]  ;;  %v7447_v57 = vrot.slane %v7352_v37, %v7257_v29  ;;  %v1082_v37 = vld [vmem:[#allocation11 + $0x1090] sm:$0xff] }
 0x22e   : > { %v6318_v17 = vpop.eup %6317  ;;  %v4013_v12 = vmul.f32 %v6316_v7, %v7333_v10  ;;  %6343 = vtanh.f32 %v3901_v33  ;;  %v1123_v33 = vld [vmem:[#allocation11 + $0x11d8] sm:$0xff]  ;;  %2400 = vmatprep.subr.mxu1 %v1817_v27  ;;  %v3584_v16 = vld [vmem:[#allocation8 + $0x88] sm:$0xff] }
 0x22f   : > { %v6320_v14 = vpop.eup %6319  ;;  %v4088_v8 = vadd.f32 %v4087_v9, %v4023_v43  ;;  %v4014_v58 = vmul.f32 %v6318_v17, %v7337_v31  ;;  %6345 = vtanh.f32 %v3902_v0  ;;  %v1816_v0 = vld [vmem:[#allocation11 + $0x2780] sm:$0xff]  ;;  %2332 = vmatpush2.msra.mxu0 %v1123_v33  ;;  %v1775_v7 = vld [vmem:[#allocation11 + $0x2638] sm:$0xff]  ;;  %v7457_v9 = vadd.f32 %v3738_v36, %v3587_v19  ;;  %v1754_v19 = vld [vmem:[#allocation11 + $0x2590] sm:$0xff] }
 0x230   : > { %v6322_v35 = vpop.eup %6321  ;;  %6347 = vtanh.f32 %v7394_v44  ;;  %v4015_v44 = vmul.f32 %v6320_v14, %v7340_v32  ;;  %2401 = vmatpush2.msra.mxu1 %v1816_v0  ;;  %v7462_v17 = vadd.f32 %v3738_v36, %v3583_v38  ;;  %2333 = vmatprep.subr.mxu0 %v1103_v39  ;;  %v7469_v33 = vadd.f32 %v7439_v42, %v3589_v48 }
 0x231   : > { %v6324_v60 = vpop.eup %6323  ;;  %v4089_v50 = vadd.f32 %v4088_v8, %v4024_v13  ;;  %v4077_v51 = vadd.f32 %v4014_v58, %v4013_v12  ;;  %6349 = vtanh.f32 %v7396_v45  ;;  %v1102_v45 = vld [vmem:[#allocation11 + $0x1130] sm:$0xff]  ;;  %v4016_v1 = vmul.f32 %v6322_v35, %v7347_v40  ;;  %2402 = vmatprep.subr.mxu1 %v1796_v55  ;;  %v1081_v12 = vld [vmem:[#allocation11 + $0x1088] sm:$0xff]  ;;  %v3595_v55 = vld [vmem:[#allocation8 + $0xe0] sm:$0xff] }
 0x232   : > { %v6326_v28 = vpop.eup %6325  ;;  %v4025_v56 = vmul.f32 %v6324_v60, %v7333_v10  ;;  %6351 = vtanh.f32 %v7399_v52  ;;  %v3585_v13 = vld [vmem:[#allocation8 + $0x90] sm:$0xff]  ;;  %2334 = vmatpush2.msra.mxu0 %v1102_v45  ;;  %2403 = vmatpush2.msra.mxu1 %v1795_v61  ;;  %v1061_v8 = vld [vmem:[#allocation11 + $0xfe8] sm:$0xff]  ;;  %v7472_v35 = vadd.f32 %v7447_v57, %v3590_v6  ;;  %v7479_v38 = vadd.f32 %v7435_v41, %v3584_v16  ;;  %v1732_v61 = vld [vmem:[#allocation11 + $0x24e0] sm:$0xff] }
 0x233   : > { %v6328_v63 = vpop.eup %6327  ;;  %4090 = vadd.xlane.f32.xlu1 %v4089_v50  ;;  %v4078_v5 = vadd.f32 %v4077_v51, %v4015_v44  ;;  %v4026_v52 = vmul.f32 %v6326_v28, %v7337_v31  ;;  %6353 = vtanh.f32 %v7401_v54  ;;  %2335 = vmatprep.subr.mxu0 %v1082_v37  ;;  %v1040_v50 = vld [vmem:[#allocation11 + $0xf40] sm:$0xff]  ;;  %v3586_v51 = vld [vmem:[#allocation8 + $0x98] sm:$0xff]  ;;  %v7482_v39 = vadd.f32 %v7439_v42, %v3585_v13  ;;  %v3596_v41 = vld [vmem:[#allocation8 + $0xe8] sm:$0xff] }
 0x234   : > { %v6330_v43 = vpop.eup %6329  ;;  %6355 = vtanh.f32 %v7405_v59  ;;  %v4027_v26 = vmul.f32 %v6328_v63, %v7340_v32  ;;  %v1774_v59 = vld [vmem:[#allocation11 + $0x2630] sm:$0xff]  ;;  %2404 = vmatprep.subr.mxu1 %v1775_v7  ;;  %2336 = vmatpush2.msra.mxu0 %v1081_v12  ;;  %v7486_v28 = vrot.slane %v7361_v53, %v7249_v25  ;;  %v1039_v42 = vld [vmem:[#allocation11 + $0xf38] sm:$0xff]  ;;  %v7496_v6 = vrot.slane %v7361_v53, %v7257_v29  ;;  %v1712_v37 = vld [vmem:[#allocation11 + $0x2440] sm:$0xff] }
 0x235   : > { %v6332_v21 = vpop.eup %6331  ;;  %v4079_v54 = vadd.f32 %v4078_v5, %v4016_v1  ;;  %v4092_v14 = vadd.f32 %v4026_v52, %v4025_v56  ;;  %6357 = vtanh.f32 %v7408_v30  ;;  %v1060_v30 = vld [vmem:[#allocation11 + $0xfe0] sm:$0xff]  ;;  %v4028_v36 = vmul.f32 %v6330_v43, %v7347_v40  ;;  %2405 = vmatpush2.msra.mxu1 %v1774_v59  ;;  %2337 = vmatprep.subr.mxu0 %v1061_v8  ;;  %v3597_v5 = vld [vmem:[#allocation8 + $0xf0] sm:$0xff] }
 0x236   : > { %v6334_v58 = vpop.eup %6333  ;;  %v4017_v27 = vmul.f32 %v6332_v21, %v7333_v10  ;;  %6359 = vtanh.f32 %v7411_v49  ;;  %v1753_v49 = vld [vmem:[#allocation11 + $0x2588] sm:$0xff]  ;;  %2406 = vmatprep.subr.mxu1 %v1754_v19  ;;  %2338 = vmatpush2.msra.mxu0 %v1060_v30  ;;  %v3762_v52 = vrot.slane %v7361_v53, %v7254_v11  ;;  %v1018_v21 = vld [vmem:[#allocation11 + $0xe90] sm:$0xff]  ;;  %v7503_v53 = vadd.f32 %v7447_v57, %v3586_v51  ;;  %v3591_v59 = vld [vmem:[#allocation8 + $0xc0] sm:$0xff] }
 0x237   : > { %v6336_v34 = vpop.eup %6335  ;;  %4080 = vadd.xlane.f32.xlu0 %v4079_v54  ;;  %v4093_v0 = vadd.f32 %v4092_v14, %v4027_v26  ;;  %v4018_v60 = vmul.f32 %v6334_v58, %v7337_v31  ;;  %6361 = vtanh.f32 %v7413_v2  ;;  %v1733_v2 = vld [vmem:[#allocation11 + $0x24e8] sm:$0xff]  ;;  %2407 = vmatpush2.msra.mxu1 %v1753_v49  ;;  %v1711_v54 = vld [vmem:[#allocation11 + $0x2438] sm:$0xff]  ;;  %v7506_v14 = vadd.f32 %v7451_v62, %v3595_v55  ;;  %v3593_v57 = vld [vmem:[#allocation8 + $0xd0] sm:$0xff] }
 0x238   : > { %v6338_v44 = vpop.eup %6337  ;;  %6363 = vtanh.f32 %v7416_v4  ;;  %v4019_v45 = vmul.f32 %v6336_v34, %v7340_v32  ;;  %2339 = vmatprep.subr.mxu0 %v1040_v50  ;;  %2408 = vmatprep.subr.mxu1 %v1733_v2  ;;  %v7509_v13 = vadd.f32 %v7486_v28, %v3596_v41  ;;  %v1691_v30 = vld [vmem:[#allocation11 + $0x2398] sm:$0xff] }
 0x239   : > { %v6340_v56 = vpop.eup %6339  ;;  %v4094_v48 = vadd.f32 %v4093_v0, %v4028_v36  ;;  %v4082_v4 = vadd.f32 %v4018_v60, %v4017_v27  ;;  %6365 = vtanh.f32 %v7420_v47  ;;  %v1019_v47 = vld [vmem:[#allocation11 + $0xe98] sm:$0xff]  ;;  %v4020_v43 = vmul.f32 %v6338_v44, %v7347_v40  ;;  %2340 = vmatpush2.msra.mxu0 %v1039_v42  ;;  %2409 = vmatpush2.msra.mxu1 %v1732_v61 }
 0x23a   : > { %v6342_v63 = vpop.eup %6341  ;;  %v4049_v1 = vmul.f32 %v6340_v56, %v7333_v10  ;;  %6367 = vtanh.f32 %v7424_v18  ;;  %v3598_v18 = vld [vmem:[#allocation8 + $0xf8] sm:$0xff]  ;;  %2341 = vmatprep.subr.mxu0 %v1019_v47  ;;  %2410 = vmatprep.subr.mxu1 %v1712_v37  ;;  %v7515_v0 = vadd.f32 %v3762_v52, %v3597_v5  ;;  %v7530_v56 = vadd.f32 %v3762_v52, %v3593_v57  ;;  %v1649_v47 = vld [vmem:[#allocation11 + $0x2248] sm:$0xff] }
 0x23b   : > { %v6344_v7 = vpop.eup %6343  ;;  %4095 = vadd.xlane.f32.xlu1 %v4094_v48  ;;  %v4083_v16 = vadd.f32 %v4082_v4, %v4019_v45  ;;  %v4050_v12 = vmul.f32 %v6342_v63, %v7337_v31  ;;  %6369 = vtanh.f32 %v7426_v20  ;;  %v998_v20 = vld [vmem:[#allocation11 + $0xdf0] sm:$0xff]  ;;  %v7518_v60 = vadd.f32 %v7496_v6, %v3598_v18  ;;  %2342 = vmatpush2.msra.mxu0 %v1018_v21  ;;  %v3594_v51 = vld [vmem:[#allocation8 + $0xd8] sm:$0xff]  ;;  %v997_v48 = vld [vmem:[#allocation11 + $0xde8] sm:$0xff] }
 0x23c   : > { %v6346_v26 = vpop.eup %6345  ;;  %6371 = vtanh.f32 %v7457_v9  ;;  %v4051_v27 = vmul.f32 %v6344_v7, %v7340_v32  ;;  %v3592_v9 = vld [vmem:[#allocation8 + $0xc8] sm:$0xff]  ;;  %2411 = vmatpush2.msra.mxu1 %v1711_v54  ;;  %2343 = vmatprep.subr.mxu0 %v998_v20  ;;  %v1690_v45 = vld [vmem:[#allocation11 + $0x2390] sm:$0xff]  ;;  %v3802_v5 = vrot.slane %v7356_v46, %v7246_v24  ;;  %v7540_v52 = vrot.slane %v7356_v46, %v7249_v25 }
 0x23d   : > { %v6348_v8 = vpop.eup %6347  ;;  %v4084_v58 = vadd.f32 %v4083_v16, %v4020_v43  ;;  %v4122_v19 = vadd.f32 %v4050_v12, %v4049_v1  ;;  %6373 = vtanh.f32 %v7460_v15  ;;  %v4052_v15 = vmul.f32 %v6346_v26, %v7347_v40  ;;  %2412 = vmatprep.subr.mxu1 %v1691_v30  ;;  %v977_v4 = vld [vmem:[#allocation11 + $0xd48] sm:$0xff]  ;;  %2344 = vmatpush2.msra.mxu0 %v997_v48  ;;  %v1648_v48 = vld [vmem:[#allocation11 + $0x2240] sm:$0xff] }
 0x23e   : > { %v6350_v34 = vpop.eup %6349  ;;  %v4045_v36 = vmul.f32 %v6348_v8, %v7333_v10  ;;  %6375 = vtanh.f32 %v7469_v33  ;;  %v7525_v33 = vadd.f32 %v7451_v62, %v3591_v59  ;;  %v7528_v2 = vadd.f32 %v7486_v28, %v3592_v9  ;;  %2413 = vmatpush2.msra.mxu1 %v1690_v45  ;;  %v1670_v62 = vld [vmem:[#allocation11 + $0x22f0] sm:$0xff]  ;;  %v1669_v63 = vld [vmem:[#allocation11 + $0x22e8] sm:$0xff]  ;;  %2345 = vmatprep.subr.mxu0 %v977_v4  ;;  %v935_v45 = vld [vmem:[#allocation11 + $0xbf8] sm:$0xff] }
 0x23f   : > { %v6352_v49 = vpop.eup %6351  ;;  %4085 = vadd.xlane.f32.xlu0 %v4084_v58  ;;  %v4123_v50 = vadd.f32 %v4122_v19, %v4051_v27  ;;  %v4046_v44 = vmul.f32 %v6350_v34, %v7337_v31  ;;  %6377 = vtanh.f32 %v7472_v35  ;;  %2414 = vmatprep.subr.mxu1 %v1670_v62  ;;  %v3620_v12 = vld [vmem:[#allocation8 + $0x1a8] sm:$0xff]  ;;  %v3890_v21 = vadd.f32 %v7496_v6, %v3594_v51  ;;  %v3621_v58 = vld [vmem:[#allocation8 + $0x1b0] sm:$0xff]  ;;  %v3622_v27 = vld [vmem:[#allocation8 + $0x1b8] sm:$0xff] }
 0x240   : > { %v6354_v55 = vpop.eup %6353  ;;  %6379 = vtanh.f32 %v7462_v17  ;;  %v4047_v35 = vmul.f32 %v6352_v49, %v7340_v32  ;;  %v976_v17 = vld [vmem:[#allocation11 + $0xd40] sm:$0xff]  ;;  %v3810_v54 = vrot.slane %v7356_v46, %v7254_v11  ;;  %v3814_v26 = vrot.slane %v7356_v46, %v7257_v29  ;;  %2415 = vmatpush2.msra.mxu1 %v1669_v63  ;;  %v3617_v49 = vld [vmem:[#allocation8 + $0x190] sm:$0xff]  ;;  %v1627_v62 = vld [vmem:[#allocation11 + $0x2198] sm:$0xff] }
 0x241   : > { %v6356_v41 = vpop.eup %6355  ;;  %v4124_v42 = vadd.f32 %v4123_v50, %v4052_v15  ;;  %v4117_v61 = vadd.f32 %v4046_v44, %v4045_v36  ;;  %6381 = vtanh.f32 %v7479_v38  ;;  %v956_v38 = vld [vmem:[#allocation11 + $0xca0] sm:$0xff]  ;;  %v4048_v7 = vmul.f32 %v6354_v55, %v7347_v40  ;;  %2346 = vmatpush2.msra.mxu0 %v976_v17  ;;  %2416 = vmatprep.subr.mxu1 %v1649_v47  ;;  %v3618_v15 = vld [vmem:[#allocation8 + $0x198] sm:$0xff] }
 0x242   : > { %v6358_v28 = vpop.eup %6357  ;;  %v4057_v1 = vmul.f32 %v6356_v41, %v7333_v10  ;;  %6383 = vtanh.f32 %v7482_v39  ;;  %v3619_v39 = vld [vmem:[#allocation8 + $0x1a0] sm:$0xff]  ;;  %2347 = vmatprep.subr.mxu0 %v956_v38  ;;  %v3916_v46 = vadd.f32 %v7540_v52, %v3620_v12  ;;  %v3917_v44 = vadd.f32 %v3810_v54, %v3621_v58  ;;  %v955_v55 = vld [vmem:[#allocation11 + $0xc98] sm:$0xff]  ;;  %2417 = vmatpush2.msra.mxu1 %v1648_v48  ;;  %v1585_v48 = vld [vmem:[#allocation11 + $0x2048] sm:$0xff] }
 0x243   : > { %v6360_v37 = vpop.eup %6359  ;;  %4125 = vadd.xlane.f32.xlu1 %v4124_v42  ;;  %v4118_v43 = vadd.f32 %v4117_v61, %v4047_v35  ;;  %v4058_v16 = vmul.f32 %v6358_v28, %v7337_v31  ;;  %6385 = vtanh.f32 %v7503_v53  ;;  %v3915_v9 = vadd.f32 %v3802_v5, %v3619_v39  ;;  %2348 = vmatpush2.msra.mxu0 %v955_v55  ;;  %v934_v61 = vld [vmem:[#allocation11 + $0xbf0] sm:$0xff]  ;;  %v892_v55 = vld [vmem:[#allocation11 + $0xaa0] sm:$0xff] }
 0x244   : > { %v6362_v18 = vpop.eup %6361  ;;  %6387 = vtanh.f32 %v7506_v14  ;;  %v4059_v53 = vmul.f32 %v6360_v37, %v7340_v32  ;;  %v3615_v14 = vld [vmem:[#allocation8 + $0x180] sm:$0xff]  ;;  %v3913_v28 = vadd.f32 %v3810_v54, %v3617_v49  ;;  %2349 = vmatprep.subr.mxu0 %v935_v45  ;;  %v3628_v54 = vld [vmem:[#allocation8 + $0x1e8] sm:$0xff] }
 0x245   : > { %v6364_v59 = vpop.eup %6363  ;;  %v4119_v20 = vadd.f32 %v4118_v43, %v4048_v7  ;;  %v4132_v8 = vadd.f32 %v4058_v16, %v4057_v1  ;;  %6389 = vtanh.f32 %v7509_v13  ;;  %v4060_v30 = vmul.f32 %v6362_v18, %v7347_v40  ;;  %v3616_v13 = vld [vmem:[#allocation8 + $0x188] sm:$0xff]  ;;  %v914_v1 = vld [vmem:[#allocation11 + $0xb50] sm:$0xff]  ;;  %2350 = vmatpush2.msra.mxu0 %v934_v61 }
 0x246   : > { %v6366_v6 = vpop.eup %6365  ;;  %v4053_v19 = vmul.f32 %v6364_v59, %v7333_v10  ;;  %6391 = vtanh.f32 %v7515_v0  ;;  %v3918_v0 = vadd.f32 %v3814_v26, %v3622_v27  ;;  %v3911_v51 = vadd.f32 %v3802_v5, %v3615_v14  ;;  %v1607_v5 = vld [vmem:[#allocation11 + $0x20f8] sm:$0xff]  ;;  %2351 = vmatprep.subr.mxu0 %v914_v1 }
 0x247   : > { %v6368_v57 = vpop.eup %6367  ;;  %4120 = vadd.xlane.f32.xlu0 %v4119_v20  ;;  %v4133_v34 = vadd.f32 %v4132_v8, %v4059_v53  ;;  %v4054_v36 = vmul.f32 %v6366_v6, %v7337_v31  ;;  %6393 = vtanh.f32 %v7518_v60  ;;  %v1628_v60 = vld [vmem:[#allocation11 + $0x21a0] sm:$0xff]  ;;  %v3912_v63 = vadd.f32 %v7540_v52, %v3616_v13  ;;  %v3629_v20 = vld [vmem:[#allocation8 + $0x1f0] sm:$0xff]  ;;  %v893_v13 = vld [vmem:[#allocation11 + $0xaa8] sm:$0xff] }
 0x248   : > { %v6370_v50 = vpop.eup %6369  ;;  %6395 = vtanh.f32 %v7525_v33  ;;  %v4055_v42 = vmul.f32 %v6368_v57, %v7340_v32  ;;  %2418 = vmatprep.subr.mxu1 %v1628_v60  ;;  %v3914_v43 = vadd.f32 %v3814_v26, %v3618_v15  ;;  %v7573_v52 = vrot.slane %v7373_v3, %v7249_v25 }
 0x249   : > { %v6372_v4 = vpop.eup %6371  ;;  %v4134_v41 = vadd.f32 %v4133_v34, %v4060_v30  ;;  %v4127_v35 = vadd.f32 %v4054_v36, %v4053_v19  ;;  %6397 = vtanh.f32 %v7528_v2  ;;  %v4056_v2 = vmul.f32 %v6370_v50, %v7347_v40  ;;  %2419 = vmatpush2.msra.mxu1 %v1627_v62  ;;  %v3630_v19 = vld [vmem:[#allocation8 + $0x1f8] sm:$0xff]  ;;  %v913_v36 = vld [vmem:[#allocation11 + $0xb48] sm:$0xff] }
 0x24a   : > { %v6374_v17 = vpop.eup %6373  ;;  %v4033_v33 = vmul.f32 %v6372_v4, %v7333_v10  ;;  %6399 = vtanh.f32 %v7530_v56  ;;  %v7569_v56 = vrot.slane %v7373_v3, %v7246_v24  ;;  %2420 = vmatprep.subr.mxu1 %v1607_v5  ;;  %v7579_v53 = vrot.slane %v7373_v3, %v7254_v11  ;;  %2352 = vmatpush2.msra.mxu0 %v913_v36 }
 0x24b   : > { %v6376_v38 = vpop.eup %6375  ;;  %4135 = vadd.xlane.f32.xlu1 %v4134_v41  ;;  %v4128_v47 = vadd.f32 %v4127_v35, %v4055_v42  ;;  %v4034_v37 = vmul.f32 %v6374_v17, %v7337_v31  ;;  %6401 = vtanh.f32 %v3890_v21  ;;  %v3627_v21 = vld [vmem:[#allocation8 + $0x1e0] sm:$0xff]  ;;  %v7583_v8 = vrot.slane %v7373_v3, %v7257_v29  ;;  %v1606_v3 = vld [vmem:[#allocation11 + $0x20f0] sm:$0xff]  ;;  %2353 = vmatprep.subr.mxu0 %v893_v13  ;;  %v1565_v42 = vld [vmem:[#allocation11 + $0x1fa8] sm:$0xff] }
 0x24c   : > { %v6378_v7 = vpop.eup %6377  ;;  %6403 = vtanh.f32 %v3915_v9  ;;  %v4035_v12 = vmul.f32 %v6376_v38, %v7340_v32  ;;  %v3623_v9 = vld [vmem:[#allocation8 + $0x1c0] sm:$0xff]  ;;  %v3923_v30 = vadd.f32 %v7569_v56, %v3627_v21  ;;  %v3924_v34 = vadd.f32 %v7573_v52, %v3628_v54  ;;  %2421 = vmatpush2.msra.mxu1 %v1606_v3  ;;  %v874_v35 = vld [vmem:[#allocation11 + $0xa10] sm:$0xff]  ;;  %2354 = vmatpush2.msra.mxu0 %v892_v55 }
 0x24d   : > { %v6380_v16 = vpop.eup %6379  ;;  %v4129_v39 = vadd.f32 %v4128_v47, %v4056_v2  ;;  %v4102_v18 = vadd.f32 %v4034_v37, %v4033_v33  ;;  %6405 = vtanh.f32 %v3916_v46  ;;  %v4036_v27 = vmul.f32 %v6378_v7, %v7347_v40  ;;  %v3624_v46 = vld [vmem:[#allocation8 + $0x1c8] sm:$0xff]  ;;  %v3625_v33 = vld [vmem:[#allocation8 + $0x1d0] sm:$0xff]  ;;  %2433 = vmatprep.subr.mxu0 %v874_v35 }
 0x24e   : > { %v6382_v26 = vpop.eup %6381  ;;  %v4029_v59 = vmul.f32 %v6380_v16, %v7333_v10  ;;  %6407 = vtanh.f32 %v3917_v44  ;;  %v3925_v4 = vadd.f32 %v7579_v53, %v3629_v20  ;;  %v3926_v41 = vadd.f32 %v7583_v8, %v3630_v19  ;;  %v7598_v7 = vld [vmem:[#allocation2 + $0x10] sm:$0xff]  ;;  %v852_v19 = vld [vmem:[#allocation11 + $0x960] sm:$0xff] }
 0x24f   : > { %v6384_v58 = vpop.eup %6383  ;;  %4130 = vadd.xlane.f32.xlu0 %v4129_v39  ;;  %v4103_v14 = vadd.f32 %v4102_v18, %v4035_v12  ;;  %v4030_v6 = vmul.f32 %v6382_v26, %v7337_v31  ;;  %6409 = vtanh.f32 %v3918_v0  ;;  %v1586_v0 = vld [vmem:[#allocation11 + $0x2050] sm:$0xff]  ;;  %v3919_v1 = vadd.f32 %v7569_v56, %v3623_v9  ;;  %2356 = vmatmul.mubr.f32.vlgmr.msra.gmra.mxu0 %v7598_v7  ;;  %v6552_v39 = vld [vmem:[#allocation2] sm:$0xff]  ;;  %v873_v20 = vld [vmem:[#allocation11 + $0xa08] sm:$0xff] }
 0x250   : > { %v6386_v57 = vpop.eup %6385  ;;  %6411 = vtanh.f32 %v3911_v51  ;;  %v4031_v50 = vmul.f32 %v6384_v58, %v7340_v32  ;;  %2422 = vmatprep.subr.mxu1 %v1586_v0  ;;  %v3920_v5 = vadd.f32 %v7573_v52, %v3624_v46  ;;  %v3921_v56 = vadd.f32 %v7579_v53, %v3625_v33  ;;  %2497 = vmatprep.mubr.f32.mxu0 %v6552_v39  ;;  %v853_v58 = vld [vmem:[#allocation11 + $0x968] sm:$0xff]  ;;  %v811_v33 = vld [vmem:[#allocation11 + $0x818] sm:$0xff] }
 0x251   : > { %v6388_v49 = vpop.eup %6387  ;;  %v4104_v15 = vadd.f32 %v4103_v14, %v4036_v27  ;;  %v4097_v44 = vadd.f32 %v4030_v6, %v4029_v59  ;;  %6413 = vtanh.f32 %v3912_v63  ;;  %v4032_v61 = vmul.f32 %v6386_v57, %v7347_v40  ;;  %v3626_v63 = vld [vmem:[#allocation8 + $0x1d8] sm:$0xff]  ;;  %2423 = vmatpush2.msra.mxu1 %v1585_v48  ;;  %v1564_v59 = vld [vmem:[#allocation11 + $0x1fa0] sm:$0xff]  ;;  %2434 = vmatpush1.msra.mxu0 %v873_v20  ;;  %v1546_v6 = vld [vmem:[#allocation11 + $0x1f10] sm:$0xff] }
 0x252   : > { %v6390_v45 = vpop.eup %6389  ;;  %v4041_v51 = vmul.f32 %v6388_v49, %v7333_v10  ;;  %6415 = vtanh.f32 %v3913_v28  ;;  %2424 = vmatprep.subr.mxu1 %v1565_v42  ;;  %v3922_v52 = vadd.f32 %v7583_v8, %v3626_v63  ;;  %v1545_v9 = vld [vmem:[#allocation11 + $0x1f08] sm:$0xff]  ;;  %2435 = vmatprep.subr.mxu0 %v853_v58 }
 0x253   : > { %v6392_v60 = vpop.eup %6391  ;;  %4105 = vadd.xlane.f32.xlu1 %v4104_v15  ;;  %v4098_v62 = vadd.f32 %v4097_v44, %v4031_v50  ;;  %v4042_v17 = vmul.f32 %v6390_v45, %v7337_v31  ;;  %6417 = vtanh.f32 %v3914_v43  ;;  %2425 = vmatpush2.msra.mxu1 %v1564_v59  ;;  %v7610_v15 = vld [vmem:[#allocation2 + $0x18] sm:$0xff] }
 0x254   : > { %v6394_v28 = vpop.eup %6393  ;;  %6419 = vtanh.f32 %v3923_v30  ;;  %v4043_v47 = vmul.f32 %v6392_v60, %v7340_v32  ;;  %2504 = vmatprep.subr.mxu1 %v1546_v6  ;;  %v832_v30 = vld [vmem:[#allocation11 + $0x8c0] sm:$0xff]  ;;  %2427 = vmatmul.mubr.f32.vlgmr.msra.gmra.mxu1 %v7610_v15 }
 0x255   : > { %v6396_v38 = vpop.eup %6395  ;;  %v4099_v2 = vadd.f32 %v4098_v62, %v4032_v61  ;;  %v4112_v37 = vadd.f32 %v4042_v17, %v4041_v51  ;;  %6421 = vtanh.f32 %v3924_v34  ;;  %v4044_v18 = vmul.f32 %v6394_v28, %v7347_v40  ;;  %v1525_v34 = vld [vmem:[#allocation11 + $0x1e68] sm:$0xff]  ;;  %2436 = vmatpush1.msra.mxu0 %v852_v19  ;;  %2505 = vmatpush1.msra.mxu1 %v1545_v9  ;;  %v831_v62 = vld [vmem:[#allocation11 + $0x8b8] sm:$0xff]  ;;  %v1524_v17 = vld [vmem:[#allocation11 + $0x1e60] sm:$0xff] }
 0x256   : > { %v6398_v43 = vpop.eup %6397  ;;  %v4037_v16 = vmul.f32 %v6396_v38, %v7333_v10  ;;  %6423 = vtanh.f32 %v3925_v4  ;;  %2437 = vmatprep.subr.mxu0 %v832_v30  ;;  %2506 = vmatprep.subr.mxu1 %v1525_v34  ;;  %v6554_v4 = vld [vmem:[#allocation2 + $0x8] sm:$0xff] }
 0x257   : > { %v6400_v12 = vpop.eup %6399  ;;  %4100 = vadd.xlane.f32.xlu0 %v4099_v2  ;;  %v4113_v21 = vadd.f32 %v4112_v37, %v4043_v47  ;;  %v4038_v54 = vmul.f32 %v6398_v43, %v7337_v31  ;;  %6425 = vtanh.f32 %v3926_v41  ;;  %2568 = vmatprep.mubr.f32.mxu1 %v6554_v4  ;;  %v1504_v38 = vld [vmem:[#allocation11 + $0x1dc0] sm:$0xff]  ;;  %v810_v2 = vld [vmem:[#allocation11 + $0x810] sm:$0xff]  ;;  %v1503_v47 = vld [vmem:[#allocation11 + $0x1db8] sm:$0xff] }
 0x258   : > { %v6402_v26 = vpop.eup %6401  ;;  %6427 = vtanh.f32 %v3919_v1  ;;  %v4039_v53 = vmul.f32 %v6400_v12, %v7340_v32  ;;  %2438 = vmatpush1.msra.mxu0 %v831_v62  ;;  %2507 = vmatpush1.msra.mxu1 %v1524_v17  ;;  %v789_v9 = vld [vmem:[#allocation11 + $0x768] sm:$0xff]  ;;  %v1419_v4 = vld [vmem:[#allocation11 + $0x1b18] sm:$0xff]  ;;  %v684_v62 = vld [vmem:[#allocation11 + $0x420] sm:$0xff] }
 0x259   : > { %v6404_v27 = vpop.eup %6403  ;;  %v4114_v14 = vadd.f32 %v4113_v21, %v4044_v18  ;;  %v4107_v8 = vadd.f32 %v4038_v54, %v4037_v16  ;;  %6429 = vtanh.f32 %v3920_v5  ;;  %v4040_v3 = vmul.f32 %v6402_v26, %v7347_v40  ;;  %2439 = vmatprep.subr.mxu0 %v811_v33  ;;  %2508 = vmatprep.subr.mxu1 %v1504_v38  ;;  %v790_v16 = vld [vmem:[#allocation11 + $0x770] sm:$0xff]  ;;  %v1377_v17 = vld [vmem:[#allocation11 + $0x19c8] sm:$0xff]  ;;  %v664_v33 = vld [vmem:[#allocation11 + $0x380] sm:$0xff] }
 0x25a   : > { %v6406_v46 = vpop.eup %6405  ;;  %v4065_v57 = vmul.f32 %v6404_v27, %v7333_v10  ;;  %6431 = vtanh.f32 %v3921_v56  ;;  %v1483_v56 = vld [vmem:[#allocation11 + $0x1d18] sm:$0xff]  ;;  %2440 = vmatpush1.msra.mxu0 %v810_v2  ;;  %2509 = vmatpush1.msra.mxu1 %v1503_v47  ;;  %v1336_v38 = vld [vmem:[#allocation11 + $0x1880] sm:$0xff]  ;;  %v642_v2 = vld [vmem:[#allocation11 + $0x2d0] sm:$0xff] }
 0x25b   : > { %v6408_v36 = vpop.eup %6407  ;;  %4115 = vadd.xlane.f32.xlu1 %v4114_v14  ;;  %v4108_v13 = vadd.f32 %v4107_v8, %v4039_v53  ;;  %v4066_v49 = vmul.f32 %v6406_v46, %v7337_v31  ;;  %6433 = vtanh.f32 %v3922_v52  ;;  %2441 = vmatprep.subr.mxu0 %v790_v16  ;;  %v1482_v46 = vld [vmem:[#allocation11 + $0x1d10] sm:$0xff]  ;;  %v1335_v47 = vld [vmem:[#allocation11 + $0x1878] sm:$0xff] }
 0x25c   : > { %v6410_v50 = vpop.eup %6409  ;;  %v4067_v55 = vmul.f32 %v6408_v36, %v7340_v32  ;;  %2510 = vmatprep.subr.mxu1 %v1483_v56  ;;  %2442 = vmatpush1.msra.mxu0 %v789_v9  ;;  %v6050_v16 = vld [vmem:[#allocation4] ss:$0 sm:$0xff]  ;;  %v621_v56 = vld [vmem:[#allocation11 + $0x228] sm:$0xff]  ;;  %v1230_v9 = vld [vmem:[#allocation11 + $0x1530] sm:$0xff] }
 0x25d   : > { %v6412_v44 = vpop.eup %6411  ;;  %v4109_v0 = vadd.f32 %v4108_v13, %v4040_v3  ;;  %v4142_v48 = vadd.f32 %v4066_v49, %v4065_v57  ;;  %v4068_v42 = vmul.f32 %v6410_v50, %v7347_v40  ;;  %v769_v57 = vld [vmem:[#allocation11 + $0x6c8] sm:$0xff]  ;;  %2511 = vmatpush1.msra.mxu1 %v1482_v46  ;;  %v1462_v3 = vld [vmem:[#allocation11 + $0x1c70] sm:$0xff]  ;;  %v768_v13 = vld [vmem:[#allocation11 + $0x6c0] sm:$0xff] }
 0x25e   : > { %v6414_v45 = vpop.eup %6413  ;;  %v4061_v51 = vmul.f32 %v6412_v44, %v7333_v10  ;;  %2443 = vmatprep.subr.mxu0 %v769_v57  ;;  %2512 = vmatprep.subr.mxu1 %v1462_v3  ;;  %v748_v49 = vld [vmem:[#allocation11 + $0x620] sm:$0xff]  ;;  %v1441_v50 = vld [vmem:[#allocation11 + $0x1bc8] sm:$0xff]  ;;  %v1882_v57 = vld [vmem:[#allocation11 + $0x2990] sm:$0xff] }
 0x25f   : > { %v6416_v41 = vpop.eup %6415  ;;  %4110 = vadd.xlane.f32.xlu0 %v4109_v0  ;;  %v4143_v35 = vadd.f32 %v4142_v48, %v4067_v55  ;;  %v4062_v60 = vmul.f32 %v6414_v45, %v7337_v31  ;;  %2444 = vmatpush1.msra.mxu0 %v768_v13  ;;  %v1440_v55 = vld [vmem:[#allocation11 + $0x1bc0] sm:$0xff]  ;;  %v727_v48 = vld [vmem:[#allocation11 + $0x578] sm:$0xff]  ;;  %v1189_v46 = vld [vmem:[#allocation11 + $0x13e8] sm:$0xff] }
 0x260   : > { %v6418_v61 = vpop.eup %6417  ;;  %v4063_v1 = vmul.f32 %v6416_v41, %v7340_v32  ;;  %2445 = vmatprep.subr.mxu0 %v748_v49  ;;  %v1420_v45 = vld [vmem:[#allocation11 + $0x1b20] sm:$0xff]  ;;  %v706_v41 = vld [vmem:[#allocation11 + $0x4d0] sm:$0xff]  ;;  %v1861_v3 = vld [vmem:[#allocation11 + $0x28e8] sm:$0xff] }
 0x261   : > { %v6420_v63 = vpop.eup %6419  ;;  %v4144_v28 = vadd.f32 %v4143_v35, %v4068_v42  ;;  %v4137_v5 = vadd.f32 %v4062_v60, %v4061_v51  ;;  %v4064_v39 = vmul.f32 %v6418_v61, %v7347_v40  ;;  %v726_v51 = vld [vmem:[#allocation11 + $0x570] sm:$0xff]  ;;  %v1399_v42 = vld [vmem:[#allocation11 + $0x1a78] sm:$0xff]  ;;  %v685_v60 = vld [vmem:[#allocation11 + $0x428] sm:$0xff] }
 0x262   : > { %v6422_v37 = vpop.eup %6421  ;;  %v4073_v43 = vmul.f32 %v6420_v63, %v7333_v10  ;;  %v1398_v35 = vld [vmem:[#allocation11 + $0x1a70] sm:$0xff]  ;;  %v1357_v63 = vld [vmem:[#allocation11 + $0x1928] sm:$0xff]  ;;  %v1167_v13 = vld [vmem:[#allocation11 + $0x1338] sm:$0xff] }
 0x263   : > { %v6424_v52 = vpop.eup %6423  ;;  %4145 = vadd.xlane.f32.xlu1 %v4144_v28  ;;  %v4138_v12 = vadd.f32 %v4137_v5, %v4063_v1  ;;  %v4074_v18 = vmul.f32 %v6422_v37, %v7337_v31  ;;  %v1378_v61 = vld [vmem:[#allocation11 + $0x19d0] sm:$0xff]  ;;  %v663_v28 = vld [vmem:[#allocation11 + $0x378] sm:$0xff]  ;;  %v1356_v1 = vld [vmem:[#allocation11 + $0x1920] sm:$0xff] }
 0x264   : > { %v6426_v21 = vpop.eup %6425  ;;  %v4075_v59 = vmul.f32 %v6424_v52, %v7340_v32  ;;  %v643_v5 = vld [vmem:[#allocation11 + $0x2d8] sm:$0xff]  ;;  %v622_v37 = vld [vmem:[#allocation11 + $0x230] sm:$0xff] }
 0x265   : > { %v6428_v54 = vpop.eup %6427  ;;  %v4139_v26 = vadd.f32 %v4138_v12, %v4064_v39  ;;  %v4152_v20 = vadd.f32 %v4074_v18, %v4073_v43  ;;  %v4076_v53 = vmul.f32 %v6426_v21, %v7347_v40  ;;  %v1315_v43 = vld [vmem:[#allocation11 + $0x17d8] sm:$0xff]  ;;  %v1314_v52 = vld [vmem:[#allocation11 + $0x17d0] sm:$0xff]  ;;  %v601_v39 = vld [vmem:[#allocation11 + $0x188] sm:$0xff] }
 0x266   : > { %v6430_v58 = vpop.eup %6429  ;;  %v4069_v27 = vmul.f32 %v6428_v54, %v7333_v10  ;;  %v1461_v10 = vld [vmem:[#allocation11 + $0x1c68] sm:$0xff]  ;;  %v1294_v12 = vld [vmem:[#allocation11 + $0x1730] sm:$0xff]  ;;  %v600_v18 = vld [vmem:[#allocation11 + $0x180] sm:$0xff] }
 0x267   : > { %v6432_v14 = vpop.eup %6431  ;;  %4140 = vadd.xlane.f32.xlu0 %v4139_v26  ;;  %v4153_v8 = vadd.f32 %v4152_v20, %v4075_v59  ;;  %v4070_v6 = vmul.f32 %v6430_v58, %v7337_v31  ;;  %2513 = vmatpush1.msra.mxu1 %v1461_v10  ;;  %v1293_v21 = vld [vmem:[#allocation11 + $0x1728] sm:$0xff]  ;;  %v580_v54 = vld [vmem:[#allocation11 + $0xe0] sm:$0xff]  ;;  %v579_v59 = vld [vmem:[#allocation11 + $0xd8] sm:$0xff] }
 0x268   : > { %v6434_v19 = vpop.eup %6433  ;;  %v4071_v34 = vmul.f32 %v6432_v14, %v7340_v32  ;;  %2514 = vmatprep.subr.mxu1 %v1441_v50  ;;  %v747_v32 = vld [vmem:[#allocation11 + $0x618] sm:$0xff]  ;;  %v1273_v26 = vld [vmem:[#allocation11 + $0x1688] sm:$0xff]  ;;  %v1272_v20 = vld [vmem:[#allocation11 + $0x1680] sm:$0xff] }
 0x269   : > { %v4154_v30 = vadd.f32 %v4153_v8, %v4076_v53  ;;  %v4147_v36 = vadd.f32 %v4070_v6, %v4069_v27  ;;  %v4072_v31 = vmul.f32 %v6434_v19, %v7347_v40  ;;  %2446 = vmatpush1.msra.mxu0 %v747_v32  ;;  %2515 = vmatpush1.msra.mxu1 %v1440_v55  ;;  %v705_v40 = vld [vmem:[#allocation11 + $0x4c8] sm:$0xff]  ;;  %v559_v58 = vld [vmem:[#allocation11 + $0x38] sm:$0xff]  ;;  %v1252_v27 = vld [vmem:[#allocation11 + $0x15e0] sm:$0xff] }
 0x26a   : > { %2447 = vmatprep.subr.mxu0 %v727_v48  ;;  %2516 = vmatprep.subr.mxu1 %v1420_v45  ;;  %v558_v14 = vld [vmem:[#allocation11 + $0x30] sm:$0xff]  ;;  %v1251_v53 = vld [vmem:[#allocation11 + $0x15d8] sm:$0xff]  ;;  %v1209_v19 = vld [vmem:[#allocation11 + $0x1488] sm:$0xff] }
 0x26b   : > { %4155 = vadd.xlane.f32.xlu1 %v4154_v30  ;;  %v4148_v44 = vadd.f32 %v4147_v36, %v4071_v34  ;;  %2448 = vmatpush1.msra.mxu0 %v726_v51  ;;  %v1210_v8 = vld [vmem:[#allocation11 + $0x1490] sm:$0xff]  ;;  %v1231_v6 = vld [vmem:[#allocation11 + $0x1538] sm:$0xff]  ;;  %v1188_v30 = vld [vmem:[#allocation11 + $0x13e0] sm:$0xff] }
 0x26c   : > { %2517 = vmatpush1.msra.mxu1 %v1419_v4  ;;  %2449 = vmatprep.subr.mxu0 %v706_v41  ;;  %v1881_v34 = vld [vmem:[#allocation11 + $0x2988] sm:$0xff]  ;;  %v1168_v36 = vld [vmem:[#allocation11 + $0x1340] sm:$0xff]  ;;  %v1147_v49 = vld [vmem:[#allocation11 + $0x1298] sm:$0xff] }
 0x26d   : > { %v4149_v0 = vadd.f32 %v4148_v44, %v4072_v31  ;;  %2518 = vmatprep.subr.mxu1 %v1399_v42  ;;  %2450 = vmatpush1.msra.mxu0 %v705_v40  ;;  %v1860_v10 = vld [vmem:[#allocation11 + $0x28e0] sm:$0xff]  ;;  %v1146_v31 = vld [vmem:[#allocation11 + $0x1290] sm:$0xff]  ;;  %v1839_v44 = vld [vmem:[#allocation11 + $0x2838] sm:$0xff] }
 0x26e   : > { %2519 = vmatpush1.msra.mxu1 %v1398_v35  ;;  %2451 = vmatprep.subr.mxu0 %v685_v60  ;;  %v1840_v50 = vld [vmem:[#allocation11 + $0x2840] sm:$0xff]  ;;  %v1819_v32 = vld [vmem:[#allocation11 + $0x2798] sm:$0xff]  ;;  %v1125_v55 = vld [vmem:[#allocation11 + $0x11e8] sm:$0xff] }
 0x26f   : > { %4150 = vadd.xlane.f32.xlu0 %v4149_v0  ;;  %2520 = vmatprep.subr.mxu1 %v1378_v61  ;;  %v1126_v0 = vld [vmem:[#allocation11 + $0x11f0] sm:$0xff]  ;;  %v1105_v45 = vld [vmem:[#allocation11 + $0x1148] sm:$0xff]  ;;  %v1104_v4 = vld [vmem:[#allocation11 + $0x1140] sm:$0xff] }
 0x270   : > { %2452 = vmatpush1.msra.mxu0 %v684_v62  ;;  %2521 = vmatpush1.msra.mxu1 %v1377_v17  ;;  %v1818_v48 = vld [vmem:[#allocation11 + $0x2790] sm:$0xff]  ;;  %v1797_v41 = vld [vmem:[#allocation11 + $0x26e8] sm:$0xff]  ;;  %v1084_v42 = vld [vmem:[#allocation11 + $0x10a0] sm:$0xff] }
 0x271   : > { %2453 = vmatprep.subr.mxu0 %v664_v33  ;;  %2522 = vmatprep.subr.mxu1 %v1357_v63  ;;  %v1798_v51 = vld [vmem:[#allocation11 + $0x26f0] sm:$0xff]  ;;  %v1777_v40 = vld [vmem:[#allocation11 + $0x2648] sm:$0xff]  ;;  %v1083_v35 = vld [vmem:[#allocation11 + $0x1098] sm:$0xff] }
 0x272   : > { %2454 = vmatpush1.msra.mxu0 %v663_v28  ;;  %2523 = vmatpush1.msra.mxu1 %v1356_v1  ;;  %v1776_v60 = vld [vmem:[#allocation11 + $0x2640] sm:$0xff]  ;;  %v1063_v61 = vld [vmem:[#allocation11 + $0xff8] sm:$0xff]  ;;  %v1062_v17 = vld [vmem:[#allocation11 + $0xff0] sm:$0xff] }
 0x273   : > { %2455 = vmatprep.subr.mxu0 %v643_v5  ;;  %2524 = vmatprep.subr.mxu1 %v1336_v38  ;;  %v1756_v62 = vld [vmem:[#allocation11 + $0x25a0] sm:$0xff]  ;;  %v1755_v33 = vld [vmem:[#allocation11 + $0x2598] sm:$0xff]  ;;  %v1042_v63 = vld [vmem:[#allocation11 + $0xf50] sm:$0xff] }
 0x274   : > { %2456 = vmatpush1.msra.mxu0 %v642_v2  ;;  %2525 = vmatpush1.msra.mxu1 %v1335_v47  ;;  %v1735_v28 = vld [vmem:[#allocation11 + $0x24f8] sm:$0xff]  ;;  %v1041_v1 = vld [vmem:[#allocation11 + $0xf48] sm:$0xff]  ;;  %v1734_v5 = vld [vmem:[#allocation11 + $0x24f0] sm:$0xff] }
 0x275   : > { %2457 = vmatprep.subr.mxu0 %v622_v37  ;;  %2526 = vmatprep.subr.mxu1 %v1315_v43  ;;  %v1021_v38 = vld [vmem:[#allocation11 + $0xea8] sm:$0xff]  ;;  %v1714_v2 = vld [vmem:[#allocation11 + $0x2450] sm:$0xff]  ;;  %v1020_v47 = vld [vmem:[#allocation11 + $0xea0] sm:$0xff] }
 0x276   : > { %2458 = vmatpush1.msra.mxu0 %v621_v56  ;;  %2527 = vmatpush1.msra.mxu1 %v1314_v52  ;;  %v1713_v37 = vld [vmem:[#allocation11 + $0x2448] sm:$0xff]  ;;  %v1000_v43 = vld [vmem:[#allocation11 + $0xe00] sm:$0xff]  ;;  %v999_v56 = vld [vmem:[#allocation11 + $0xdf8] sm:$0xff] }
 0x277   : > { %2459 = vmatprep.subr.mxu0 %v601_v39  ;;  %2528 = vmatprep.subr.mxu1 %v1294_v12  ;;  %v1692_v52 = vld [vmem:[#allocation11 + $0x23a0] sm:$0xff]  ;;  %v979_v39 = vld [vmem:[#allocation11 + $0xd58] sm:$0xff] }
 0x278   : > { %2460 = vmatpush1.msra.mxu0 %v600_v18  ;;  %2529 = vmatpush1.msra.mxu1 %v1293_v21  ;;  %v1672_v12 = vld [vmem:[#allocation11 + $0x2300] sm:$0xff]  ;;  %v978_v18 = vld [vmem:[#allocation11 + $0xd50] sm:$0xff]  ;;  %v1671_v21 = vld [vmem:[#allocation11 + $0x22f8] sm:$0xff] }
 0x279   : > { %2461 = vmatprep.subr.mxu0 %v580_v54  ;;  %2530 = vmatprep.subr.mxu1 %v1273_v26  ;;  %v958_v54 = vld [vmem:[#allocation11 + $0xcb0] sm:$0xff]  ;;  %v1651_v26 = vld [vmem:[#allocation11 + $0x2258] sm:$0xff] }
 0x27a   : > { %2462 = vmatpush1.msra.mxu0 %v579_v59  ;;  %2531 = vmatpush1.msra.mxu1 %v1272_v20  ;;  %v957_v59 = vld [vmem:[#allocation11 + $0xca8] sm:$0xff]  ;;  %v1650_v20 = vld [vmem:[#allocation11 + $0x2250] sm:$0xff] }
 0x27b   : > { %2463 = vmatprep.subr.mxu0 %v559_v58  ;;  %2532 = vmatprep.subr.mxu1 %v1252_v27  ;;  %v937_v58 = vld [vmem:[#allocation11 + $0xc08] sm:$0xff]  ;;  %v1630_v27 = vld [vmem:[#allocation11 + $0x21b0] sm:$0xff] }
 0x27c   : > { %2464 = vmatpush1.msra.mxu0 %v558_v14  ;;  %2533 = vmatpush1.msra.mxu1 %v1251_v53  ;;  %v936_v14 = vld [vmem:[#allocation11 + $0xc00] sm:$0xff]  ;;  %v1629_v53 = vld [vmem:[#allocation11 + $0x21a8] sm:$0xff] }
 0x27d   : > { %2465 = vmatprep.subr.mxu0 %v1210_v8  ;;  %2534 = vmatprep.subr.mxu1 %v1231_v6  ;;  %v916_v8 = vld [vmem:[#allocation11 + $0xb60] sm:$0xff]  ;;  %v1609_v6 = vld [vmem:[#allocation11 + $0x2108] sm:$0xff] }
 0x27e   : > { %2466 = vmatpush2.msra.mxu0 %v1209_v19  ;;  %2535 = vmatpush1.msra.mxu1 %v1230_v9  ;;  %v915_v19 = vld [vmem:[#allocation11 + $0xb58] sm:$0xff]  ;;  %v1608_v9 = vld [vmem:[#allocation11 + $0x2100] sm:$0xff] }
 0x27f   : > { %2467 = vmatprep.subr.mxu0 %v1189_v46  ;;  %2536 = vmatprep.subr.mxu1 %v1882_v57  ;;  %v895_v46 = vld [vmem:[#allocation11 + $0xab8] sm:$0xff]  ;;  %v1588_v57 = vld [vmem:[#allocation11 + $0x2060] sm:$0xff] }
 0x280   : > { %2468 = vmatpush2.msra.mxu0 %v1188_v30  ;;  %2537 = vmatpush2.msra.mxu1 %v1881_v34  ;;  %v894_v30 = vld [vmem:[#allocation11 + $0xab0] sm:$0xff]  ;;  %v1587_v34 = vld [vmem:[#allocation11 + $0x2058] sm:$0xff] }
 0x281   : > { %2469 = vmatprep.subr.mxu0 %v1168_v36  ;;  %2538 = vmatprep.subr.mxu1 %v1861_v3  ;;  %v1567_v36 = vld [vmem:[#allocation11 + $0x1fb8] sm:$0xff]  ;;  %v876_v3 = vld [vmem:[#allocation11 + $0xa20] sm:$0xff] }
 0x282   : > { %2470 = vmatpush2.msra.mxu0 %v1167_v13  ;;  %2539 = vmatpush2.msra.mxu1 %v1860_v10  ;;  %v1566_v13 = vld [vmem:[#allocation11 + $0x1fb0] sm:$0xff]  ;;  %v875_v10 = vld [vmem:[#allocation11 + $0xa18] sm:$0xff] }
 0x283   : > { %2471 = vmatprep.subr.mxu0 %v1147_v49  ;;  %2540 = vmatprep.subr.mxu1 %v1840_v50  ;;  %v1548_v49 = vld [vmem:[#allocation11 + $0x1f20] sm:$0xff]  ;;  %v855_v50 = vld [vmem:[#allocation11 + $0x978] sm:$0xff] }
 0x284   : > { %2472 = vmatpush2.msra.mxu0 %v1146_v31  ;;  %2541 = vmatpush2.msra.mxu1 %v1839_v44  ;;  %v854_v31 = vld [vmem:[#allocation11 + $0x970] sm:$0xff]  ;;  %v1547_v44 = vld [vmem:[#allocation11 + $0x1f18] sm:$0xff] }
 0x285   : > { %4164 = vperm.xlu0 %6305, %v6050_v16   ;;  %2473 = vmatprep.subr.mxu0 %v1126_v0  ;;  %v1693_v16 = vld [vmem:[#allocation11 + $0x23a8] sm:$0xff]  ;;  %v834_v0 = vld [vmem:[#allocation11 + $0x8d0] sm:$0xff] }
 0x286   : > { %2542 = vmatprep.subr.mxu1 %v1819_v32  ;;  %2474 = vmatpush2.msra.mxu0 %v1125_v55  ;;  %v1527_v32 = vld [vmem:[#allocation11 + $0x1e78] sm:$0xff]  ;;  %v833_v55 = vld [vmem:[#allocation11 + $0x8c8] sm:$0xff] }
 0x287   : > { %2543 = vmatpush2.msra.mxu1 %v1818_v48  ;;  %2475 = vmatprep.subr.mxu0 %v1105_v45  ;;  %v1526_v48 = vld [vmem:[#allocation11 + $0x1e70] sm:$0xff]  ;;  %v813_v45 = vld [vmem:[#allocation11 + $0x828] sm:$0xff] }
 0x288   : > { %2544 = vmatprep.subr.mxu1 %v1798_v51  ;;  %2476 = vmatpush2.msra.mxu0 %v1104_v4  ;;  %v1506_v51 = vld [vmem:[#allocation11 + $0x1dd0] sm:$0xff]  ;;  %v812_v4 = vld [vmem:[#allocation11 + $0x820] sm:$0xff] }
 0x289   : > { %2545 = vmatpush2.msra.mxu1 %v1797_v41  ;;  %2477 = vmatprep.subr.mxu0 %v1084_v42  ;;  %v792_v41 = vld [vmem:[#allocation11 + $0x780] sm:$0xff]  ;;  %v1485_v42 = vld [vmem:[#allocation11 + $0x1d28] sm:$0xff] }
 0x28a   : > { %2546 = vmatprep.subr.mxu1 %v1777_v40  ;;  %2478 = vmatpush2.msra.mxu0 %v1083_v35  ;;  %v791_v40 = vld [vmem:[#allocation11 + $0x778] sm:$0xff]  ;;  %v1484_v35 = vld [vmem:[#allocation11 + $0x1d20] sm:$0xff] }
 0x28b   : > { %2547 = vmatpush2.msra.mxu1 %v1776_v60  ;;  %2479 = vmatprep.subr.mxu0 %v1063_v61  ;;  %v1464_v60 = vld [vmem:[#allocation11 + $0x1c80] sm:$0xff]  ;;  %v770_v61 = vld [vmem:[#allocation11 + $0x6d0] sm:$0xff] }
 0x28c   : > { %2548 = vmatprep.subr.mxu1 %v1756_v62  ;;  %2480 = vmatpush2.msra.mxu0 %v1062_v17  ;;  %v1463_v62 = vld [vmem:[#allocation11 + $0x1c78] sm:$0xff]  ;;  %v750_v17 = vld [vmem:[#allocation11 + $0x630] sm:$0xff] }
 0x28d   : > { %2549 = vmatpush2.msra.mxu1 %v1755_v33  ;;  %2481 = vmatprep.subr.mxu0 %v1042_v63  ;;  %v1443_v33 = vld [vmem:[#allocation11 + $0x1bd8] sm:$0xff]  ;;  %v749_v63 = vld [vmem:[#allocation11 + $0x628] sm:$0xff] }
 0x28e   : > { %2550 = vmatprep.subr.mxu1 %v1735_v28  ;;  %2482 = vmatpush2.msra.mxu0 %v1041_v1  ;;  %v1442_v28 = vld [vmem:[#allocation11 + $0x1bd0] sm:$0xff]  ;;  %v729_v1 = vld [vmem:[#allocation11 + $0x588] sm:$0xff] }
 0x28f   : > { %2551 = vmatpush2.msra.mxu1 %v1734_v5  ;;  %2483 = vmatprep.subr.mxu0 %v1021_v38  ;;  %v1422_v5 = vld [vmem:[#allocation11 + $0x1b30] sm:$0xff]  ;;  %v728_v38 = vld [vmem:[#allocation11 + $0x580] sm:$0xff] }
 0x290   : > { %2552 = vmatprep.subr.mxu1 %v1714_v2  ;;  %2484 = vmatpush2.msra.mxu0 %v1020_v47  ;;  %v1421_v2 = vld [vmem:[#allocation11 + $0x1b28] sm:$0xff]  ;;  %v708_v47 = vld [vmem:[#allocation11 + $0x4e0] sm:$0xff] }
 0x291   : > { %2553 = vmatpush2.msra.mxu1 %v1713_v37  ;;  %2485 = vmatprep.subr.mxu0 %v1000_v43  ;;  %v1401_v37 = vld [vmem:[#allocation11 + $0x1a88] sm:$0xff]  ;;  %v707_v43 = vld [vmem:[#allocation11 + $0x4d8] sm:$0xff] }
 0x292   : > { %2554 = vmatprep.subr.mxu1 %v1693_v16  ;;  %2486 = vmatpush2.msra.mxu0 %v999_v56  ;;  %v1400_v16 = vld [vmem:[#allocation11 + $0x1a80] sm:$0xff]  ;;  %v687_v56 = vld [vmem:[#allocation11 + $0x438] sm:$0xff] }
 0x293   : > { %2555 = vmatpush2.msra.mxu1 %v1692_v52  ;;  %2487 = vmatprep.subr.mxu0 %v979_v39  ;;  %v1380_v52 = vld [vmem:[#allocation11 + $0x19e0] sm:$0xff]  ;;  %v686_v39 = vld [vmem:[#allocation11 + $0x430] sm:$0xff] }
 0x294   : > { %2556 = vmatprep.subr.mxu1 %v1672_v12  ;;  %2488 = vmatpush2.msra.mxu0 %v978_v18  ;;  %v1379_v12 = vld [vmem:[#allocation11 + $0x19d8] sm:$0xff]  ;;  %v666_v18 = vld [vmem:[#allocation11 + $0x390] sm:$0xff] }
 0x295   : > { %2557 = vmatpush2.msra.mxu1 %v1671_v21  ;;  %2489 = vmatprep.subr.mxu0 %v958_v54  ;;  %v1359_v21 = vld [vmem:[#allocation11 + $0x1938] sm:$0xff]  ;;  %v665_v54 = vld [vmem:[#allocation11 + $0x388] sm:$0xff] }
 0x296   : > { %2558 = vmatprep.subr.mxu1 %v1651_v26  ;;  %2490 = vmatpush2.msra.mxu0 %v957_v59  ;;  %v1358_v26 = vld [vmem:[#allocation11 + $0x1930] sm:$0xff]  ;;  %v645_v59 = vld [vmem:[#allocation11 + $0x2e8] sm:$0xff] }
 0x297   : > { %2559 = vmatpush2.msra.mxu1 %v1650_v20  ;;  %2491 = vmatprep.subr.mxu0 %v937_v58  ;;  %v1338_v20 = vld [vmem:[#allocation11 + $0x1890] sm:$0xff]  ;;  %v644_v58 = vld [vmem:[#allocation11 + $0x2e0] sm:$0xff] }
 0x298   : > { %2560 = vmatprep.subr.mxu1 %v1630_v27  ;;  %2492 = vmatpush2.msra.mxu0 %v936_v14  ;;  %v1337_v27 = vld [vmem:[#allocation11 + $0x1888] sm:$0xff]  ;;  %v624_v14 = vld [vmem:[#allocation11 + $0x240] sm:$0xff] }
 0x299   : > { %2561 = vmatpush2.msra.mxu1 %v1629_v53  ;;  %2493 = vmatprep.subr.mxu0 %v916_v8  ;;  %v1317_v53 = vld [vmem:[#allocation11 + $0x17e8] sm:$0xff]  ;;  %v623_v8 = vld [vmem:[#allocation11 + $0x238] sm:$0xff] }
 0x29a   : > { %2562 = vmatprep.subr.mxu1 %v1609_v6  ;;  %2494 = vmatpush2.msra.mxu0 %v915_v19  ;;  %v1316_v6 = vld [vmem:[#allocation11 + $0x17e0] sm:$0xff]  ;;  %v603_v19 = vld [vmem:[#allocation11 + $0x198] sm:$0xff] }
 0x29b   : > { %2563 = vmatpush2.msra.mxu1 %v1608_v9  ;;  %2495 = vmatprep.subr.mxu0 %v895_v46  ;;  %v1296_v9 = vld [vmem:[#allocation11 + $0x1740] sm:$0xff]  ;;  %v602_v46 = vld [vmem:[#allocation11 + $0x190] sm:$0xff] }
 0x29c   : > { %2564 = vmatprep.subr.mxu1 %v1588_v57  ;;  %2496 = vmatpush2.msra.mxu0 %v894_v30  ;;  %v1295_v57 = vld [vmem:[#allocation11 + $0x1738] sm:$0xff]  ;;  %v582_v30 = vld [vmem:[#allocation11 + $0xf0] sm:$0xff] }
 0x29d   : > { %2565 = vmatpush2.msra.mxu1 %v1587_v34  ;;  %2575 = vmatprep.subr.mxu0 %v876_v3  ;;  %v1275_v34 = vld [vmem:[#allocation11 + $0x1698] sm:$0xff]  ;;  %v1274_v3 = vld [vmem:[#allocation11 + $0x1690] sm:$0xff] }
 0x29e   : > { %2566 = vmatprep.subr.mxu1 %v1567_v36  ;;  %2498 = vmatmul.mubr.f32.vlgmr.msra.gmra.mxu0 %v7598_v7  ;;  %v1505_v7 = vld [vmem:[#allocation11 + $0x1dc8] sm:$0xff] }
 0x29f   : > { %2567 = vmatpush2.msra.mxu1 %v1566_v13  ;;  %2576 = vmatpush1.msra.mxu0 %v875_v10  ;;  %v581_v36 = vld [vmem:[#allocation11 + $0xe8] sm:$0xff]  ;;  %v1254_v10 = vld [vmem:[#allocation11 + $0x15f0] sm:$0xff] }
 0x2a0   : > { %2646 = vmatprep.subr.mxu1 %v1548_v49  ;;  %2577 = vmatprep.subr.mxu0 %v855_v50  ;;  %v561_v13 = vld [vmem:[#allocation11 + $0x48] sm:$0xff]  ;;  %v560_v49 = vld [vmem:[#allocation11 + $0x40] sm:$0xff] }
 0x2a1   : > { %2569 = vmatmul.mubr.f32.vlgmr.msra.gmra.mxu1 %v7610_v15  ;;  %2578 = vmatpush1.msra.mxu0 %v854_v31  ;;  %v771_v15 = vld [vmem:[#allocation11 + $0x6d8] sm:$0xff]  ;;  %v1253_v50 = vld [vmem:[#allocation11 + $0x15e8] sm:$0xff]  ;;  %v1212_v31 = vld [vmem:[#allocation11 + $0x14a0] sm:$0xff] }
 0x2a2   : > { %2647 = vmatpush1.msra.mxu1 %v1547_v44  ;;  %2579 = vmatprep.subr.mxu0 %v834_v0  ;;  %v1233_v44 = vld [vmem:[#allocation11 + $0x1548] sm:$0xff]  ;;  %v1211_v0 = vld [vmem:[#allocation11 + $0x1498] sm:$0xff] }
 0x2a3   : > { %2648 = vmatprep.subr.mxu1 %v1527_v32  ;;  %2580 = vmatpush1.msra.mxu0 %v833_v55  ;;  %v1232_v32 = vld [vmem:[#allocation11 + $0x1540] sm:$0xff]  ;;  %v1191_v55 = vld [vmem:[#allocation11 + $0x13f8] sm:$0xff] }
 0x2a4   : > { %2649 = vmatpush1.msra.mxu1 %v1526_v48  ;;  %2581 = vmatprep.subr.mxu0 %v813_v45  ;;  %v1884_v48 = vld [vmem:[#allocation11 + $0x29a0] sm:$0xff]  ;;  %v1190_v45 = vld [vmem:[#allocation11 + $0x13f0] sm:$0xff] }
 0x2a5   : > { %2650 = vmatprep.subr.mxu1 %v1506_v51  ;;  %2582 = vmatpush1.msra.mxu0 %v812_v4  ;;  %v1883_v51 = vld [vmem:[#allocation11 + $0x2998] sm:$0xff]  ;;  %v1170_v4 = vld [vmem:[#allocation11 + $0x1350] sm:$0xff] }
 0x2a6   : > { %2651 = vmatpush1.msra.mxu1 %v1505_v7  ;;  %2583 = vmatprep.subr.mxu0 %v792_v41  ;;  %v1863_v7 = vld [vmem:[#allocation11 + $0x28f8] sm:$0xff]  ;;  %v1169_v41 = vld [vmem:[#allocation11 + $0x1348] sm:$0xff] }
 0x2a7   : > { %2652 = vmatprep.subr.mxu1 %v1485_v42  ;;  %2584 = vmatpush1.msra.mxu0 %v791_v40  ;;  %v1862_v42 = vld [vmem:[#allocation11 + $0x28f0] sm:$0xff]  ;;  %v1149_v40 = vld [vmem:[#allocation11 + $0x12a8] sm:$0xff] }
 0x2a8   : > { %2653 = vmatpush1.msra.mxu1 %v1484_v35  ;;  %2585 = vmatprep.subr.mxu0 %v771_v15  ;;  %v1842_v35 = vld [vmem:[#allocation11 + $0x2850] sm:$0xff]  ;;  %v1148_v15 = vld [vmem:[#allocation11 + $0x12a0] sm:$0xff] }
 0x2a9   : > { %2654 = vmatprep.subr.mxu1 %v1464_v60  ;;  %2586 = vmatpush1.msra.mxu0 %v770_v61  ;;  %v1841_v60 = vld [vmem:[#allocation11 + $0x2848] sm:$0xff] }
 0x2aa   : > { %2655 = vmatpush1.msra.mxu1 %v1463_v62  ;;  %2587 = vmatprep.subr.mxu0 %v750_v17  ;;  %v1128_v62 = vld [vmem:[#allocation11 + $0x1200] sm:$0xff]  ;;  %v1821_v17 = vld [vmem:[#allocation11 + $0x27a8] sm:$0xff] }
 0x2ab   : > { %2656 = vmatprep.subr.mxu1 %v1443_v33  ;;  %2588 = vmatpush1.msra.mxu0 %v749_v63  ;;  %v1127_v33 = vld [vmem:[#allocation11 + $0x11f8] sm:$0xff]  ;;  %v1820_v63 = vld [vmem:[#allocation11 + $0x27a0] sm:$0xff] }
 0x2ac   : > { %2657 = vmatpush1.msra.mxu1 %v1442_v28  ;;  %2589 = vmatprep.subr.mxu0 %v729_v1  ;;  %v1107_v28 = vld [vmem:[#allocation11 + $0x1158] sm:$0xff]  ;;  %v1800_v1 = vld [vmem:[#allocation11 + $0x2700] sm:$0xff] }
 0x2ad   : > { %2658 = vmatprep.subr.mxu1 %v1422_v5  ;;  %2590 = vmatpush1.msra.mxu0 %v728_v38  ;;  %v1106_v5 = vld [vmem:[#allocation11 + $0x1150] sm:$0xff]  ;;  %v1799_v38 = vld [vmem:[#allocation11 + $0x26f8] sm:$0xff] }
 0x2ae   : > { %2659 = vmatpush1.msra.mxu1 %v1421_v2  ;;  %2591 = vmatprep.subr.mxu0 %v708_v47  ;;  %v1086_v2 = vld [vmem:[#allocation11 + $0x10b0] sm:$0xff]  ;;  %v1779_v47 = vld [vmem:[#allocation11 + $0x2658] sm:$0xff] }
 0x2af   : > { %2660 = vmatprep.subr.mxu1 %v1401_v37  ;;  %2592 = vmatpush1.msra.mxu0 %v707_v43  ;;  %v1085_v37 = vld [vmem:[#allocation11 + $0x10a8] sm:$0xff]  ;;  %v1778_v43 = vld [vmem:[#allocation11 + $0x2650] sm:$0xff] }
 0x2b0   : > { %2661 = vmatpush1.msra.mxu1 %v1400_v16  ;;  %2593 = vmatprep.subr.mxu0 %v687_v56  ;;  %v1065_v56 = vld [vmem:[#allocation11 + $0x1008] sm:$0xff] }
 0x2b1   : > { %2662 = vmatprep.subr.mxu1 %v1380_v52  ;;  %2594 = vmatpush1.msra.mxu0 %v686_v39  ;;  %v1758_v52 = vld [vmem:[#allocation11 + $0x25b0] sm:$0xff]  ;;  %v1064_v39 = vld [vmem:[#allocation11 + $0x1000] sm:$0xff] }
 0x2b2   : > { %2663 = vmatpush1.msra.mxu1 %v1379_v12  ;;  %2595 = vmatprep.subr.mxu0 %v666_v18  ;;  %v1757_v12 = vld [vmem:[#allocation11 + $0x25a8] sm:$0xff]  ;;  %v1044_v18 = vld [vmem:[#allocation11 + $0xf60] sm:$0xff] }
 0x2b3   : > { %2664 = vmatprep.subr.mxu1 %v1359_v21  ;;  %2596 = vmatpush1.msra.mxu0 %v665_v54  ;;  %v1737_v21 = vld [vmem:[#allocation11 + $0x2508] sm:$0xff]  ;;  %v1043_v54 = vld [vmem:[#allocation11 + $0xf58] sm:$0xff] }
 0x2b4   : > { %2665 = vmatpush1.msra.mxu1 %v1358_v26  ;;  %2597 = vmatprep.subr.mxu0 %v645_v59  ;;  %v1736_v26 = vld [vmem:[#allocation11 + $0x2500] sm:$0xff] }
 0x2b5   : > { %2666 = vmatprep.subr.mxu1 %v1338_v20  ;;  %2598 = vmatpush1.msra.mxu0 %v644_v58  ;;  %v1023_v20 = vld [vmem:[#allocation11 + $0xeb8] sm:$0xff]  ;;  %v1716_v58 = vld [vmem:[#allocation11 + $0x2460] sm:$0xff] }
 0x2b6   : > { %2667 = vmatpush1.msra.mxu1 %v1337_v27  ;;  %2599 = vmatprep.subr.mxu0 %v624_v14  ;;  %v1022_v27 = vld [vmem:[#allocation11 + $0xeb0] sm:$0xff]  ;;  %v1715_v14 = vld [vmem:[#allocation11 + $0x2458] sm:$0xff] }
 0x2b7   : > { %2668 = vmatprep.subr.mxu1 %v1317_v53  ;;  %2600 = vmatpush1.msra.mxu0 %v623_v8  ;;  %v1002_v8 = vld [vmem:[#allocation11 + $0xe10] sm:$0xff] }
 0x2b8   : > { %2669 = vmatpush1.msra.mxu1 %v1316_v6  ;;  %2601 = vmatprep.subr.mxu0 %v603_v19  ;;  %v1695_v6 = vld [vmem:[#allocation11 + $0x23b8] sm:$0xff]  ;;  %v1001_v19 = vld [vmem:[#allocation11 + $0xe08] sm:$0xff] }
 0x2b9   : > { %2670 = vmatprep.subr.mxu1 %v1296_v9  ;;  %2602 = vmatpush1.msra.mxu0 %v602_v46  ;;  %v1694_v9 = vld [vmem:[#allocation11 + $0x23b0] sm:$0xff]  ;;  %v981_v46 = vld [vmem:[#allocation11 + $0xd68] sm:$0xff] }
 0x2ba   : > { %2671 = vmatpush1.msra.mxu1 %v1295_v57  ;;  %2603 = vmatprep.subr.mxu0 %v582_v30  ;;  %v1674_v57 = vld [vmem:[#allocation11 + $0x2310] sm:$0xff]  ;;  %v980_v30 = vld [vmem:[#allocation11 + $0xd60] sm:$0xff] }
 0x2bb   : > { %2672 = vmatprep.subr.mxu1 %v1275_v34  ;;  %2604 = vmatpush1.msra.mxu0 %v581_v36  ;;  %v1673_v34 = vld [vmem:[#allocation11 + $0x2308] sm:$0xff] }
 0x2bc   : > { %2673 = vmatpush1.msra.mxu1 %v1274_v3  ;;  %2605 = vmatprep.subr.mxu0 %v561_v13  ;;  %v7633_v59 = vpop.xlane.xlu1 %4090  ;;  %v960_v3 = vld [vmem:[#allocation11 + $0xcc0] sm:$0xff]  ;;  %v1653_v13 = vld [vmem:[#allocation11 + $0x2268] sm:$0xff] }
 0x2bd   : > { %2674 = vmatprep.subr.mxu1 %v1254_v10  ;;  %2606 = vmatpush1.msra.mxu0 %v560_v49  ;;  %v959_v10 = vld [vmem:[#allocation11 + $0xcb8] sm:$0xff]  ;;  %v1652_v49 = vld [vmem:[#allocation11 + $0x2260] sm:$0xff] }
 0x2be   : > { %2675 = vmatpush1.msra.mxu1 %v1253_v50  ;;  %2607 = vmatprep.subr.mxu0 %v1212_v31  ;;  %v939_v31 = vld [vmem:[#allocation11 + $0xc18] sm:$0xff] }
 0x2bf   : > { %2676 = vmatprep.subr.mxu1 %v1233_v44  ;;  %2608 = vmatpush2.msra.mxu0 %v1211_v0  ;;  %v1632_v44 = vld [vmem:[#allocation11 + $0x21c0] sm:$0xff]  ;;  %v938_v0 = vld [vmem:[#allocation11 + $0xc10] sm:$0xff] }
 0x2c0   : > { %2677 = vmatpush1.msra.mxu1 %v1232_v32  ;;  %2609 = vmatprep.subr.mxu0 %v1191_v55  ;;  %v7629_v61 = vpop.xlane.xlu0 %4080  ;;  %v1631_v32 = vld [vmem:[#allocation11 + $0x21b8] sm:$0xff]  ;;  %v918_v55 = vld [vmem:[#allocation11 + $0xb70] sm:$0xff] }
 0x2c1   : > { %2678 = vmatprep.subr.mxu1 %v1884_v48  ;;  %2610 = vmatpush2.msra.mxu0 %v1190_v45  ;;  %v1611_v48 = vld [vmem:[#allocation11 + $0x2118] sm:$0xff]  ;;  %v917_v45 = vld [vmem:[#allocation11 + $0xb68] sm:$0xff] }
 0x2c2   : > { %2679 = vmatpush2.msra.mxu1 %v1883_v51  ;;  %2611 = vmatprep.subr.mxu0 %v1170_v4  ;;  %v1610_v51 = vld [vmem:[#allocation11 + $0x2110] sm:$0xff] }
 0x2c3   : > { %2680 = vmatprep.subr.mxu1 %v1863_v7  ;;  %2612 = vmatpush2.msra.mxu0 %v1169_v41  ;;  %v897_v7 = vld [vmem:[#allocation11 + $0xac8] sm:$0xff]  ;;  %v1590_v41 = vld [vmem:[#allocation11 + $0x2070] sm:$0xff] }
 0x2c4   : > { %2681 = vmatpush2.msra.mxu1 %v1862_v42  ;;  %2613 = vmatprep.subr.mxu0 %v1149_v40  ;;  %v7637_v36 = vpop.xlane.xlu1 %4095  ;;  %v896_v42 = vld [vmem:[#allocation11 + $0xac0] sm:$0xff]  ;;  %v1589_v40 = vld [vmem:[#allocation11 + $0x2068] sm:$0xff] }
 0x2c5   : > { %2682 = vmatprep.subr.mxu1 %v1842_v35  ;;  %2614 = vmatpush2.msra.mxu0 %v1148_v15  ;;  %v1569_v15 = vld [vmem:[#allocation11 + $0x1fc8] sm:$0xff] }
 0x2c6   : > { %2683 = vmatpush2.msra.mxu1 %v1841_v60  ;;  %2615 = vmatprep.subr.mxu0 %v1128_v62  ;;  %v878_v60 = vld [vmem:[#allocation11 + $0xa30] sm:$0xff]  ;;  %v1568_v62 = vld [vmem:[#allocation11 + $0x1fc0] sm:$0xff] }
 0x2c7   : > { %2684 = vmatprep.subr.mxu1 %v1821_v17  ;;  %2616 = vmatpush2.msra.mxu0 %v1127_v33  ;;  %v877_v17 = vld [vmem:[#allocation11 + $0xa28] sm:$0xff]  ;;  %v7645_v33 = vld [vmem:[#allocation2] sm:$0xff] }
 0x2c8   : > { %2685 = vmatpush2.msra.mxu1 %v1820_v63  ;;  %2617 = vmatprep.subr.mxu0 %v1107_v28  ;;  %v7631_v16 = vpop.xlane.xlu0 %4085  ;;  %v857_v63 = vld [vmem:[#allocation11 + $0x988] sm:$0xff] }
 0x2c9   : > { %2686 = vmatprep.subr.mxu1 %v1800_v1  ;;  %2618 = vmatpush2.msra.mxu0 %v1106_v5  ;;  %v7650_v1 = vld [vmem:[#allocation2 + $0x10] sm:$0xff] }
 0x2ca   : > { %2687 = vmatpush2.msra.mxu1 %v1799_v38  ;;  %2619 = vmatprep.subr.mxu0 %v1086_v2  ;;  %v1550_v5 = vld [vmem:[#allocation11 + $0x1f30] sm:$0xff]  ;;  %v856_v38 = vld [vmem:[#allocation11 + $0x980] sm:$0xff]  ;;  %v1549_v2 = vld [vmem:[#allocation11 + $0x1f28] sm:$0xff] }
 0x2cb   : > { %2688 = vmatprep.subr.mxu1 %v1779_v47  ;;  %2620 = vmatpush2.msra.mxu0 %v1085_v37  ;;  %v7655_v37 = vld [vmem:[#allocation2 + $0x8] sm:$0xff] }
 0x2cc   : > { %2689 = vmatpush2.msra.mxu1 %v1778_v43  ;;  %2621 = vmatprep.subr.mxu0 %v1065_v56  ;;  %v7641_v4 = vpop.xlane.xlu1 %4125  ;;  %v836_v43 = vld [vmem:[#allocation11 + $0x8e0] sm:$0xff]  ;;  %v1529_v56 = vld [vmem:[#allocation11 + $0x1e88] sm:$0xff] }
 0x2cd   : > { %2690 = vmatprep.subr.mxu1 %v1758_v52  ;;  %2622 = vmatpush2.msra.mxu0 %v1064_v39  ;;  %v7658_v52 = vld [vmem:[#allocation2 + $0x18] sm:$0xff] }
 0x2ce   : > { %2691 = vmatpush2.msra.mxu1 %v1757_v12  ;;  %2623 = vmatprep.subr.mxu0 %v1044_v18  ;;  %v835_v39 = vld [vmem:[#allocation11 + $0x8d8] sm:$0xff]  ;;  %v1528_v12 = vld [vmem:[#allocation11 + $0x1e80] sm:$0xff] }
 0x2cf   : > { %2692 = vmatprep.subr.mxu1 %v1737_v21  ;;  %2624 = vmatpush2.msra.mxu0 %v1043_v54  ;;  %v815_v18 = vld [vmem:[#allocation11 + $0x838] sm:$0xff]  ;;  %v1508_v21 = vld [vmem:[#allocation11 + $0x1de0] sm:$0xff]  ;;  %v814_v54 = vld [vmem:[#allocation11 + $0x830] sm:$0xff] }
 0x2d0   : > { %v7635_v53 = vpop.xlane.xlu0 %4120  ;;  %2693 = vmatpush2.msra.mxu1 %v1736_v26  ;;  %2625 = vmatprep.subr.mxu0 %v1023_v20  ;;  %v1507_v26 = vld [vmem:[#allocation11 + $0x1dd8] sm:$0xff] }
 0x2d1   : > { %2694 = vmatprep.subr.mxu1 %v1716_v58  ;;  %2626 = vmatpush2.msra.mxu0 %v1022_v27  ;;  %v794_v58 = vld [vmem:[#allocation11 + $0x790] sm:$0xff]  ;;  %v1487_v27 = vld [vmem:[#allocation11 + $0x1d38] sm:$0xff] }
 0x2d2   : > { %2695 = vmatpush2.msra.mxu1 %v1715_v14  ;;  %2627 = vmatprep.subr.mxu0 %v1002_v8  ;;  %v793_v14 = vld [vmem:[#allocation11 + $0x788] sm:$0xff]  ;;  %v1486_v8 = vld [vmem:[#allocation11 + $0x1d30] sm:$0xff] }
 0x2d3   : > { %2696 = vmatprep.subr.mxu1 %v1695_v6  ;;  %2628 = vmatpush2.msra.mxu0 %v1001_v19  ;;  %v773_v19 = vld [vmem:[#allocation11 + $0x6e8] sm:$0xff] }
 0x2d4   : > { %2697 = vmatpush2.msra.mxu1 %v1694_v9  ;;  %2629 = vmatprep.subr.mxu0 %v981_v46  ;;  %v7648_v28 = vpop.xlane.xlu1 %4135  ;;  %v1466_v9 = vld [vmem:[#allocation11 + $0x1c90] sm:$0xff]  ;;  %v772_v46 = vld [vmem:[#allocation11 + $0x6e0] sm:$0xff] }
 0x2d5   : > { %2698 = vmatprep.subr.mxu1 %v1674_v57  ;;  %2630 = vmatpush2.msra.mxu0 %v980_v30  ;;  %v1465_v57 = vld [vmem:[#allocation11 + $0x1c88] sm:$0xff]  ;;  %v4200_v30 = vand.u32 127, %v1902_v22  ;;  %v710_v22 = vld [vmem:[#allocation11 + $0x4f0] sm:$0xff] }
 0x2d6   : > { %2699 = vmatpush2.msra.mxu1 %v1673_v34  ;;  %2631 = vmatprep.subr.mxu0 %v960_v3  ;;  %v752_v34 = vld [vmem:[#allocation11 + $0x640] sm:$0xff]  ;;  %v1445_v3 = vld [vmem:[#allocation11 + $0x1be8] sm:$0xff] }
 0x2d7   : > { %2700 = vmatprep.subr.mxu1 %v1653_v13  ;;  %2632 = vmatpush2.msra.mxu0 %v959_v10  ;;  %v751_v13 = vld [vmem:[#allocation11 + $0x638] sm:$0xff]  ;;  %v1444_v10 = vld [vmem:[#allocation11 + $0x1be0] sm:$0xff] }
 0x2d8   : > { %v7639_v50 = vpop.xlane.xlu0 %4130  ;;  %2701 = vmatpush2.msra.mxu1 %v1652_v49  ;;  %2633 = vmatprep.subr.mxu0 %v939_v31  ;;  %v731_v31 = vld [vmem:[#allocation11 + $0x598] sm:$0xff] }
 0x2d9   : > { %2702 = vmatprep.subr.mxu1 %v1632_v44  ;;  %2634 = vmatpush2.msra.mxu0 %v938_v0  ;;  %v1424_v44 = vld [vmem:[#allocation11 + $0x1b40] sm:$0xff]  ;;  %v730_v0 = vld [vmem:[#allocation11 + $0x590] sm:$0xff] }
 0x2da   : > { %2703 = vmatpush2.msra.mxu1 %v1631_v32  ;;  %2635 = vmatprep.subr.mxu0 %v918_v55  ;;  %v1423_v32 = vld [vmem:[#allocation11 + $0x1b38] sm:$0xff]  ;;  %v4205_v55 = vadd.s32 4294967288, %v4200_v30 }
 0x2db   : > { %2704 = vmatprep.subr.mxu1 %v1611_v48  ;;  %2636 = vmatpush2.msra.mxu0 %v917_v45  ;;  %v1403_v45 = vld [vmem:[#allocation11 + $0x1a98] sm:$0xff] }
 0x2dc   : > { %2705 = vmatpush2.msra.mxu1 %v1610_v51  ;;  %2637 = vmatprep.subr.mxu0 %v897_v7  ;;  %v7661_v20 = vpop.xlane.xlu1 %4105  ;;  %v709_v51 = vld [vmem:[#allocation11 + $0x4e8] sm:$0xff]  ;;  %v1402_v7 = vld [vmem:[#allocation11 + $0x1a90] sm:$0xff] }
 0x2dd   : > { %2706 = vmatprep.subr.mxu1 %v1590_v41  ;;  %2638 = vmatpush2.msra.mxu0 %v896_v42  ;;  %v689_v41 = vld [vmem:[#allocation11 + $0x448] sm:$0xff]  ;;  %v1382_v42 = vld [vmem:[#allocation11 + $0x19f0] sm:$0xff] }
 0x2de   : > { %2707 = vmatpush2.msra.mxu1 %v1589_v40  ;;  %2639 = vmatprep.mubr.f32.mxu0 %v7645_v33  ;;  %v7667_v40 = vsub.s32 %v4200_v30, %v7243_v23 }
 0x2df   : > { %2708 = vmatprep.subr.mxu1 %v1569_v15  ;;  %2717 = vmatprep.subr.mxu0 %v878_v60  ;;  %v7670_v15 = vsub.s32 %v4205_v55, %v7243_v23 }
 0x2e0   : > { %v7643_v35 = vpop.xlane.xlu0 %4100  ;;  %2640 = vmatmul.mubr.f32.vlgmr.msra.gmra.mxu0 %v7650_v1  ;;  %2709 = vmatpush2.msra.mxu1 %v1568_v62 }
 0x2e1   : > { %2718 = vmatpush1.msra.mxu0 %v877_v17  ;;  %2710 = vmatprep.mubr.f32.mxu1 %v7655_v37  ;;  %v688_v17 = vld [vmem:[#allocation11 + $0x440] sm:$0xff] }
 0x2e2   : > { %2719 = vmatprep.subr.mxu0 %v857_v63  ;;  %2788 = vmatprep.subr.mxu1 %v1550_v5 }
 0x2e3   : > { %2711 = vmatmul.mubr.f32.vlgmr.msra.gmra.mxu1 %v7658_v52  ;;  %2720 = vmatpush1.msra.mxu0 %v856_v38 }
 0x2e4   : > { %2789 = vmatpush1.msra.mxu1 %v1549_v2  ;;  %2721 = vmatprep.subr.mxu0 %v836_v43  ;;  %v4116_v49 = vpop.xlane.xlu1 %4115  ;;  %v1381_v43 = vld [vmem:[#allocation11 + $0x19e8] sm:$0xff] }
 0x2e5   : > { %2790 = vmatprep.subr.mxu1 %v1529_v56  ;;  %2722 = vmatpush1.msra.mxu0 %v835_v39 }
 0x2e6   : > { %2791 = vmatpush1.msra.mxu1 %v1528_v12  ;;  %2723 = vmatprep.subr.mxu0 %v815_v18 }
 0x2e7   : > { %2792 = vmatprep.subr.mxu1 %v1508_v21  ;;  %2724 = vmatpush1.msra.mxu0 %v814_v54 }
 0x2e8   : > { %v7653_v47 = vpop.xlane.xlu0 %4110  ;;  %2793 = vmatpush1.msra.mxu1 %v1507_v26  ;;  %2725 = vmatprep.subr.mxu0 %v794_v58 }
 0x2e9   : > { %2794 = vmatprep.subr.mxu1 %v1487_v27  ;;  %2726 = vmatpush1.msra.mxu0 %v793_v14 }
 0x2ea   : > { %2795 = vmatpush1.msra.mxu1 %v1486_v8  ;;  %2727 = vmatprep.subr.mxu0 %v773_v19  ;;  %v647_v19 = vld [vmem:[#allocation11 + $0x2f8] sm:$0xff] }
 0x2eb   : > { %2796 = vmatprep.subr.mxu1 %v1466_v9  ;;  %2728 = vmatpush1.msra.mxu0 %v772_v46 }
 0x2ec   : > { %2797 = vmatpush1.msra.mxu1 %v1465_v57  ;;  %2729 = vmatprep.subr.mxu0 %v752_v34  ;;  %v4146_v60 = vpop.xlane.xlu1 %4145  ;;  %v1340_v34 = vld [vmem:[#allocation11 + $0x18a0] sm:$0xff] }
 0x2ed   : > { %2798 = vmatprep.subr.mxu1 %v1445_v3  ;;  %2730 = vmatpush1.msra.mxu0 %v751_v13  ;;  %v646_v3 = vld [vmem:[#allocation11 + $0x2f0] sm:$0xff] }
 0x2ee   : > { %2799 = vmatpush1.msra.mxu1 %v1444_v10  ;;  %2731 = vmatprep.subr.mxu0 %v731_v31  ;;  %v1339_v31 = vld [vmem:[#allocation11 + $0x1898] sm:$0xff] }
 0x2ef   : > { %2800 = vmatprep.subr.mxu1 %v1424_v44  ;;  %2732 = vmatpush1.msra.mxu0 %v730_v0  ;;  %v626_v44 = vld [vmem:[#allocation11 + $0x250] sm:$0xff] }
 0x2f0   : > { %v7663_v6 = vpop.xlane.xlu0 %4140  ;;  %2801 = vmatpush1.msra.mxu1 %v1423_v32  ;;  %2733 = vmatprep.subr.mxu0 %v710_v22  ;;  %v625_v22 = vld [vmem:[#allocation11 + $0x248] sm:$0xff] }
 0x2f1   : > { %2802 = vmatprep.subr.mxu1 %v1403_v45  ;;  %2734 = vmatpush1.msra.mxu0 %v709_v51 }
 0x2f2   : > { %2803 = vmatpush1.msra.mxu1 %v1402_v7  ;;  %2735 = vmatprep.subr.mxu0 %v689_v41  ;;  %v1318_v41 = vld [vmem:[#allocation11 + $0x17f0] sm:$0xff] }
 0x2f3   : > { %2804 = vmatprep.subr.mxu1 %v1382_v42  ;;  %2736 = vmatpush1.msra.mxu0 %v688_v17  ;;  %v605_v42 = vld [vmem:[#allocation11 + $0x1a8] sm:$0xff] }
 0x2f4   : > { %2805 = vmatpush1.msra.mxu1 %v1381_v43  ;;  %v4156_v58 = vpop.xlane.xlu1 %4155  ;;  %v1298_v43 = vld [vmem:[#allocation11 + $0x1750] sm:$0xff]  ;;  %2781 = vmatprep.mubr.f32.mxu0 %v7645_v33  ;;  %v7769_v33 = vld [vmem:[#allocation13] sm:$0xff] }
 0x2f5   : > { %2852 = vmatprep.mubr.f32.mxu1 %v7655_v37 }
 0x2f8   : > { %v4151_v48 = vpop.xlane.xlu0 %4150 }
 0x300   : > { %v4165_v62 = vpop.permute.xlu0 %4164 }
 0x301   : > { %v7673_v63 = vadd.f32 %v4165_v62, %v7629_v61  ;;  %v7676_v5 = vadd.f32 %v4165_v62, %v7631_v16  ;;  %v7679_v38 = vadd.f32 %v4165_v62, %v7633_v59  ;;  %v7682_v2 = vadd.f32 %v4165_v62, %v7637_v36  ;;  %v668_v16 = vld [vmem:[#allocation11 + $0x3a0] sm:$0xff] }
 0x302   : > { %v7685_v56 = vadd.f32 %v4165_v62, %v7643_v35  ;;  %v7688_v39 = vadd.f32 %v4165_v62, %v7661_v20  ;;  %v7691_v61 = vadd.f32 %v4165_v62, %v7653_v47  ;;  %v7693_v12 = vadd.f32 %v4165_v62, %v4116_v49  ;;  %v1361_v35 = vld [vmem:[#allocation11 + $0x1948] sm:$0xff]  ;;  %2737 = vmatprep.subr.mxu0 %v668_v16  ;;  %v1360_v20 = vld [vmem:[#allocation11 + $0x1940] sm:$0xff] }
 0x303   : > { %v7696_v59 = vadd.f32 %v4165_v62, %v7635_v53  ;;  %v7699_v36 = vadd.f32 %v4165_v62, %v7641_v4  ;;  %v7702_v18 = vadd.f32 %v4165_v62, %v7639_v50  ;;  %v7705_v47 = vadd.f32 %v4165_v62, %v7648_v28  ;;  %v667_v53 = vld [vmem:[#allocation11 + $0x398] sm:$0xff]  ;;  %2806 = vmatprep.subr.mxu1 %v1361_v35  ;;  %v604_v16 = vld [vmem:[#allocation11 + $0x1a0] sm:$0xff] }
 0x304   : > { %v7708_v21 = vadd.f32 %v4165_v62, %v7663_v6  ;;  %v7710_v54 = vadd.f32 %v4165_v62, %v4146_v60  ;;  %v4204_v4 = vrot.slane %v7673_v63, %v7667_v40  ;;  %v4209_v26 = vrot.slane %v7676_v5, %v7670_v15  ;;  %2738 = vmatpush1.msra.mxu0 %v667_v53 }
 0x305   : > { %v4215_v50 = vrot.slane %v7679_v38, %v7667_v40  ;;  %v4219_v28 = vrot.slane %v7682_v2, %v7670_v15  ;;  %v4224_v27 = vrot.slane %v7685_v56, %v7667_v40  ;;  %v4228_v14 = vrot.slane %v7688_v39, %v7670_v15  ;;  %2807 = vmatpush1.msra.mxu1 %v1360_v20  ;;  %v1277_v20 = vld [vmem:[#allocation11 + $0x16a8] sm:$0xff] }
 0x306   : > { %v4233_v8 = vrot.slane %v7691_v61, %v7667_v40  ;;  %v4237_v6 = vrot.slane %v7693_v12, %v7670_v15  ;;  %v7728_v9 = vadd.f32 %v4165_v62, %v4151_v48  ;;  %v7730_v46 = vadd.f32 %v4165_v62, %v4156_v58  ;;  %2739 = vmatprep.subr.mxu0 %v647_v19  ;;  %v1319_v48 = vld [vmem:[#allocation11 + $0x17f8] sm:$0xff] }
 0x307   : > { %v4211_v57 = vsel %vm4210_vm0, %v4209_v26, %v4204_v4  ;;  %v4220_v30 = vsel %vm4210_vm0, %v4219_v28, %v4215_v50  ;;  %v4229_v13 = vsel %vm4210_vm0, %v4228_v14, %v4224_v27  ;;  %v4242_v10 = vrot.slane %v7696_v59, %v7667_v40  ;;  %2808 = vmatprep.subr.mxu1 %v1340_v34  ;;  %v1297_v4 = vld [vmem:[#allocation11 + $0x1748] sm:$0xff]  ;;  %v584_v26 = vld [vmem:[#allocation11 + $0x100] sm:$0xff]  ;;  %v583_v58 = vld [vmem:[#allocation11 + $0xf8] sm:$0xff] }
 0x308   : > { %v4246_v49 = vrot.slane %v7699_v36, %v7670_v15  ;;  %v4238_v0 = vsel %vm4210_vm0, %v4237_v6, %v4233_v8  ;;  %v4251_v32 = vrot.slane %v7702_v18, %v7667_v40  ;;  %v4255_v55 = vrot.slane %v7705_v47, %v7670_v15  ;;  %2740 = vmatpush1.msra.mxu0 %v646_v3  ;;  %v1276_v8 = vld [vmem:[#allocation11 + $0x16a0] sm:$0xff]  ;;  %v563_v6 = vld [vmem:[#allocation11 + $0x58] sm:$0xff]  ;;  %v562_v3 = vld [vmem:[#allocation11 + $0x50] sm:$0xff] }
 0x309   : > { %v4260_v45 = vrot.slane %v7708_v21, %v7667_v40  ;;  %v4264_v51 = vrot.slane %v7710_v54, %v7670_v15  ;;  %v4276_v7 = vsel %vm4275_vm1, %v4220_v30, %v4211_v57  ;;  %v4269_v60 = vrot.slane %v7728_v9, %v7667_v40  ;;  %2809 = vmatpush1.msra.mxu1 %v1339_v31  ;;  %v1256_v30 = vld [vmem:[#allocation11 + $0x1600] sm:$0xff]  ;;  %v1235_v31 = vld [vmem:[#allocation11 + $0x1558] sm:$0xff] }
 0x30a   : > { %v4273_v62 = vrot.slane %v7730_v46, %v7670_v15  ;;  %v4278_v17 = vsel %vm4277_vm2, %v4229_v13, %v4276_v7  ;;  %2741 = vmatprep.subr.mxu0 %v626_v44  ;;  %v4247_v35 = vsel %vm4210_vm0, %v4246_v49, %v4242_v10  ;;  %2810 = vmatprep.subr.mxu1 %v1319_v48  ;;  %v1255_v13 = vld [vmem:[#allocation11 + $0x15f8] sm:$0xff]  ;;  %v1214_v49 = vld [vmem:[#allocation11 + $0x14b0] sm:$0xff]  ;;  %v1213_v44 = vld [vmem:[#allocation11 + $0x14a8] sm:$0xff] }
 0x30b   : > { %v4280_v53 = vsel %vm4279_vm3, %v4238_v0, %v4278_v17  ;;  %2742 = vmatpush1.msra.mxu0 %v625_v22  ;;  %v4256_v50 = vsel %vm4210_vm0, %v4255_v55, %v4251_v32  ;;  %2811 = vmatpush1.msra.mxu1 %v1318_v41  ;;  %v4265_v27 = vsel %vm4210_vm0, %v4264_v51, %v4260_v45  ;;  %v1234_v0 = vld [vmem:[#allocation11 + $0x1550] sm:$0xff]  ;;  %v1193_v32 = vld [vmem:[#allocation11 + $0x1408] sm:$0xff]  ;;  %v1192_v48 = vld [vmem:[#allocation11 + $0x1400] sm:$0xff] }
 0x30c   : > { %v4282_v28 = vsel %vm4281_vm4, %v4247_v35, %v4280_v53  ;;  %2743 = vmatprep.subr.mxu0 %v605_v42  ;;  %2812 = vmatprep.subr.mxu1 %v1298_v43  ;;  %v4274_v19 = vsel %vm4210_vm0, %v4273_v62, %v4269_v60  ;;  %v1886_v55 = vld [vmem:[#allocation11 + $0x29b0] sm:$0xff]  ;;  %v1885_v22 = vld [vmem:[#allocation11 + $0x29a8] sm:$0xff]  ;;  %v1172_v45 = vld [vmem:[#allocation11 + $0x1360] sm:$0xff] }
 0x30d   : > { %v4284_v14 = vsel %vm4283_vm5, %v4256_v50, %v4282_v28  ;;  %2744 = vmatpush1.msra.mxu0 %v604_v16  ;;  %2813 = vmatpush1.msra.mxu1 %v1297_v4  ;;  %v1865_v51 = vld [vmem:[#allocation11 + $0x2908] sm:$0xff]  ;;  %v1171_v7 = vld [vmem:[#allocation11 + $0x1358] sm:$0xff]  ;;  %v1864_v41 = vld [vmem:[#allocation11 + $0x2900] sm:$0xff] }
 0x30e   : > { %v4286_v57 = vsel %vm4285_vm6, %v4265_v27, %v4284_v14  ;;  %2745 = vmatprep.subr.mxu0 %v584_v26  ;;  %2814 = vmatprep.subr.mxu1 %v1277_v20  ;;  %v1151_v42 = vld [vmem:[#allocation11 + $0x12b8] sm:$0xff]  ;;  %v1844_v60 = vld [vmem:[#allocation11 + $0x2860] sm:$0xff]  ;;  %v1150_v62 = vld [vmem:[#allocation11 + $0x12b0] sm:$0xff] }
 0x30f   : > { %v4288_v34 = vsel %vm4287_vm7, %v4274_v19, %v4286_v57  ;;  %2746 = vmatpush1.msra.mxu0 %v583_v58  ;;  %2815 = vmatpush1.msra.mxu1 %v1276_v8  ;;  %v1843_v17 = vld [vmem:[#allocation11 + $0x2858] sm:$0xff]  ;;  %v1130_v43 = vld [vmem:[#allocation11 + $0x1210] sm:$0xff]  ;;  %v1129_v35 = vld [vmem:[#allocation11 + $0x1208] sm:$0xff] }
 0x310   : > { %v4291_v10 = vsel %vm4290_vm8, %v4288_v34, -inf  ;;  %2747 = vmatprep.subr.mxu0 %v563_v6  ;;  %2816 = vmatprep.subr.mxu1 %v1256_v30  ;;  %v1823_v16 = vld [vmem:[#allocation11 + $0x27b8] sm:$0xff]  ;;  %v1822_v53 = vld [vmem:[#allocation11 + $0x27b0] sm:$0xff]  ;;  %v1109_v4 = vld [vmem:[#allocation11 + $0x1168] sm:$0xff] }
 0x311   : > { %4292 = vmax.xlane.f32.xlu1 %v4291_v10  ;;  %2748 = vmatpush1.msra.mxu0 %v562_v3  ;;  %v1802_v26 = vld [vmem:[#allocation11 + $0x2710] sm:$0xff]  ;;  %v1108_v50 = vld [vmem:[#allocation11 + $0x1160] sm:$0xff]  ;;  %v1801_v28 = vld [vmem:[#allocation11 + $0x2708] sm:$0xff]  ;;  %v2357_v10 = vpop.f32.mrf.mxu0 }
 0x312   : > { %2817 = vmatpush1.msra.mxu1 %v1255_v13  ;;  %2749 = vmatprep.subr.mxu0 %v1214_v49  ;;  %v1088_v20 = vld [vmem:[#allocation11 + $0x10c0] sm:$0xff]  ;;  %v1781_v58 = vld [vmem:[#allocation11 + $0x2668] sm:$0xff]  ;;  %v1087_v27 = vld [vmem:[#allocation11 + $0x10b8] sm:$0xff]  ;;  %v7767_v13 = vsub.s32 4, %v7243_v23 }
 0x313   : > { %2818 = vmatprep.subr.mxu1 %v1235_v31  ;;  %2750 = vmatpush2.msra.mxu0 %v1213_v44  ;;  %v1780_v14 = vld [vmem:[#allocation11 + $0x2660] sm:$0xff]  ;;  %v1067_v8 = vld [vmem:[#allocation11 + $0x1018] sm:$0xff]  ;;  %v1066_v19 = vld [vmem:[#allocation11 + $0x1010] sm:$0xff] }
 0x314   : > { %2819 = vmatpush1.msra.mxu1 %v1234_v0  ;;  %2751 = vmatprep.subr.mxu0 %v1193_v32  ;;  %v1760_v6 = vld [vmem:[#allocation11 + $0x25c0] sm:$0xff]  ;;  %v1759_v57 = vld [vmem:[#allocation11 + $0x25b8] sm:$0xff]  ;;  %v1046_v30 = vld [vmem:[#allocation11 + $0xf70] sm:$0xff]  ;;  %v1921_v37 = vrot.slane %v7769_v33, %v7767_v13 }
 0x315   : > { %2820 = vmatprep.subr.mxu1 %v1886_v55  ;;  %2752 = vmatpush2.msra.mxu0 %v1192_v48  ;;  %v1739_v34 = vld [vmem:[#allocation11 + $0x2518] sm:$0xff]  ;;  %v1045_v3 = vld [vmem:[#allocation11 + $0xf68] sm:$0xff]  ;;  %v1738_v49 = vld [vmem:[#allocation11 + $0x2510] sm:$0xff]  ;;  %v7774_v48 = vsub.s32 5, %v7243_v23 }
 0x316   : > { %2821 = vmatpush2.msra.mxu1 %v1885_v22  ;;  %2753 = vmatprep.subr.mxu0 %v1172_v45  ;;  %v1025_v31 = vld [vmem:[#allocation11 + $0xec8] sm:$0xff]  ;;  %v1718_v44 = vld [vmem:[#allocation11 + $0x2470] sm:$0xff]  ;;  %v1024_v0 = vld [vmem:[#allocation11 + $0xec0] sm:$0xff] }
 0x317   : > { %2822 = vmatprep.subr.mxu1 %v1865_v51  ;;  %2754 = vmatpush2.msra.mxu0 %v1171_v7  ;;  %v1717_v32 = vld [vmem:[#allocation11 + $0x2468] sm:$0xff]  ;;  %v1004_v55 = vld [vmem:[#allocation11 + $0xe20] sm:$0xff]  ;;  %v1003_v45 = vld [vmem:[#allocation11 + $0xe18] sm:$0xff] }
 0x318   : > { %2823 = vmatpush2.msra.mxu1 %v1864_v41  ;;  %2755 = vmatprep.subr.mxu0 %v1151_v42  ;;  %v1697_v22 = vld [vmem:[#allocation11 + $0x23c8] sm:$0xff]  ;;  %v1696_v51 = vld [vmem:[#allocation11 + $0x23c0] sm:$0xff]  ;;  %v983_v7 = vld [vmem:[#allocation11 + $0xd78] sm:$0xff]  ;;  %v2358_v42 = vadd.f32 %v2357_v10, %v1921_v37 }
 0x319   : > { %2824 = vmatprep.subr.mxu1 %v1844_v60  ;;  %2756 = vmatpush2.msra.mxu0 %v1150_v62  ;;  %v1676_v41 = vld [vmem:[#allocation11 + $0x2320] sm:$0xff]  ;;  %v1925_v60 = vrot.slane %v7769_v33, %v7774_v48  ;;  %v2359_v62 = vpop.f32.mrf.mxu0 }
 0x31a   : > { %2825 = vmatpush2.msra.mxu1 %v1843_v17  ;;  %2757 = vmatprep.subr.mxu0 %v1130_v43  ;;  %v982_v17 = vld [vmem:[#allocation11 + $0xd70] sm:$0xff]  ;;  %v1675_v43 = vld [vmem:[#allocation11 + $0x2318] sm:$0xff]  ;;  %v1592_v10 = vld [vmem:[#allocation11 + $0x2080] sm:$0xff] }
 0x31b   : > { %2826 = vmatprep.subr.mxu1 %v1823_v16  ;;  %2758 = vmatpush2.msra.mxu0 %v1129_v35  ;;  %v2428_v16 = vpop.f32.mrf.mxu1  ;;  %v962_v35 = vld [vmem:[#allocation11 + $0xcd0] sm:$0xff]  ;;  %v1552_v37 = vld [vmem:[#allocation11 + $0x1f40] sm:$0xff] }
 0x31c   : > { %2827 = vmatpush2.msra.mxu1 %v1822_v53  ;;  %2759 = vmatprep.subr.mxu0 %v1109_v4  ;;  %v1655_v53 = vld [vmem:[#allocation11 + $0x2278] sm:$0xff]  ;;  %v7778_v4 = vadd.f32 %v2428_v16, %v2358_v42  ;;  %v837_v42 = vld [vmem:[#allocation11 + $0x8e8] sm:$0xff]  ;;  %v796_v16 = vld [vmem:[#allocation11 + $0x7a0] sm:$0xff] }
 0x31d   : > { %2828 = vmatprep.subr.mxu1 %v1802_v26  ;;  %2760 = vmatpush2.msra.mxu0 %v1108_v50  ;;  %v961_v26 = vld [vmem:[#allocation11 + $0xcc8] sm:$0xff]  ;;  %v1654_v50 = vld [vmem:[#allocation11 + $0x2270] sm:$0xff] }
 0x31e   : > { %2829 = vmatpush2.msra.mxu1 %v1801_v28  ;;  %2761 = vmatprep.subr.mxu0 %v1088_v20  ;;  %v2360_v28 = vadd.f32 %v2359_v62, %v1925_v60  ;;  %v941_v20 = vld [vmem:[#allocation11 + $0xc28] sm:$0xff]  ;;  %v1530_v60 = vld [vmem:[#allocation11 + $0x1e90] sm:$0xff] }
 0x31f   : > { %2830 = vmatprep.subr.mxu1 %v1781_v58  ;;  %2762 = vmatpush2.msra.mxu0 %v1087_v27  ;;  %v1634_v58 = vld [vmem:[#allocation11 + $0x21d0] sm:$0xff]  ;;  %v940_v27 = vld [vmem:[#allocation11 + $0xc20] sm:$0xff]  ;;  %v817_v62 = vld [vmem:[#allocation11 + $0x848] sm:$0xff] }
 0x320   : > { %2831 = vmatpush2.msra.mxu1 %v1780_v14  ;;  %2763 = vmatprep.subr.mxu0 %v1067_v8  ;;  %v1633_v14 = vld [vmem:[#allocation11 + $0x21c8] sm:$0xff]  ;;  %v920_v8 = vld [vmem:[#allocation11 + $0xb80] sm:$0xff] }
 0x321   : > { %2832 = vmatprep.subr.mxu1 %v1760_v6  ;;  %2764 = vmatpush2.msra.mxu0 %v1066_v19  ;;  %v1613_v6 = vld [vmem:[#allocation11 + $0x2128] sm:$0xff]  ;;  %v2430_v19 = vpop.f32.mrf.mxu1 }
 0x322   : > { %2833 = vmatpush2.msra.mxu1 %v1759_v57  ;;  %2765 = vmatprep.subr.mxu0 %v1046_v30  ;;  %v919_v57 = vld [vmem:[#allocation11 + $0xb78] sm:$0xff]  ;;  %v1612_v30 = vld [vmem:[#allocation11 + $0x2120] sm:$0xff] }
 0x323   : > { %2834 = vmatprep.subr.mxu1 %v1739_v34  ;;  %2766 = vmatpush2.msra.mxu0 %v1045_v3  ;;  %v7780_v34 = vadd.f32 %v2430_v19, %v2360_v28  ;;  %v899_v3 = vld [vmem:[#allocation11 + $0xad8] sm:$0xff]  ;;  %v774_v28 = vld [vmem:[#allocation11 + $0x6f0] sm:$0xff] }
 0x324   : > { %2835 = vmatpush2.msra.mxu1 %v1738_v49  ;;  %2767 = vmatprep.subr.mxu0 %v1025_v31  ;;  %v898_v49 = vld [vmem:[#allocation11 + $0xad0] sm:$0xff]  ;;  %v1591_v31 = vld [vmem:[#allocation11 + $0x2078] sm:$0xff] }
 0x325   : > { %2836 = vmatprep.subr.mxu1 %v1718_v44  ;;  %2768 = vmatpush2.msra.mxu0 %v1024_v0  ;;  %v1571_v44 = vld [vmem:[#allocation11 + $0x1fd8] sm:$0xff]  ;;  %v880_v0 = vld [vmem:[#allocation11 + $0xa40] sm:$0xff]  ;;  %v1426_v19 = vld [vmem:[#allocation11 + $0x1b50] sm:$0xff] }
 0x326   : > { %2837 = vmatpush2.msra.mxu1 %v1717_v32  ;;  %2769 = vmatprep.subr.mxu0 %v1004_v55  ;;  %v1570_v32 = vld [vmem:[#allocation11 + $0x1fd0] sm:$0xff]  ;;  %v879_v55 = vld [vmem:[#allocation11 + $0xa38] sm:$0xff] }
 0x327   : > { %2838 = vmatprep.subr.mxu1 %v1697_v22  ;;  %2770 = vmatpush2.msra.mxu0 %v1003_v45  ;;  %v859_v22 = vld [vmem:[#allocation11 + $0x998] sm:$0xff]  ;;  %v858_v45 = vld [vmem:[#allocation11 + $0x990] sm:$0xff] }
 0x328   : > { %2839 = vmatpush2.msra.mxu1 %v1696_v51  ;;  %2771 = vmatprep.subr.mxu0 %v983_v7  ;;  %v1551_v51 = vld [vmem:[#allocation11 + $0x1f38] sm:$0xff]  ;;  %v838_v7 = vld [vmem:[#allocation11 + $0x8f0] sm:$0xff] }
 0x329   : > { %2840 = vmatprep.subr.mxu1 %v1676_v41  ;;  %2772 = vmatpush2.msra.mxu0 %v982_v17  ;;  %v1531_v41 = vld [vmem:[#allocation11 + $0x1e98] sm:$0xff]  ;;  %v1510_v17 = vld [vmem:[#allocation11 + $0x1df0] sm:$0xff] }
 0x32a   : > { %2841 = vmatpush2.msra.mxu1 %v1675_v43  ;;  %2773 = vmatprep.subr.mxu0 %v962_v35  ;;  %v816_v43 = vld [vmem:[#allocation11 + $0x840] sm:$0xff]  ;;  %v1489_v35 = vld [vmem:[#allocation11 + $0x1d48] sm:$0xff] }
 0x32b   : > { %2842 = vmatprep.subr.mxu1 %v1655_v53  ;;  %2774 = vmatpush2.msra.mxu0 %v961_v26  ;;  %v795_v53 = vld [vmem:[#allocation11 + $0x798] sm:$0xff]  ;;  %v1488_v26 = vld [vmem:[#allocation11 + $0x1d40] sm:$0xff] }
 0x32c   : > { %2843 = vmatpush2.msra.mxu1 %v1654_v50  ;;  %2775 = vmatprep.subr.mxu0 %v941_v20  ;;  %v1468_v50 = vld [vmem:[#allocation11 + $0x1ca0] sm:$0xff]  ;;  %v1467_v20 = vld [vmem:[#allocation11 + $0x1c98] sm:$0xff] }
 0x32d   : > { %2844 = vmatprep.subr.mxu1 %v1634_v58  ;;  %2776 = vmatpush2.msra.mxu0 %v940_v27  ;;  %v754_v58 = vld [vmem:[#allocation11 + $0x650] sm:$0xff]  ;;  %v1447_v27 = vld [vmem:[#allocation11 + $0x1bf8] sm:$0xff] }
 0x32e   : > { %2845 = vmatpush2.msra.mxu1 %v1633_v14  ;;  %2777 = vmatprep.subr.mxu0 %v920_v8  ;;  %v753_v14 = vld [vmem:[#allocation11 + $0x648] sm:$0xff]  ;;  %v1446_v8 = vld [vmem:[#allocation11 + $0x1bf0] sm:$0xff] }
 0x32f   : > { %2846 = vmatprep.subr.mxu1 %v1613_v6  ;;  %2778 = vmatpush2.msra.mxu0 %v919_v57  ;;  %v733_v6 = vld [vmem:[#allocation11 + $0x5a8] sm:$0xff]  ;;  %v732_v57 = vld [vmem:[#allocation11 + $0x5a0] sm:$0xff] }
 0x330   : > { %2847 = vmatpush2.msra.mxu1 %v1612_v30  ;;  %2779 = vmatprep.subr.mxu0 %v899_v3  ;;  %v1425_v30 = vld [vmem:[#allocation11 + $0x1b48] sm:$0xff]  ;;  %v712_v3 = vld [vmem:[#allocation11 + $0x500] sm:$0xff] }
 0x331   : > { %2848 = vmatprep.subr.mxu1 %v1592_v10  ;;  %2780 = vmatpush2.msra.mxu0 %v898_v49  ;;  %v1405_v10 = vld [vmem:[#allocation11 + $0x1aa8] sm:$0xff]  ;;  %v711_v49 = vld [vmem:[#allocation11 + $0x4f8] sm:$0xff] }
 0x332   : > { %2849 = vmatpush2.msra.mxu1 %v1591_v31  ;;  %2859 = vmatprep.subr.mxu0 %v880_v0  ;;  %v1404_v31 = vld [vmem:[#allocation11 + $0x1aa0] sm:$0xff] }
 0x333   : > { %2850 = vmatprep.subr.mxu1 %v1571_v44  ;;  %2782 = vmatmul.mubr.f32.vlgmr.msra.gmra.mxu0 %v7650_v1  ;;  %v1509_v1 = vld [vmem:[#allocation11 + $0x1de8] sm:$0xff]  ;;  %v691_v44 = vld [vmem:[#allocation11 + $0x458] sm:$0xff]  ;;  %v1384_v0 = vld [vmem:[#allocation11 + $0x1a00] sm:$0xff] }
 0x334   : > { %2851 = vmatpush2.msra.mxu1 %v1570_v32  ;;  %2860 = vmatpush1.msra.mxu0 %v879_v55  ;;  %v690_v32 = vld [vmem:[#allocation11 + $0x450] sm:$0xff]  ;;  %v1383_v55 = vld [vmem:[#allocation11 + $0x19f8] sm:$0xff] }
 0x335   : > { %2930 = vmatprep.subr.mxu1 %v1552_v37  ;;  %2861 = vmatprep.subr.mxu0 %v859_v22  ;;  %v670_v37 = vld [vmem:[#allocation11 + $0x3b0] sm:$0xff]  ;;  %v1363_v22 = vld [vmem:[#allocation11 + $0x1958] sm:$0xff] }
 0x336   : > { %2853 = vmatmul.mubr.f32.vlgmr.msra.gmra.mxu1 %v7658_v52  ;;  %2862 = vmatpush1.msra.mxu0 %v858_v45  ;;  %v775_v52 = vld [vmem:[#allocation11 + $0x6f8] sm:$0xff]  ;;  %v669_v45 = vld [vmem:[#allocation11 + $0x3a8] sm:$0xff] }
 0x337   : > { %2931 = vmatpush1.msra.mxu1 %v1551_v51  ;;  %2863 = vmatprep.subr.mxu0 %v838_v7  ;;  %v1362_v51 = vld [vmem:[#allocation11 + $0x1950] sm:$0xff]  ;;  %v649_v7 = vld [vmem:[#allocation11 + $0x308] sm:$0xff] }
 0x338   : > { %2932 = vmatprep.subr.mxu1 %v1531_v41  ;;  %2864 = vmatpush1.msra.mxu0 %v837_v42  ;;  %v1342_v41 = vld [vmem:[#allocation11 + $0x18b0] sm:$0xff]  ;;  %v648_v42 = vld [vmem:[#allocation11 + $0x300] sm:$0xff] }
 0x339   : > { %2933 = vmatpush1.msra.mxu1 %v1530_v60  ;;  %2865 = vmatprep.subr.mxu0 %v817_v62  ;;  %v1341_v60 = vld [vmem:[#allocation11 + $0x18a8] sm:$0xff]  ;;  %v628_v62 = vld [vmem:[#allocation11 + $0x260] sm:$0xff] }
 0x33a   : > { %2934 = vmatprep.subr.mxu1 %v1510_v17  ;;  %2866 = vmatpush1.msra.mxu0 %v816_v43  ;;  %v1321_v17 = vld [vmem:[#allocation11 + $0x1808] sm:$0xff]  ;;  %v627_v43 = vld [vmem:[#allocation11 + $0x258] sm:$0xff] }
 0x33b   : > { %2935 = vmatpush1.msra.mxu1 %v1509_v1  ;;  %2867 = vmatprep.subr.mxu0 %v796_v16  ;;  %v1320_v1 = vld [vmem:[#allocation11 + $0x1800] sm:$0xff]  ;;  %v607_v16 = vld [vmem:[#allocation11 + $0x1b8] sm:$0xff] }
 0x33c   : > { %2936 = vmatprep.subr.mxu1 %v1489_v35  ;;  %2868 = vmatpush1.msra.mxu0 %v795_v53  ;;  %v1300_v35 = vld [vmem:[#allocation11 + $0x1760] sm:$0xff]  ;;  %v606_v53 = vld [vmem:[#allocation11 + $0x1b0] sm:$0xff] }
 0x33d   : > { %2937 = vmatpush1.msra.mxu1 %v1488_v26  ;;  %2869 = vmatprep.subr.mxu0 %v775_v52  ;;  %v1299_v26 = vld [vmem:[#allocation11 + $0x1758] sm:$0xff]  ;;  %v586_v52 = vld [vmem:[#allocation11 + $0x110] sm:$0xff] }
 0x33e   : > { %2938 = vmatprep.subr.mxu1 %v1468_v50  ;;  %2870 = vmatpush1.msra.mxu0 %v774_v28  ;;  %v1279_v50 = vld [vmem:[#allocation11 + $0x16b8] sm:$0xff]  ;;  %v585_v28 = vld [vmem:[#allocation11 + $0x108] sm:$0xff] }
 0x33f   : > { %2939 = vmatpush1.msra.mxu1 %v1467_v20  ;;  %2871 = vmatprep.subr.mxu0 %v754_v58  ;;  %v1278_v20 = vld [vmem:[#allocation11 + $0x16b0] sm:$0xff]  ;;  %v565_v58 = vld [vmem:[#allocation11 + $0x68] sm:$0xff] }
 0x340   : > { %2940 = vmatprep.subr.mxu1 %v1447_v27  ;;  %2872 = vmatpush1.msra.mxu0 %v753_v14  ;;  %v1258_v27 = vld [vmem:[#allocation11 + $0x1610] sm:$0xff]  ;;  %v564_v14 = vld [vmem:[#allocation11 + $0x60] sm:$0xff] }
 0x341   : > { %2941 = vmatpush1.msra.mxu1 %v1446_v8  ;;  %2873 = vmatprep.subr.mxu0 %v733_v6  ;;  %v1257_v8 = vld [vmem:[#allocation11 + $0x1608] sm:$0xff]  ;;  %v1216_v6 = vld [vmem:[#allocation11 + $0x14c0] sm:$0xff] }
 0x342   : > { %2942 = vmatprep.subr.mxu1 %v1426_v19  ;;  %2874 = vmatpush1.msra.mxu0 %v732_v57  ;;  %v1237_v19 = vld [vmem:[#allocation11 + $0x1568] sm:$0xff]  ;;  %v1215_v57 = vld [vmem:[#allocation11 + $0x14b8] sm:$0xff] }
 0x343   : > { %2943 = vmatpush1.msra.mxu1 %v1425_v30  ;;  %2875 = vmatprep.subr.mxu0 %v712_v3  ;;  %v1236_v30 = vld [vmem:[#allocation11 + $0x1560] sm:$0xff]  ;;  %v1195_v3 = vld [vmem:[#allocation11 + $0x1418] sm:$0xff] }
 0x344   : > { %2944 = vmatprep.subr.mxu1 %v1405_v10  ;;  %2876 = vmatpush1.msra.mxu0 %v711_v49  ;;  %v1888_v10 = vld [vmem:[#allocation11 + $0x29c0] sm:$0xff]  ;;  %v1194_v49 = vld [vmem:[#allocation11 + $0x1410] sm:$0xff] }
 0x345   : > { %2945 = vmatpush1.msra.mxu1 %v1404_v31  ;;  %2877 = vmatprep.subr.mxu0 %v691_v44  ;;  %v1887_v31 = vld [vmem:[#allocation11 + $0x29b8] sm:$0xff]  ;;  %v1174_v44 = vld [vmem:[#allocation11 + $0x1370] sm:$0xff] }
 0x346   : > { %2946 = vmatprep.subr.mxu1 %v1384_v0  ;;  %2878 = vmatpush1.msra.mxu0 %v690_v32  ;;  %v1867_v0 = vld [vmem:[#allocation11 + $0x2918] sm:$0xff]  ;;  %v1173_v32 = vld [vmem:[#allocation11 + $0x1368] sm:$0xff] }
 0x347   : > { %2947 = vmatpush1.msra.mxu1 %v1383_v55  ;;  %2879 = vmatprep.subr.mxu0 %v670_v37  ;;  %v1866_v55 = vld [vmem:[#allocation11 + $0x2910] sm:$0xff]  ;;  %v1153_v37 = vld [vmem:[#allocation11 + $0x12c8] sm:$0xff] }
 0x348   : > { %2948 = vmatprep.subr.mxu1 %v1363_v22  ;;  %2880 = vmatpush1.msra.mxu0 %v669_v45  ;;  %v1846_v22 = vld [vmem:[#allocation11 + $0x2870] sm:$0xff]  ;;  %v1152_v45 = vld [vmem:[#allocation11 + $0x12c0] sm:$0xff] }
 0x349   : > { %2949 = vmatpush1.msra.mxu1 %v1362_v51  ;;  %2881 = vmatprep.subr.mxu0 %v649_v7  ;;  %v1845_v51 = vld [vmem:[#allocation11 + $0x2868] sm:$0xff]  ;;  %v1132_v7 = vld [vmem:[#allocation11 + $0x1220] sm:$0xff] }
 0x34a   : > { %2950 = vmatprep.subr.mxu1 %v1342_v41  ;;  %2882 = vmatpush1.msra.mxu0 %v648_v42  ;;  %v1825_v41 = vld [vmem:[#allocation11 + $0x27c8] sm:$0xff]  ;;  %v1131_v42 = vld [vmem:[#allocation11 + $0x1218] sm:$0xff] }
 0x34b   : > { %2951 = vmatpush1.msra.mxu1 %v1341_v60  ;;  %2883 = vmatprep.subr.mxu0 %v628_v62  ;;  %v1824_v60 = vld [vmem:[#allocation11 + $0x27c0] sm:$0xff]  ;;  %v1111_v62 = vld [vmem:[#allocation11 + $0x1178] sm:$0xff] }
 0x34c   : > { %2952 = vmatprep.subr.mxu1 %v1321_v17  ;;  %2884 = vmatpush1.msra.mxu0 %v627_v43  ;;  %v1804_v17 = vld [vmem:[#allocation11 + $0x2720] sm:$0xff]  ;;  %v7785_v43 = vsub.s32 6, %v7243_v23 }
 0x34d   : > { %2953 = vmatpush1.msra.mxu1 %v1320_v1  ;;  %2885 = vmatprep.subr.mxu0 %v607_v16  ;;  %v1110_v1 = vld [vmem:[#allocation11 + $0x1170] sm:$0xff]  ;;  %v1803_v16 = vld [vmem:[#allocation11 + $0x2718] sm:$0xff] }
 0x34e   : > { %2954 = vmatprep.subr.mxu1 %v1300_v35  ;;  %2886 = vmatpush1.msra.mxu0 %v606_v53  ;;  %v1090_v35 = vld [vmem:[#allocation11 + $0x10d0] sm:$0xff]  ;;  %v1783_v53 = vld [vmem:[#allocation11 + $0x2678] sm:$0xff] }
 0x34f   : > { %2955 = vmatpush1.msra.mxu1 %v1299_v26  ;;  %2887 = vmatprep.subr.mxu0 %v586_v52  ;;  %v1089_v26 = vld [vmem:[#allocation11 + $0x10c8] sm:$0xff]  ;;  %v1782_v52 = vld [vmem:[#allocation11 + $0x2670] sm:$0xff] }
 0x350   : > { %2956 = vmatprep.subr.mxu1 %v1279_v50  ;;  %2888 = vmatpush1.msra.mxu0 %v585_v28  ;;  %v1929_v50 = vrot.slane %v7769_v33, %v7785_v43  ;;  %v1069_v28 = vld [vmem:[#allocation11 + $0x1028] sm:$0xff]  ;;  %v1027_v33 = vld [vmem:[#allocation11 + $0xed8] sm:$0xff] }
 0x351   : > { %2957 = vmatpush1.msra.mxu1 %v1278_v20  ;;  %2889 = vmatprep.subr.mxu0 %v565_v58  ;;  %v1762_v20 = vld [vmem:[#allocation11 + $0x25d0] sm:$0xff]  ;;  %v1068_v58 = vld [vmem:[#allocation11 + $0x1020] sm:$0xff] }
 0x352   : > { %2958 = vmatprep.subr.mxu1 %v1258_v27  ;;  %2890 = vmatpush1.msra.mxu0 %v564_v14  ;;  %v1761_v27 = vld [vmem:[#allocation11 + $0x25c8] sm:$0xff]  ;;  %v1048_v14 = vld [vmem:[#allocation11 + $0xf80] sm:$0xff] }
 0x353   : > { %2959 = vmatpush1.msra.mxu1 %v1257_v8  ;;  %2891 = vmatprep.subr.mxu0 %v1216_v6  ;;  %v1741_v8 = vld [vmem:[#allocation11 + $0x2528] sm:$0xff] }
 0x354   : > { %2960 = vmatprep.subr.mxu1 %v1237_v19  ;;  %2892 = vmatpush2.msra.mxu0 %v1215_v57  ;;  %v1047_v19 = vld [vmem:[#allocation11 + $0xf78] sm:$0xff]  ;;  %v1740_v57 = vld [vmem:[#allocation11 + $0x2520] sm:$0xff] }
 0x355   : > { %2961 = vmatpush1.msra.mxu1 %v1236_v30  ;;  %2893 = vmatprep.subr.mxu0 %v1195_v3  ;;  %v1720_v3 = vld [vmem:[#allocation11 + $0x2480] sm:$0xff] }
 0x356   : > { %2962 = vmatprep.subr.mxu1 %v1888_v10  ;;  %2894 = vmatpush2.msra.mxu0 %v1194_v49  ;;  %v1026_v49 = vld [vmem:[#allocation11 + $0xed0] sm:$0xff] }
 0x357   : > { %2963 = vmatpush2.msra.mxu1 %v1887_v31  ;;  %2895 = vmatprep.subr.mxu0 %v1174_v44  ;;  %v1719_v31 = vld [vmem:[#allocation11 + $0x2478] sm:$0xff] }
 0x358   : > { %2964 = vmatprep.subr.mxu1 %v1867_v0  ;;  %2896 = vmatpush2.msra.mxu0 %v1173_v32  ;;  %v1006_v0 = vld [vmem:[#allocation11 + $0xe30] sm:$0xff]  ;;  %v1699_v32 = vld [vmem:[#allocation11 + $0x23d8] sm:$0xff] }
 0x359   : > { %2965 = vmatpush2.msra.mxu1 %v1866_v55  ;;  %2897 = vmatprep.subr.mxu0 %v1153_v37  ;;  %v1005_v55 = vld [vmem:[#allocation11 + $0xe28] sm:$0xff]  ;;  %v1698_v37 = vld [vmem:[#allocation11 + $0x23d0] sm:$0xff] }
 0x35a   : > { %2966 = vmatprep.subr.mxu1 %v1846_v22  ;;  %2898 = vmatpush2.msra.mxu0 %v1152_v45  ;;  %v985_v22 = vld [vmem:[#allocation11 + $0xd88] sm:$0xff]  ;;  %v1678_v45 = vld [vmem:[#allocation11 + $0x2330] sm:$0xff] }
 0x35b   : > { %2967 = vmatpush2.msra.mxu1 %v1845_v51  ;;  %2899 = vmatprep.subr.mxu0 %v1132_v7  ;;  %v984_v51 = vld [vmem:[#allocation11 + $0xd80] sm:$0xff]  ;;  %v1677_v7 = vld [vmem:[#allocation11 + $0x2328] sm:$0xff] }
 0x35c   : > { %2968 = vmatprep.subr.mxu1 %v1825_v41  ;;  %2900 = vmatpush2.msra.mxu0 %v1131_v42  ;;  %v964_v41 = vld [vmem:[#allocation11 + $0xce0] sm:$0xff]  ;;  %v1657_v42 = vld [vmem:[#allocation11 + $0x2288] sm:$0xff] }
 0x35d   : > { %2969 = vmatpush2.msra.mxu1 %v1824_v60  ;;  %2901 = vmatprep.subr.mxu0 %v1111_v62  ;;  %v963_v60 = vld [vmem:[#allocation11 + $0xcd8] sm:$0xff]  ;;  %v1656_v62 = vld [vmem:[#allocation11 + $0x2280] sm:$0xff] }
 0x35e   : > { %2970 = vmatprep.subr.mxu1 %v1804_v17  ;;  %2902 = vmatpush2.msra.mxu0 %v1110_v1  ;;  %v2499_v6 = vpop.f32.mrf.mxu0  ;;  %v943_v17 = vld [vmem:[#allocation11 + $0xc38] sm:$0xff]  ;;  %v1636_v1 = vld [vmem:[#allocation11 + $0x21e0] sm:$0xff] }
 0x35f   : > { %2971 = vmatpush2.msra.mxu1 %v1803_v16  ;;  %2903 = vmatprep.subr.mxu0 %v1090_v35  ;;  %v2500_v30 = vadd.f32 %v2499_v6, %v1929_v50  ;;  %v942_v16 = vld [vmem:[#allocation11 + $0xc30] sm:$0xff]  ;;  %v1635_v35 = vld [vmem:[#allocation11 + $0x21d8] sm:$0xff]  ;;  %v1572_v6 = vld [vmem:[#allocation11 + $0x1fe0] sm:$0xff] }
 0x360   : > { %2972 = vmatprep.subr.mxu1 %v1783_v53  ;;  %2904 = vmatpush2.msra.mxu0 %v1089_v26  ;;  %v922_v53 = vld [vmem:[#allocation11 + $0xb90] sm:$0xff]  ;;  %v1615_v26 = vld [vmem:[#allocation11 + $0x2138] sm:$0xff] }
 0x361   : > { %2973 = vmatpush2.msra.mxu1 %v1782_v52  ;;  %2905 = vmatprep.subr.mxu0 %v1069_v28  ;;  %v2570_v10 = vpop.f32.mrf.mxu1  ;;  %v921_v52 = vld [vmem:[#allocation11 + $0xb88] sm:$0xff]  ;;  %v1614_v50 = vld [vmem:[#allocation11 + $0x2130] sm:$0xff] }
 0x362   : > { %2974 = vmatprep.subr.mxu1 %v1762_v20  ;;  %2906 = vmatpush2.msra.mxu0 %v1068_v58  ;;  %v7789_v44 = vadd.f32 %v2570_v10, %v2500_v30  ;;  %v901_v28 = vld [vmem:[#allocation11 + $0xae8] sm:$0xff]  ;;  %v1594_v20 = vld [vmem:[#allocation11 + $0x2090] sm:$0xff]  ;;  %v900_v58 = vld [vmem:[#allocation11 + $0xae0] sm:$0xff] }
 0x363   : > { %2975 = vmatpush2.msra.mxu1 %v1761_v27  ;;  %2907 = vmatprep.subr.mxu0 %v1048_v14  ;;  %v1593_v27 = vld [vmem:[#allocation11 + $0x2088] sm:$0xff]  ;;  %v860_v10 = vld [vmem:[#allocation11 + $0x9a0] sm:$0xff] }
 0x364   : > { %2976 = vmatprep.subr.mxu1 %v1741_v8  ;;  %2908 = vmatpush2.msra.mxu0 %v1047_v19  ;;  %v1573_v14 = vld [vmem:[#allocation11 + $0x1fe8] sm:$0xff]  ;;  %v882_v8 = vld [vmem:[#allocation11 + $0xa50] sm:$0xff] }
 0x365   : > { %2977 = vmatpush2.msra.mxu1 %v1740_v57  ;;  %2909 = vmatprep.subr.mxu0 %v1027_v33  ;;  %v881_v19 = vld [vmem:[#allocation11 + $0xa48] sm:$0xff]  ;;  %v7791_v57 = vld [vmem:[#allocation2] sm:$0xff] }
 0x366   : > { %2978 = vmatprep.subr.mxu1 %v1720_v3  ;;  %2910 = vmatpush2.msra.mxu0 %v1026_v49  ;;  %v861_v30 = vld [vmem:[#allocation11 + $0x9a8] sm:$0xff]  ;;  %v1554_v3 = vld [vmem:[#allocation11 + $0x1f50] sm:$0xff] }
 0x367   : > { %2979 = vmatpush2.msra.mxu1 %v1719_v31  ;;  %2911 = vmatprep.subr.mxu0 %v1006_v0  ;;  %v7794_v33 = vld [vmem:[#allocation2 + $0x10] sm:$0xff]  ;;  %v7797_v31 = vld [vmem:[#allocation2 + $0x8] sm:$0xff] }
 0x368   : > { %2980 = vmatprep.subr.mxu1 %v1699_v32  ;;  %2912 = vmatpush2.msra.mxu0 %v1005_v55  ;;  %v1553_v49 = vld [vmem:[#allocation11 + $0x1f48] sm:$0xff]  ;;  %v840_v0 = vld [vmem:[#allocation11 + $0x900] sm:$0xff]  ;;  %v7800_v55 = vld [vmem:[#allocation2 + $0x18] sm:$0xff] }
 0x369   : > { %2981 = vmatpush2.msra.mxu1 %v1698_v37  ;;  %2913 = vmatprep.subr.mxu0 %v985_v22  ;;  %v1533_v32 = vld [vmem:[#allocation11 + $0x1ea8] sm:$0xff]  ;;  %v839_v37 = vld [vmem:[#allocation11 + $0x8f8] sm:$0xff]  ;;  %v1532_v22 = vld [vmem:[#allocation11 + $0x1ea0] sm:$0xff] }
 0x36a   : > { %2982 = vmatprep.subr.mxu1 %v1678_v45  ;;  %2914 = vmatpush2.msra.mxu0 %v984_v51  ;;  %v819_v45 = vld [vmem:[#allocation11 + $0x858] sm:$0xff]  ;;  %v1512_v51 = vld [vmem:[#allocation11 + $0x1e00] sm:$0xff] }
 0x36b   : > { %2983 = vmatpush2.msra.mxu1 %v1677_v7  ;;  %2915 = vmatprep.subr.mxu0 %v964_v41  ;;  %v818_v7 = vld [vmem:[#allocation11 + $0x850] sm:$0xff]  ;;  %v1511_v41 = vld [vmem:[#allocation11 + $0x1df8] sm:$0xff] }
 0x36c   : > { %2984 = vmatprep.subr.mxu1 %v1657_v42  ;;  %2916 = vmatpush2.msra.mxu0 %v963_v60  ;;  %v798_v42 = vld [vmem:[#allocation11 + $0x7b0] sm:$0xff]  ;;  %v1491_v60 = vld [vmem:[#allocation11 + $0x1d58] sm:$0xff] }
 0x36d   : > { %2985 = vmatpush2.msra.mxu1 %v1656_v62  ;;  %2917 = vmatprep.subr.mxu0 %v943_v17  ;;  %v797_v62 = vld [vmem:[#allocation11 + $0x7a8] sm:$0xff]  ;;  %v1490_v17 = vld [vmem:[#allocation11 + $0x1d50] sm:$0xff] }
 0x36e   : > { %2986 = vmatprep.subr.mxu1 %v1636_v1  ;;  %2918 = vmatpush2.msra.mxu0 %v942_v16  ;;  %v777_v1 = vld [vmem:[#allocation11 + $0x708] sm:$0xff]  ;;  %v1470_v16 = vld [vmem:[#allocation11 + $0x1cb0] sm:$0xff] }
 0x36f   : > { %2987 = vmatpush2.msra.mxu1 %v1635_v35  ;;  %2919 = vmatprep.subr.mxu0 %v922_v53  ;;  %v776_v35 = vld [vmem:[#allocation11 + $0x700] sm:$0xff]  ;;  %v1469_v53 = vld [vmem:[#allocation11 + $0x1ca8] sm:$0xff] }
 0x370   : > { %2988 = vmatprep.subr.mxu1 %v1615_v26  ;;  %2920 = vmatpush2.msra.mxu0 %v921_v52  ;;  %v756_v26 = vld [vmem:[#allocation11 + $0x660] sm:$0xff]  ;;  %v1449_v52 = vld [vmem:[#allocation11 + $0x1c08] sm:$0xff] }
 0x371   : > { %2989 = vmatpush2.msra.mxu1 %v1614_v50  ;;  %2921 = vmatprep.subr.mxu0 %v901_v28  ;;  %v755_v50 = vld [vmem:[#allocation11 + $0x658] sm:$0xff]  ;;  %v1448_v28 = vld [vmem:[#allocation11 + $0x1c00] sm:$0xff] }
 0x372   : > { %2990 = vmatprep.subr.mxu1 %v1594_v20  ;;  %2922 = vmatpush2.msra.mxu0 %v900_v58  ;;  %v735_v20 = vld [vmem:[#allocation11 + $0x5b8] sm:$0xff]  ;;  %v1428_v58 = vld [vmem:[#allocation11 + $0x1b60] sm:$0xff] }
 0x373   : > { %2991 = vmatpush2.msra.mxu1 %v1593_v27  ;;  %2923 = vmatprep.mubr.f32.mxu0 %v7791_v57  ;;  %v734_v27 = vld [vmem:[#allocation11 + $0x5b0] sm:$0xff] }
 0x374   : > { %2992 = vmatprep.subr.mxu1 %v1573_v14  ;;  %3001 = vmatprep.subr.mxu0 %v882_v8  ;;  %v1427_v14 = vld [vmem:[#allocation11 + $0x1b58] sm:$0xff]  ;;  %v714_v8 = vld [vmem:[#allocation11 + $0x510] sm:$0xff] }
 0x375   : > { %2924 = vmatmul.mubr.f32.vlgmr.msra.gmra.mxu0 %v7794_v33  ;;  %2993 = vmatpush2.msra.mxu1 %v1572_v6  ;;  %v1407_v6 = vld [vmem:[#allocation11 + $0x1ab8] sm:$0xff] }
 0x376   : > { %3002 = vmatpush1.msra.mxu0 %v881_v19  ;;  %2994 = vmatprep.mubr.f32.mxu1 %v7797_v31  ;;  %v713_v19 = vld [vmem:[#allocation11 + $0x508] sm:$0xff] }
 0x377   : > { %3003 = vmatprep.subr.mxu0 %v861_v30  ;;  %3072 = vmatprep.subr.mxu1 %v1554_v3  ;;  %v1406_v30 = vld [vmem:[#allocation11 + $0x1ab0] sm:$0xff]  ;;  %v693_v3 = vld [vmem:[#allocation11 + $0x468] sm:$0xff] }
 0x378   : > { %2995 = vmatmul.mubr.f32.vlgmr.msra.gmra.mxu1 %v7800_v55  ;;  %3004 = vmatpush1.msra.mxu0 %v860_v10  ;;  %v1386_v10 = vld [vmem:[#allocation11 + $0x1a10] sm:$0xff] }
 0x379   : > { %3073 = vmatpush1.msra.mxu1 %v1553_v49  ;;  %3005 = vmatprep.subr.mxu0 %v840_v0  ;;  %v692_v49 = vld [vmem:[#allocation11 + $0x460] sm:$0xff]  ;;  %v1385_v0 = vld [vmem:[#allocation11 + $0x1a08] sm:$0xff] }
 0x37a   : > { %3074 = vmatprep.subr.mxu1 %v1533_v32  ;;  %3006 = vmatpush1.msra.mxu0 %v839_v37  ;;  %v672_v32 = vld [vmem:[#allocation11 + $0x3c0] sm:$0xff]  ;;  %v1365_v37 = vld [vmem:[#allocation11 + $0x1968] sm:$0xff] }
 0x37b   : > { %3075 = vmatpush1.msra.mxu1 %v1532_v22  ;;  %3007 = vmatprep.subr.mxu0 %v819_v45  ;;  %v671_v22 = vld [vmem:[#allocation11 + $0x3b8] sm:$0xff]  ;;  %v1364_v45 = vld [vmem:[#allocation11 + $0x1960] sm:$0xff] }
 0x37c   : > { %3076 = vmatprep.subr.mxu1 %v1512_v51  ;;  %3008 = vmatpush1.msra.mxu0 %v818_v7  ;;  %v651_v51 = vld [vmem:[#allocation11 + $0x318] sm:$0xff]  ;;  %v1344_v7 = vld [vmem:[#allocation11 + $0x18c0] sm:$0xff] }
 0x37d   : > { %3077 = vmatpush1.msra.mxu1 %v1511_v41  ;;  %3009 = vmatprep.subr.mxu0 %v798_v42  ;;  %v650_v41 = vld [vmem:[#allocation11 + $0x310] sm:$0xff]  ;;  %v1343_v42 = vld [vmem:[#allocation11 + $0x18b8] sm:$0xff] }
 0x37e   : > { %3078 = vmatprep.subr.mxu1 %v1491_v60  ;;  %3010 = vmatpush1.msra.mxu0 %v797_v62  ;;  %v630_v60 = vld [vmem:[#allocation11 + $0x270] sm:$0xff]  ;;  %v1323_v62 = vld [vmem:[#allocation11 + $0x1818] sm:$0xff] }
 0x37f   : > { %3079 = vmatpush1.msra.mxu1 %v1490_v17  ;;  %3011 = vmatprep.subr.mxu0 %v777_v1  ;;  %v629_v17 = vld [vmem:[#allocation11 + $0x268] sm:$0xff]  ;;  %v1322_v1 = vld [vmem:[#allocation11 + $0x1810] sm:$0xff] }
 0x380   : > { %3080 = vmatprep.subr.mxu1 %v1470_v16  ;;  %3012 = vmatpush1.msra.mxu0 %v776_v35  ;;  %v609_v16 = vld [vmem:[#allocation11 + $0x1c8] sm:$0xff]  ;;  %v1302_v35 = vld [vmem:[#allocation11 + $0x1770] sm:$0xff] }
 0x381   : > { %3081 = vmatpush1.msra.mxu1 %v1469_v53  ;;  %3013 = vmatprep.subr.mxu0 %v756_v26  ;;  %v608_v26 = vld [vmem:[#allocation11 + $0x1c0] sm:$0xff] }
 0x382   : > { %3082 = vmatprep.subr.mxu1 %v1449_v52  ;;  %3014 = vmatpush1.msra.mxu0 %v755_v50  ;;  %v1301_v50 = vld [vmem:[#allocation11 + $0x1768] sm:$0xff] }
 0x383   : > { %3083 = vmatpush1.msra.mxu1 %v1448_v28  ;;  %3015 = vmatprep.subr.mxu0 %v735_v20  ;;  %v588_v28 = vld [vmem:[#allocation11 + $0x120] sm:$0xff] }
 0x384   : > { %3084 = vmatprep.subr.mxu1 %v1428_v58  ;;  %3016 = vmatpush1.msra.mxu0 %v734_v27  ;;  %v1281_v27 = vld [vmem:[#allocation11 + $0x16c8] sm:$0xff] }
 0x385   : > { %3085 = vmatpush1.msra.mxu1 %v1427_v14  ;;  %3017 = vmatprep.subr.mxu0 %v714_v8  ;;  %v587_v14 = vld [vmem:[#allocation11 + $0x118] sm:$0xff] }
 0x386   : > { %3086 = vmatprep.subr.mxu1 %v1407_v6  ;;  %3018 = vmatpush1.msra.mxu0 %v713_v19  ;;  %v1280_v19 = vld [vmem:[#allocation11 + $0x16c0] sm:$0xff] }
 0x387   : > { %3087 = vmatpush1.msra.mxu1 %v1406_v30  ;;  %3019 = vmatprep.subr.mxu0 %v693_v3  ;;  %v567_v30 = vld [vmem:[#allocation11 + $0x78] sm:$0xff]  ;;  %v1260_v3 = vld [vmem:[#allocation11 + $0x1620] sm:$0xff] }
 0x388   : > { %3088 = vmatprep.subr.mxu1 %v1386_v10  ;;  %3020 = vmatpush1.msra.mxu0 %v692_v49  ;;  %v566_v10 = vld [vmem:[#allocation11 + $0x70] sm:$0xff] }
 0x389   : > { %3089 = vmatpush1.msra.mxu1 %v1385_v0  ;;  %3021 = vmatprep.subr.mxu0 %v672_v32  ;;  %v1259_v0 = vld [vmem:[#allocation11 + $0x1618] sm:$0xff] }
 0x38a   : > { %3090 = vmatprep.subr.mxu1 %v1365_v37  ;;  %3022 = vmatpush1.msra.mxu0 %v671_v22  ;;  %v1239_v37 = vld [vmem:[#allocation11 + $0x1578] sm:$0xff]  ;;  %v1217_v22 = vld [vmem:[#allocation11 + $0x14c8] sm:$0xff] }
 0x38b   : > { %3091 = vmatpush1.msra.mxu1 %v1364_v45  ;;  %3023 = vmatprep.subr.mxu0 %v651_v51  ;;  %v1238_v51 = vld [vmem:[#allocation11 + $0x1570] sm:$0xff] }
 0x38c   : > { %3092 = vmatprep.subr.mxu1 %v1344_v7  ;;  %3024 = vmatpush1.msra.mxu0 %v650_v41  ;;  %v1197_v7 = vld [vmem:[#allocation11 + $0x1428] sm:$0xff] }
 0x38d   : > { %3093 = vmatpush1.msra.mxu1 %v1343_v42  ;;  %3025 = vmatprep.subr.mxu0 %v630_v60  ;;  %v1196_v42 = vld [vmem:[#allocation11 + $0x1420] sm:$0xff]  ;;  %v1889_v60 = vld [vmem:[#allocation11 + $0x29c8] sm:$0xff] }
 0x38e   : > { %3094 = vmatprep.subr.mxu1 %v1323_v62  ;;  %3026 = vmatpush1.msra.mxu0 %v629_v17  ;;  %v1176_v62 = vld [vmem:[#allocation11 + $0x1380] sm:$0xff] }
 0x38f   : > { %3095 = vmatpush1.msra.mxu1 %v1322_v1  ;;  %3027 = vmatprep.subr.mxu0 %v609_v16  ;;  %v1175_v1 = vld [vmem:[#allocation11 + $0x1378] sm:$0xff] }
 0x390   : > { %3096 = vmatprep.subr.mxu1 %v1302_v35  ;;  %3028 = vmatpush1.msra.mxu0 %v608_v26 }
 0x391   : > { %3097 = vmatpush1.msra.mxu1 %v1301_v50  ;;  %3029 = vmatprep.subr.mxu0 %v588_v28  ;;  %v1155_v50 = vld [vmem:[#allocation11 + $0x12d8] sm:$0xff] }
 0x392   : > { %3098 = vmatprep.subr.mxu1 %v1281_v27  ;;  %3030 = vmatpush1.msra.mxu0 %v587_v14  ;;  %v1848_v27 = vld [vmem:[#allocation11 + $0x2880] sm:$0xff]  ;;  %v1154_v14 = vld [vmem:[#allocation11 + $0x12d0] sm:$0xff] }
 0x393   : > { %3099 = vmatpush1.msra.mxu1 %v1280_v19  ;;  %3031 = vmatprep.subr.mxu0 %v567_v30  ;;  %v1133_v19 = vld [vmem:[#allocation11 + $0x1228] sm:$0xff] }
 0x394   : > { %3100 = vmatprep.subr.mxu1 %v1260_v3  ;;  %3032 = vmatpush1.msra.mxu0 %v566_v10  ;;  %v1826_v3 = vld [vmem:[#allocation11 + $0x27d0] sm:$0xff]  ;;  %v1113_v10 = vld [vmem:[#allocation11 + $0x1188] sm:$0xff] }
 0x395   : > { %3101 = vmatpush1.msra.mxu1 %v1259_v0  ;;  %3065 = vmatprep.mubr.f32.mxu0 %v7791_v57  ;;  %v842_v57 = vld [vmem:[#allocation11 + $0x910] sm:$0xff] }
 0x396   : > { %3102 = vmatprep.subr.mxu1 %v1239_v37  ;;  %v1112_v37 = vld [vmem:[#allocation11 + $0x1180] sm:$0xff]  ;;  %3136 = vmatprep.mubr.f32.mxu1 %v7797_v31  ;;  %v1513_v31 = vld [vmem:[#allocation11 + $0x1e08] sm:$0xff] }
 0x397   : > { %3103 = vmatpush1.msra.mxu1 %v1238_v51 }
 0x39a   : > { %v7803_v53 = vpop.xlane.xlu1 %4292 }
 0x39b   : > { %v4298_v52 = vrot.slane %v7803_v53, %v7246_v24  ;;  %v7809_v20 = vrot.slane %v7803_v53, %v7257_v29  ;;  %v7814_v8 = vrot.slane %v7803_v53, %v7249_v25  ;;  %v7823_v41 = vrot.slane %v7803_v53, %v7767_v13 }
 0x39c   : > { %v7827_v16 = vrot.slane %v7803_v53, %v7254_v11  ;;  %v7844_v0 = vrot.slane %v7803_v53, %v7785_v43 }
 0x39d   : > { %v4335_v58 = vsub.f32 %v7673_v63, %v4298_v52  ;;  %v4336_v6 = vsub.f32 %v7676_v5, %v4298_v52  ;;  %v1218_v63 = vld [vmem:[#allocation11 + $0x14d0] sm:$0xff]  ;;  %v4342_v32 = vsub.f32 %v7693_v12, %v7809_v20  ;;  %v4337_v5 = vsub.f32 %v7679_v38, %v7814_v8  ;;  %v1869_v38 = vld [vmem:[#allocation11 + $0x2928] sm:$0xff]  ;;  %v1868_v52 = vld [vmem:[#allocation11 + $0x2920] sm:$0xff] }
 0x39e   : > { %3033 = vmatprep.subr.mxu0 %v1218_v63  ;;  %v1890_v12 = vld [vmem:[#allocation11 + $0x29d0] sm:$0xff]  ;;  %v4338_v35 = vsub.f32 %v7682_v2, %v7814_v8  ;;  %v4344_v28 = vsub.f32 %v7699_v36, %v7823_v41  ;;  %v1847_v2 = vld [vmem:[#allocation11 + $0x2878] sm:$0xff]  ;;  %v4339_v36 = vsub.f32 %v7685_v56, %v7827_v16 }
 0x39f   : > { %v4351_v49 = vmul.f32 1.442695, %v4335_v58  ;;  %v4353_v45 = vmul.f32 1.442695, %v4336_v6  ;;  %3034 = vmatpush2.msra.mxu0 %v1217_v22  ;;  %v4365_v17 = vmul.f32 1.442695, %v4342_v32  ;;  %3104 = vmatprep.subr.mxu1 %v1890_v12  ;;  %v7835_v58 = vrot.slane %v7803_v53, %v7774_v48 }
 0x3a0   : > { %3035 = vmatprep.subr.mxu0 %v1197_v7  ;;  %v4355_v26 = vmul.f32 1.442695, %v4337_v5  ;;  %3105 = vmatpush2.msra.mxu1 %v1889_v60  ;;  %v1134_v8 = vld [vmem:[#allocation11 + $0x1230] sm:$0xff]  ;;  %v1827_v6 = vld [vmem:[#allocation11 + $0x27d8] sm:$0xff]  ;;  %v4357_v30 = vmul.f32 1.442695, %v4338_v35  ;;  %v4348_v60 = vsub.f32 %v7710_v54, %v7844_v0 }
 0x3a1   : > { %6435 = vpow2.f32 %v4351_v49  ;;  %3036 = vmatpush2.msra.mxu0 %v1196_v42  ;;  %3106 = vmatprep.subr.mxu1 %v1869_v38  ;;  %v7840_v49 = vsub.s32 7, %v7243_v23  ;;  %v4369_v63 = vmul.f32 1.442695, %v4344_v28  ;;  %v4346_v32 = vsub.f32 %v7705_v47, %v7835_v58  ;;  %v1806_v56 = vld [vmem:[#allocation11 + $0x2730] sm:$0xff]  ;;  %v1805_v22 = vld [vmem:[#allocation11 + $0x2728] sm:$0xff]  ;;  %v1092_v5 = vld [vmem:[#allocation11 + $0x10e0] sm:$0xff] }
 0x3a2   : > { %6437 = vpow2.f32 %v4353_v45  ;;  %3037 = vmatprep.subr.mxu0 %v1176_v62  ;;  %3107 = vmatpush2.msra.mxu1 %v1868_v52  ;;  %v1785_v23 = vld [vmem:[#allocation11 + $0x2688] sm:$0xff]  ;;  %v4340_v45 = vsub.f32 %v7688_v39, %v7827_v16  ;;  %v4359_v51 = vmul.f32 1.442695, %v4339_v36  ;;  %v1091_v7 = vld [vmem:[#allocation11 + $0x10d8] sm:$0xff]  ;;  %v1784_v47 = vld [vmem:[#allocation11 + $0x2680] sm:$0xff] }
 0x3a3   : > { %3038 = vmatpush2.msra.mxu0 %v1175_v1  ;;  %6439 = vpow2.f32 %v4365_v17  ;;  %3108 = vmatprep.subr.mxu1 %v1848_v27  ;;  %v7854_v42 = vrot.slane %v7803_v53, %v7840_v49  ;;  %v4373_v62 = vmul.f32 1.442695, %v4346_v32  ;;  %v1071_v39 = vld [vmem:[#allocation11 + $0x1038] sm:$0xff]  ;;  %v1764_v17 = vld [vmem:[#allocation11 + $0x25e0] sm:$0xff]  ;;  %v1070_v38 = vld [vmem:[#allocation11 + $0x1030] sm:$0xff]  ;;  %v4341_v53 = vsub.f32 %v7691_v61, %v7809_v20  ;;  %v7865_v27 = vpop.f32.mrf.mxu0 }
 0x3a4   : > { %3039 = vmatprep.subr.mxu0 %v1155_v50  ;;  %6441 = vpow2.f32 %v4355_v26  ;;  %3109 = vmatpush2.msra.mxu1 %v1847_v2  ;;  %v1763_v1 = vld [vmem:[#allocation11 + $0x25d8] sm:$0xff]  ;;  %v1050_v16 = vld [vmem:[#allocation11 + $0xf90] sm:$0xff]  ;;  %v4361_v35 = vmul.f32 1.442695, %v4340_v45  ;;  %v1049_v26 = vld [vmem:[#allocation11 + $0xf88] sm:$0xff] }
 0x3a5   : > { %3040 = vmatpush2.msra.mxu0 %v1154_v14  ;;  %3110 = vmatprep.subr.mxu1 %v1827_v6  ;;  %6443 = vpow2.f32 %v4357_v30  ;;  %v1743_v54 = vld [vmem:[#allocation11 + $0x2538] sm:$0xff]  ;;  %v4350_v50 = vsub.f32 %v7730_v46, %v7854_v42  ;;  %v4377_v28 = vmul.f32 1.442695, %v4348_v60  ;;  %v1742_v14 = vld [vmem:[#allocation11 + $0x2530] sm:$0xff]  ;;  %v1029_v2 = vld [vmem:[#allocation11 + $0xee8] sm:$0xff]  ;;  %v7872_v6 = vpop.f32.mrf.mxu1 }
 0x3a6   : > { %3041 = vmatprep.subr.mxu0 %v1134_v8  ;;  %3111 = vmatpush2.msra.mxu1 %v1826_v3  ;;  %6445 = vpow2.f32 %v4369_v63  ;;  %v7867_v61 = vld [vmem:[#allocation13 + $0x8] sm:$0xff]  ;;  %v1722_v20 = vld [vmem:[#allocation11 + $0x2490] sm:$0xff]  ;;  %v1028_v46 = vld [vmem:[#allocation11 + $0xee0] sm:$0xff]  ;;  %v4363_v30 = vmul.f32 1.442695, %v4341_v53  ;;  %v4343_v3 = vsub.f32 %v7696_v59, %v7823_v41 }
 0x3a7   : > { %3042 = vmatpush2.msra.mxu0 %v1133_v19  ;;  %3112 = vmatprep.subr.mxu1 %v1806_v56  ;;  %6447 = vpow2.f32 %v4359_v51  ;;  %v1937_v8 = vrot.slane %v7867_v61, %v7246_v24  ;;  %v2641_v19 = vpop.f32.mrf.mxu0  ;;  %v1008_v63 = vld [vmem:[#allocation11 + $0xe40] sm:$0xff]  ;;  %v987_v59 = vld [vmem:[#allocation11 + $0xd98] sm:$0xff]  ;;  %v986_v60 = vld [vmem:[#allocation11 + $0xd90] sm:$0xff] }
 0x3a8   : > { %3043 = vmatprep.subr.mxu0 %v1113_v10  ;;  %3113 = vmatpush2.msra.mxu1 %v1805_v22  ;;  %6449 = vpow2.f32 %v4373_v62  ;;  %v1721_v10 = vld [vmem:[#allocation11 + $0x2488] sm:$0xff]  ;;  %v1700_v45 = vld [vmem:[#allocation11 + $0x23e0] sm:$0xff] }
 0x3a9   : > { %3044 = vmatpush2.msra.mxu0 %v1112_v37  ;;  %3114 = vmatprep.subr.mxu1 %v1785_v23  ;;  %6451 = vpow2.f32 %v4361_v35  ;;  %v2642_v32 = vadd.f32 %v2641_v19, %v1937_v8  ;;  %v4381_v37 = vmul.f32 1.442695, %v4350_v50  ;;  %v1701_v22 = vld [vmem:[#allocation11 + $0x23e8] sm:$0xff]  ;;  %v2712_v23 = vpop.f32.mrf.mxu1  ;;  %v1680_v51 = vld [vmem:[#allocation11 + $0x2340] sm:$0xff]  ;;  %v923_v8 = vld [vmem:[#allocation11 + $0xb98] sm:$0xff] }
 0x3aa   : > { %3045 = vmatprep.subr.mxu0 %v1092_v5  ;;  %3115 = vmatpush2.msra.mxu1 %v1784_v47  ;;  %6453 = vpow2.f32 %v4377_v28  ;;  %v1007_v5 = vld [vmem:[#allocation11 + $0xe38] sm:$0xff]  ;;  %v4345_v47 = vsub.f32 %v7702_v18, %v7835_v58  ;;  %v1658_v18 = vld [vmem:[#allocation11 + $0x2290] sm:$0xff]  ;;  %v4347_v58 = vsub.f32 %v7708_v21, %v7844_v0  ;;  %v945_v35 = vld [vmem:[#allocation11 + $0xc48] sm:$0xff]  ;;  %v4349_v0 = vsub.f32 %v7728_v9, %v7854_v42 }
 0x3ab   : > { %3046 = vmatpush2.msra.mxu0 %v1091_v7  ;;  %3116 = vmatprep.subr.mxu1 %v1764_v17  ;;  %v7882_v41 = vadd.f32 %v2712_v23, %v2642_v32  ;;  %6455 = vpow2.f32 %v4363_v30  ;;  %v4367_v7 = vmul.f32 1.442695, %v4343_v3  ;;  %v966_v17 = vld [vmem:[#allocation11 + $0xcf0] sm:$0xff]  ;;  %v944_v50 = vld [vmem:[#allocation11 + $0xc40] sm:$0xff]  ;;  %v1617_v21 = vld [vmem:[#allocation11 + $0x2148] sm:$0xff] }
 0x3ac   : > { %3047 = vmatprep.subr.mxu0 %v1071_v39  ;;  %3117 = vmatpush2.msra.mxu1 %v1763_v1  ;;  %6457 = vpow2.f32 %v4381_v37  ;;  %v1679_v39 = vld [vmem:[#allocation11 + $0x2338] sm:$0xff]  ;;  %v4371_v53 = vmul.f32 1.442695, %v4345_v47  ;;  %v1616_v19 = vld [vmem:[#allocation11 + $0x2140] sm:$0xff]  ;;  %v4379_v42 = vmul.f32 1.442695, %v4349_v0 }
 0x3ad   : > { %3048 = vmatpush2.msra.mxu0 %v1070_v38  ;;  %3118 = vmatprep.subr.mxu1 %v1743_v54  ;;  %8347 = vst [vmem:[#allocation31_spill] sm:$0xff] %v7882_v41  ;;  %v1659_v1 = vld [vmem:[#allocation11 + $0x2298] sm:$0xff]  ;;  %6459 = vpow2.f32 %v4367_v7  ;;  %v1574_v23 = vld [vmem:[#allocation11 + $0x1ff0] sm:$0xff]  ;;  %v1556_v7 = vld [vmem:[#allocation11 + $0x1f60] sm:$0xff] }
 0x3ae   : > { %v7850_v12 = vpop.eup %6435  ;;  %3049 = vmatprep.subr.mxu0 %v1050_v16  ;;  %3119 = vmatpush2.msra.mxu1 %v1742_v14  ;;  %v965_v16 = vld [vmem:[#allocation11 + $0xce8] sm:$0xff]  ;;  %6461 = vpow2.f32 %v4371_v53  ;;  %v903_v30 = vld [vmem:[#allocation11 + $0xaf8] sm:$0xff]  ;;  %v862_v47 = vld [vmem:[#allocation11 + $0x9b0] sm:$0xff] }
 0x3af   : > { %4400 = vperm.xlu1 %6306, %v7850_v12   ;;  %v7861_v52 = vpop.eup %6437  ;;  %3050 = vmatpush2.msra.mxu0 %v1049_v26  ;;  %v1638_v26 = vld [vmem:[#allocation11 + $0x21f0] sm:$0xff]  ;;  %v1637_v14 = vld [vmem:[#allocation11 + $0x21e8] sm:$0xff]  ;;  %v1595_v9 = vld [vmem:[#allocation11 + $0x2098] sm:$0xff] }
 0x3b0   : > { %v7874_v36 = vpop.eup %6439  ;;  %3051 = vmatprep.subr.mxu0 %v1029_v2  ;;  %3120 = vmatprep.subr.mxu1 %v1722_v20  ;;  %v924_v2 = vld [vmem:[#allocation11 + $0xba0] sm:$0xff]  ;;  %v4375_v20 = vmul.f32 1.442695, %v4347_v58  ;;  %v1575_v37 = vld [vmem:[#allocation11 + $0x1ff8] sm:$0xff] }
 0x3b1   : > { %v7878_v56 = vpop.eup %6441  ;;  %4421 = vperm.xlu0 %6305, %v7874_v36   ;;  %3052 = vmatpush2.msra.mxu0 %v1028_v46  ;;  %v820_v58 = vld [vmem:[#allocation11 + $0x860] sm:$0xff]  ;;  %v1471_v0 = vld [vmem:[#allocation11 + $0x1cb8] sm:$0xff] }
 0x3b2   : > { %3121 = vmatpush2.msra.mxu1 %v1721_v10  ;;  %3053 = vmatprep.subr.mxu0 %v1008_v63  ;;  %v7886_v62 = vpop.eup %6443  ;;  %v1596_v10 = vld [vmem:[#allocation11 + $0x20a0] sm:$0xff]  ;;  %v902_v63 = vld [vmem:[#allocation11 + $0xaf0] sm:$0xff]  ;;  %6463 = vpow2.f32 %v4375_v20 }
 0x3b3   : > { %4403 = vperm.xlu1 %6306, %v7861_v52   ;;  %3122 = vmatprep.subr.mxu1 %v1701_v22  ;;  %v7888_v38 = vpop.eup %6445  ;;  %v884_v22 = vld [vmem:[#allocation11 + $0xa60] sm:$0xff]  ;;  %6465 = vpow2.f32 %v4379_v42  ;;  %v758_v20 = vld [vmem:[#allocation11 + $0x670] sm:$0xff] }
 0x3b4   : > { %3054 = vmatpush2.msra.mxu0 %v1007_v5  ;;  %3123 = vmatpush2.msra.mxu1 %v1700_v45  ;;  %v7894_v54 = vpop.eup %6447  ;;  %v883_v45 = vld [vmem:[#allocation11 + $0xa58] sm:$0xff]  ;;  %v800_v53 = vld [vmem:[#allocation11 + $0x7c0] sm:$0xff] }
 0x3b5   : > { %3055 = vmatprep.subr.mxu0 %v987_v59  ;;  %3124 = vmatprep.subr.mxu1 %v1680_v51  ;;  %v7896_v28 = vpop.eup %6449  ;;  %v863_v59 = vld [vmem:[#allocation11 + $0x9b8] sm:$0xff]  ;;  %v736_v42 = vld [vmem:[#allocation11 + $0x5c0] sm:$0xff] }
 0x3b6   : > { %4427 = vperm.xlu0 %6305, %v7888_v38   ;;  %3056 = vmatpush2.msra.mxu0 %v986_v60  ;;  %v7902_v46 = vpop.eup %6451  ;;  %v1555_v60 = vld [vmem:[#allocation11 + $0x1f58] sm:$0xff] }
 0x3b7   : > { %4406 = vperm.xlu1 %6306, %v7878_v56   ;;  %3125 = vmatpush2.msra.mxu1 %v1679_v39  ;;  %v7904_v3 = vpop.eup %6453  ;;  %v1535_v39 = vld [vmem:[#allocation11 + $0x1eb8] sm:$0xff] }
 0x3b8   : > { %3057 = vmatprep.subr.mxu0 %v966_v17  ;;  %3126 = vmatprep.subr.mxu1 %v1659_v1  ;;  %v7908_v32 = vpop.eup %6455  ;;  %v841_v17 = vld [vmem:[#allocation11 + $0x908] sm:$0xff] }
 0x3b9   : > { %3058 = vmatpush2.msra.mxu0 %v965_v16  ;;  %3127 = vmatpush2.msra.mxu1 %v1658_v18  ;;  %v7910_v5 = vpop.eup %6457  ;;  %v821_v16 = vld [vmem:[#allocation11 + $0x868] sm:$0xff]  ;;  %v1514_v18 = vld [vmem:[#allocation11 + $0x1e10] sm:$0xff] }
 0x3ba   : > { %4433 = vperm.xlu0 %6305, %v7896_v28   ;;  %3059 = vmatprep.subr.mxu0 %v945_v35  ;;  %v7915_v51 = vpop.eup %6459 }
 0x3bb   : > { %4409 = vperm.xlu1 %6306, %v7886_v62   ;;  %3128 = vmatprep.subr.mxu1 %v1638_v26  ;;  %v7921_v1 = vpop.eup %6461  ;;  %v799_v26 = vld [vmem:[#allocation11 + $0x7b8] sm:$0xff] }
 0x3bc   : > { %3060 = vmatpush2.msra.mxu0 %v944_v50  ;;  %3129 = vmatpush2.msra.mxu1 %v1637_v14  ;;  %v1492_v50 = vld [vmem:[#allocation11 + $0x1d60] sm:$0xff]  ;;  %v779_v14 = vld [vmem:[#allocation11 + $0x718] sm:$0xff] }
 0x3bd   : > { %3061 = vmatprep.subr.mxu0 %v924_v2  ;;  %3130 = vmatprep.subr.mxu1 %v1617_v21  ;;  %v1472_v2 = vld [vmem:[#allocation11 + $0x1cc0] sm:$0xff]  ;;  %v778_v21 = vld [vmem:[#allocation11 + $0x710] sm:$0xff] }
 0x3be   : > { %4439 = vperm.xlu0 %6305, %v7904_v3   ;;  %3062 = vmatpush2.msra.mxu0 %v923_v8 }
 0x3bf   : > { %4412 = vperm.xlu1 %6306, %v7894_v54   ;;  %3131 = vmatpush2.msra.mxu1 %v1616_v19  ;;  %v7924_v35 = vpop.eup %6463  ;;  %v1451_v19 = vld [vmem:[#allocation11 + $0x1c18] sm:$0xff] }
 0x3c0   : > { %3063 = vmatprep.subr.mxu0 %v903_v30  ;;  %3132 = vmatprep.subr.mxu1 %v1596_v10  ;;  %v7927_v8 = vpop.eup %6465  ;;  %v757_v30 = vld [vmem:[#allocation11 + $0x668] sm:$0xff]  ;;  %v1450_v10 = vld [vmem:[#allocation11 + $0x1c10] sm:$0xff] }
 0x3c1   : > { %3064 = vmatpush2.msra.mxu0 %v902_v63  ;;  %3133 = vmatpush2.msra.mxu1 %v1595_v9  ;;  %v737_v63 = vld [vmem:[#allocation11 + $0x5c8] sm:$0xff]  ;;  %v1430_v9 = vld [vmem:[#allocation11 + $0x1b70] sm:$0xff] }
 0x3c2   : > { %4445 = vperm.xlu0 %6305, %v7910_v5   ;;  %3134 = vmatprep.subr.mxu1 %v1575_v37  ;;  %v1429_v37 = vld [vmem:[#allocation11 + $0x1b68] sm:$0xff] }
 0x3c3   : > { %4415 = vperm.xlu1 %6306, %v7902_v46   ;;  %3143 = vmatprep.subr.mxu0 %v884_v22  ;;  %v716_v22 = vld [vmem:[#allocation11 + $0x520] sm:$0xff] }
 0x3c4   : > { %3066 = vmatmul.mubr.f32.vlgmr.msra.gmra.mxu0 %v7794_v33  ;;  %3135 = vmatpush2.msra.mxu1 %v1574_v23  ;;  %v1534_v33 = vld [vmem:[#allocation11 + $0x1eb0] sm:$0xff]  ;;  %v1409_v23 = vld [vmem:[#allocation11 + $0x1ac8] sm:$0xff] }
 0x3c5   : > { %3144 = vmatpush1.msra.mxu0 %v883_v45  ;;  %3214 = vmatprep.subr.mxu1 %v1556_v7  ;;  %v715_v45 = vld [vmem:[#allocation11 + $0x518] sm:$0xff] }
 0x3c6   : > { %3145 = vmatprep.subr.mxu0 %v863_v59  ;;  %3137 = vmatmul.mubr.f32.vlgmr.msra.gmra.mxu1 %v7800_v55  ;;  %v1493_v55 = vld [vmem:[#allocation11 + $0x1d68] sm:$0xff]  ;;  %v1408_v59 = vld [vmem:[#allocation11 + $0x1ac0] sm:$0xff]  ;;  %v695_v7 = vld [vmem:[#allocation11 + $0x478] sm:$0xff] }
 0x3c7   : > { %4418 = vperm.xlu1 %6306, %v7908_v32   ;;  %3146 = vmatpush1.msra.mxu0 %v862_v47  ;;  %v1388_v47 = vld [vmem:[#allocation11 + $0x1a20] sm:$0xff] }
 0x3c8   : > { %3215 = vmatpush1.msra.mxu1 %v1555_v60  ;;  %3147 = vmatprep.subr.mxu0 %v842_v57  ;;  %v694_v60 = vld [vmem:[#allocation11 + $0x470] sm:$0xff]  ;;  %v1387_v57 = vld [vmem:[#allocation11 + $0x1a18] sm:$0xff] }
 0x3c9   : > { %3216 = vmatprep.subr.mxu1 %v1535_v39  ;;  %3148 = vmatpush1.msra.mxu0 %v841_v17  ;;  %v674_v39 = vld [vmem:[#allocation11 + $0x3d0] sm:$0xff]  ;;  %v1367_v17 = vld [vmem:[#allocation11 + $0x1978] sm:$0xff] }
 0x3ca   : > { %3217 = vmatpush1.msra.mxu1 %v1534_v33  ;;  %3149 = vmatprep.subr.mxu0 %v821_v16  ;;  %v673_v33 = vld [vmem:[#allocation11 + $0x3c8] sm:$0xff]  ;;  %v1366_v16 = vld [vmem:[#allocation11 + $0x1970] sm:$0xff] }
 0x3cb   : > { %4424 = vperm.xlu1 %6306, %v7915_v51   ;;  %3218 = vmatprep.subr.mxu1 %v1514_v18  ;;  %v653_v18 = vld [vmem:[#allocation11 + $0x328] sm:$0xff] }
 0x3cc   : > { %3150 = vmatpush1.msra.mxu0 %v820_v58  ;;  %3219 = vmatpush1.msra.mxu1 %v1513_v31  ;;  %v1346_v58 = vld [vmem:[#allocation11 + $0x18d0] sm:$0xff]  ;;  %v652_v31 = vld [vmem:[#allocation11 + $0x320] sm:$0xff] }
 0x3cd   : > { %3151 = vmatprep.subr.mxu0 %v800_v53  ;;  %3220 = vmatprep.subr.mxu1 %v1493_v55  ;;  %v1345_v53 = vld [vmem:[#allocation11 + $0x18c8] sm:$0xff]  ;;  %v632_v55 = vld [vmem:[#allocation11 + $0x280] sm:$0xff] }
 0x3ce   : > { %3152 = vmatpush1.msra.mxu0 %v799_v26  ;;  %3221 = vmatpush1.msra.mxu1 %v1492_v50  ;;  %v1325_v26 = vld [vmem:[#allocation11 + $0x1828] sm:$0xff]  ;;  %v631_v50 = vld [vmem:[#allocation11 + $0x278] sm:$0xff] }
 0x3cf   : > { %4430 = vperm.xlu1 %6306, %v7921_v1   ;;  %3153 = vmatprep.subr.mxu0 %v779_v14  ;;  %v1324_v14 = vld [vmem:[#allocation11 + $0x1820] sm:$0xff] }
 0x3d0   : > { %3222 = vmatprep.subr.mxu1 %v1472_v2  ;;  %3154 = vmatpush1.msra.mxu0 %v778_v21  ;;  %v611_v2 = vld [vmem:[#allocation11 + $0x1d8] sm:$0xff]  ;;  %v1304_v21 = vld [vmem:[#allocation11 + $0x1780] sm:$0xff] }
 0x3d1   : > { %3223 = vmatpush1.msra.mxu1 %v1471_v0  ;;  %3155 = vmatprep.subr.mxu0 %v758_v20  ;;  %v610_v0 = vld [vmem:[#allocation11 + $0x1d0] sm:$0xff]  ;;  %v1303_v20 = vld [vmem:[#allocation11 + $0x1778] sm:$0xff] }
 0x3d2   : > { %3224 = vmatprep.subr.mxu1 %v1451_v19  ;;  %3156 = vmatpush1.msra.mxu0 %v757_v30  ;;  %v590_v19 = vld [vmem:[#allocation11 + $0x130] sm:$0xff]  ;;  %v1283_v30 = vld [vmem:[#allocation11 + $0x16d8] sm:$0xff] }
 0x3d3   : > { %4436 = vperm.xlu1 %6306, %v7924_v35   ;;  %3225 = vmatpush1.msra.mxu1 %v1450_v10  ;;  %v589_v10 = vld [vmem:[#allocation11 + $0x128] sm:$0xff] }
 0x3d4   : > { %3157 = vmatprep.subr.mxu0 %v737_v63  ;;  %3226 = vmatprep.subr.mxu1 %v1430_v9  ;;  %v1282_v63 = vld [vmem:[#allocation11 + $0x16d0] sm:$0xff]  ;;  %v569_v9 = vld [vmem:[#allocation11 + $0x88] sm:$0xff] }
 0x3d5   : > { %3158 = vmatpush1.msra.mxu0 %v736_v42  ;;  %3227 = vmatpush1.msra.mxu1 %v1429_v37  ;;  %v1262_v42 = vld [vmem:[#allocation11 + $0x1630] sm:$0xff]  ;;  %v568_v37 = vld [vmem:[#allocation11 + $0x80] sm:$0xff] }
 0x3d6   : > { %3159 = vmatprep.subr.mxu0 %v716_v22  ;;  %3228 = vmatprep.subr.mxu1 %v1409_v23  ;;  %v1261_v22 = vld [vmem:[#allocation11 + $0x1628] sm:$0xff]  ;;  %v1220_v23 = vld [vmem:[#allocation11 + $0x14e0] sm:$0xff] }
 0x3d7   : > { %4442 = vperm.xlu1 %6306, %v7927_v8   ;;  %3160 = vmatpush1.msra.mxu0 %v715_v45  ;;  %v1241_v45 = vld [vmem:[#allocation11 + $0x1588] sm:$0xff] }
 0x3d8   : > { %3229 = vmatpush1.msra.mxu1 %v1408_v59  ;;  %3161 = vmatprep.subr.mxu0 %v695_v7  ;;  %v1219_v59 = vld [vmem:[#allocation11 + $0x14d8] sm:$0xff]  ;;  %v1240_v7 = vld [vmem:[#allocation11 + $0x1580] sm:$0xff] }
 0x3d9   : > { %3230 = vmatprep.subr.mxu1 %v1388_v47  ;;  %3162 = vmatpush1.msra.mxu0 %v694_v60  ;;  %v1199_v47 = vld [vmem:[#allocation11 + $0x1438] sm:$0xff]  ;;  %v1892_v60 = vld [vmem:[#allocation11 + $0x29e0] sm:$0xff] }
 0x3da   : > { %3231 = vmatpush1.msra.mxu1 %v1387_v57  ;;  %3163 = vmatprep.subr.mxu0 %v674_v39  ;;  %v1198_v57 = vld [vmem:[#allocation11 + $0x1430] sm:$0xff]  ;;  %v1891_v39 = vld [vmem:[#allocation11 + $0x29d8] sm:$0xff] }
 0x3db   : > { %3232 = vmatprep.subr.mxu1 %v1367_v17  ;;  %3164 = vmatpush1.msra.mxu0 %v673_v33  ;;  %v1178_v17 = vld [vmem:[#allocation11 + $0x1390] sm:$0xff]  ;;  %v1871_v33 = vld [vmem:[#allocation11 + $0x2938] sm:$0xff] }
 0x3dc   : > { %3233 = vmatpush1.msra.mxu1 %v1366_v16  ;;  %3165 = vmatprep.subr.mxu0 %v653_v18  ;;  %v1177_v16 = vld [vmem:[#allocation11 + $0x1388] sm:$0xff]  ;;  %v1870_v18 = vld [vmem:[#allocation11 + $0x2930] sm:$0xff] }
 0x3dd   : > { %3234 = vmatprep.subr.mxu1 %v1346_v58  ;;  %3166 = vmatpush1.msra.mxu0 %v652_v31  ;;  %v1157_v58 = vld [vmem:[#allocation11 + $0x12e8] sm:$0xff]  ;;  %v1850_v31 = vld [vmem:[#allocation11 + $0x2890] sm:$0xff] }
 0x3de   : > { %3235 = vmatpush1.msra.mxu1 %v1345_v53  ;;  %3167 = vmatprep.subr.mxu0 %v632_v55  ;;  %v1156_v53 = vld [vmem:[#allocation11 + $0x12e0] sm:$0xff]  ;;  %v1849_v55 = vld [vmem:[#allocation11 + $0x2888] sm:$0xff] }
 0x3df   : > { %3236 = vmatprep.subr.mxu1 %v1325_v26  ;;  %3168 = vmatpush1.msra.mxu0 %v631_v50  ;;  %v1136_v26 = vld [vmem:[#allocation11 + $0x1240] sm:$0xff]  ;;  %v1829_v50 = vld [vmem:[#allocation11 + $0x27e8] sm:$0xff] }
 0x3e0   : > { %3237 = vmatpush1.msra.mxu1 %v1324_v14  ;;  %3169 = vmatprep.subr.mxu0 %v611_v2  ;;  %v1135_v14 = vld [vmem:[#allocation11 + $0x1238] sm:$0xff]  ;;  %v1828_v2 = vld [vmem:[#allocation11 + $0x27e0] sm:$0xff] }
 0x3e1   : > { %3238 = vmatprep.subr.mxu1 %v1304_v21  ;;  %3170 = vmatpush1.msra.mxu0 %v610_v0  ;;  %v1115_v21 = vld [vmem:[#allocation11 + $0x1198] sm:$0xff]  ;;  %v1808_v0 = vld [vmem:[#allocation11 + $0x2740] sm:$0xff] }
 0x3e2   : > { %3239 = vmatpush1.msra.mxu1 %v1303_v20  ;;  %3171 = vmatprep.subr.mxu0 %v590_v19  ;;  %v1114_v20 = vld [vmem:[#allocation11 + $0x1190] sm:$0xff]  ;;  %v1807_v19 = vld [vmem:[#allocation11 + $0x2738] sm:$0xff] }
 0x3e3   : > { %3240 = vmatprep.subr.mxu1 %v1283_v30  ;;  %3172 = vmatpush1.msra.mxu0 %v589_v10  ;;  %v1094_v30 = vld [vmem:[#allocation11 + $0x10f0] sm:$0xff]  ;;  %v1787_v10 = vld [vmem:[#allocation11 + $0x2698] sm:$0xff] }
 0x3e4   : > { %3241 = vmatpush1.msra.mxu1 %v1282_v63  ;;  %3173 = vmatprep.subr.mxu0 %v569_v9  ;;  %v1093_v63 = vld [vmem:[#allocation11 + $0x10e8] sm:$0xff]  ;;  %v1786_v9 = vld [vmem:[#allocation11 + $0x2690] sm:$0xff] }
 0x3e5   : > { %3242 = vmatprep.subr.mxu1 %v1262_v42  ;;  %3174 = vmatpush1.msra.mxu0 %v568_v37  ;;  %v1073_v42 = vld [vmem:[#allocation11 + $0x1048] sm:$0xff]  ;;  %v1766_v37 = vld [vmem:[#allocation11 + $0x25f0] sm:$0xff] }
 0x3e6   : > { %3243 = vmatpush1.msra.mxu1 %v1261_v22  ;;  %3175 = vmatprep.subr.mxu0 %v1220_v23  ;;  %v1072_v22 = vld [vmem:[#allocation11 + $0x1040] sm:$0xff]  ;;  %v1765_v23 = vld [vmem:[#allocation11 + $0x25e8] sm:$0xff] }
 0x3e7   : > { %3244 = vmatprep.subr.mxu1 %v1241_v45  ;;  %3176 = vmatpush2.msra.mxu0 %v1219_v59  ;;  %v1052_v45 = vld [vmem:[#allocation11 + $0xfa0] sm:$0xff]  ;;  %v1745_v59 = vld [vmem:[#allocation11 + $0x2548] sm:$0xff] }
 0x3e8   : > { %3245 = vmatpush1.msra.mxu1 %v1240_v7  ;;  %3177 = vmatprep.subr.mxu0 %v1199_v47  ;;  %v1051_v7 = vld [vmem:[#allocation11 + $0xf98] sm:$0xff]  ;;  %v1744_v47 = vld [vmem:[#allocation11 + $0x2540] sm:$0xff] }
 0x3e9   : > { %3246 = vmatprep.subr.mxu1 %v1892_v60  ;;  %3178 = vmatpush2.msra.mxu0 %v1198_v57  ;;  %v1031_v60 = vld [vmem:[#allocation11 + $0xef8] sm:$0xff]  ;;  %v1945_v57 = vrot.slane %v7867_v61, %v7254_v11 }
 0x3ea   : > { %3247 = vmatpush2.msra.mxu1 %v1891_v39  ;;  %3179 = vmatprep.subr.mxu0 %v1178_v17  ;;  %v7932_v39 = vpop.f32.mrf.mxu0  ;;  %v1724_v17 = vld [vmem:[#allocation11 + $0x24a0] sm:$0xff] }
 0x3eb   : > { %3248 = vmatprep.subr.mxu1 %v1871_v33  ;;  %3180 = vmatpush2.msra.mxu0 %v1177_v16  ;;  %v1030_v33 = vld [vmem:[#allocation11 + $0xef0] sm:$0xff]  ;;  %v1723_v16 = vld [vmem:[#allocation11 + $0x2498] sm:$0xff] }
 0x3ec   : > { %3249 = vmatpush2.msra.mxu1 %v1870_v18  ;;  %3181 = vmatprep.subr.mxu0 %v1157_v58  ;;  %v1010_v18 = vld [vmem:[#allocation11 + $0xe50] sm:$0xff]  ;;  %v1949_v58 = vrot.slane %v7867_v61, %v7257_v29  ;;  %v1681_v61 = vld [vmem:[#allocation11 + $0x2348] sm:$0xff] }
 0x3ed   : > { %3250 = vmatprep.subr.mxu1 %v1850_v31  ;;  %3182 = vmatpush2.msra.mxu0 %v1156_v53  ;;  %v7936_v31 = vpop.f32.mrf.mxu1  ;;  %v1703_v53 = vld [vmem:[#allocation11 + $0x23f8] sm:$0xff] }
 0x3ee   : > { %3251 = vmatpush2.msra.mxu1 %v1849_v55  ;;  %3183 = vmatprep.subr.mxu0 %v1136_v26  ;;  %8348 = vst [vmem:[#allocation32_spill] sm:$0xff] %v7936_v31  ;;  %v1009_v55 = vld [vmem:[#allocation11 + $0xe48] sm:$0xff]  ;;  %v970_v31 = vld [vmem:[#allocation11 + $0xd10] sm:$0xff] }
 0x3ef   : > { %3252 = vmatprep.subr.mxu1 %v1829_v50  ;;  %3184 = vmatpush2.msra.mxu0 %v1135_v14  ;;  %v1702_v50 = vld [vmem:[#allocation11 + $0x23f0] sm:$0xff]  ;;  %v989_v14 = vld [vmem:[#allocation11 + $0xda8] sm:$0xff] }
 0x3f0   : > { %3253 = vmatpush2.msra.mxu1 %v1828_v2  ;;  %3185 = vmatprep.subr.mxu0 %v1115_v21  ;;  %v1682_v21 = vld [vmem:[#allocation11 + $0x2350] sm:$0xff] }
 0x3f1   : > { %3254 = vmatprep.subr.mxu1 %v1808_v0  ;;  %3186 = vmatpush2.msra.mxu0 %v1114_v20  ;;  %v988_v0 = vld [vmem:[#allocation11 + $0xda0] sm:$0xff] }
 0x3f2   : > { %3255 = vmatpush2.msra.mxu1 %v1807_v19  ;;  %3187 = vmatprep.subr.mxu0 %v1094_v30  ;;  %v968_v30 = vld [vmem:[#allocation11 + $0xd00] sm:$0xff] }
 0x3f3   : > { %3256 = vmatprep.subr.mxu1 %v1787_v10  ;;  %3188 = vmatpush2.msra.mxu0 %v1093_v63  ;;  %v2783_v26 = vpop.f32.mrf.mxu0 }
 0x3f4   : > { %3257 = vmatpush2.msra.mxu1 %v1786_v9  ;;  %3189 = vmatprep.subr.mxu0 %v1073_v42  ;;  %v2784_v2 = vadd.f32 %v2783_v26, %v1945_v57  ;;  %v1661_v9 = vld [vmem:[#allocation11 + $0x22a8] sm:$0xff]  ;;  %v967_v42 = vld [vmem:[#allocation11 + $0xcf8] sm:$0xff]  ;;  %v886_v26 = vld [vmem:[#allocation11 + $0xa70] sm:$0xff] }
 0x3f5   : > { %3258 = vmatprep.subr.mxu1 %v1766_v37  ;;  %3190 = vmatpush2.msra.mxu0 %v1072_v22  ;;  %v2785_v20 = vpop.f32.mrf.mxu0  ;;  %v1660_v22 = vld [vmem:[#allocation11 + $0x22a0] sm:$0xff]  ;;  %v1619_v57 = vld [vmem:[#allocation11 + $0x2158] sm:$0xff] }
 0x3f6   : > { %3259 = vmatpush2.msra.mxu1 %v1765_v23  ;;  %3191 = vmatprep.subr.mxu0 %v1052_v45  ;;  %v2854_v19 = vpop.f32.mrf.mxu1  ;;  %v2786_v10 = vadd.f32 %v2785_v20, %v1949_v58  ;;  %v947_v23 = vld [vmem:[#allocation11 + $0xc58] sm:$0xff]  ;;  %v904_v58 = vld [vmem:[#allocation11 + $0xb00] sm:$0xff]  ;;  %v7945_v20 = vld [vmem:[#allocation2 + $0x10] sm:$0xff] }
 0x3f7   : > { %3260 = vmatprep.subr.mxu1 %v1745_v59  ;;  %3192 = vmatpush2.msra.mxu0 %v1051_v7  ;;  %v7938_v63 = vadd.f32 %v2854_v19, %v2784_v2  ;;  %v1640_v59 = vld [vmem:[#allocation11 + $0x2200] sm:$0xff]  ;;  %v946_v7 = vld [vmem:[#allocation11 + $0xc50] sm:$0xff]  ;;  %v885_v2 = vld [vmem:[#allocation11 + $0xa68] sm:$0xff] }
 0x3f8   : > { %3261 = vmatpush2.msra.mxu1 %v1744_v47  ;;  %3193 = vmatprep.subr.mxu0 %v1031_v60  ;;  %v2856_v37 = vpop.f32.mrf.mxu1  ;;  %v1639_v47 = vld [vmem:[#allocation11 + $0x21f8] sm:$0xff]  ;;  %v926_v60 = vld [vmem:[#allocation11 + $0xbb0] sm:$0xff]  ;;  %v864_v19 = vld [vmem:[#allocation11 + $0x9c0] sm:$0xff] }
 0x3f9   : > { %3262 = vmatprep.subr.mxu1 %v1724_v17  ;;  %3194 = vmatpush2.msra.mxu0 %v1030_v33  ;;  %8349 = vst [vmem:[#allocation33_spill] sm:$0xff] %v7938_v63  ;;  %v7940_v45 = vadd.f32 %v2856_v37, %v2786_v10  ;;  %v925_v17 = vld [vmem:[#allocation11 + $0xba8] sm:$0xff]  ;;  %v1618_v33 = vld [vmem:[#allocation11 + $0x2150] sm:$0xff]  ;;  %v844_v10 = vld [vmem:[#allocation11 + $0x920] sm:$0xff] }
 0x3fa   : > { %3263 = vmatpush2.msra.mxu1 %v1723_v16  ;;  %3195 = vmatprep.subr.mxu0 %v1010_v18  ;;  %v905_v16 = vld [vmem:[#allocation11 + $0xb08] sm:$0xff]  ;;  %v1598_v18 = vld [vmem:[#allocation11 + $0x20b0] sm:$0xff]  ;;  %v991_v63 = vld [vmem:[#allocation11 + $0xdb8] sm:$0xff] }
 0x3fb   : > { %3264 = vmatprep.subr.mxu1 %v1703_v53  ;;  %3196 = vmatpush2.msra.mxu0 %v1009_v55  ;;  %8350 = vst [vmem:[#allocation34_spill] sm:$0xff] %v7940_v45  ;;  %v1597_v53 = vld [vmem:[#allocation11 + $0x20a8] sm:$0xff]  ;;  %v7951_v37 = vld [vmem:[#allocation2 + $0x18] sm:$0xff]  ;;  %v1704_v45 = vld [vmem:[#allocation11 + $0x2400] sm:$0xff] }
 0x3fc   : > { %3265 = vmatpush2.msra.mxu1 %v1702_v50  ;;  %3197 = vmatprep.subr.mxu0 %v989_v14  ;;  %v1577_v55 = vld [vmem:[#allocation11 + $0x2008] sm:$0xff]  ;;  %v1576_v50 = vld [vmem:[#allocation11 + $0x2000] sm:$0xff] }
 0x3fd   : > { %3266 = vmatprep.subr.mxu1 %v1682_v21  ;;  %3198 = vmatpush2.msra.mxu0 %v988_v0  ;;  %v7942_v14 = vld [vmem:[#allocation2] sm:$0xff]  ;;  %v865_v21 = vld [vmem:[#allocation11 + $0x9c8] sm:$0xff]  ;;  %v1558_v0 = vld [vmem:[#allocation11 + $0x1f70] sm:$0xff] }
 0x3fe   : > { %3267 = vmatpush2.msra.mxu1 %v1681_v61  ;;  %3199 = vmatprep.subr.mxu0 %v968_v30  ;;  %v7948_v61 = vld [vmem:[#allocation2 + $0x8] sm:$0xff] }
 0x3ff   : > { %3268 = vmatprep.subr.mxu1 %v1661_v9  ;;  %3200 = vmatpush2.msra.mxu0 %v967_v42  ;;  %v1557_v30 = vld [vmem:[#allocation11 + $0x1f68] sm:$0xff]  ;;  %v843_v42 = vld [vmem:[#allocation11 + $0x918] sm:$0xff] }
 0x400   : > { %3269 = vmatpush2.msra.mxu1 %v1660_v22  ;;  %3201 = vmatprep.subr.mxu0 %v947_v23  ;;  %v1537_v9 = vld [vmem:[#allocation11 + $0x1ec8] sm:$0xff]  ;;  %v1536_v22 = vld [vmem:[#allocation11 + $0x1ec0] sm:$0xff]  ;;  %v823_v23 = vld [vmem:[#allocation11 + $0x878] sm:$0xff] }
 0x401   : > { %3270 = vmatprep.subr.mxu1 %v1640_v59  ;;  %3202 = vmatpush2.msra.mxu0 %v946_v7  ;;  %v1516_v59 = vld [vmem:[#allocation11 + $0x1e20] sm:$0xff]  ;;  %v822_v7 = vld [vmem:[#allocation11 + $0x870] sm:$0xff] }
 0x402   : > { %3271 = vmatpush2.msra.mxu1 %v1639_v47  ;;  %3203 = vmatprep.subr.mxu0 %v926_v60  ;;  %v1515_v47 = vld [vmem:[#allocation11 + $0x1e18] sm:$0xff]  ;;  %v802_v60 = vld [vmem:[#allocation11 + $0x7d0] sm:$0xff] }
 0x403   : > { %3272 = vmatprep.subr.mxu1 %v1619_v57  ;;  %3204 = vmatpush2.msra.mxu0 %v925_v17  ;;  %v1495_v57 = vld [vmem:[#allocation11 + $0x1d78] sm:$0xff]  ;;  %v801_v17 = vld [vmem:[#allocation11 + $0x7c8] sm:$0xff] }
 0x404   : > { %3273 = vmatpush2.msra.mxu1 %v1618_v33  ;;  %3205 = vmatprep.subr.mxu0 %v905_v16  ;;  %v1494_v33 = vld [vmem:[#allocation11 + $0x1d70] sm:$0xff]  ;;  %v781_v16 = vld [vmem:[#allocation11 + $0x728] sm:$0xff] }
 0x405   : > { %3274 = vmatprep.subr.mxu1 %v1598_v18  ;;  %3206 = vmatpush2.msra.mxu0 %v904_v58  ;;  %v1474_v18 = vld [vmem:[#allocation11 + $0x1cd0] sm:$0xff]  ;;  %v780_v58 = vld [vmem:[#allocation11 + $0x720] sm:$0xff] }
 0x406   : > { %3275 = vmatpush2.msra.mxu1 %v1597_v53  ;;  %3207 = vmatprep.mubr.f32.mxu0 %v7942_v14  ;;  %v1473_v53 = vld [vmem:[#allocation11 + $0x1cc8] sm:$0xff] }
 0x407   : > { %3276 = vmatprep.subr.mxu1 %v1577_v55  ;;  %3285 = vmatprep.subr.mxu0 %v886_v26  ;;  %v760_v55 = vld [vmem:[#allocation11 + $0x680] sm:$0xff]  ;;  %v1453_v26 = vld [vmem:[#allocation11 + $0x1c28] sm:$0xff] }
 0x408   : > { %3208 = vmatmul.mubr.f32.vlgmr.msra.gmra.mxu0 %v7945_v20  ;;  %3277 = vmatpush2.msra.mxu1 %v1576_v50  ;;  %v759_v50 = vld [vmem:[#allocation11 + $0x678] sm:$0xff] }
 0x409   : > { %3286 = vmatpush1.msra.mxu0 %v885_v2  ;;  %3278 = vmatprep.mubr.f32.mxu1 %v7948_v61  ;;  %v1452_v2 = vld [vmem:[#allocation11 + $0x1c20] sm:$0xff] }
 0x40a   : > { %3287 = vmatprep.subr.mxu0 %v865_v21  ;;  %3356 = vmatprep.subr.mxu1 %v1558_v0  ;;  %v739_v21 = vld [vmem:[#allocation11 + $0x5d8] sm:$0xff]  ;;  %v1432_v0 = vld [vmem:[#allocation11 + $0x1b80] sm:$0xff] }
 0x40b   : > { %3279 = vmatmul.mubr.f32.vlgmr.msra.gmra.mxu1 %v7951_v37  ;;  %3288 = vmatpush1.msra.mxu0 %v864_v19  ;;  %v738_v19 = vld [vmem:[#allocation11 + $0x5d0] sm:$0xff] }
 0x40c   : > { %3357 = vmatpush1.msra.mxu1 %v1557_v30  ;;  %3289 = vmatprep.subr.mxu0 %v844_v10  ;;  %v1431_v30 = vld [vmem:[#allocation11 + $0x1b78] sm:$0xff]  ;;  %v718_v10 = vld [vmem:[#allocation11 + $0x530] sm:$0xff] }
 0x40d   : > { %3358 = vmatprep.subr.mxu1 %v1537_v9  ;;  %3290 = vmatpush1.msra.mxu0 %v843_v42  ;;  %v1411_v9 = vld [vmem:[#allocation11 + $0x1ad8] sm:$0xff]  ;;  %v717_v42 = vld [vmem:[#allocation11 + $0x528] sm:$0xff] }
 0x40e   : > { %3359 = vmatpush1.msra.mxu1 %v1536_v22  ;;  %3291 = vmatprep.subr.mxu0 %v823_v23  ;;  %v1410_v22 = vld [vmem:[#allocation11 + $0x1ad0] sm:$0xff]  ;;  %v697_v23 = vld [vmem:[#allocation11 + $0x488] sm:$0xff] }
 0x40f   : > { %3360 = vmatprep.subr.mxu1 %v1516_v59  ;;  %3292 = vmatpush1.msra.mxu0 %v822_v7  ;;  %v1390_v59 = vld [vmem:[#allocation11 + $0x1a30] sm:$0xff]  ;;  %v696_v7 = vld [vmem:[#allocation11 + $0x480] sm:$0xff] }
 0x410   : > { %3361 = vmatpush1.msra.mxu1 %v1515_v47  ;;  %3293 = vmatprep.subr.mxu0 %v802_v60  ;;  %v1389_v47 = vld [vmem:[#allocation11 + $0x1a28] sm:$0xff]  ;;  %v676_v60 = vld [vmem:[#allocation11 + $0x3e0] sm:$0xff] }
 0x411   : > { %3362 = vmatprep.subr.mxu1 %v1495_v57  ;;  %3294 = vmatpush1.msra.mxu0 %v801_v17  ;;  %v1369_v57 = vld [vmem:[#allocation11 + $0x1988] sm:$0xff]  ;;  %v675_v17 = vld [vmem:[#allocation11 + $0x3d8] sm:$0xff] }
 0x412   : > { %3363 = vmatpush1.msra.mxu1 %v1494_v33  ;;  %3295 = vmatprep.subr.mxu0 %v781_v16  ;;  %v1368_v33 = vld [vmem:[#allocation11 + $0x1980] sm:$0xff]  ;;  %v655_v16 = vld [vmem:[#allocation11 + $0x338] sm:$0xff] }
 0x413   : > { %3364 = vmatprep.subr.mxu1 %v1474_v18  ;;  %3296 = vmatpush1.msra.mxu0 %v780_v58  ;;  %v1348_v18 = vld [vmem:[#allocation11 + $0x18e0] sm:$0xff]  ;;  %v654_v58 = vld [vmem:[#allocation11 + $0x330] sm:$0xff] }
 0x414   : > { %3365 = vmatpush1.msra.mxu1 %v1473_v53  ;;  %3297 = vmatprep.subr.mxu0 %v760_v55  ;;  %v1347_v53 = vld [vmem:[#allocation11 + $0x18d8] sm:$0xff]  ;;  %v634_v55 = vld [vmem:[#allocation11 + $0x290] sm:$0xff] }
 0x415   : > { %3366 = vmatprep.subr.mxu1 %v1453_v26  ;;  %3298 = vmatpush1.msra.mxu0 %v759_v50  ;;  %v1327_v26 = vld [vmem:[#allocation11 + $0x1838] sm:$0xff]  ;;  %v633_v50 = vld [vmem:[#allocation11 + $0x288] sm:$0xff] }
 0x416   : > { %3367 = vmatpush1.msra.mxu1 %v1452_v2  ;;  %3299 = vmatprep.subr.mxu0 %v739_v21  ;;  %v1326_v2 = vld [vmem:[#allocation11 + $0x1830] sm:$0xff]  ;;  %v613_v21 = vld [vmem:[#allocation11 + $0x1e8] sm:$0xff] }
 0x417   : > { %3368 = vmatprep.subr.mxu1 %v1432_v0  ;;  %3300 = vmatpush1.msra.mxu0 %v738_v19  ;;  %v1306_v0 = vld [vmem:[#allocation11 + $0x1790] sm:$0xff]  ;;  %v612_v19 = vld [vmem:[#allocation11 + $0x1e0] sm:$0xff] }
 0x418   : > { %3369 = vmatpush1.msra.mxu1 %v1431_v30  ;;  %3301 = vmatprep.subr.mxu0 %v718_v10  ;;  %v1305_v30 = vld [vmem:[#allocation11 + $0x1788] sm:$0xff]  ;;  %v592_v10 = vld [vmem:[#allocation11 + $0x140] sm:$0xff] }
 0x419   : > { %3370 = vmatprep.subr.mxu1 %v1411_v9  ;;  %3302 = vmatpush1.msra.mxu0 %v717_v42  ;;  %v1285_v9 = vld [vmem:[#allocation11 + $0x16e8] sm:$0xff]  ;;  %v591_v42 = vld [vmem:[#allocation11 + $0x138] sm:$0xff] }
 0x41a   : > { %3371 = vmatpush1.msra.mxu1 %v1410_v22  ;;  %3303 = vmatprep.subr.mxu0 %v697_v23  ;;  %v1284_v22 = vld [vmem:[#allocation11 + $0x16e0] sm:$0xff]  ;;  %v571_v23 = vld [vmem:[#allocation11 + $0x98] sm:$0xff] }
 0x41b   : > { %3372 = vmatprep.subr.mxu1 %v1390_v59  ;;  %3304 = vmatpush1.msra.mxu0 %v696_v7  ;;  %v1264_v7 = vld [vmem:[#allocation11 + $0x1640] sm:$0xff] }
 0x41c   : > { %3373 = vmatpush1.msra.mxu1 %v1389_v47  ;;  %3305 = vmatprep.subr.mxu0 %v676_v60  ;;  %v570_v47 = vld [vmem:[#allocation11 + $0x90] sm:$0xff]  ;;  %v1263_v60 = vld [vmem:[#allocation11 + $0x1638] sm:$0xff] }
 0x41d   : > { %3374 = vmatprep.subr.mxu1 %v1369_v57  ;;  %3306 = vmatpush1.msra.mxu0 %v675_v17  ;;  %v1222_v57 = vld [vmem:[#allocation11 + $0x14f0] sm:$0xff]  ;;  %v1243_v17 = vld [vmem:[#allocation11 + $0x1598] sm:$0xff] }
 0x41e   : > { %3375 = vmatpush1.msra.mxu1 %v1368_v33  ;;  %3307 = vmatprep.subr.mxu0 %v655_v16  ;;  %v1221_v33 = vld [vmem:[#allocation11 + $0x14e8] sm:$0xff]  ;;  %v1242_v16 = vld [vmem:[#allocation11 + $0x1590] sm:$0xff] }
 0x41f   : > { %3376 = vmatprep.subr.mxu1 %v1348_v18  ;;  %3308 = vmatpush1.msra.mxu0 %v654_v58  ;;  %v1201_v18 = vld [vmem:[#allocation11 + $0x1448] sm:$0xff] }
 0x420   : > { %3377 = vmatpush1.msra.mxu1 %v1347_v53  ;;  %3309 = vmatprep.subr.mxu0 %v634_v55  ;;  %v1894_v53 = vld [vmem:[#allocation11 + $0x29f0] sm:$0xff]  ;;  %v1200_v55 = vld [vmem:[#allocation11 + $0x1440] sm:$0xff] }
 0x421   : > { %3378 = vmatprep.subr.mxu1 %v1327_v26  ;;  %3310 = vmatpush1.msra.mxu0 %v633_v50  ;;  %v1893_v26 = vld [vmem:[#allocation11 + $0x29e8] sm:$0xff]  ;;  %v1180_v50 = vld [vmem:[#allocation11 + $0x13a0] sm:$0xff] }
 0x422   : > { %3379 = vmatpush1.msra.mxu1 %v1326_v2  ;;  %3311 = vmatprep.subr.mxu0 %v613_v21  ;;  %v1873_v2 = vld [vmem:[#allocation11 + $0x2948] sm:$0xff]  ;;  %v1179_v21 = vld [vmem:[#allocation11 + $0x1398] sm:$0xff] }
 0x423   : > { %3380 = vmatprep.subr.mxu1 %v1306_v0  ;;  %3312 = vmatpush1.msra.mxu0 %v612_v19  ;;  %v1872_v0 = vld [vmem:[#allocation11 + $0x2940] sm:$0xff]  ;;  %v1159_v19 = vld [vmem:[#allocation11 + $0x12f8] sm:$0xff] }
 0x424   : > { %3381 = vmatpush1.msra.mxu1 %v1305_v30  ;;  %3313 = vmatprep.subr.mxu0 %v592_v10  ;;  %v1852_v10 = vld [vmem:[#allocation11 + $0x28a0] sm:$0xff] }
 0x425   : > { %3382 = vmatprep.subr.mxu1 %v1285_v9  ;;  %3314 = vmatpush1.msra.mxu0 %v591_v42  ;;  %v1158_v9 = vld [vmem:[#allocation11 + $0x12f0] sm:$0xff]  ;;  %v1851_v42 = vld [vmem:[#allocation11 + $0x2898] sm:$0xff] }
 0x426   : > { %3383 = vmatpush1.msra.mxu1 %v1284_v22  ;;  %3315 = vmatprep.subr.mxu0 %v571_v23  ;;  %v1138_v22 = vld [vmem:[#allocation11 + $0x1250] sm:$0xff]  ;;  %v1831_v23 = vld [vmem:[#allocation11 + $0x27f8] sm:$0xff] }
 0x427   : > { %3384 = vmatprep.subr.mxu1 %v1264_v7  ;;  %3316 = vmatpush1.msra.mxu0 %v570_v47  ;;  %v1137_v7 = vld [vmem:[#allocation11 + $0x1248] sm:$0xff]  ;;  %v1830_v47 = vld [vmem:[#allocation11 + $0x27f0] sm:$0xff] }
 0x428   : > { %3385 = vmatpush1.msra.mxu1 %v1263_v60  ;;  %3317 = vmatprep.subr.mxu0 %v1222_v57  ;;  %v1117_v60 = vld [vmem:[#allocation11 + $0x11a8] sm:$0xff] }
 0x429   : > { %3386 = vmatprep.subr.mxu1 %v1243_v17  ;;  %3318 = vmatpush2.msra.mxu0 %v1221_v33  ;;  %v1810_v17 = vld [vmem:[#allocation11 + $0x2750] sm:$0xff]  ;;  %v1116_v33 = vld [vmem:[#allocation11 + $0x11a0] sm:$0xff] }
 0x42a   : > { %v7954_v59 = vpop.permute.xlu1 %4400  ;;  %3387 = vmatpush1.msra.mxu1 %v1242_v16  ;;  %3319 = vmatprep.subr.mxu0 %v1201_v18  ;;  %v1809_v16 = vld [vmem:[#allocation11 + $0x2748] sm:$0xff]  ;;  %v1096_v18 = vld [vmem:[#allocation11 + $0x1100] sm:$0xff] }
 0x42b   : > { %3388 = vmatprep.subr.mxu1 %v1894_v53  ;;  %3320 = vmatpush2.msra.mxu0 %v1200_v55  ;;  %v1789_v55 = vld [vmem:[#allocation11 + $0x26a8] sm:$0xff] }
 0x42c   : > { %3389 = vmatpush2.msra.mxu1 %v1893_v26  ;;  %3321 = vmatprep.subr.mxu0 %v1180_v50  ;;  %v7962_v53 = vpop.permute.xlu0 %4421  ;;  %v1095_v26 = vld [vmem:[#allocation11 + $0x10f8] sm:$0xff]  ;;  %v1788_v50 = vld [vmem:[#allocation11 + $0x26a0] sm:$0xff] }
 0x42d   : > { %3390 = vmatprep.subr.mxu1 %v1873_v2  ;;  %3322 = vmatpush2.msra.mxu0 %v1179_v21  ;;  %v1075_v2 = vld [vmem:[#allocation11 + $0x1058] sm:$0xff] }
 0x42e   : > { %v7956_v58 = vpop.permute.xlu1 %4403  ;;  %3391 = vmatpush2.msra.mxu1 %v1872_v0  ;;  %3323 = vmatprep.subr.mxu0 %v1159_v19  ;;  %v1768_v0 = vld [vmem:[#allocation11 + $0x2600] sm:$0xff]  ;;  %v1074_v19 = vld [vmem:[#allocation11 + $0x1050] sm:$0xff] }
 0x42f   : > { %3392 = vmatprep.subr.mxu1 %v1852_v10  ;;  %3324 = vmatpush2.msra.mxu0 %v1158_v9  ;;  %v1767_v10 = vld [vmem:[#allocation11 + $0x25f8] sm:$0xff]  ;;  %v1054_v9 = vld [vmem:[#allocation11 + $0xfb0] sm:$0xff] }
 0x430   : > { %3393 = vmatpush2.msra.mxu1 %v1851_v42  ;;  %3325 = vmatprep.subr.mxu0 %v1138_v22  ;;  %v1747_v42 = vld [vmem:[#allocation11 + $0x2558] sm:$0xff]  ;;  %v1053_v22 = vld [vmem:[#allocation11 + $0xfa8] sm:$0xff] }
 0x431   : > { %3394 = vmatprep.subr.mxu1 %v1831_v23  ;;  %3326 = vmatpush2.msra.mxu0 %v1137_v7  ;;  %v7966_v23 = vld [vmem:[#allocation13 + $0x8] sm:$0xff] }
 0x432   : > { %v7958_v30 = vpop.permute.xlu1 %4406  ;;  %3395 = vmatpush2.msra.mxu1 %v1830_v47  ;;  %3327 = vmatprep.subr.mxu0 %v1117_v60  ;;  %v1953_v7 = vrot.slane %v7966_v23, %v7767_v13  ;;  %v1746_v47 = vld [vmem:[#allocation11 + $0x2550] sm:$0xff]  ;;  %v1033_v60 = vld [vmem:[#allocation11 + $0xf08] sm:$0xff] }
 0x433   : > { %3396 = vmatprep.subr.mxu1 %v1810_v17  ;;  %3328 = vmatpush2.msra.mxu0 %v1116_v33  ;;  %v7970_v17 = vpop.permute.xlu0 %4427 }
 0x434   : > { %3397 = vmatpush2.msra.mxu1 %v1809_v16  ;;  %3329 = vmatprep.subr.mxu0 %v1096_v18  ;;  %v1726_v16 = vld [vmem:[#allocation11 + $0x24b0] sm:$0xff]  ;;  %v1032_v18 = vld [vmem:[#allocation11 + $0xf00] sm:$0xff] }
 0x435   : > { %3398 = vmatprep.subr.mxu1 %v1789_v55  ;;  %3330 = vmatpush2.msra.mxu0 %v1095_v26  ;;  %v1725_v55 = vld [vmem:[#allocation11 + $0x24a8] sm:$0xff]  ;;  %v1012_v26 = vld [vmem:[#allocation11 + $0xe60] sm:$0xff] }
 0x436   : > { %v7960_v57 = vpop.permute.xlu1 %4409  ;;  %3399 = vmatpush2.msra.mxu1 %v1788_v50  ;;  %3331 = vmatprep.subr.mxu0 %v1075_v2  ;;  %v2925_v50 = vpop.f32.mrf.mxu0  ;;  %v1705_v2 = vld [vmem:[#allocation11 + $0x2408] sm:$0xff] }
 0x437   : > { %3400 = vmatprep.subr.mxu1 %v1768_v0  ;;  %3332 = vmatpush2.msra.mxu0 %v1074_v19  ;;  %v1011_v0 = vld [vmem:[#allocation11 + $0xe58] sm:$0xff]  ;;  %v2926_v19 = vadd.f32 %v2925_v50, %v1953_v7  ;;  %v1642_v50 = vld [vmem:[#allocation11 + $0x2210] sm:$0xff] }
 0x438   : > { %3401 = vmatpush2.msra.mxu1 %v1767_v10  ;;  %3333 = vmatprep.subr.mxu0 %v1054_v9  ;;  %v1684_v10 = vld [vmem:[#allocation11 + $0x2360] sm:$0xff]  ;;  %v990_v9 = vld [vmem:[#allocation11 + $0xdb0] sm:$0xff]  ;;  %v1663_v7 = vld [vmem:[#allocation11 + $0x22b8] sm:$0xff] }
 0x439   : > { %3402 = vmatprep.subr.mxu1 %v1747_v42  ;;  %3334 = vmatpush2.msra.mxu0 %v1053_v22  ;;  %v2996_v42 = vpop.f32.mrf.mxu1  ;;  %v1683_v22 = vld [vmem:[#allocation11 + $0x2358] sm:$0xff] }
 0x43a   : > { %v7964_v21 = vpop.permute.xlu1 %4412  ;;  %3403 = vmatpush2.msra.mxu1 %v1746_v47  ;;  %3335 = vmatprep.subr.mxu0 %v1033_v60  ;;  %v7976_v47 = vadd.f32 %v2996_v42, %v2926_v19  ;;  %v7978_v60 = vpop.permute.xlu0 %4433  ;;  %v928_v19 = vld [vmem:[#allocation11 + $0xbc0] sm:$0xff]  ;;  %v907_v42 = vld [vmem:[#allocation11 + $0xb18] sm:$0xff] }
 0x43b   : > { %3404 = vmatprep.subr.mxu1 %v1726_v16  ;;  %3336 = vmatpush2.msra.mxu0 %v1032_v18  ;;  %v969_v16 = vld [vmem:[#allocation11 + $0xd08] sm:$0xff]  ;;  %v1662_v18 = vld [vmem:[#allocation11 + $0x22b0] sm:$0xff] }
 0x43c   : > { %3405 = vmatpush2.msra.mxu1 %v1725_v55  ;;  %3337 = vmatprep.subr.mxu0 %v1012_v26  ;;  %8351 = vst [vmem:[#allocation35_spill] sm:$0xff] %v7976_v47  ;;  %v949_v55 = vld [vmem:[#allocation11 + $0xc68] sm:$0xff]  ;;  %v4459_v47 = vrot.slane %v7958_v30, %v7667_v40  ;;  %v4481_v30 = vrot.slane %v7962_v53, %v7670_v15 }
 0x43d   : > { %3406 = vmatprep.subr.mxu1 %v1705_v2  ;;  %3338 = vmatpush2.msra.mxu0 %v1011_v0  ;;  %v948_v2 = vld [vmem:[#allocation11 + $0xc60] sm:$0xff]  ;;  %v1641_v0 = vld [vmem:[#allocation11 + $0x2208] sm:$0xff]  ;;  %v4499_v53 = vrot.slane %v7978_v60, %v7670_v15 }
 0x43e   : > { %v7972_v33 = vpop.permute.xlu1 %4415  ;;  %3407 = vmatpush2.msra.mxu1 %v1704_v45  ;;  %3339 = vmatprep.subr.mxu0 %v991_v63  ;;  %v1621_v45 = vld [vmem:[#allocation11 + $0x2168] sm:$0xff]  ;;  %v927_v63 = vld [vmem:[#allocation11 + $0xbb8] sm:$0xff] }
 0x43f   : > { %3408 = vmatprep.subr.mxu1 %v1684_v10  ;;  %3340 = vmatpush2.msra.mxu0 %v990_v9  ;;  %v4463_v10 = vrot.slane %v7960_v57, %v7670_v15  ;;  %v1620_v9 = vld [vmem:[#allocation11 + $0x2160] sm:$0xff] }
 0x440   : > { %3409 = vmatpush2.msra.mxu1 %v1683_v22  ;;  %3341 = vmatprep.subr.mxu0 %v970_v31  ;;  %v4454_v31 = vrot.slane %v7956_v58, %v7670_v15  ;;  %v4440_v22 = vpop.permute.xlu0 %4439  ;;  %v4450_v58 = vrot.slane %v7954_v59, %v7667_v40  ;;  %v1578_v59 = vld [vmem:[#allocation11 + $0x2010] sm:$0xff] }
 0x441   : > { %3410 = vmatprep.subr.mxu1 %v1663_v7  ;;  %3342 = vmatpush2.msra.mxu0 %v969_v16  ;;  %v4472_v7 = vrot.slane %v7972_v33, %v7670_v15  ;;  %v4468_v33 = vrot.slane %v7964_v21, %v7667_v40  ;;  %v4490_v21 = vrot.slane %v7970_v17, %v7670_v15  ;;  %v1895_v17 = vld [vmem:[#allocation11 + $0x29f8] sm:$0xff] }
 0x442   : > { %v7974_v41 = vpop.permute.xlu1 %4418  ;;  %3411 = vmatpush2.msra.mxu1 %v1662_v18  ;;  %3343 = vmatprep.subr.mxu0 %v949_v55  ;;  %v1600_v18 = vld [vmem:[#allocation11 + $0x20c0] sm:$0xff]  ;;  %v906_v55 = vld [vmem:[#allocation11 + $0xb10] sm:$0xff] }
 0x443   : > { %3412 = vmatprep.subr.mxu1 %v1642_v50  ;;  %3344 = vmatpush2.msra.mxu0 %v948_v2  ;;  %v4477_v57 = vrot.slane %v7974_v41, %v7667_v40  ;;  %v1599_v50 = vld [vmem:[#allocation11 + $0x20b8] sm:$0xff]  ;;  %v4464_v41 = vsel %vm4210_vm0, %v4463_v10, %v4459_v47 }
 0x444   : > { %3413 = vmatpush2.msra.mxu1 %v1641_v0  ;;  %3345 = vmatprep.subr.mxu0 %v928_v19  ;;  %v1579_v0 = vld [vmem:[#allocation11 + $0x2018] sm:$0xff] }
 0x445   : > { %3414 = vmatprep.subr.mxu1 %v1621_v45  ;;  %3346 = vmatpush2.msra.mxu0 %v927_v63  ;;  %v1223_v19 = vld [vmem:[#allocation11 + $0x14f8] sm:$0xff]  ;;  %v4455_v63 = vsel %vm4210_vm0, %v4454_v31, %v4450_v58  ;;  %v4482_v47 = vsel %vm4210_vm0, %v4481_v30, %v4477_v57  ;;  %v4508_v31 = vrot.slane %v4440_v22, %v7670_v15  ;;  %v845_v30 = vld [vmem:[#allocation11 + $0x928] sm:$0xff] }
 0x446   : > { %v7980_v26 = vpop.permute.xlu1 %4424  ;;  %3415 = vmatpush2.msra.mxu1 %v1620_v9  ;;  %3347 = vmatprep.subr.mxu0 %v907_v42  ;;  %v887_v42 = vld [vmem:[#allocation11 + $0xa78] sm:$0xff] }
 0x447   : > { %v4486_v2 = vrot.slane %v7980_v26, %v7667_v40  ;;  %3416 = vmatprep.subr.mxu1 %v1600_v18  ;;  %3348 = vmatpush2.msra.mxu0 %v906_v55  ;;  %v4473_v26 = vsel %vm4210_vm0, %v4472_v7, %v4468_v33  ;;  %v4519_v7 = vsel %vm4275_vm1, %v4464_v41, %v4455_v63  ;;  %v4446_v18 = vpop.permute.xlu0 %4445  ;;  %v1559_v58 = vld [vmem:[#allocation11 + $0x1f78] sm:$0xff]  ;;  %v1181_v33 = vld [vmem:[#allocation11 + $0x13a8] sm:$0xff]  ;;  %v1160_v63 = vld [vmem:[#allocation11 + $0x1300] sm:$0xff] }
 0x448   : > { %3417 = vmatpush2.msra.mxu1 %v1599_v50  ;;  %3349 = vmatprep.mubr.f32.mxu0 %v7942_v14  ;;  %v866_v50 = vld [vmem:[#allocation11 + $0x9d0] sm:$0xff]  ;;  %v4520_v60 = vsel %vm4277_vm2, %v4473_v26, %v4519_v7  ;;  %v4517_v41 = vrot.slane %v4446_v18, %v7670_v15  ;;  %v803_v18 = vld [vmem:[#allocation11 + $0x7d8] sm:$0xff] }
 0x449   : > { %3418 = vmatprep.subr.mxu1 %v1579_v0  ;;  %6082 = vmatprep.subr.mxu0 %v1223_v19  ;;  %v4491_v55 = vsel %vm4210_vm0, %v4490_v21, %v4486_v2  ;;  %v4521_v22 = vsel %vm4279_vm3, %v4482_v47, %v4520_v60  ;;  %v1874_v2 = vld [vmem:[#allocation11 + $0x2950] sm:$0xff]  ;;  %v1811_v60 = vld [vmem:[#allocation11 + $0x2758] sm:$0xff] }
 0x44a   : > { %v4431_v16 = vpop.permute.xlu1 %4430  ;;  %3350 = vmatmul.mubr.f32.vlgmr.msra.gmra.mxu0 %v7945_v20  ;;  %3419 = vmatpush2.msra.mxu1 %v1578_v59  ;;  %v4522_v59 = vsel %vm4281_vm4, %v4491_v55, %v4521_v22  ;;  %v1538_v21 = vld [vmem:[#allocation11 + $0x1ed0] sm:$0xff]  ;;  %v1496_v55 = vld [vmem:[#allocation11 + $0x1d80] sm:$0xff] }
 0x44b   : > { %v4495_v45 = vrot.slane %v4431_v16, %v7667_v40  ;;  %v1202_v16 = vld [vmem:[#allocation11 + $0x1450] sm:$0xff]  ;;  %6083 = vmatpush3.msra.mxu0 %v887_v42  ;;  %3420 = vmatprep.mubr.f32.mxu1 %v7948_v61  ;;  %v824_v42 = vld [vmem:[#allocation11 + $0x880] sm:$0xff] }
 0x44c   : > { %6084 = vmatprep.subr.mxu0 %v1202_v16  ;;  %6117 = vmatprep.subr.mxu1 %v1895_v17  ;;  %v1139_v17 = vld [vmem:[#allocation11 + $0x1258] sm:$0xff]  ;;  %v1790_v22 = vld [vmem:[#allocation11 + $0x26b0] sm:$0xff] }
 0x44d   : > { %v4500_v57 = vsel %vm4210_vm0, %v4499_v53, %v4495_v45  ;;  %3421 = vmatmul.mubr.f32.vlgmr.msra.gmra.mxu1 %v7951_v37  ;;  %6085 = vmatpush3.msra.mxu0 %v866_v50  ;;  %v1118_v50 = vld [vmem:[#allocation11 + $0x11b0] sm:$0xff] }
 0x44e   : > { %v4437_v9 = vpop.permute.xlu1 %4436  ;;  %v4523_v26 = vsel %vm4283_vm5, %v4500_v57, %v4522_v59  ;;  %6118 = vmatpush3.msra.mxu1 %v1559_v58  ;;  %6086 = vmatprep.subr.mxu0 %v1181_v33  ;;  %v782_v57 = vld [vmem:[#allocation11 + $0x730] sm:$0xff]  ;;  %v1475_v58 = vld [vmem:[#allocation11 + $0x1cd8] sm:$0xff]  ;;  %v1097_v33 = vld [vmem:[#allocation11 + $0x1108] sm:$0xff] }
 0x44f   : > { %v4504_v10 = vrot.slane %v4437_v9, %v7667_v40  ;;  %v1853_v9 = vld [vmem:[#allocation11 + $0x28a8] sm:$0xff]  ;;  %6119 = vmatprep.subr.mxu1 %v1874_v2  ;;  %6087 = vmatpush3.msra.mxu0 %v845_v30  ;;  %v1076_v2 = vld [vmem:[#allocation11 + $0x1060] sm:$0xff] }
 0x450   : > { %6120 = vmatpush3.msra.mxu1 %v1538_v21  ;;  %6088 = vmatprep.subr.mxu0 %v1160_v63  ;;  %v1769_v30 = vld [vmem:[#allocation11 + $0x2608] sm:$0xff]  ;;  %v1748_v21 = vld [vmem:[#allocation11 + $0x2560] sm:$0xff]  ;;  %v719_v63 = vld [vmem:[#allocation11 + $0x538] sm:$0xff] }
 0x451   : > { %v4509_v0 = vsel %vm4210_vm0, %v4508_v31, %v4504_v10  ;;  %v1517_v10 = vld [vmem:[#allocation11 + $0x1e28] sm:$0xff]  ;;  %v1832_v31 = vld [vmem:[#allocation11 + $0x2800] sm:$0xff]  ;;  %6121 = vmatprep.subr.mxu1 %v1853_v9  ;;  %6089 = vmatpush3.msra.mxu0 %v824_v42  ;;  %v1034_v9 = vld [vmem:[#allocation11 + $0xf10] sm:$0xff] }
 0x452   : > { %v4443_v19 = vpop.permute.xlu1 %4442  ;;  %v4524_v47 = vsel %vm4285_vm6, %v4509_v0, %v4523_v26  ;;  %6122 = vmatpush3.msra.mxu1 %v1517_v10  ;;  %6090 = vmatprep.subr.mxu0 %v1139_v17  ;;  %v761_v0 = vld [vmem:[#allocation11 + $0x688] sm:$0xff]  ;;  %v1412_v26 = vld [vmem:[#allocation11 + $0x1ae0] sm:$0xff]  ;;  %v1727_v42 = vld [vmem:[#allocation11 + $0x24b8] sm:$0xff] }
 0x453   : > { %v4513_v45 = vrot.slane %v4443_v19, %v7667_v40  ;;  %6123 = vmatprep.subr.mxu1 %v1832_v31  ;;  %6091 = vmatpush3.msra.mxu0 %v803_v18  ;;  %v1454_v19 = vld [vmem:[#allocation11 + $0x1c30] sm:$0xff]  ;;  %v1433_v59 = vld [vmem:[#allocation11 + $0x1b88] sm:$0xff] }
 0x454   : > { %6124 = vmatpush3.msra.mxu1 %v1496_v55  ;;  %6092 = vmatprep.subr.mxu0 %v1118_v50  ;;  %v1013_v10 = vld [vmem:[#allocation11 + $0xe68] sm:$0xff]  ;;  %v1370_v31 = vld [vmem:[#allocation11 + $0x1990] sm:$0xff]  ;;  %v656_v55 = vld [vmem:[#allocation11 + $0x340] sm:$0xff] }
 0x455   : > { %v4518_v53 = vsel %vm4210_vm0, %v4517_v41, %v4513_v45  ;;  %6125 = vmatprep.subr.mxu1 %v1811_v60  ;;  %6093 = vmatpush3.msra.mxu0 %v782_v57  ;;  %v740_v41 = vld [vmem:[#allocation11 + $0x5e0] sm:$0xff]  ;;  %v1055_v45 = vld [vmem:[#allocation11 + $0xfb8] sm:$0xff]  ;;  %v677_v17 = vld [vmem:[#allocation11 + $0x3e8] sm:$0xff] }
 0x456   : > { %v4525_v16 = vsel %vm4287_vm7, %v4518_v53, %v4524_v47  ;;  %6126 = vmatpush3.msra.mxu1 %v1475_v58  ;;  %6094 = vmatprep.subr.mxu0 %v1097_v33  ;;  %v698_v53 = vld [vmem:[#allocation11 + $0x490] sm:$0xff]  ;;  %v1391_v47 = vld [vmem:[#allocation11 + $0x1a38] sm:$0xff]  ;;  %v1685_v18 = vld [vmem:[#allocation11 + $0x2368] sm:$0xff] }
 0x457   : > { %v4527_v7 = vsel %vm4290_vm8, %v4525_v16, 0.0  ;;  %6127 = vmatprep.subr.mxu1 %v1790_v22  ;;  %6095 = vmatpush3.msra.mxu0 %v761_v0  ;;  %v1706_v16 = vld [vmem:[#allocation11 + $0x2410] sm:$0xff]  ;;  %v1349_v50 = vld [vmem:[#allocation11 + $0x18e8] sm:$0xff]  ;;  %v971_v60 = vld [vmem:[#allocation11 + $0xd18] sm:$0xff] }
 0x458   : > { %4528 = vadd.xlane.f32.xlu1 %v4527_v7  ;;  %6128 = vmatpush3.msra.mxu1 %v1454_v19  ;;  %v992_v7 = vld [vmem:[#allocation11 + $0xdc0] sm:$0xff]  ;;  %v635_v58 = vld [vmem:[#allocation11 + $0x298] sm:$0xff]  ;;  %v950_v22 = vld [vmem:[#allocation11 + $0xc70] sm:$0xff] }
 0x459   : > { %6096 = vmatprep.subr.mxu0 %v1076_v2  ;;  %6129 = vmatprep.subr.mxu1 %v1769_v30  ;;  %v1664_v57 = vld [vmem:[#allocation11 + $0x22c0] sm:$0xff]  ;;  %v1643_v0 = vld [vmem:[#allocation11 + $0x2218] sm:$0xff]  ;;  %v614_v19 = vld [vmem:[#allocation11 + $0x1f0] sm:$0xff] }
 0x45a   : > { %6097 = vmatpush3.msra.mxu0 %v740_v41  ;;  %6130 = vmatpush3.msra.mxu1 %v1433_v59  ;;  %v1328_v33 = vld [vmem:[#allocation11 + $0x1840] sm:$0xff]  ;;  %v1307_v2 = vld [vmem:[#allocation11 + $0x1798] sm:$0xff]  ;;  %v929_v30 = vld [vmem:[#allocation11 + $0xbc8] sm:$0xff] }
 0x45b   : > { %6098 = vmatprep.subr.mxu0 %v1055_v45  ;;  %6131 = vmatprep.subr.mxu1 %v1748_v21  ;;  %v1622_v41 = vld [vmem:[#allocation11 + $0x2170] sm:$0xff]  ;;  %v593_v59 = vld [vmem:[#allocation11 + $0x148] sm:$0xff]  ;;  %v908_v21 = vld [vmem:[#allocation11 + $0xb20] sm:$0xff] }
 0x45c   : > { %6099 = vmatpush3.msra.mxu0 %v719_v63  ;;  %6132 = vmatpush3.msra.mxu1 %v1412_v26  ;;  %v1286_v45 = vld [vmem:[#allocation11 + $0x16f0] sm:$0xff]  ;;  %v1601_v63 = vld [vmem:[#allocation11 + $0x20c8] sm:$0xff]  ;;  %v572_v26 = vld [vmem:[#allocation11 + $0xa0] sm:$0xff] }
 0x45d   : > { %6100 = vmatprep.subr.mxu0 %v1034_v9  ;;  %6133 = vmatprep.subr.mxu1 %v1727_v42  ;;  %v1265_v9 = vld [vmem:[#allocation11 + $0x1648] sm:$0xff]  ;;  %v1580_v42 = vld [vmem:[#allocation11 + $0x2020] sm:$0xff] }
 0x45e   : > { %6101 = vmatpush3.msra.mxu0 %v698_v53  ;;  %6134 = vmatpush3.msra.mxu1 %v1391_v47  ;;  %v1244_v53 = vld [vmem:[#allocation11 + $0x15a0] sm:$0xff]  ;;  %v1961_v47 = vrot.slane %v7966_v23, %v7785_v43 }
 0x45f   : > { %6102 = vmatprep.subr.mxu0 %v1013_v10  ;;  %6135 = vmatprep.subr.mxu1 %v1706_v16  ;;  %v8035_v10 = vpop.f32.mrf.mxu0 }
 0x460   : > { %6103 = vmatpush3.msra.mxu0 %v677_v17  ;;  %6136 = vmatpush3.msra.mxu1 %v1370_v31  ;;  %v8037_v17 = vpop.f32.mrf.mxu1 }
 0x461   : > { %6104 = vmatprep.subr.mxu0 %v992_v7  ;;  %6137 = vmatprep.subr.mxu1 %v1685_v18  ;;  %v8041_v18 = vld [vmem:[#allocation13 + $0x10] sm:$0x1f] }
 0x462   : > { %6105 = vmatpush3.msra.mxu0 %v656_v55  ;;  %6138 = vmatpush3.msra.mxu1 %v1349_v50 }
 0x463   : > { %6106 = vmatprep.subr.mxu0 %v971_v60  ;;  %6139 = vmatprep.subr.mxu1 %v1664_v57 }
 0x464   : > { %6107 = vmatpush3.msra.mxu0 %v635_v58  ;;  %6140 = vmatpush3.msra.mxu1 %v1328_v33 }
 0x465   : > { %6108 = vmatprep.subr.mxu0 %v950_v22  ;;  %6141 = vmatprep.subr.mxu1 %v1643_v0 }
 0x466   : > { %6109 = vmatpush3.msra.mxu0 %v614_v19  ;;  %6142 = vmatpush3.msra.mxu1 %v1307_v2 }
 0x467   : > { %6110 = vmatprep.subr.mxu0 %v929_v30  ;;  %6143 = vmatprep.subr.mxu1 %v1622_v41 }
 0x468   : > { %6111 = vmatpush3.msra.mxu0 %v593_v59  ;;  %6144 = vmatpush3.msra.mxu1 %v1286_v45 }
 0x469   : > { %6112 = vmatprep.subr.mxu0 %v908_v21  ;;  %6145 = vmatprep.subr.mxu1 %v1601_v63 }
 0x46a   : > { %6113 = vmatpush3.msra.mxu0 %v572_v26  ;;  %3491 = vmatprep.mubr.f32.mxu0 %v7942_v14 }
 0x46b   : > { %6146 = vmatpush3.msra.mxu1 %v1265_v9  ;;  %3492 = vmatmul.mubr.f32.vlgmr.msra.gmra.mxu0 %v7945_v20  ;;  %v1969_v20 = vrot.slane %v8041_v18, %v7246_v24 }
 0x46c   : > { %6147 = vmatprep.subr.mxu1 %v1580_v42  ;;  %3561 = vmatprep.mubr.f32.mxu1 %v7948_v61 }
 0x46d   : > { %6148 = vmatpush3.msra.mxu1 %v1244_v53 }
 0x46e   : > { %3562 = vmatmul.mubr.f32.vlgmr.msra.gmra.mxu1 %v7951_v37  ;;  %v1973_v37 = vrot.slane %v8041_v18, %v7249_v25 }
 0x484   : > { %v3067_v16 = vpop.f32.mrf.mxu0 }
 0x485   : > { %v3068_v31 = vadd.f32 %v3067_v16, %v1961_v47 }
 0x486   : > { %v3138_v14 = vpop.f32.mrf.mxu1  ;;  %v8045_v61 = vpop.f32.mrf.mxu0 }
 0x487   : > { %v8039_v7 = vadd.f32 %v3138_v14, %v3068_v31 }
 0x488   : > { %v8049_v55 = vpop.f32.mrf.mxu1 }
 0x4c8   : > { %v3209_v23 = vpop.f32.mrf.mxu0 }
 0x4c9   : > { %v3210_v50 = vadd.f32 %v3209_v23, %v1969_v20 }
 0x4ca   : > { %v3211_v60 = vpop.f32.mrf.mxu0 }
 0x4cb   : > { %v3212_v57 = vadd.f32 %v3211_v60, %v1973_v37  ;;  %v3280_v58 = vpop.f32.mrf.mxu1 }
 0x4cc   : > { %v8051_v33 = vadd.f32 %v3280_v58, %v3210_v50 }
 0x4cd   : > { %v3282_v22 = vpop.f32.mrf.mxu1 }
 0x4ce   : > { %v8053_v0 = vadd.f32 %v3282_v22, %v3212_v57 }
 0x4e1   : > { %v4529_v19 = vpop.xlane.xlu1 %4528 }
 0x4e2   : > { %v4550_v2 = vrot.slane %v4529_v19, %v7767_v13  ;;  %v4534_v30 = vrot.slane %v4529_v19, %v7246_v24  ;;  %v4562_v41 = vrot.slane %v4529_v19, %v7840_v49  ;;  %v4538_v59 = vrot.slane %v4529_v19, %v7249_v25 }
 0x4e3   : > { %v4542_v45 = vrot.slane %v4529_v19, %v7254_v11  ;;  %v4546_v47 = vrot.slane %v4529_v19, %v7257_v29  ;;  %v4554_v20 = vrot.slane %v4529_v19, %v7774_v48 }
 0x4e4   : > { %6467 = vrcp.f32 %v4550_v2 }
 0x4e5   : > { %6469 = vrcp.f32 %v4534_v30 }
 0x4e6   : > { %6471 = vrcp.f32 %v4562_v41 }
 0x4e7   : > { %6473 = vrcp.f32 %v4538_v59  ;;  %v4948_v59 = vld [vmem:[#allocation14 + $0x388] sm:$0xff] }
 0x4e8   : > { %6475 = vrcp.f32 %v4542_v45  ;;  %v4950_v45 = vld [vmem:[#allocation14 + $0x398] sm:$0xff]  ;;  %4982 = vmatprep.subr.mxu0 %v4948_v59 }
 0x4e9   : > { %6477 = vrcp.f32 %v4546_v47  ;;  %5053 = vmatprep.subr.mxu1 %v4950_v45  ;;  %v4899_v47 = vld [vmem:[#allocation14 + $0x200] sm:$0xff] }
 0x4ea   : > { %6479 = vrcp.f32 %v4554_v20  ;;  %v4868_v20 = vld [vmem:[#allocation14 + $0x108] sm:$0xff] }
 0x4f1   : > { %v6468_v21 = vpop.eup %6467 }
 0x4f2   : > { %v6470_v63 = vpop.eup %6469  ;;  %v4585_v26 = vmul.f32 %v6468_v21, %v7888_v38  ;;  %v4584_v57 = vmul.f32 %v6468_v21, %v7915_v51  ;;  %v4947_v21 = vld [vmem:[#allocation14 + $0x380] sm:$0xff] }
 0x4f3   : > { %v6472_v9 = vpop.eup %6471  ;;  %v4572_v42 = vmul.f32 %v6470_v63, %v7850_v12  ;;  %v4573_v53 = vmul.f32 %v6470_v63, %v7861_v52  ;;  %v4932_v63 = vld [vmem:[#allocation14 + $0x308] sm:$0xff]  ;;  %4983 = vmatpush1.msra.mxu0 %v4947_v21 }
 0x4f4   : > { %4658 = vperm.xlu1 %6306, %v4585_v26   ;;  %v4593_v24 = vmul.f32 %v6472_v9, %v7927_v8  ;;  %v6474_v16 = vpop.eup %6473  ;;  %v4594_v41 = vmul.f32 %v6472_v9, %v7910_v5  ;;  %v4934_v26 = vld [vmem:[#allocation14 + $0x318] sm:$0xff]  ;;  %4984 = vmatprep.subr.mxu0 %v4932_v63  ;;  %v4900_v5 = vld [vmem:[#allocation14 + $0x208] sm:$0xff] }
 0x4f5   : > { %4613 = vperm.xlu0 %6305, %v4572_v42   ;;  %v4575_v31 = vmul.f32 %v6474_v16, %v7878_v56  ;;  %v4576_v38 = vmul.f32 %v6474_v16, %v7886_v62  ;;  %v6476_v14 = vpop.eup %6475  ;;  %v4558_v56 = vrot.slane %v4529_v19, %v7785_v43  ;;  %v1977_v62 = vrot.slane %v8041_v18, %v7254_v11  ;;  %v4933_v42 = vld [vmem:[#allocation14 + $0x310] sm:$0xff]  ;;  %v4902_v9 = vld [vmem:[#allocation14 + $0x218] sm:$0xff] }
 0x4f6   : > { %v4578_v12 = vmul.f32 %v6476_v14, %v7894_v54  ;;  %v4579_v52 = vmul.f32 %v6476_v14, %v7902_v46  ;;  %v6478_v8 = vpop.eup %6477  ;;  %v1981_v54 = vrot.slane %v8041_v18, %v7257_v29  ;;  %v4901_v16 = vld [vmem:[#allocation14 + $0x210] sm:$0xff]  ;;  %v4883_v14 = vld [vmem:[#allocation14 + $0x180] sm:$0xff] }
 0x4f7   : > { %v4581_v37 = vmul.f32 %v6478_v8, %v7908_v32  ;;  %v4582_v23 = vmul.f32 %v6478_v8, %v7874_v36  ;;  %6481 = vrcp.f32 %v4558_v56  ;;  %v6480_v22 = vpop.eup %6479  ;;  %v4867_v8 = vld [vmem:[#allocation14 + $0x100] sm:$0xff]  ;;  %v4852_v56 = vld [vmem:[#allocation14 + $0x88] sm:$0xff] }
 0x4f8   : > { %4683 = vperm.xlu1 %6306, %v4593_v24   ;;  %v4587_v36 = vmul.f32 %v6480_v22, %v7921_v1  ;;  %v4588_v29 = vmul.f32 %v6480_v22, %v7896_v28  ;;  %v4949_v1 = vld [vmem:[#allocation14 + $0x390] sm:$0xff]  ;;  %v4931_v28 = vld [vmem:[#allocation14 + $0x300] sm:$0xff]  ;;  %v6941_v22 = vmov 0.0  }
 0x4f9   : > { %4618 = vperm.xlu0 %6305, %v4573_v53   ;;  %5054 = vmatpush1.msra.mxu1 %v4949_v1  ;;  %v4915_v24 = vld [vmem:[#allocation14 + $0x280] sm:$0xff]  ;;  %v4917_v53 = vld [vmem:[#allocation14 + $0x290] sm:$0xff] }
 0x4fa   : > { %5055 = vmatprep.subr.mxu1 %v4934_v26  ;;  %4985 = vmatpush1.msra.mxu0 %v4931_v28 }
 0x4fb   : > { %5056 = vmatpush1.msra.mxu1 %v4933_v42  ;;  %5030 = vmatprep.mubr.f32.mxu0 %v6941_v22 }
 0x4fc   : > { %5101 = vmatprep.mubr.f32.mxu1 %v6941_v22 }
 0x4fd   : > { %4623 = vperm.xlu0 %6305, %v4575_v31   ;;  %v4884_v31 = vld [vmem:[#allocation14 + $0x188] sm:$0xff] }
 0x501   : > { %4628 = vperm.xlu0 %6305, %v4576_v38   ;;  %v4886_v38 = vld [vmem:[#allocation14 + $0x198] sm:$0xff] }
 0x504   : > { %v6482_v2 = vpop.eup %6481 }
 0x505   : > { %4633 = vperm.xlu0 %6305, %v4578_v12   ;;  %v4590_v30 = vmul.f32 %v6482_v2, %v7924_v35  ;;  %v4591_v51 = vmul.f32 %v6482_v2, %v7904_v3  ;;  %v4916_v35 = vld [vmem:[#allocation14 + $0x288] sm:$0xff]  ;;  %v4918_v3 = vld [vmem:[#allocation14 + $0x298] sm:$0xff]  ;;  %v4885_v12 = vld [vmem:[#allocation14 + $0x190] sm:$0xff] }
 0x506   : > { %4986 = vmatprep.subr.mxu0 %v4916_v35  ;;  %5057 = vmatprep.subr.mxu1 %v4918_v3  ;;  %v1985_v35 = vrot.slane %v8041_v18, %v7767_v13  ;;  %v4596_v13 = vld [vmem:[#allocation5 + $0x8] sm:$0xff]  ;;  %v4602_v18 = vld [vmem:[#allocation5 + $0x38] sm:$0xff] }
 0x507   : > { %4987 = vmatpush1.msra.mxu0 %v4915_v24  ;;  %5058 = vmatpush1.msra.mxu1 %v4917_v53 }
 0x508   : > { %4988 = vmatprep.subr.mxu0 %v4900_v5  ;;  %5059 = vmatprep.subr.mxu1 %v4902_v9 }
 0x509   : > { %4638 = vperm.xlu0 %6305, %v4579_v52   ;;  %4989 = vmatpush1.msra.mxu0 %v4899_v47  ;;  %v4870_v52 = vld [vmem:[#allocation14 + $0x118] sm:$0xff] }
 0x50a   : > { %v3351_v50 = vpop.f32.mrf.mxu0  ;;  %5060 = vmatpush1.msra.mxu1 %v4901_v16  ;;  %4990 = vmatprep.subr.mxu0 %v4884_v31 }
 0x50b   : > { %v3352_v46 = vadd.f32 %v3351_v50, %v1977_v62  ;;  %5061 = vmatprep.subr.mxu1 %v4886_v38  ;;  %4991 = vmatpush1.msra.mxu0 %v4883_v14  ;;  %v4854_v62 = vld [vmem:[#allocation14 + $0x98] sm:$0xff]  ;;  %v4836_v50 = vld [vmem:[#allocation14 + $0x8] sm:$0xff] }
 0x50c   : > { %v3353_v60 = vpop.f32.mrf.mxu0  ;;  %5062 = vmatpush1.msra.mxu1 %v4885_v12  ;;  %4992 = vmatprep.subr.mxu0 %v4868_v20  ;;  %v4598_v38 = vld [vmem:[#allocation5 + $0x18] sm:$0xff]  ;;  %v4597_v20 = vld [vmem:[#allocation5 + $0x10] sm:$0xff] }
 0x50d   : > { %4643 = vperm.xlu0 %6305, %v4581_v37   ;;  %v3354_v58 = vadd.f32 %v3353_v60, %v1981_v54  ;;  %v3422_v32 = vpop.f32.mrf.mxu1  ;;  %v4869_v37 = vld [vmem:[#allocation14 + $0x110] sm:$0xff]  ;;  %5063 = vmatprep.subr.mxu1 %v4870_v52  ;;  %v4835_v60 = vld [vmem:[#allocation14] sm:$0xff] }
 0x50e   : > { %v8078_v43 = vadd.f32 %v3422_v32, %v3352_v46  ;;  %v4853_v54 = vld [vmem:[#allocation14 + $0x90] sm:$0xff]  ;;  %4993 = vmatpush1.msra.mxu0 %v4867_v8  ;;  %5064 = vmatpush1.msra.mxu1 %v4869_v37  ;;  %v4838_v46 = vld [vmem:[#allocation14 + $0x18] sm:$0xff] }
 0x50f   : > { %v3424_v19 = vpop.f32.mrf.mxu1  ;;  %4994 = vmatprep.subr.mxu0 %v4852_v56  ;;  %5065 = vmatprep.subr.mxu1 %v4854_v62  ;;  %v4954_v32 = vld [vmem:[#allocation14 + $0x3b8] sm:$0xff] }
 0x510   : > { %v8080_v11 = vadd.f32 %v3424_v19, %v3354_v58  ;;  %5066 = vmatpush1.msra.mxu1 %v4853_v54  ;;  %v4952_v58 = vld [vmem:[#allocation14 + $0x3a8] sm:$0xff]  ;;  %v4600_v37 = vld [vmem:[#allocation5 + $0x28] sm:$0xff] }
 0x511   : > { %4648 = vperm.xlu0 %6305, %v4582_v23   ;;  %v4851_v23 = vld [vmem:[#allocation14 + $0x80] sm:$0xff]  ;;  %5067 = vmatprep.subr.mxu1 %v4838_v46 }
 0x512   : > { %4995 = vmatpush1.msra.mxu0 %v4851_v23  ;;  %v4595_v23 = vld [vmem:[#allocation5] sm:$0xff] }
 0x513   : > { %4996 = vmatprep.subr.mxu0 %v4836_v50  ;;  %v4599_v50 = vld [vmem:[#allocation5 + $0x20] sm:$0xff] }
 0x514   : > { %4997 = vmatpush1.msra.mxu0 %v4835_v60 }
 0x515   : > { %4653 = vperm.xlu0 %6305, %v4584_v57   ;;  %v4837_v57 = vld [vmem:[#allocation14 + $0x10] sm:$0xff]  ;;  %5124 = vmatprep.subr.mxu0 %v4952_v58  ;;  %v4601_v58 = vld [vmem:[#allocation5 + $0x30] sm:$0xff] }
 0x516   : > { %5068 = vmatpush1.msra.mxu1 %v4837_v57 }
 0x517   : > { %5195 = vmatprep.subr.mxu1 %v4954_v32 }
 0x519   : > { %4663 = vperm.xlu0 %6305, %v4587_v36  }
 0x51d   : > { %4668 = vperm.xlu0 %6305, %v4588_v29  }
 0x521   : > { %4673 = vperm.xlu0 %6305, %v4590_v30  }
 0x525   : > { %4678 = vperm.xlu0 %6305, %v4591_v51  }
 0x529   : > { %4688 = vperm.xlu0 %6305, %v4594_v41  }
 0x52b   : > { %v6114_v41 = vpop.f32.mrf.mxu0 }
 0x52d   : > { %v6115_v63 = vpop.f32.mrf.mxu0 }
 0x52e   : > { %v6149_v26 = vpop.f32.mrf.mxu1  ;;  %v6116_v3 = vadd.f32 %v6115_v63, %v6114_v41 }
 0x530   : > { %v6150_v24 = vpop.f32.mrf.mxu1  ;;  %v3494_v47 = vadd.f32 %v6116_v3, %v1985_v35 }
 0x531   : > { %v6151_v16 = vadd.f32 %v6150_v24, %v6149_v26 }
 0x533   : > { %v3564_v52 = vadd.f32 %v6151_v16, %v3494_v47 }
 0x535   : > { %v6051_v32 = vmul.f32 -1.442695, %v3564_v52 }
 0x537   : > { %6483 = vpow2.f32 %v6051_v32 }
 0x56f   : > { %v4659_v62 = vpop.permute.xlu1 %4658 }
 0x570   : > { %v4614_v19 = vpop.permute.xlu0 %4613 }
 0x571   : > { %v5663_v29 = vrot.slane %v4614_v19, %v7667_v40 }
 0x574   : > { %v4619_v36 = vpop.permute.xlu0 %4618 }
 0x575   : > { %v5667_v2 = vrot.slane %v4619_v36, %v7670_v15 }
 0x577   : > { %v5668_v30 = vsel %vm4210_vm0, %v5667_v2, %v5663_v29  ;;  %v4603_v29 = vld [vmem:[#allocation5 + $0x40] sm:$0xff]  ;;  %v4604_v2 = vld [vmem:[#allocation5 + $0x48] sm:$0xff] }
 0x578   : > { %v4624_v51 = vpop.permute.xlu0 %4623 }
 0x579   : > { %v5672_v45 = vrot.slane %v4624_v51, %v7667_v40  ;;  %v4693_v54 = vmul.f32 %v4624_v51, %v4597_v20  ;;  %v4691_v51 = vmul.f32 %v4614_v19, %v4595_v23 }
 0x57c   : > { %v4629_v59 = vpop.permute.xlu0 %4628 }
 0x57d   : > { %v5676_v21 = vrot.slane %v4629_v59, %v7670_v15  ;;  %v4694_v8 = vmul.f32 %v4629_v59, %v4598_v38  ;;  %v4605_v38 = vld [vmem:[#allocation5 + $0x50] sm:$0xff] }
 0x57f   : > { %v5677_v1 = vsel %vm4210_vm0, %v5676_v21, %v5672_v45  ;;  %v4718_v41 = vsel %vm4707_vm9, %v4694_v8, 0.0  ;;  %v5703_v21 = vrot.slane %v4659_v62, %v7670_v15 }
 0x580   : > { %v5732_v28 = vsel %vm4275_vm1, %v5677_v1, %v5668_v30  ;;  %v4634_v42 = vpop.permute.xlu0 %4633  ;;  %v4692_v30 = vmul.f32 %v4619_v36, %v4596_v13 }
 0x581   : > { %v5681_v5 = vrot.slane %v4634_v42, %v7667_v40  ;;  %v4695_v1 = vmul.f32 %v4634_v42, %v4599_v50 }
 0x583   : > { %v4726_v42 = vsel %vm4707_vm9, %v4695_v1, 0.0 }
 0x584   : > { %v4639_v53 = vpop.permute.xlu0 %4638 }
 0x585   : > { %v5685_v9 = vrot.slane %v4639_v53, %v7670_v15  ;;  %v4696_v57 = vmul.f32 %v4639_v53, %v4600_v37  ;;  %v4700_v53 = vmul.f32 %v4659_v62, %v4604_v2 }
 0x587   : > { %v5686_v31 = vsel %vm4210_vm0, %v5685_v9, %v5681_v5  ;;  %v4727_v5 = vsel %vm4707_vm9, %v4696_v57, 0.0  ;;  %v4709_v9 = vsel %vm4707_vm9, %v4692_v30, 0.0  ;;  %v4745_v8 = vsel %vm4707_vm9, %v4700_v53, 0.0  ;;  %v4609_v53 = vld [vmem:[#allocation5 + $0x70] sm:$0xff] }
 0x588   : > { %v5733_v14 = vsel %vm4277_vm2, %v5686_v31, %v5732_v28  ;;  %v4644_v12 = vpop.permute.xlu0 %4643  ;;  %v4717_v28 = vsel %vm4707_vm9, %v4693_v54, 0.0  ;;  %v4728_v20 = vadd.f32 %v4727_v5, %v4726_v42  ;;  %v6484_v42 = vpop.eup %6483 }
 0x589   : > { %v5690_v46 = vrot.slane %v4644_v12, %v7667_v40  ;;  %v4697_v35 = vmul.f32 %v4644_v12, %v4601_v58  ;;  %v4719_v36 = vadd.f32 %v4718_v41, %v4717_v28  ;;  %v4708_v12 = vsel %vm4707_vm9, %v4691_v51, 0.0  ;;  %v4607_v51 = vld [vmem:[#allocation5 + $0x60] sm:$0xff] }
 0x58a   : > { %v4710_v37 = vadd.f32 %v4709_v9, %v4708_v12  ;;  %v4729_v50 = vrot.slane %v4728_v20, 4 }
 0x58b   : > { %v4735_v52 = vsel %vm4707_vm9, %v4697_v35, 0.0  ;;  %v4720_v13 = vrot.slane %v4719_v36, 4 }
 0x58c   : > { %v4649_v56 = vpop.permute.xlu0 %4648  ;;  %v4711_v58 = vrot.slane %v4710_v37, 4 }
 0x58d   : > { %v5694_v60 = vrot.slane %v4649_v56, %v7670_v15  ;;  %v4698_v59 = vmul.f32 %v4649_v56, %v4602_v18  ;;  %v4606_v56 = vld [vmem:[#allocation5 + $0x58] sm:$0xff]  ;;  %v4721_v32 = vadd.f32 %v4720_v13, %v4719_v36  ;;  %v4684_v36 = vpop.permute.xlu1 %4683 }
 0x58e   : > { %v4705_v12 = vmul.f32 %v4684_v36, %v4609_v53 }
 0x58f   : > { %v5695_v45 = vsel %vm4210_vm0, %v5694_v60, %v5690_v46  ;;  %v4736_v47 = vsel %vm4707_vm9, %v4698_v59, 0.0  ;;  %v4722_v28 = vrot.slane %v4721_v32, 2 }
 0x590   : > { %v5734_v63 = vsel %vm4279_vm3, %v5695_v45, %v5733_v14  ;;  %v4654_v26 = vpop.permute.xlu0 %4653  ;;  %v4737_v18 = vadd.f32 %v4736_v47, %v4735_v52 }
 0x591   : > { %v4699_v3 = vmul.f32 %v4654_v26, %v4603_v29  ;;  %v5699_v24 = vrot.slane %v4654_v26, %v7667_v40  ;;  %v4712_v26 = vadd.f32 %v4711_v58, %v4710_v37  ;;  %v4723_v52 = vadd.f32 %v4722_v28, %v4721_v32  ;;  %v4610_v37 = vld [vmem:[#allocation5 + $0x78] sm:$0xff] }
 0x592   : > { %v4738_v29 = vrot.slane %v4737_v18, 4 }
 0x593   : > { %v5704_v19 = vsel %vm4210_vm0, %v5703_v21, %v5699_v24  ;;  %v4744_v16 = vsel %vm4707_vm9, %v4699_v3, 0.0  ;;  %v4608_v24 = vld [vmem:[#allocation5 + $0x68] sm:$0xff] }
 0x594   : > { %v5735_v31 = vsel %vm4281_vm4, %v5704_v19, %v5734_v63  ;;  %v4664_v14 = vpop.permute.xlu0 %4663  ;;  %v4746_v62 = vadd.f32 %v4745_v8, %v4744_v16  ;;  %v4730_v63 = vadd.f32 %v4729_v50, %v4728_v20  ;;  %v4739_v35 = vadd.f32 %v4738_v29, %v4737_v18 }
 0x595   : > { %v4701_v23 = vmul.f32 %v4664_v14, %v4605_v38  ;;  %v5708_v46 = vrot.slane %v4664_v14, %v7667_v40  ;;  %v4713_v20 = vrot.slane %v4712_v26, 2 }
 0x596   : > { %v4747_v2 = vrot.slane %v4746_v62, 4  ;;  %v4731_v16 = vrot.slane %v4730_v63, 2  ;;  %v4740_v8 = vrot.slane %v4739_v35, 2 }
 0x597   : > { %v4753_v30 = vsel %vm4707_vm9, %v4701_v23, 0.0  ;;  %v4783_v23 = vadd.f32 1.0, %v6484_v42 }
 0x598   : > { %v4669_v54 = vpop.permute.xlu0 %4668  ;;  %v4748_v5 = vadd.f32 %v4747_v2, %v4746_v62  ;;  %v4732_v58 = vadd.f32 %v4731_v16, %v4730_v63  ;;  %v4771_v2 = vsel %vm4707_vm9, %v4705_v12, 0.0 }
 0x599   : > { %v4702_v60 = vmul.f32 %v4669_v54, %v4606_v56  ;;  %v5712_v57 = vrot.slane %v4669_v54, %v7670_v15  ;;  %6485 = vrcp.f32 %v4783_v23 }
 0x59a   : > { %v4749_v13 = vrot.slane %v4748_v5, 2  ;;  %v4733_v63 = vrot.slane %v4732_v58, 1 }
 0x59b   : > { %v4754_v41 = vsel %vm4707_vm9, %v4702_v60, 0.0  ;;  %v5713_v59 = vsel %vm4210_vm0, %v5712_v57, %v5708_v46  ;;  %v5726_v57 = vrot.slane %v4684_v36, %v7667_v40 }
 0x59c   : > { %v4755_v45 = vadd.f32 %v4754_v41, %v4753_v30  ;;  %v5736_v21 = vsel %vm4283_vm5, %v5713_v59, %v5735_v31  ;;  %v4674_v1 = vpop.permute.xlu0 %4673  ;;  %v4714_v30 = vadd.f32 %v4713_v20, %v4712_v26  ;;  %v4741_v41 = vadd.f32 %v4740_v8, %v4739_v35 }
 0x59d   : > { %v4703_v9 = vmul.f32 %v4674_v1, %v4607_v51  ;;  %v5717_v38 = vrot.slane %v4674_v1, %v7667_v40  ;;  %v4750_v51 = vadd.f32 %v4749_v13, %v4748_v5  ;;  %v4734_v16 = vadd.f32 %v4733_v63, %v4732_v58  ;;  %v4951_v58 = vld [vmem:[#allocation14 + $0x3a0] sm:$0xff]  ;;  %v4888_v63 = vld [vmem:[#allocation14 + $0x1a8] sm:$0xff] }
 0x59e   : > { %v4756_v3 = vrot.slane %v4755_v45, 4  ;;  %v4742_v53 = vrot.slane %v4741_v41, 1 }
 0x59f   : > { %v4762_v18 = vsel %vm4707_vm9, %v4703_v9, 0.0  ;;  %v4751_v35 = vrot.slane %v4750_v51, 1 }
 0x5a0   : > { %v4757_v47 = vadd.f32 %v4756_v3, %v4755_v45  ;;  %v4679_v19 = vpop.permute.xlu0 %4678  ;;  %v4724_v45 = vrot.slane %v4723_v52, 1 }
 0x5a1   : > { %v4704_v14 = vmul.f32 %v4679_v19, %v4608_v24  ;;  %v5721_v31 = vrot.slane %v4679_v19, %v7670_v15  ;;  %v4752_v12 = vadd.f32 %v4751_v35, %v4750_v51  ;;  %v4919_v51 = vld [vmem:[#allocation14 + $0x2a0] sm:$0xff]  ;;  %v4874_v35 = vld [vmem:[#allocation14 + $0x138] sm:$0xff] }
 0x5a2   : > { %v4758_v54 = vrot.slane %v4757_v47, 2  ;;  %v4725_v9 = vadd.f32 %v4724_v45, %v4723_v52  ;;  %v4922_v45 = vld [vmem:[#allocation14 + $0x2b8] sm:$0xff] }
 0x5a3   : > { %v4763_v56 = vsel %vm4707_vm9, %v4704_v14, 0.0  ;;  %v5722_v62 = vsel %vm4210_vm0, %v5721_v31, %v5717_v38  ;;  %v4743_v14 = vadd.f32 %v4742_v53, %v4741_v41  ;;  %v4937_v41 = vld [vmem:[#allocation14 + $0x330] sm:$0xff]  ;;  %v4887_v53 = vld [vmem:[#allocation14 + $0x1a0] sm:$0xff] }
 0x5a4   : > { %v4764_v50 = vadd.f32 %v4763_v56, %v4762_v18  ;;  %v4689_v46 = vpop.permute.xlu0 %4688  ;;  %v5737_v60 = vsel %vm4285_vm6, %v5722_v62, %v5736_v21  ;;  %v4759_v3 = vadd.f32 %v4758_v54, %v4757_v47 }
 0x5a5   : > { %v4706_v29 = vmul.f32 %v4689_v46, %v4610_v37  ;;  %v5730_v32 = vrot.slane %v4689_v46, %v7670_v15  ;;  %v4715_v15 = vrot.slane %v4714_v30, 1 }
 0x5a6   : > { %v4765_v59 = vrot.slane %v4764_v50, 4  ;;  %v4760_v19 = vrot.slane %v4759_v3, 1  ;;  %v6486_v46 = vpop.eup %6485 }
 0x5a7   : > { %v4772_v1 = vsel %vm4707_vm9, %v4706_v29, 0.0  ;;  %v5731_v28 = vsel %vm4210_vm0, %v5730_v32, %v5726_v57  ;;  %v4716_v38 = vadd.f32 %v4715_v15, %v4714_v30  ;;  %v4953_v29 = vld [vmem:[#allocation14 + $0x3b0] sm:$0xff]  ;;  %v4936_v32 = vld [vmem:[#allocation14 + $0x328] sm:$0xff]  ;;  %v4935_v30 = vld [vmem:[#allocation14 + $0x320] sm:$0xff] }
 0x5a8   : > { %v4766_v24 = vadd.f32 %v4765_v59, %v4764_v50  ;;  %v4773_v21 = vadd.f32 %v4772_v1, %v4771_v2  ;;  %v8138_v40 = vsel %vm4287_vm7, %v5731_v28, %v5737_v60  ;;  %v4761_v8 = vadd.f32 %v4760_v19, %v4759_v3  ;;  %v4938_v2 = vld [vmem:[#allocation14 + $0x338] sm:$0xff]  ;;  %v4920_v59 = vld [vmem:[#allocation14 + $0x2a8] sm:$0xff]  ;;  %v4921_v1 = vld [vmem:[#allocation14 + $0x2b0] sm:$0xff] }
 0x5a9   : > { %v4794_v20 = vsel %vm4275_vm1, %v4725_v9, %v4716_v38  ;;  %v4904_v28 = vld [vmem:[#allocation14 + $0x228] sm:$0xff]  ;;  %v4906_v3 = vld [vmem:[#allocation14 + $0x238] sm:$0xff]  ;;  %v4871_v9 = vld [vmem:[#allocation14 + $0x120] sm:$0xff] }
 0x5aa   : > { %v4767_v36 = vrot.slane %v4766_v24, 2  ;;  %v4774_v26 = vrot.slane %v4773_v21, 4  ;;  %v4795_v13 = vsel %vm4277_vm2, %v4734_v16, %v4794_v20  ;;  %v4890_v15 = vld [vmem:[#allocation14 + $0x1b8] sm:$0xff]  ;;  %v4873_v19 = vld [vmem:[#allocation14 + $0x130] sm:$0xff]  ;;  %v4855_v16 = vld [vmem:[#allocation14 + $0xa0] sm:$0xff] }
 0x5ab   : > { %v4796_v56 = vsel %vm4279_vm3, %v4743_v14, %v4795_v13  ;;  %v4857_v38 = vld [vmem:[#allocation14 + $0xb0] sm:$0xff]  ;;  %v4840_v14 = vld [vmem:[#allocation14 + $0x28] sm:$0xff] }
 0x5ac   : > { %v4768_v5 = vadd.f32 %v4767_v36, %v4766_v24  ;;  %v4775_v42 = vadd.f32 %v4774_v26, %v4773_v21  ;;  %v4797_v52 = vsel %vm4281_vm4, %v4752_v12, %v4796_v56  ;;  %v4903_v24 = vld [vmem:[#allocation14 + $0x220] sm:$0xff]  ;;  %v4905_v21 = vld [vmem:[#allocation14 + $0x230] sm:$0xff]  ;;  %v4872_v26 = vld [vmem:[#allocation14 + $0x128] sm:$0xff] }
 0x5ad   : > { %v4798_v23 = vsel %vm4283_vm5, %v4761_v8, %v4797_v52  ;;  %v4889_v36 = vld [vmem:[#allocation14 + $0x1b0] sm:$0xff]  ;;  %v4956_v20 = vld [vmem:[#allocation14 + $0x3c8] sm:$0xff]  ;;  %v4958_v8 = vld [vmem:[#allocation14 + $0x3d8] sm:$0xff] }
 0x5ae   : > { %v4769_v47 = vrot.slane %v4768_v5, 1  ;;  %v4776_v31 = vrot.slane %v4775_v42, 2  ;;  %v4841_v12 = vld [vmem:[#allocation14 + $0x30] sm:$0xff]  ;;  %v4942_v56 = vld [vmem:[#allocation14 + $0x358] sm:$0xff] }
 0x5af   : > { %v4957_v13 = vld [vmem:[#allocation14 + $0x3d0] sm:$0xff] }
 0x5b0   : > { %v4777_v37 = vadd.f32 %v4776_v31, %v4775_v42  ;;  %v4770_v18 = vadd.f32 %v4769_v47, %v4768_v5  ;;  %v4856_v5 = vld [vmem:[#allocation14 + $0xa8] sm:$0xff]  ;;  %v4858_v42 = vld [vmem:[#allocation14 + $0xb8] sm:$0xff]  ;;  %v4839_v31 = vld [vmem:[#allocation14 + $0x20] sm:$0xff] }
 0x5b1   : > { %v4842_v47 = vld [vmem:[#allocation14 + $0x38] sm:$0xff]  ;;  %v4941_v52 = vld [vmem:[#allocation14 + $0x350] sm:$0xff] }
 0x5b2   : > { %v4778_v62 = vrot.slane %v4777_v37, 1  ;;  %v4799_v50 = vsel %vm4285_vm6, %v4770_v18, %v4798_v23  ;;  %v4940_v18 = vld [vmem:[#allocation14 + $0x348] sm:$0xff] }
 0x5b3   : > { %v4924_v23 = vld [vmem:[#allocation14 + $0x2c8] sm:$0xff] }
 0x5b4   : > { %v4779_v54 = vadd.f32 %v4778_v62, %v4777_v37  ;;  %v4955_v37 = vld [vmem:[#allocation14 + $0x3c0] sm:$0xff] }
 0x5b5   : > { %v4939_v62 = vld [vmem:[#allocation14 + $0x340] sm:$0xff] }
 0x5b6   : > { %v4800_v60 = vsel %vm4287_vm7, %v4779_v54, %v4799_v50  ;;  %v4926_v54 = vld [vmem:[#allocation14 + $0x2d8] sm:$0xff]  ;;  %v4923_v50 = vld [vmem:[#allocation14 + $0x2c0] sm:$0xff] }
 0x5b7   : > { %v8147_v57 = vmul.f32 %v6486_v46, %v4800_v60  ;;  %v4925_v46 = vld [vmem:[#allocation14 + $0x2d0] sm:$0xff]  ;;  %v4908_v60 = vld [vmem:[#allocation14 + $0x248] sm:$0xff] }
 0x5b9   : > { %6052 = vmatmul.mubr.msk.f32.vlgmr.msra.gmra.mxu0 %vm4707_vm9, %v8147_v57  ;;  %6053 = vmatmul.mubr.msk.f32.vlgmr.msra.gmra.mxu1 %vm4707_vm9, %v8147_v57 }
 0x5ba   : > { %5125 = vmatpush1.msra.mxu0 %v4951_v58  ;;  %5196 = vmatpush1.msra.mxu1 %v4953_v29  ;;  %v4910_v58 = vld [vmem:[#allocation14 + $0x258] sm:$0xff]  ;;  %v4907_v29 = vld [vmem:[#allocation14 + $0x240] sm:$0xff] }
 0x5bb   : > { %5126 = vmatprep.subr.mxu0 %v4936_v32  ;;  %5197 = vmatprep.subr.mxu1 %v4938_v2  ;;  %v4909_v32 = vld [vmem:[#allocation14 + $0x250] sm:$0xff]  ;;  %v4892_v2 = vld [vmem:[#allocation14 + $0x1c8] sm:$0xff] }
 0x5bc   : > { %5127 = vmatpush1.msra.mxu0 %v4935_v30  ;;  %5198 = vmatpush1.msra.mxu1 %v4937_v41  ;;  %v4894_v30 = vld [vmem:[#allocation14 + $0x1d8] sm:$0xff]  ;;  %v4891_v41 = vld [vmem:[#allocation14 + $0x1c0] sm:$0xff] }
 0x5bd   : > { %5128 = vmatprep.subr.mxu0 %v4920_v59  ;;  %5199 = vmatprep.subr.mxu1 %v4922_v45  ;;  %v4893_v59 = vld [vmem:[#allocation14 + $0x1d0] sm:$0xff]  ;;  %v4876_v45 = vld [vmem:[#allocation14 + $0x148] sm:$0xff] }
 0x5be   : > { %5129 = vmatpush1.msra.mxu0 %v4919_v51  ;;  %5200 = vmatpush1.msra.mxu1 %v4921_v1  ;;  %v4878_v51 = vld [vmem:[#allocation14 + $0x158] sm:$0xff]  ;;  %v4875_v1 = vld [vmem:[#allocation14 + $0x140] sm:$0xff] }
 0x5bf   : > { %5130 = vmatprep.subr.mxu0 %v4904_v28  ;;  %5201 = vmatprep.subr.mxu1 %v4906_v3  ;;  %v4877_v28 = vld [vmem:[#allocation14 + $0x150] sm:$0xff]  ;;  %v4860_v3 = vld [vmem:[#allocation14 + $0xc8] sm:$0xff] }
 0x5c0   : > { %5131 = vmatpush1.msra.mxu0 %v4903_v24  ;;  %5202 = vmatpush1.msra.mxu1 %v4905_v21  ;;  %v4862_v24 = vld [vmem:[#allocation14 + $0xd8] sm:$0xff]  ;;  %v4859_v21 = vld [vmem:[#allocation14 + $0xc0] sm:$0xff] }
 0x5c1   : > { %5132 = vmatprep.subr.mxu0 %v4888_v63  ;;  %5203 = vmatprep.subr.mxu1 %v4890_v15  ;;  %v4861_v63 = vld [vmem:[#allocation14 + $0xd0] sm:$0xff]  ;;  %v4844_v15 = vld [vmem:[#allocation14 + $0x48] sm:$0xff] }
 0x5c2   : > { %5133 = vmatpush1.msra.mxu0 %v4887_v53  ;;  %5204 = vmatpush1.msra.mxu1 %v4889_v36  ;;  %v4846_v53 = vld [vmem:[#allocation14 + $0x58] sm:$0xff]  ;;  %v4843_v36 = vld [vmem:[#allocation14 + $0x40] sm:$0xff] }
 0x5c3   : > { %5134 = vmatprep.subr.mxu0 %v4872_v26  ;;  %5205 = vmatprep.subr.mxu1 %v4874_v35  ;;  %v4845_v26 = vld [vmem:[#allocation14 + $0x50] sm:$0xff]  ;;  %v4960_v35 = vld [vmem:[#allocation14 + $0x3e8] sm:$0xff] }
 0x5c4   : > { %5135 = vmatpush1.msra.mxu0 %v4871_v9  ;;  %5206 = vmatpush1.msra.mxu1 %v4873_v19  ;;  %v4962_v9 = vld [vmem:[#allocation14 + $0x3f8] sm:$0xff]  ;;  %v4959_v19 = vld [vmem:[#allocation14 + $0x3e0] sm:$0xff] }
 0x5c5   : > { %5136 = vmatprep.subr.mxu0 %v4856_v5  ;;  %5207 = vmatprep.subr.mxu1 %v4858_v42  ;;  %v4961_v5 = vld [vmem:[#allocation14 + $0x3f0] sm:$0xff]  ;;  %v4944_v42 = vld [vmem:[#allocation14 + $0x368] sm:$0xff] }
 0x5c6   : > { %5137 = vmatpush1.msra.mxu0 %v4855_v16  ;;  %5208 = vmatpush1.msra.mxu1 %v4857_v38  ;;  %v4946_v16 = vld [vmem:[#allocation14 + $0x378] sm:$0xff]  ;;  %v4943_v38 = vld [vmem:[#allocation14 + $0x360] sm:$0xff] }
 0x5c7   : > { %5138 = vmatprep.subr.mxu0 %v4840_v14  ;;  %5209 = vmatprep.subr.mxu1 %v4842_v47  ;;  %v4945_v14 = vld [vmem:[#allocation14 + $0x370] sm:$0xff]  ;;  %v4928_v47 = vld [vmem:[#allocation14 + $0x2e8] sm:$0xff] }
 0x5c8   : > { %5139 = vmatpush1.msra.mxu0 %v4839_v31  ;;  %5172 = vmatprep.mubr.f32.mxu0 %v6941_v22  ;;  %v4930_v31 = vld [vmem:[#allocation14 + $0x2f8] sm:$0xff] }
 0x5c9   : > { %5210 = vmatpush1.msra.mxu1 %v4841_v12  ;;  %5243 = vmatprep.mubr.f32.mxu1 %v6941_v22  ;;  %v4927_v12 = vld [vmem:[#allocation14 + $0x2e0] sm:$0xff] }
 0x5ca   : > { %6054 = vmatmul.mubr.msk.f32.vlgmr.msra.gmra.mxu0 %vm4707_vm9, %v8147_v57  ;;  %6055 = vmatmul.mubr.msk.f32.vlgmr.msra.gmra.mxu1 %vm4707_vm9, %v8147_v57 }
 0x5cb   : > { %5266 = vmatprep.subr.mxu0 %v4956_v20  ;;  %5337 = vmatprep.subr.mxu1 %v4958_v8  ;;  %v4929_v20 = vld [vmem:[#allocation14 + $0x2f0] sm:$0xff]  ;;  %v4912_v8 = vld [vmem:[#allocation14 + $0x268] sm:$0xff] }
 0x5cc   : > { %5267 = vmatpush1.msra.mxu0 %v4955_v37  ;;  %5338 = vmatpush1.msra.mxu1 %v4957_v13  ;;  %v4914_v37 = vld [vmem:[#allocation14 + $0x278] sm:$0xff]  ;;  %v4911_v13 = vld [vmem:[#allocation14 + $0x260] sm:$0xff] }
 0x5cd   : > { %5268 = vmatprep.subr.mxu0 %v4940_v18  ;;  %5339 = vmatprep.subr.mxu1 %v4942_v56  ;;  %v4913_v18 = vld [vmem:[#allocation14 + $0x270] sm:$0xff]  ;;  %v4896_v56 = vld [vmem:[#allocation14 + $0x1e8] sm:$0xff] }
 0x5ce   : > { %5269 = vmatpush1.msra.mxu0 %v4939_v62  ;;  %5340 = vmatpush1.msra.mxu1 %v4941_v52  ;;  %v4898_v62 = vld [vmem:[#allocation14 + $0x1f8] sm:$0xff]  ;;  %v4895_v52 = vld [vmem:[#allocation14 + $0x1e0] sm:$0xff] }
 0x5cf   : > { %5270 = vmatprep.subr.mxu0 %v4924_v23  ;;  %5341 = vmatprep.subr.mxu1 %v4926_v54  ;;  %v4897_v23 = vld [vmem:[#allocation14 + $0x1f0] sm:$0xff]  ;;  %v4880_v54 = vld [vmem:[#allocation14 + $0x168] sm:$0xff] }
 0x5d0   : > { %5271 = vmatpush1.msra.mxu0 %v4923_v50  ;;  %5342 = vmatpush1.msra.mxu1 %v4925_v46  ;;  %v4882_v50 = vld [vmem:[#allocation14 + $0x178] sm:$0xff]  ;;  %v4879_v46 = vld [vmem:[#allocation14 + $0x160] sm:$0xff] }
 0x5d1   : > { %5272 = vmatprep.subr.mxu0 %v4908_v60  ;;  %5343 = vmatprep.subr.mxu1 %v4910_v58  ;;  %v4881_v60 = vld [vmem:[#allocation14 + $0x170] sm:$0xff]  ;;  %v4864_v58 = vld [vmem:[#allocation14 + $0xe8] sm:$0xff] }
 0x5d2   : > { %5273 = vmatpush1.msra.mxu0 %v4907_v29  ;;  %5344 = vmatpush1.msra.mxu1 %v4909_v32  ;;  %v4866_v29 = vld [vmem:[#allocation14 + $0xf8] sm:$0xff]  ;;  %v4863_v32 = vld [vmem:[#allocation14 + $0xe0] sm:$0xff] }
 0x5d3   : > { %5274 = vmatprep.subr.mxu0 %v4892_v2  ;;  %5345 = vmatprep.subr.mxu1 %v4894_v30  ;;  %v4865_v2 = vld [vmem:[#allocation14 + $0xf0] sm:$0xff]  ;;  %v4848_v30 = vld [vmem:[#allocation14 + $0x68] sm:$0xff] }
 0x5d4   : > { %5275 = vmatpush1.msra.mxu0 %v4891_v41  ;;  %5346 = vmatpush1.msra.mxu1 %v4893_v59  ;;  %v4850_v41 = vld [vmem:[#allocation14 + $0x78] sm:$0xff]  ;;  %v4847_v59 = vld [vmem:[#allocation14 + $0x60] sm:$0xff] }
 0x5d5   : > { %5276 = vmatprep.subr.mxu0 %v4876_v45  ;;  %5347 = vmatprep.subr.mxu1 %v4878_v51  ;;  %v4849_v45 = vld [vmem:[#allocation14 + $0x70] sm:$0xff] }
 0x5d6   : > { %5277 = vmatpush1.msra.mxu0 %v4875_v1  ;;  %5348 = vmatpush1.msra.mxu1 %v4877_v28  ;;  %v5659_v51 = vld [vmem:[#allocation17 + $0x8] sm:$0xff]  ;;  %v5658_v1 = vld [vmem:[#allocation17] sm:$0xff] }
 0x5d7   : > { %5278 = vmatprep.subr.mxu0 %v4860_v3  ;;  %5349 = vmatprep.subr.mxu1 %v4862_v24  ;;  %v6569_v28 = vld [vmem:[#allocation13] sm:$0xff]  ;;  %v4803_v24 = vld [vmem:[%s7210_s4] sm:$0xff] }
 0x5d8   : > { %5279 = vmatpush1.msra.mxu0 %v4859_v21  ;;  %5350 = vmatpush1.msra.mxu1 %v4861_v63  ;;  %v1933_v3 = vrot.slane %v6569_v28, %v7840_v49  ;;  %v4805_v63 = vld [vmem:[%s7210_s4 + $0x10] sm:$0xff] }
 0x5d9   : > { %5280 = vmatprep.subr.mxu0 %v4844_v15  ;;  %5351 = vmatprep.subr.mxu1 %v4846_v53 }
 0x5da   : > { %5281 = vmatpush1.msra.mxu0 %v4843_v36  ;;  %5314 = vmatprep.mubr.f32.mxu0 %v6941_v22  ;;  %v4804_v36 = vld [vmem:[%s7210_s4 + $0x8] sm:$0xff] }
 0x5db   : > { %5352 = vmatpush1.msra.mxu1 %v4845_v26  ;;  %5385 = vmatprep.mubr.f32.mxu1 %v6941_v22  ;;  %v4819_v26 = vadd.f32 %v4803_v24, %v7778_v4 }
 0x5dc   : > { %6056 = vmatmul.mubr.msk.f32.vlgmr.msra.gmra.mxu0 %vm4707_vm9, %v8147_v57  ;;  %6057 = vmatmul.mubr.msk.f32.vlgmr.msra.gmra.mxu1 %vm4707_vm9, %v8147_v57 }
 0x5dd   : > { %5408 = vmatprep.subr.mxu0 %v4960_v35  ;;  %5479 = vmatprep.subr.mxu1 %v4962_v9  ;;  %v4806_v35 = vld [vmem:[%s7210_s4 + $0x18] sm:$0xff] }
 0x5de   : > { %5409 = vmatpush1.msra.mxu0 %v4959_v19  ;;  %5480 = vmatpush1.msra.mxu1 %v4961_v5 }
 0x5df   : > { %5410 = vmatprep.subr.mxu0 %v4944_v42  ;;  %5481 = vmatprep.subr.mxu1 %v4946_v16 }
 0x5e0   : > { %5411 = vmatpush1.msra.mxu0 %v4943_v38  ;;  %5482 = vmatpush1.msra.mxu1 %v4945_v14 }
 0x5e1   : > { %5412 = vmatprep.subr.mxu0 %v4928_v47  ;;  %5483 = vmatprep.subr.mxu1 %v4930_v31 }
 0x5e2   : > { %5413 = vmatpush1.msra.mxu0 %v4927_v12  ;;  %5484 = vmatpush1.msra.mxu1 %v4929_v20  ;;  %v4807_v20 = vld [vmem:[%s7210_s4 + $0x20] sm:$0xff] }
 0x5e3   : > { %5414 = vmatprep.subr.mxu0 %v4912_v8  ;;  %5485 = vmatprep.subr.mxu1 %v4914_v37  ;;  %v4809_v8 = vld [vmem:[%s7210_s4 + $0x30] sm:$0xff]  ;;  %v8352_v37 = vld [vmem:[#allocation32_spill] sm:$0xff] }
 0x5e4   : > { %5415 = vmatpush1.msra.mxu0 %v4911_v13  ;;  %5486 = vmatpush1.msra.mxu1 %v4913_v18  ;;  %v8353_v13 = vld [vmem:[#allocation31_spill] sm:$0xff] }
 0x5e5   : > { %5416 = vmatprep.subr.mxu0 %v4896_v56  ;;  %5487 = vmatprep.subr.mxu1 %v4898_v62  ;;  %v4823_v18 = vadd.f32 %v4807_v20, %v8353_v13  ;;  %v8354_v56 = vld [vmem:[#allocation33_spill] sm:$0xff] }
 0x5e6   : > { %5417 = vmatpush1.msra.mxu0 %v4895_v52  ;;  %5488 = vmatpush1.msra.mxu1 %v4897_v23  ;;  %v4825_v62 = vadd.f32 %v4809_v8, %v8354_v56  ;;  %v4810_v52 = vld [vmem:[%s7210_s4 + $0x38] sm:$0xff]  ;;  %v4815_v56 = vld [vmem:[%s7210_s4 + $0x60] sm:$0xff] }
 0x5e7   : > { %5418 = vmatprep.subr.mxu0 %v4880_v54  ;;  %5489 = vmatprep.subr.mxu1 %v4882_v50 }
 0x5e8   : > { %5419 = vmatpush1.msra.mxu0 %v4879_v46  ;;  %5490 = vmatpush1.msra.mxu1 %v4881_v60 }
 0x5e9   : > { %5420 = vmatprep.subr.mxu0 %v4864_v58  ;;  %5491 = vmatprep.subr.mxu1 %v4866_v29  ;;  %v8355_v58 = vld [vmem:[#allocation34_spill] sm:$0xff] }
 0x5ea   : > { %5421 = vmatpush1.msra.mxu0 %v4863_v32  ;;  %5492 = vmatpush1.msra.mxu1 %v4865_v2  ;;  %v4826_v29 = vadd.f32 %v4810_v52, %v8355_v58 }
 0x5eb   : > { %5422 = vmatprep.subr.mxu0 %v4848_v30  ;;  %5493 = vmatprep.subr.mxu1 %v4850_v41 }
 0x5ec   : > { %5423 = vmatpush1.msra.mxu0 %v4847_v59  ;;  %5456 = vmatprep.mubr.f32.mxu0 %v6941_v22 }
 0x5ed   : > { %5494 = vmatpush1.msra.mxu1 %v4849_v45  ;;  %5527 = vmatprep.mubr.f32.mxu1 %v6941_v22 }
 0x5ee   : > { %6058 = vmatmul.mubr.msk.f32.vlgmr.msra.gmra.mxu0 %vm4707_vm9, %v8147_v57  ;;  %6059 = vmatmul.mubr.msk.f32.vlgmr.msra.gmra.mxu1 %vm4707_vm9, %v8147_v57  ;;  %v2502_v57 = vadd.f32 %v7865_v27, %v1933_v3  ;;  %v4820_v27 = vadd.f32 %v4804_v36, %v7780_v34  ;;  %v4808_v34 = vld [vmem:[%s7210_s4 + $0x28] sm:$0xff] }
 0x5ef   : > { %6155 = vmatprep.subr.mxu0 %v6941_v22  ;;  %6159 = vmatprep.mubr.msk.f32.mxu0 %vm6942_vm10, %v6941_v22 }
 0x5f0   : > { %6156 = vmatpush3.msra.mxu0 %v5659_v51  ;;  %v2573_v53 = vadd.f32 %v7872_v6, %v2502_v57 }
 0x5f1   : > { %6157 = vmatprep.subr.mxu0 %v6941_v22  ;;  %v4821_v22 = vadd.f32 %v4805_v63, %v7789_v44 }
 0x5f2   : > { %6158 = vmatpush3.msra.mxu0 %v5658_v1  ;;  %v4822_v38 = vadd.f32 %v4806_v35, %v2573_v53 }
 0x5f3   : > { %6160 = vmatmul.mubr.msk.f32.vlgmr.msra.gmra.mxu0 %vm4290_vm8, %v8138_v40  ;;  %v6570_v40 = vld [vmem:[#allocation13 + $0x8] sm:$0xff] }
 0x5f4   : > { %v1941_v19 = vrot.slane %v6570_v40, %v7249_v25  ;;  %v1957_v51 = vrot.slane %v6570_v40, %v7774_v48  ;;  %v1965_v3 = vrot.slane %v6570_v40, %v7840_v49  ;;  %v4811_v48 = vld [vmem:[%s7210_s4 + $0x40] sm:$0xff]  ;;  %v8356_v49 = vld [vmem:[#allocation35_spill] sm:$0xff] }
 0x5f5   : > { %v4827_v40 = vadd.f32 %v4811_v48, %v8356_v49 }
 0x5f6   : > { %v2644_v4 = vadd.f32 %v7932_v39, %v1941_v19  ;;  %v2928_v24 = vadd.f32 %v8035_v10, %v1957_v51  ;;  %v3070_v53 = vadd.f32 %v8045_v61, %v1965_v3  ;;  %v4812_v19 = vld [vmem:[%s7210_s4 + $0x48] sm:$0xff] }
 0x5f7   : > { %v549_v51 = vld [vmem:[#allocation3 + $0x18] sm:$0xff] }
 0x5f8   : > { %v2715_v25 = vadd.f32 %v8352_v37, %v2644_v4  ;;  %v2999_v35 = vadd.f32 %v8037_v17, %v2928_v24 }
 0x5fa   : > { %v4824_v46 = vadd.f32 %v4808_v34, %v2715_v25 }
 0x679   : > { %v5032_v21 = vpop.f32.mrf.mxu0  ;;  %v5103_v15 = vpop.f32.mrf.mxu1 }
 0x67a   : > { %v5534_v5 = vadd.f32 %v5032_v21, %v4819_v26  ;;  %v5536_v16 = vadd.f32 %v5103_v15, %v4821_v22  ;;  %v4813_v26 = vld [vmem:[%s7210_s4 + $0x50] sm:$0xff] }
 0x67b   : > { %v5034_v9 = vpop.f32.mrf.mxu0  ;;  %v5105_v42 = vpop.f32.mrf.mxu1  ;;  %v4829_v10 = vadd.f32 %v4813_v26, %v8039_v7 }
 0x67c   : > { %v5535_v6 = vadd.f32 %v5034_v9, %v4820_v27  ;;  %v5537_v14 = vadd.f32 %v5105_v42, %v4822_v38  ;;  %v6060_v47 = vmul.f32 -1.442695, %v5534_v5  ;;  %v6062_v44 = vmul.f32 -1.442695, %v5536_v16 }
 0x67d   : > { %v3141_v5 = vadd.f32 %v8049_v55, %v3070_v53  ;;  %v4828_v38 = vadd.f32 %v4812_v19, %v2999_v35 }
 0x67e   : > { %v6061_v31 = vmul.f32 -1.442695, %v5535_v6  ;;  %v6063_v12 = vmul.f32 -1.442695, %v5537_v14  ;;  %6487 = vpow2.f32 %v6060_v47  ;;  %v4814_v6 = vld [vmem:[%s7210_s4 + $0x58] sm:$0xff] }
 0x67f   : > { %6489 = vpow2.f32 %v6062_v44  ;;  %v4830_v7 = vadd.f32 %v4814_v6, %v3141_v5 }
 0x680   : > { %6491 = vpow2.f32 %v6061_v31 }
 0x681   : > { %6493 = vpow2.f32 %v6063_v12 }
 0x68a   : > { %v5174_v23 = vpop.f32.mrf.mxu0  ;;  %v5245_v39 = vpop.f32.mrf.mxu1 }
 0x68b   : > { %v5538_v54 = vadd.f32 %v5174_v23, %v4823_v18  ;;  %v5540_v50 = vadd.f32 %v5245_v39, %v4825_v62  ;;  %v6488_v28 = vpop.eup %6487  ;;  %v4817_v62 = vld [vmem:[%s7210_s4 + $0x70] sm:$0xff]  ;;  %v4816_v39 = vld [vmem:[%s7210_s4 + $0x68] sm:$0xff] }
 0x68c   : > { %v5176_v60 = vpop.f32.mrf.mxu0  ;;  %v5247_v32 = vpop.f32.mrf.mxu1  ;;  %v5562_v15 = vadd.f32 1.0, %v6488_v28  ;;  %v4833_v58 = vadd.f32 %v4817_v62, %v8078_v43  ;;  %v4832_v3 = vadd.f32 %v4816_v39, %v8053_v0 }
 0x68d   : > { %v5539_v2 = vadd.f32 %v5176_v60, %v4824_v46  ;;  %v6064_v30 = vmul.f32 -1.442695, %v5538_v54  ;;  %v5541_v41 = vadd.f32 %v5247_v32, %v4826_v29  ;;  %v6066_v59 = vmul.f32 -1.442695, %v5540_v50  ;;  %v6490_v57 = vpop.eup %6489  ;;  %v548_v50 = vld [vmem:[#allocation3] sm:$0xff] }
 0x68e   : > { %v6492_v21 = vpop.eup %6491  ;;  %v5564_v36 = vadd.f32 1.0, %v6490_v57  ;;  %v4831_v60 = vadd.f32 %v4815_v56, %v8051_v33  ;;  %v4818_v29 = vld [vmem:[%s7210_s4 + $0x78] sm:$0xff] }
 0x68f   : > { %v6065_v45 = vmul.f32 -1.442695, %v5539_v2  ;;  %v6067_v1 = vmul.f32 -1.442695, %v5541_v41  ;;  %6495 = vpow2.f32 %v6064_v30  ;;  %v6494_v63 = vpop.eup %6493  ;;  %v5563_v22 = vadd.f32 1.0, %v6492_v21  ;;  %v550_v2 = vld [vmem:[#allocation3 + $0x8] sm:$0xff] }
 0x690   : > { %6497 = vpow2.f32 %v6066_v59  ;;  %v5565_v9 = vadd.f32 1.0, %v6494_v63  ;;  %v551_v21 = vld [vmem:[#allocation3 + $0x10] sm:$0xff]  ;;  %v4834_v43 = vadd.f32 %v4818_v29, %v8080_v11 }
 0x691   : > { %6499 = vpow2.f32 %v6065_v45 }
 0x692   : > { %6501 = vpow2.f32 %v6067_v1 }
 0x693   : > { %6503 = vrcp.f32 %v5562_v15 }
 0x694   : > { %6505 = vrcp.f32 %v5564_v36 }
 0x695   : > { %6507 = vrcp.f32 %v5563_v22 }
 0x696   : > { %6509 = vrcp.f32 %v5565_v9 }
 0x69c   : > { %v5316_v27 = vpop.f32.mrf.mxu0  ;;  %v5387_v42 = vpop.f32.mrf.mxu1 }
 0x69d   : > { %v5542_v61 = vadd.f32 %v5316_v27, %v4827_v40  ;;  %v5544_v16 = vadd.f32 %v5387_v42, %v4829_v10  ;;  %v6496_v14 = vpop.eup %6495 }
 0x69e   : > { %v5318_v17 = vpop.f32.mrf.mxu0  ;;  %v5389_v47 = vpop.f32.mrf.mxu1  ;;  %v5586_v31 = vadd.f32 1.0, %v6496_v14 }
 0x69f   : > { %6511 = vtanh.f32 %v5542_v61  ;;  %v5543_v4 = vadd.f32 %v5318_v17, %v4828_v38  ;;  %v6498_v44 = vpop.eup %6497  ;;  %v5545_v37 = vadd.f32 %v5389_v47, %v4830_v7 }
 0x6a0   : > { %6513 = vtanh.f32 %v5544_v16  ;;  %v6500_v55 = vpop.eup %6499  ;;  %v5588_v12 = vadd.f32 1.0, %v6498_v44 }
 0x6a1   : > { %6515 = vtanh.f32 %v5543_v4  ;;  %v6502_v20 = vpop.eup %6501  ;;  %v5587_v8 = vadd.f32 1.0, %v6500_v55 }
 0x6a2   : > { %6517 = vrcp.f32 %v5586_v31  ;;  %v5589_v25 = vadd.f32 1.0, %v6502_v20  ;;  %v6504_v34 = vpop.eup %6503 }
 0x6a3   : > { %6519 = vrcp.f32 %v5588_v12  ;;  %v6506_v13 = vpop.eup %6505 }
 0x6a4   : > { %6521 = vrcp.f32 %v5587_v8  ;;  %v6508_v18 = vpop.eup %6507 }
 0x6a5   : > { %6523 = vrcp.f32 %v5589_v25  ;;  %v6510_v52 = vpop.eup %6509 }
 0x6a6   : > { %6525 = vtanh.f32 %v5545_v37 }
 0x6ac   : > { %v6512_v23 = vpop.eup %6511 }
 0x6ad   : > { %v6514_v54 = vpop.eup %6513  ;;  %v5630_v46 = vmul.f32 %v6512_v23, %v6504_v34 }
 0x6ae   : > { %v6516_v32 = vpop.eup %6515  ;;  %v5632_v30 = vmul.f32 %v6514_v54, %v6506_v13  ;;  %v5458_v41 = vpop.f32.mrf.mxu0 }
 0x6af   : > { %v5529_v59 = vpop.f32.mrf.mxu1  ;;  %v6518_v45 = vpop.eup %6517  ;;  %v5546_v1 = vadd.f32 %v5458_v41, %v4831_v60  ;;  %v5631_v9 = vmul.f32 %v6516_v32, %v6508_v18 }
 0x6b0   : > { %v5548_v28 = vadd.f32 %v5529_v59, %v4833_v58  ;;  %v6520_v57 = vpop.eup %6519  ;;  %v5626_v24 = vmul.f32 %v6518_v45, %v548_v50  ;;  %v5460_v33 = vpop.f32.mrf.mxu0 }
 0x6b1   : > { %v5531_v63 = vpop.f32.mrf.mxu1  ;;  %v6522_v15 = vpop.eup %6521  ;;  %v5628_v53 = vmul.f32 %v6520_v57, %v550_v2  ;;  %v6068_v36 = vmul.f32 -1.442695, %v5546_v1  ;;  %v5547_v48 = vadd.f32 %v5460_v33, %v4832_v3 }
 0x6b2   : > { %v6524_v26 = vpop.eup %6523  ;;  %v5634_v35 = vadd.f32 %v5630_v46, %v5626_v24  ;;  %v5627_v22 = vmul.f32 %v6522_v15, %v549_v51  ;;  %v5549_v19 = vadd.f32 %v5531_v63, %v4834_v43  ;;  %v6070_v40 = vmul.f32 -1.442695, %v5548_v28 }
 0x6b3   : > { %v6526_v0 = vpop.eup %6525  ;;  %v5636_v11 = vadd.f32 %v5632_v30, %v5628_v53  ;;  %v5629_v49 = vmul.f32 %v6524_v26, %v551_v21  ;;  %6527 = vpow2.f32 %v6068_v36  ;;  %v5807_v10 = vpop.f32.mrf.mxu0  ;;  %v6069_v42 = vmul.f32 -1.442695, %v5547_v48 }
 0x6b4   : > { %5650 = vst [vmem:[#allocation3] sm:$0xff] %v5634_v35  ;;  %v5635_v5 = vadd.f32 %v5631_v9, %v5627_v22  ;;  %v5633_v27 = vmul.f32 %v6526_v0, %v6510_v52  ;;  %5811 = vst [vmem:[%s7220_s7] sm:$0xff] %v5807_v10 }
 0x6b5   : > { %5652 = vst [vmem:[#allocation3 + $0x8] sm:$0xff] %v5636_v11  ;;  %v6161_v61 = vpop.f32.mrf.mxu0 }
 0x6b6   : > { %6820 = shalt.err (!%p6817_p6)
}
 0x6b7   : > { %s6821_s4 = scalar_lea.hbm %s8221_s29, 128  ;;  %s6825_s7 = scalar_lea.hbm %s8309_s11, 1024 }
 0x6b8   : > { %p6822_p12 = scmp.ne.s32.totalorder %s8221_s29, %s6821_s4  ;;  %p6826_p9 = scmp.lt.s32.totalorder %s8221_s29, %s8309_s11 }
 0x6b9   : > { %p6827_p10 = scmp.lt.s32.totalorder %s6825_s7, %s6821_s4 }
 0x6ba   : > { %p6823_p11 = pnand %p6822_p12, %p8357_p0 }
 0x6bb   : > { %p6828_p13 = por %p6827_p10, %p6826_p9 }
 0x6bc   : > { %p6824_p5 = pneg %p6823_p11 }
 0x6be   : > { %p6829_p7 = pnand %p6828_p13, %p6824_p5 }
 0x6c0   : > { %6832 = shalt.err (!%p6829_p7)
}
 0x6c1   : > { %6197 = dma.vmem_to_hbm [thread:$0]  (%p8357_p0), %s8223_s17, 128, %s8221_s29, %s5818_s27   ;;  %5651 = vst [vmem:[#allocation3 + $0x18] sm:$0xff] %v5635_v5  ;;  %v5637_v16 = vadd.f32 %v5633_v27, %v5629_v49  ;;  %v6071_v38 = vmul.f32 -1.442695, %v5549_v19  ;;  %6529 = vpow2.f32 %v6070_v40  ;;  %v6528_v6 = vpop.eup %6527 }
 0x6c2   : > { %6531 = vpow2.f32 %v6069_v42  ;;  %v5614_v17 = vadd.f32 1.0, %v6528_v6  ;;  %s6081_s17 = sshll.u32 %s7029_s24, 9  ;;  %s5832_s15 = sshll.u32 %s7218_s13, 4  ;;  %s8256_s15 = int_to_ptr.vmem [resolvable:$true] %s5832_s15 }
 0x6c3   : > { %5653 = vst [vmem:[#allocation3 + $0x10] sm:$0xff] %v5637_v16  ;;  %6533 = vpow2.f32 %v6071_v38  ;;  %s8254_s28 = scalar_lea.hbm %s8308_s10, %s6081_s17  ;;  %s5813_s24 = scalar_lea.sflag [#allocation7], %s7207_s1 }
 0x6c4   : > { %6535 = vtanh.f32 %v5634_v35  ;;  %s6833_s0 = scalar_lea.vmem %s8256_s15, 512  ;;  %s6944_s2 = smov [#allocation20]  }
 0x6c5   : > { %6537 = vrcp.f32 %v5614_v17  ;;  %p6834_p2 = scmp.ne.s32.totalorder %s8256_s15, %s6833_s0  ;;  %s6837_s3 = sshll.u32 %s6944_s2, 4  ;;  %s6838_s3 = int_to_ptr.vmem [resolvable:$false] %s6837_s3 }
 0x6c6   : > { %6539 = vtanh.f32 %v5636_v11  ;;  %s6839_s4 = scalar_lea.vmem %s6838_s3, 1024  ;;  %p6840_p3 = scmp.lt.s32.totalorder %s8256_s15, %s6838_s3 }
 0x6c7   : > { %6541 = vtanh.f32 %v5635_v5  ;;  %p6835_p4 = pnand %p6834_p2, %p8357_p0  ;;  %p6841_p8 = scmp.lt.s32.totalorder %s6839_s4, %s6833_s0 }
 0x6c9   : > { %p6836_p1 = pneg %p6835_p4  ;;  %p6842_p6 = por %p6841_p8, %p6840_p3 }
 0x6cb   : > { %p6843_p12 = pnand %p6842_p6, %p6836_p1 }
 0x6ce   : > { %v6530_v14 = vpop.eup %6529 }
 0x6cf   : > { %v5616_v4 = vadd.f32 1.0, %v6530_v14  ;;  %v6532_v47 = vpop.eup %6531 }
 0x6d0   : > { %v6534_v44 = vpop.eup %6533  ;;  %v5615_v31 = vadd.f32 1.0, %v6532_v47 }
 0x6d1   : > { %6543 = vrcp.f32 %v5616_v4  ;;  %v5617_v7 = vadd.f32 1.0, %v6534_v44  ;;  %v6536_v55 = vpop.eup %6535 }
 0x6d2   : > { %6545 = vtanh.f32 %v5637_v16  ;;  %v6538_v12 = vpop.eup %6537 }
 0x6d3   : > { %6547 = vrcp.f32 %v5615_v31  ;;  %v5642_v20 = vmul.f32 %v6538_v12, %v6536_v55  ;;  %v6540_v8 = vpop.eup %6539 }
 0x6d4   : > { %6549 = vrcp.f32 %v5617_v7  ;;  %v6542_v37 = vpop.eup %6541 }
 0x6d5   : > { %5646 = vst [vmem:[#allocation2 + $0x10] sm:$0xff] %v5642_v20  ;;  %5654 = vst [vmem:[%s7218_s13] sm:$0xff] %v5642_v20 }
 0x6de   : > { %v6544_v25 = vpop.eup %6543 }
 0x6df   : > { %v6546_v34 = vpop.eup %6545  ;;  %v5644_v13 = vmul.f32 %v6544_v25, %v6540_v8 }
 0x6e0   : > { %v6548_v18 = vpop.eup %6547 }
 0x6e1   : > { %v6550_v56 = vpop.eup %6549  ;;  %v5643_v62 = vmul.f32 %v6548_v18, %v6542_v37  ;;  %5648 = vst [vmem:[#allocation2 + $0x18] sm:$0xff] %v5644_v13  ;;  %5656 = vst [vmem:[%s7218_s13 + $0x10] sm:$0xff] %v5644_v13 }
 0x6e2   : > { %v5645_v52 = vmul.f32 %v6550_v56, %v6546_v34 }
 0x6e3   : > { %5647 = vst [vmem:[#allocation2] sm:$0xff] %v5643_v62  ;;  %5655 = vst [vmem:[%s7218_s13 + $0x8] sm:$0xff] %v5643_v62 }
 0x6e4   : > { %5649 = vst [vmem:[#allocation2 + $0x8] sm:$0xff] %v5645_v52  ;;  %5657 = vst [vmem:[%s7218_s13 + $0x18] sm:$0xff] %v5645_v52 }
 0x6e5   : > { %6846 = shalt.err (!%p6843_p12)
}
 0x6e6   : > { %s6847_s13 = scalar_lea.hbm %s8254_s28, 512  ;;  %s6851_s30 = scalar_lea.hbm %s8308_s10, 4096 }
 0x6e7   : > { %p6848_p11 = scmp.ne.s32.totalorder %s8254_s28, %s6847_s13  ;;  %p6852_p10 = scmp.lt.s32.totalorder %s8254_s28, %s8308_s10 }
 0x6e8   : > { %p6853_p13 = scmp.lt.s32.totalorder %s6851_s30, %s6847_s13 }
 0x6e9   : > { %p6849_p5 = pnand %p6848_p11, %p8357_p0 }
 0x6ea   : > { %p6854_p7 = por %p6853_p13, %p6852_p10 }
 0x6eb   : > { %p6850_p9 = pneg %p6849_p5 }
 0x6ed   : > { %p6855_p2 = pnand %p6854_p7, %p6850_p9 }
 0x6ef   : > { %6858 = shalt.err (!%p6855_p2)
}
 0x6f0   : > { %6196 = dma.vmem_to_hbm [thread:$0]  (%p8357_p0), %s8256_s15, 512, %s8254_s28, %s5813_s24  }
 0x6f1 PF: > { %p6253_p4 = scmp.ge.s32.totalorder %s6921_s22, 2  ;;  %s5857_s23 = sand.u32 1, %s6909_s19  }
 0x6f2   : > { %p8358_p1 = scmp.ne.s32.totalorder %s8332_s26, 0  ;;  %s5858_s17 = scalar_lea.sflag [#allocation7], %s5857_s23 }
 0x6f4   : > { %p6230_p3 = pnand %p6253_p4, %p8358_p1 }
 0x6f6   : > { %p6231_p8 = pneg %p6230_p3 }
 0x6f8   : > { %6900 = dma.done.wait (%p6231_p8), %s5858_s17, 512  }
 0x6f9   : > { %6902 = vsyncadd (%p6231_p8), %s5858_s17, 4294966784  ;;  %s5867_s29 = scalar_lea.sflag [#allocation22], %s5857_s23 }
 0x6fa   : > { %6904 = dma.done.wait (%p6231_p8), %s5867_s29, 128  }
 0x6fb   : > { %6906 = vsyncadd (%p6231_p8), %s5867_s29, 4294967168  ;;  %p32_p0 = scmp.ge.s32.totalorder %s7128_s12, 10   ;;  %s8359_s19 = smov %s6913_s20 }
 0x6fc   : > { %s8360_s20 = smov %s6917_s21  ;;  %s8361_s21 = smov %s7140_s16 }
 0x6fd   : > { %s8362_s22 = smov %s7128_s12  ;;  %34 = sbr.rel (!%p32_p0) target bundleno = 16 (0x10), region = 157 }
 0x702   :  { %5872 = vsyncpa [#allocation6], 1 }
 0x703   :  { %5874 = vsyncpa [#allocation6 + $0x1], 1 }
 0x704   :  { %5875 = vsyncpa [#allocation9], 1 }
 0x705   :  { %5876 = vsyncpa [#allocation12], 1 }
 0x706   :  { %5877 = vsyncpa [#allocation15], 1 }
 0x707   :  { %5878 = vsyncpa [#allocation18], 1 }
 0x708   :  { %5879 = vsyncpa [#allocation7], 1 }
 0x709   :  { %5881 = vsyncpa [#allocation7 + $0x1], 1 }
 0x70a   :  { %5882 = vsyncpa [#allocation22], 1 }
 0x70b   :  { %5884 = vsyncpa [#allocation22 + $0x1], 1 }

</bundles_post_ra>
